<compile_context>
chip_gen: v5e
topology: v5e:2x2
jax: 0.10.0
libtpu: 0.0.40
codegen_flags: <defaults>
</compile_context>

<pallas_src>
import functools

import jax
import jax.numpy as jnp
from jax import lax
from jax.experimental import pallas as pl
from jax.experimental.pallas import tpu as pltpu

LN_EPS = 1e-5
_INV_SQRT2 = 0.7071067811865476


def _round_up(n, m):
    return ((n + m - 1) // m) * m


def _pick_block_rows(rows, C, H, x_itemsize, w_itemsize):
    """Choose a large, VMEM-safe row tile (multiple of 8, grid >= 2 if possible)."""
    budget = 48 << 20  # stay under the explicit 64 MiB vmem_limit_bytes
    # Conservative: assume weight matrices are double-buffered.
    weight_bytes = 2 * C * H * w_itemsize * 2
    # x tile + out tile (double-buffered) + f32 intermediates (xn/h/y) per row.
    per_row = 2 * C * x_itemsize * 2 + (H + 2 * C) * 4
    max_by_vmem = max(8, (budget - weight_bytes) // per_row)
    bm = min(512, int(max_by_vmem))
    if rows >= 16:
        # Keep at least 2 grid steps so v7x megacore / pipelining have work.
        bm = min(bm, _round_up((rows + 1) // 2, 8))
    else:
        bm = min(bm, _round_up(rows, 8))
    return max(8, (bm // 8) * 8)


def channel_mixer_kernel(x_ref, g_ref, beta_ref, w1_ref, b1_ref, w2_ref,
                         b2_ref, o_ref):
    # x_ref: (tm, C) tile of rows; parameters are full (untiled) blocks.
    x = x_ref[...].astype(jnp.float32)

    # --- LayerNorm over the channel dim (biased variance, like PyTorch) ---
    mean = jnp.mean(x, axis=-1, keepdims=True)
    centered = x - mean
    var = jnp.mean(centered * centered, axis=-1, keepdims=True)
    xn = centered * lax.rsqrt(var + LN_EPS)
    xn = xn * g_ref[...] + beta_ref[...]

    # --- fc1 (bf16 operands, f32 accumulation) + exact erf GELU ---
    h = jnp.dot(xn.astype(w1_ref.dtype), w1_ref[...],
                preferred_element_type=jnp.float32)
    h = h + b1_ref[...]
    h = 0.5 * h * (1.0 + lax.erf(h * jnp.float32(_INV_SQRT2)))

    # --- fc2 (bf16 operands, f32 accumulation) + residual ---
    y = jnp.dot(h.astype(w2_ref.dtype), w2_ref[...],
                preferred_element_type=jnp.float32)
    y = y + b2_ref[...]

    o_ref[...] = (x + y).astype(o_ref.dtype)


@functools.partial(
    jax.jit,
    static_argnames=("block_rows", "single_buffer_params", "matmul_dtype"))
def channel_mixer(x, gamma, beta, w1, b1, w2, b2, *, block_rows=None,
                  single_buffer_params=True, matmul_dtype=jnp.bfloat16):
    """x: (B, P, C) channels-last. Returns (B, P, C)."""
    B, P, C = x.shape
    H = w1.shape[1]
    rows = B * P

    x_itemsize = jnp.dtype(x.dtype).itemsize
    w_itemsize = jnp.dtype(matmul_dtype).itemsize
    if block_rows is None:
        block_rows = _pick_block_rows(rows, C, H, x_itemsize, w_itemsize)

    rows_p = _round_up(rows, block_rows)
    x2 = x.reshape(rows, C)
    if rows_p != rows:
        # Zero-padded rows are harmless (LN of a zero row is finite) and sliced off.
        x2 = jnp.pad(x2, ((0, rows_p - rows), (0, 0)))

    g2 = gamma.reshape(1, C).astype(jnp.float32)
    be2 = beta.reshape(1, C).astype(jnp.float32)
    b1r = b1.reshape(1, H).astype(jnp.float32)
    b2r = b2.reshape(1, C).astype(jnp.float32)
    w1m = w1.astype(matmul_dtype)
    w2m = w2.astype(matmul_dtype)

    def row_spec(shape):
        return pl.BlockSpec(shape, lambda i: (i, 0))

    def const_spec(shape):
        # Parameters are re-used by every grid step; single-buffer them so the
        # freed VMEM can go into a larger row tile.
        if single_buffer_params:
            return pl.BlockSpec(shape, lambda i: (0, 0),
                                pipeline_mode=pl.Buffered(1))
        return pl.BlockSpec(shape, lambda i: (0, 0))

    grid = (rows_p // block_rows,)
    out = pl.pallas_call(
        channel_mixer_kernel,
        out_shape=jax.ShapeDtypeStruct((rows_p, C), x.dtype),
        grid_spec=pltpu.PrefetchScalarGridSpec(
            num_scalar_prefetch=0,
            grid=grid,
            in_specs=[
                row_spec((block_rows, C)),   # x rows tile
                const_spec((1, C)),          # gamma
                const_spec((1, C)),          # beta
                const_spec((C, H)),          # w1 (bf16)
                const_spec((1, H)),          # b1
                const_spec((H, C)),          # w2 (bf16)
                const_spec((1, C)),          # b2
            ],
            out_specs=row_spec((block_rows, C)),
        ),
        compiler_params=pltpu.CompilerParams(
            dimension_semantics=("parallel",),
            vmem_limit_bytes=64 * 1024 * 1024),
    )(x2, g2, be2, w1m, b1r, w2m, b2r)

    if rows_p != rows:
        out = out[:rows]
    return out.reshape(B, P, C)


def channel_mixer_ref(x, gamma, beta, w1, b1, w2, b2):
    """Pure-JAX f32 reference of the PyTorch forward (dropout = identity)."""
    xf = x.astype(jnp.float32)
    mean = jnp.mean(xf, axis=-1, keepdims=True)
    var = jnp.mean((xf - mean) ** 2, axis=-1, keepdims=True)
    xn = (xf - mean) / jnp.sqrt(var + LN_EPS) * gamma + beta
    h = xn @ w1 + b1
    h = jax.nn.gelu(h, approximate=False)
    y = h @ w2 + b2
    return (xf + y).astype(x.dtype)


def _run(x, params):
    try:
        return jax.block_until_ready(
            channel_mixer(x, *params, single_buffer_params=True))
    except Exception:
        # pipeline_mode=pl.Buffered(1) not supported by this jax version;
        # fall back to default double-buffered parameter specs.
        return jax.block_until_ready(
            channel_mixer(x, *params, single_buffer_params=False))


if __name__ == "__main__":
    # Channels mixed along the last dim: tokens = (batch, num_patches).
    # C = 128 keeps the channel axis lane-dense (full 128-lane stores).
    batch, num_patches, num_channels = 2, 64, 128
    expansion = 4
    num_hidden = int(expansion * num_channels)

    key = jax.random.PRNGKey(0)
    kx, kg, kb, kw1, kb1, kw2, kb2, kx2 = jax.random.split(key, 8)

    x = jax.random.normal(kx, (batch, num_patches, num_channels), jnp.float32)
    # Deterministic synthetic parameters (not a checkpoint load).
    gamma = 1.0 + 0.01 * jax.random.normal(kg, (num_channels,), jnp.float32)
    beta = 0.01 * jax.random.normal(kb, (num_channels,), jnp.float32)
    w1 = jax.random.normal(kw1, (num_channels, num_hidden), jnp.float32) * 0.05
    b1 = 0.01 * jax.random.normal(kb1, (num_hidden,), jnp.float32)
    w2 = jax.random.normal(kw2, (num_hidden, num_channels), jnp.float32) * 0.05
    b2 = 0.01 * jax.random.normal(kb2, (num_channels,), jnp.float32)
    params = (gamma, beta, w1, b1, w2, b2)

    # bf16 MXU operands with f32 accumulation => compare vs f32 ref at ~1e-2 scale.
    TOL = 5e-2

    out = _run(x, params)
    ref = channel_mixer_ref(x, *params)
    assert out.shape == x.shape and out.dtype == x.dtype
    assert jnp.max(jnp.abs(out - ref)) < TOL, "mismatch vs reference"

    # Second case: row count (3 * 49 = 147) not a multiple of the tile -> pad path.
    x_odd = jax.random.normal(kx2, (3, 49, num_channels), jnp.float32)
    out_odd = _run(x_odd, params)
    ref_odd = channel_mixer_ref(x_odd, *params)
    assert out_odd.shape == x_odd.shape and out_odd.dtype == x_odd.dtype
    assert jnp.max(jnp.abs(out_odd - ref_odd)) < TOL, "mismatch vs reference (padded rows)"

    print("KERNEL_OK")
</pallas_src>

<mosaic_0001>
module attributes {stable_mosaic.version = 11 : i64} {
  func.func @channel_mixer_kernel(%arg0: i32, %arg1: memref<64x128xf32, #tpu.memory_space<vmem>>, %arg2: memref<1x128xf32, #tpu.memory_space<vmem>>, %arg3: memref<1x128xf32, #tpu.memory_space<vmem>>, %arg4: memref<128x512xbf16, #tpu.memory_space<vmem>>, %arg5: memref<1x512xf32, #tpu.memory_space<vmem>>, %arg6: memref<512x128xbf16, #tpu.memory_space<vmem>>, %arg7: memref<1x128xf32, #tpu.memory_space<vmem>>, %arg8: memref<64x128xf32, #tpu.memory_space<vmem>>) attributes {dimension_semantics = [#tpu.dimension_semantics<parallel>], iteration_bounds = array<i64: 2>, scalar_prefetch = 0 : i64, scratch_operands = 0 : i64, tpu.core_type = #tpu.core_type<tc>, window_params = [{transform_indices = @transform_0, window_bounds = array<i64: 64, 128>}, {pipeline_mode = #tpu.pipeline_mode<synchronous>, transform_indices = @transform_1, window_bounds = array<i64: 1, 128>}, {pipeline_mode = #tpu.pipeline_mode<synchronous>, transform_indices = @transform_2, window_bounds = array<i64: 1, 128>}, {pipeline_mode = #tpu.pipeline_mode<synchronous>, transform_indices = @transform_3, window_bounds = array<i64: 128, 512>}, {pipeline_mode = #tpu.pipeline_mode<synchronous>, transform_indices = @transform_4, window_bounds = array<i64: 1, 512>}, {pipeline_mode = #tpu.pipeline_mode<synchronous>, transform_indices = @transform_5, window_bounds = array<i64: 512, 128>}, {pipeline_mode = #tpu.pipeline_mode<synchronous>, transform_indices = @transform_6, window_bounds = array<i64: 1, 128>}, {transform_indices = @transform_7, window_bounds = array<i64: 64, 128>}]} {
    %c0 = arith.constant 0 : index
    %c0_0 = arith.constant 0 : index
    %0 = vector.load %arg1[%c0, %c0_0] : memref<64x128xf32, #tpu.memory_space<vmem>>, vector<64x128xf32>
    %cst = arith.constant dense<0.000000e+00> : vector<64xf32>
    %1 = vector.multi_reduction <add>, %0, %cst [1] : vector<64x128xf32> to vector<64xf32>
    %2 = vector.shape_cast %1 : vector<64xf32> to vector<64x1xf32>
    %cst_1 = arith.constant 1.280000e+02 : f32
    %3 = vector.broadcast %cst_1 : f32 to vector<64x1xf32>
    %4 = arith.divf %2, %3 : vector<64x1xf32>
    %5 = vector.broadcast %4 : vector<64x1xf32> to vector<64x128xf32>
    %6 = arith.subf %0, %5 : vector<64x128xf32>
    %7 = arith.mulf %6, %6 : vector<64x128xf32>
    %cst_2 = arith.constant dense<0.000000e+00> : vector<64xf32>
    %8 = vector.multi_reduction <add>, %7, %cst_2 [1] : vector<64x128xf32> to vector<64xf32>
    %9 = vector.shape_cast %8 : vector<64xf32> to vector<64x1xf32>
    %cst_3 = arith.constant 1.280000e+02 : f32
    %10 = vector.broadcast %cst_3 : f32 to vector<64x1xf32>
    %11 = arith.divf %9, %10 : vector<64x1xf32>
    %cst_4 = arith.constant 9.99999974E-6 : f32
    %12 = vector.broadcast %cst_4 : f32 to vector<64x1xf32>
    %13 = arith.addf %11, %12 : vector<64x1xf32>
    %14 = math.rsqrt %13 : vector<64x1xf32>
    %15 = vector.broadcast %14 : vector<64x1xf32> to vector<64x128xf32>
    %16 = arith.mulf %6, %15 : vector<64x128xf32>
    %c0_5 = arith.constant 0 : index
    %c0_6 = arith.constant 0 : index
    %17 = vector.load %arg2[%c0_5, %c0_6] : memref<1x128xf32, #tpu.memory_space<vmem>>, vector<1x128xf32>
    %18 = vector.broadcast %17 : vector<1x128xf32> to vector<64x128xf32>
    %19 = arith.mulf %16, %18 : vector<64x128xf32>
    %c0_7 = arith.constant 0 : index
    %c0_8 = arith.constant 0 : index
    %20 = vector.load %arg3[%c0_7, %c0_8] : memref<1x128xf32, #tpu.memory_space<vmem>>, vector<1x128xf32>
    %21 = vector.broadcast %20 : vector<1x128xf32> to vector<64x128xf32>
    %22 = arith.addf %19, %21 : vector<64x128xf32>
    %23 = arith.truncf %22 : vector<64x128xf32> to vector<64x128xbf16>
    %c0_9 = arith.constant 0 : index
    %c0_10 = arith.constant 0 : index
    %24 = vector.load %arg4[%c0_9, %c0_10] : memref<128x512xbf16, #tpu.memory_space<vmem>>, vector<128x512xbf16>
    %cst_11 = arith.constant dense<0.000000e+00> : vector<64x512xf32>
    %25 = tpu.matmul %23, %24, %cst_11 {dimension_numbers = #tpu.dot_dimension_numbers<[1], [0], [0], [1], [0, 0, 1, 1], [], []>} : vector<64x128xbf16>, vector<128x512xbf16>, vector<64x512xf32> -> vector<64x512xf32>
    %c0_12 = arith.constant 0 : index
    %c0_13 = arith.constant 0 : index
    %26 = vector.load %arg5[%c0_12, %c0_13] : memref<1x512xf32, #tpu.memory_space<vmem>>, vector<1x512xf32>
    %27 = vector.broadcast %26 : vector<1x512xf32> to vector<64x512xf32>
    %28 = arith.addf %25, %27 : vector<64x512xf32>
    %cst_14 = arith.constant 5.000000e-01 : f32
    %29 = vector.broadcast %cst_14 : f32 to vector<64x512xf32>
    %30 = arith.mulf %29, %28 : vector<64x512xf32>
    %cst_15 = arith.constant 0.707106769 : f32
    %31 = vector.broadcast %cst_15 : f32 to vector<64x512xf32>
    %32 = arith.mulf %28, %31 : vector<64x512xf32>
    %33 = math.erf %32 : vector<64x512xf32>
    %cst_16 = arith.constant 1.000000e+00 : f32
    %34 = vector.broadcast %cst_16 : f32 to vector<64x512xf32>
    %35 = arith.addf %34, %33 : vector<64x512xf32>
    %36 = arith.mulf %30, %35 : vector<64x512xf32>
    %37 = arith.truncf %36 : vector<64x512xf32> to vector<64x512xbf16>
    %c0_17 = arith.constant 0 : index
    %c0_18 = arith.constant 0 : index
    %38 = vector.load %arg6[%c0_17, %c0_18] : memref<512x128xbf16, #tpu.memory_space<vmem>>, vector<512x128xbf16>
    %cst_19 = arith.constant dense<0.000000e+00> : vector<64x128xf32>
    %39 = tpu.matmul %37, %38, %cst_19 {dimension_numbers = #tpu.dot_dimension_numbers<[1], [0], [0], [1], [0, 0, 1, 1], [], []>} : vector<64x512xbf16>, vector<512x128xbf16>, vector<64x128xf32> -> vector<64x128xf32>
    %c0_20 = arith.constant 0 : index
    %c0_21 = arith.constant 0 : index
    %40 = vector.load %arg7[%c0_20, %c0_21] : memref<1x128xf32, #tpu.memory_space<vmem>>, vector<1x128xf32>
    %41 = vector.broadcast %40 : vector<1x128xf32> to vector<64x128xf32>
    %42 = arith.addf %39, %41 : vector<64x128xf32>
    %43 = arith.addf %0, %42 : vector<64x128xf32>
    %c0_22 = arith.constant 0 : index
    %c0_23 = arith.constant 0 : index
    %44 = vector.load %arg8[%c0_22, %c0_23] : memref<64x128xf32, #tpu.memory_space<vmem>>, vector<64x128xf32>
    tpu.vector_store %arg8[%c0_22, %c0_23], %43 {strides = array<i32>} : memref<64x128xf32, #tpu.memory_space<vmem>>, vector<64x128xf32>,
    return
  }
  func.func @transform_0(%arg0: i32) -> (i32, i32) {
    %c0_i32 = arith.constant 0 : i32
    %c0_i32_0 = arith.constant 0 : i32
    return %arg0, %c0_i32 : i32, i32
  }
  func.func @transform_1(%arg0: i32) -> (i32, i32) {
    %c0_i32 = arith.constant 0 : i32
    %c0_i32_0 = arith.constant 0 : i32
    %c0_i32_1 = arith.constant 0 : i32
    return %c0_i32, %c0_i32_0 : i32, i32
  }
  func.func @transform_2(%arg0: i32) -> (i32, i32) {
    %c0_i32 = arith.constant 0 : i32
    %c0_i32_0 = arith.constant 0 : i32
    %c0_i32_1 = arith.constant 0 : i32
    return %c0_i32, %c0_i32_0 : i32, i32
  }
  func.func @transform_3(%arg0: i32) -> (i32, i32) {
    %c0_i32 = arith.constant 0 : i32
    %c0_i32_0 = arith.constant 0 : i32
    %c0_i32_1 = arith.constant 0 : i32
    return %c0_i32, %c0_i32_0 : i32, i32
  }
  func.func @transform_4(%arg0: i32) -> (i32, i32) {
    %c0_i32 = arith.constant 0 : i32
    %c0_i32_0 = arith.constant 0 : i32
    %c0_i32_1 = arith.constant 0 : i32
    return %c0_i32, %c0_i32_0 : i32, i32
  }
  func.func @transform_5(%arg0: i32) -> (i32, i32) {
    %c0_i32 = arith.constant 0 : i32
    %c0_i32_0 = arith.constant 0 : i32
    %c0_i32_1 = arith.constant 0 : i32
    return %c0_i32, %c0_i32_0 : i32, i32
  }
  func.func @transform_6(%arg0: i32) -> (i32, i32) {
    %c0_i32 = arith.constant 0 : i32
    %c0_i32_0 = arith.constant 0 : i32
    %c0_i32_1 = arith.constant 0 : i32
    return %c0_i32, %c0_i32_0 : i32, i32
  }
  func.func @transform_7(%arg0: i32) -> (i32, i32) {
    %c0_i32 = arith.constant 0 : i32
    %c0_i32_0 = arith.constant 0 : i32
    return %arg0, %c0_i32 : i32, i32
  }
}

module attributes {stable_mosaic.version = 11 : i64} {
  func.func @channel_mixer_kernel(%arg0: i32, %arg1: memref<64x128xf32, #tpu.memory_space<vmem>>, %arg2: memref<1x128xf32, #tpu.memory_space<vmem>>, %arg3: memref<1x128xf32, #tpu.memory_space<vmem>>, %arg4: memref<128x512xbf16, #tpu.memory_space<vmem>>, %arg5: memref<1x512xf32, #tpu.memory_space<vmem>>, %arg6: memref<512x128xbf16, #tpu.memory_space<vmem>>, %arg7: memref<1x128xf32, #tpu.memory_space<vmem>>, %arg8: memref<64x128xf32, #tpu.memory_space<vmem>>) attributes {dimension_semantics = [#tpu.dimension_semantics<parallel>], iteration_bounds = array<i64: 2>, scalar_prefetch = 0 : i64, scratch_operands = 0 : i64, tpu.core_type = #tpu.core_type<tc>, window_params = [{transform_indices = @transform_0, window_bounds = array<i64: 64, 128>}, {pipeline_mode = #tpu.pipeline_mode<synchronous>, transform_indices = @transform_1, window_bounds = array<i64: 1, 128>}, {pipeline_mode = #tpu.pipeline_mode<synchronous>, transform_indices = @transform_2, window_bounds = array<i64: 1, 128>}, {pipeline_mode = #tpu.pipeline_mode<synchronous>, transform_indices = @transform_3, window_bounds = array<i64: 128, 512>}, {pipeline_mode = #tpu.pipeline_mode<synchronous>, transform_indices = @transform_4, window_bounds = array<i64: 1, 512>}, {pipeline_mode = #tpu.pipeline_mode<synchronous>, transform_indices = @transform_5, window_bounds = array<i64: 512, 128>}, {pipeline_mode = #tpu.pipeline_mode<synchronous>, transform_indices = @transform_6, window_bounds = array<i64: 1, 128>}, {transform_indices = @transform_7, window_bounds = array<i64: 64, 128>}]} {
    %c0 = arith.constant 0 : index
    %c0_0 = arith.constant 0 : index
    %0 = vector.load %arg1[%c0, %c0_0] : memref<64x128xf32, #tpu.memory_space<vmem>>, vector<64x128xf32>
    %cst = arith.constant dense<0.000000e+00> : vector<64xf32>
    %1 = vector.multi_reduction <add>, %0, %cst [1] : vector<64x128xf32> to vector<64xf32>
    %2 = vector.shape_cast %1 : vector<64xf32> to vector<64x1xf32>
    %cst_1 = arith.constant 1.280000e+02 : f32
    %3 = vector.broadcast %cst_1 : f32 to vector<64x1xf32>
    %4 = arith.divf %2, %3 : vector<64x1xf32>
    %5 = vector.broadcast %4 : vector<64x1xf32> to vector<64x128xf32>
    %6 = arith.subf %0, %5 : vector<64x128xf32>
    %7 = arith.mulf %6, %6 : vector<64x128xf32>
    %cst_2 = arith.constant dense<0.000000e+00> : vector<64xf32>
    %8 = vector.multi_reduction <add>, %7, %cst_2 [1] : vector<64x128xf32> to vector<64xf32>
    %9 = vector.shape_cast %8 : vector<64xf32> to vector<64x1xf32>
    %cst_3 = arith.constant 1.280000e+02 : f32
    %10 = vector.broadcast %cst_3 : f32 to vector<64x1xf32>
    %11 = arith.divf %9, %10 : vector<64x1xf32>
    %cst_4 = arith.constant 9.99999974E-6 : f32
    %12 = vector.broadcast %cst_4 : f32 to vector<64x1xf32>
    %13 = arith.addf %11, %12 : vector<64x1xf32>
    %14 = math.rsqrt %13 : vector<64x1xf32>
    %15 = vector.broadcast %14 : vector<64x1xf32> to vector<64x128xf32>
    %16 = arith.mulf %6, %15 : vector<64x128xf32>
    %c0_5 = arith.constant 0 : index
    %c0_6 = arith.constant 0 : index
    %17 = vector.load %arg2[%c0_5, %c0_6] : memref<1x128xf32, #tpu.memory_space<vmem>>, vector<1x128xf32>
    %18 = vector.broadcast %17 : vector<1x128xf32> to vector<64x128xf32>
    %19 = arith.mulf %16, %18 : vector<64x128xf32>
    %c0_7 = arith.constant 0 : index
    %c0_8 = arith.constant 0 : index
    %20 = vector.load %arg3[%c0_7, %c0_8] : memref<1x128xf32, #tpu.memory_space<vmem>>, vector<1x128xf32>
    %21 = vector.broadcast %20 : vector<1x128xf32> to vector<64x128xf32>
    %22 = arith.addf %19, %21 : vector<64x128xf32>
    %23 = arith.truncf %22 : vector<64x128xf32> to vector<64x128xbf16>
    %c0_9 = arith.constant 0 : index
    %c0_10 = arith.constant 0 : index
    %24 = vector.load %arg4[%c0_9, %c0_10] : memref<128x512xbf16, #tpu.memory_space<vmem>>, vector<128x512xbf16>
    %cst_11 = arith.constant dense<0.000000e+00> : vector<64x512xf32>
    %25 = tpu.matmul %23, %24, %cst_11 {dimension_numbers = #tpu.dot_dimension_numbers<[1], [0], [0], [1], [0, 0, 1, 1], [], []>} : vector<64x128xbf16>, vector<128x512xbf16>, vector<64x512xf32> -> vector<64x512xf32>
    %c0_12 = arith.constant 0 : index
    %c0_13 = arith.constant 0 : index
    %26 = vector.load %arg5[%c0_12, %c0_13] : memref<1x512xf32, #tpu.memory_space<vmem>>, vector<1x512xf32>
    %27 = vector.broadcast %26 : vector<1x512xf32> to vector<64x512xf32>
    %28 = arith.addf %25, %27 : vector<64x512xf32>
    %cst_14 = arith.constant 5.000000e-01 : f32
    %29 = vector.broadcast %cst_14 : f32 to vector<64x512xf32>
    %30 = arith.mulf %29, %28 : vector<64x512xf32>
    %cst_15 = arith.constant 0.707106769 : f32
    %31 = vector.broadcast %cst_15 : f32 to vector<64x512xf32>
    %32 = arith.mulf %28, %31 : vector<64x512xf32>
    %33 = math.erf %32 : vector<64x512xf32>
    %cst_16 = arith.constant 1.000000e+00 : f32
    %34 = vector.broadcast %cst_16 : f32 to vector<64x512xf32>
    %35 = arith.addf %34, %33 : vector<64x512xf32>
    %36 = arith.mulf %30, %35 : vector<64x512xf32>
    %37 = arith.truncf %36 : vector<64x512xf32> to vector<64x512xbf16>
    %c0_17 = arith.constant 0 : index
    %c0_18 = arith.constant 0 : index
    %38 = vector.load %arg6[%c0_17, %c0_18] : memref<512x128xbf16, #tpu.memory_space<vmem>>, vector<512x128xbf16>
    %cst_19 = arith.constant dense<0.000000e+00> : vector<64x128xf32>
    %39 = tpu.matmul %37, %38, %cst_19 {dimension_numbers = #tpu.dot_dimension_numbers<[1], [0], [0], [1], [0, 0, 1, 1], [], []>} : vector<64x512xbf16>, vector<512x128xbf16>, vector<64x128xf32> -> vector<64x128xf32>
    %c0_20 = arith.constant 0 : index
    %c0_21 = arith.constant 0 : index
    %40 = vector.load %arg7[%c0_20, %c0_21] : memref<1x128xf32, #tpu.memory_space<vmem>>, vector<1x128xf32>
    %41 = vector.broadcast %40 : vector<1x128xf32> to vector<64x128xf32>
    %42 = arith.addf %39, %41 : vector<64x128xf32>
    %43 = arith.addf %0, %42 : vector<64x128xf32>
    %c0_22 = arith.constant 0 : index
    %c0_23 = arith.constant 0 : index
    %44 = vector.load %arg8[%c0_22, %c0_23] : memref<64x128xf32, #tpu.memory_space<vmem>>, vector<64x128xf32>
    tpu.vector_store %arg8[%c0_22, %c0_23], %43 {strides = array<i32>} : memref<64x128xf32, #tpu.memory_space<vmem>>, vector<64x128xf32>,
    return
  }
  func.func @transform_0(%arg0: i32) -> (i32, i32) {
    %c0_i32 = arith.constant 0 : i32
    %c0_i32_0 = arith.constant 0 : i32
    return %arg0, %c0_i32 : i32, i32
  }
  func.func @transform_1(%arg0: i32) -> (i32, i32) {
    %c0_i32 = arith.constant 0 : i32
    %c0_i32_0 = arith.constant 0 : i32
    %c0_i32_1 = arith.constant 0 : i32
    return %c0_i32, %c0_i32_0 : i32, i32
  }
  func.func @transform_2(%arg0: i32) -> (i32, i32) {
    %c0_i32 = arith.constant 0 : i32
    %c0_i32_0 = arith.constant 0 : i32
    %c0_i32_1 = arith.constant 0 : i32
    return %c0_i32, %c0_i32_0 : i32, i32
  }
  func.func @transform_3(%arg0: i32) -> (i32, i32) {
    %c0_i32 = arith.constant 0 : i32
    %c0_i32_0 = arith.constant 0 : i32
    %c0_i32_1 = arith.constant 0 : i32
    return %c0_i32, %c0_i32_0 : i32, i32
  }
  func.func @transform_4(%arg0: i32) -> (i32, i32) {
    %c0_i32 = arith.constant 0 : i32
    %c0_i32_0 = arith.constant 0 : i32
    %c0_i32_1 = arith.constant 0 : i32
    return %c0_i32, %c0_i32_0 : i32, i32
  }
  func.func @transform_5(%arg0: i32) -> (i32, i32) {
    %c0_i32 = arith.constant 0 : i32
    %c0_i32_0 = arith.constant 0 : i32
    %c0_i32_1 = arith.constant 0 : i32
    return %c0_i32, %c0_i32_0 : i32, i32
  }
  func.func @transform_6(%arg0: i32) -> (i32, i32) {
    %c0_i32 = arith.constant 0 : i32
    %c0_i32_0 = arith.constant 0 : i32
    %c0_i32_1 = arith.constant 0 : i32
    return %c0_i32, %c0_i32_0 : i32, i32
  }
  func.func @transform_7(%arg0: i32) -> (i32, i32) {
    %c0_i32 = arith.constant 0 : i32
    %c0_i32_0 = arith.constant 0 : i32
    return %arg0, %c0_i32 : i32, i32
  }
}

</mosaic_0001>

<bundles_post_ra>
// kernel: channel_mixer.1
= control target key start
LH: loop header
LB: loop body
LE: loop exit
PB: predicated region body
PF: predicated region fallthrough
CT: control target
= control target key end

     0   :  { %12 = vsyncpa [#allocation3], 0  ;;  %s5251_s0 = inlined_call_operand.vmem [shape: f32[128,128], index: 0, kind: input, shape index: {}]   ;;  %s5252_s1 = inlined_call_operand.vmem [shape: f32[1,128], index: 1, kind: input, shape index: {}]   ;;  %s5253_s2 = inlined_call_operand.vmem [shape: f32[1,128], index: 2, kind: input, shape index: {}]   ;;  %s5254_s3 = inlined_call_operand.vmem [shape: bf16[128,512], index: 3, kind: input, shape index: {}]   ;;  %s5255_s4 = inlined_call_operand.vmem [shape: f32[1,512], index: 4, kind: input, shape index: {}]   ;;  %s5256_s5 = inlined_call_operand.vmem [shape: bf16[512,128], index: 5, kind: input, shape index: {}]   ;;  %s5257_s6 = inlined_call_operand.vmem [shape: f32[1,128], index: 6, kind: input, shape index: {}]   ;;  %s5258_s7 = inlined_call_operand.hbm [shape: f32[128,128], index: 7, kind: output, shape index: {}]  }
   0x1   :  { %14 = vsyncpa [#allocation3 + $0x1], 0  ;;  %s3302_s24 = smov 0   ;;  %s3304_s25 = smov 0  }
   0x2   :  { %s3306_s26 = smov 0   ;;  %s3308_s27 = smov 0  }
   0x3 LB: > { %s3323_s28 = sadd.s32 4294967295, %s3257_s27   ;;  %s2695_s29 = sadd.s32 4294967294, %s3257_s27   ;;  %s3257_s27 = sphi %s3308_s27, %s5390_s27   ;;  %s3253_s26 = sphi %s3306_s26, %s5389_s26   ;;  %s3249_s25 = sphi %s3304_s25, %s5388_s25   ;;  %s3245_s24 = sphi %s3302_s24, %s5387_s24  }
   0x4   : > { %s3327_s30 = sadd.s32 1, %s3257_s27   ;;  %s179_s8 = sadd.s32 1, %s3253_s26 }
   0x5   : > { %s176_s9 = ssub.s32 %s3257_s27, %s3327_s30  ;;  %p189_p0 = scmp.ne.s32.totalorder %s3253_s26, %s3249_s25 }
   0x6   : > { %p177_p1 = scmp.eq.s32.totalorder %s176_s9, 0  ;;  %p190_p2 = scmp.eq.s32.totalorder %s3323_s28, 1 }
   0x7   : > { %p195_p3 = scmp.ne.s32.totalorder %s3249_s25, %s3245_s24  ;;  %p196_p4 = scmp.eq.s32.totalorder %s2695_s29, 1 }
   0x8   : > { %s3338_s10 = scalar_select %p177_p1, %s3253_s26, %s179_s8  }
   0x9   : > { %p3340_p5 = por %p190_p2, %p189_p0  ;;  %p3344_p6 = por %p196_p4, %p195_p3 }
   0xa   : > { %p2698_p7 = scmp.ge.s32.totalorder %s3257_s27, 1  ;;  %p241_p8 = scmp.lt.s32.totalorder %s3257_s27, 3 }
   0xc   : > { %p242_p9 = pnand %p2698_p7, %p241_p8 }
   0xe   : > { %245 = sbr.rel (%p242_p9) target bundleno = 947 (0x3b3), region = 48 }
  0x13   : > { %s2700_s13 = sshll.u32 %s3323_s28, 3  ;;  %v3259_v7 = vmov 128.0   ;;  %v2816_v43 = vld [vmem:[%s5254_s3 + $0xe0] sm:$0xf]  ;;  %v3025_v44 = vld [vmem:[%s5254_s3 + $0xec] sm:$0xf0] }
  0x14   : > { %p274_p10 = scmp.lt.s32.totalorder %s2700_s13, 15  ;;  %3105 = vrcp.f32 %v3259_v7  ;;  %v3023_v45 = vld [vmem:[%s5254_s3 + $0xe4] sm:$0xf]  ;;  %v2817_v46 = vor.u32 %v3025_v44, %v2816_v43  ;;  %v2818_v47 = vld [vmem:[%s5254_s3 + $0xf0] sm:$0xf0]  ;;  %s270_s23 = sand.u32 1, %s3249_s25  }
  0x15   : > { %v2824_v48 = vld [vmem:[%s5254_s3 + $0xe8] sm:$0xf]  ;;  %v3026_v49 = vld [vmem:[%s5254_s3 + $0xf4] sm:$0xf0]  ;;  %v2821_v50 = vor.u32 %v3023_v45, %v2818_v47  ;;  %v3024_v52 = vld [vmem:[%s5254_s3 + $0xec] sm:$0xf] }
  0x16   : > { %s5392_s13 = smov (!%p274_p10, %s2700_s13), 15  ;;  %v2825_v51 = vor.u32 %v3026_v49, %v2824_v48  ;;  %v2826_v53 = vld [vmem:[%s5254_s3 + $0xf8] sm:$0xf0]  ;;  %685 = vmatpush.bf16.msra.mxu0 %v2817_v46  ;;  %v2800_v55 = vld [vmem:[%s5254_s3 + $0xc0] sm:$0xf]  ;;  %s2699_s29 = sshll.u32 %s270_s23, 6 }
  0x17   : > { %s2701_s14 = sshll.u32 %s5392_s13, 3  ;;  %v2829_v54 = vor.u32 %v3024_v52, %v2826_v53  ;;  %714 = vmatpush.bf16.msra.mxu1 %v2821_v50  ;;  %v3021_v56 = vld [vmem:[%s5254_s3 + $0xcc] sm:$0xf0]  ;;  %v3019_v57 = vld [vmem:[%s5254_s3 + $0xc4] sm:$0xf]  ;;  %s5181_s8 = scalar_lea.vmem [#allocation2], %s2699_s29 }
  0x18   : > { %s3354_s17 = scalar_lea.vmem %s5251_s0, %s2701_s14  ;;  %743 = vmatpush.bf16.msra.mxu2 %v2825_v51  ;;  %v2801_v58 = vor.u32 %v3021_v56, %v2800_v55  ;;  %v2802_v59 = vld [vmem:[%s5254_s3 + $0xd0] sm:$0xf0]  ;;  %v2808_v60 = vld [vmem:[%s5254_s3 + $0xc8] sm:$0xf]  ;;  %v3022_v61 = vld [vmem:[%s5254_s3 + $0xd4] sm:$0xf0] }
  0x19   : > { %v284_v0 = vld [vmem:[%s3354_s17 + $0x20] sm:$0xff]  ;;  %v282_v1 = vld [vmem:[%s3354_s17 + $0x10] sm:$0xff]  ;;  %v285_v3 = vld [vmem:[%s3354_s17 + $0x28] sm:$0xff]  ;;  %772 = vmatpush.bf16.msra.mxu3 %v2829_v54  ;;  %v2805_v62 = vor.u32 %v3019_v57, %v2802_v59  ;;  %v2809_v63 = vor.u32 %v3022_v61, %v2808_v60  ;;  %s3059_s9 = sshll.u32 %s3323_s28, 6  ;;  %s2630_s16 = sshll.u32 %s5181_s8, 4  ;;  %s2631_s16 = int_to_ptr.vmem [resolvable:$true] %s2630_s16 }
  0x1a   : > { %v280_v2 = vld [vmem:[%s3354_s17] sm:$0xff]  ;;  %296 = vadd.xlane.f32.xlu2 %v284_v0  ;;  %292 = vadd.xlane.f32.xlu1 %v282_v1  ;;  %v283_v4 = vld [vmem:[%s3354_s17 + $0x18] sm:$0xff]  ;;  %v281_v5 = vld [vmem:[%s3354_s17 + $0x8] sm:$0xff]  ;;  %v3106_v8 = vpop.eup %3105  ;;  %s2629_s15 = scalar_lea.hbm %s5258_s7, %s3059_s9  ;;  %s2618_s28 = scalar_lea.sflag [#allocation3], %s270_s23 }
  0x1b   : > { %288 = vadd.xlane.f32.xlu0 %v280_v2  ;;  %v286_v6 = vld [vmem:[%s3354_s17 + $0x30] sm:$0xff]  ;;  %v305_v9 = vmul.f32 128.0, %v3106_v8  ;;  %vm309_vm0 = vweird.f32 %v3106_v8  ;;  %v3381_v30 = vld [vmem:[%s3354_s17 + $0x38] sm:$0xff]  ;;  %686 = vmatpush.bf16.msra.mxu0 %v2801_v58  ;;  %v3008_v45 = vld [vmem:[%s5254_s3 + $0x6c] sm:$0xf]  ;;  %s2632_s18 = sshll.u32 %s2629_s15, 4  ;;  %s2633_s18 = int_to_ptr.hbm [resolvable:$true] %s2632_s18 }
  0x1c   : > { %715 = vmatpush.bf16.msra.mxu1 %v2805_v62  ;;  %744 = vmatpush.bf16.msra.mxu2 %v2809_v63  ;;  %v2786_v7 = vld [vmem:[%s5254_s3 + $0xb0] sm:$0xf0]  ;;  %v2762_v46 = vld [vmem:[%s5254_s3 + $0x78] sm:$0xf0]  ;;  %v2736_v48 = vld [vmem:[%s5254_s3 + $0x40] sm:$0xf] }
  0x1d   : > { %v306_v10 = vsub.f32 1.0, %v305_v9  ;;  %v3018_v9 = vld [vmem:[%s5254_s3 + $0xb4] sm:$0xf0]  ;;  %v2765_v47 = vor.u32 %v3008_v45, %v2762_v46  ;;  %v3005_v49 = vld [vmem:[%s5254_s3 + $0x4c] sm:$0xf0]  ;;  %s3209_s19 = sshra.s32 %s2633_s18, 4  ;;  %s3210_s19 = int_to_ptr.hbm [resolvable:$true] %s3209_s19 }
  0x1e   : > { %v3003_v50 = vld [vmem:[%s5254_s3 + $0x44] sm:$0xf]  ;;  %v2737_v51 = vor.u32 %v3005_v49, %v2736_v48  ;;  %v2738_v52 = vld [vmem:[%s5254_s3 + $0x50] sm:$0xf0]  ;;  %v2744_v53 = vld [vmem:[%s5254_s3 + $0x48] sm:$0xf]  ;;  %p3216_p0 = scmp.lt.s32.totalorder %s3210_s19, %s5258_s7 }
  0x1f   : > { %v307_v11 = vmul.f32 %v3106_v8, %v306_v10  ;;  %v3006_v54 = vld [vmem:[%s5254_s3 + $0x54] sm:$0xf0]  ;;  %v2741_v55 = vor.u32 %v3003_v50, %v2738_v52  ;;  %v3004_v57 = vld [vmem:[%s5254_s3 + $0x4c] sm:$0xf]  ;;  %v2746_v58 = vld [vmem:[%s5254_s3 + $0x58] sm:$0xf0] }
  0x20   : > { %v2745_v56 = vor.u32 %v3006_v54, %v2744_v53  ;;  %v2749_v59 = vor.u32 %v3004_v57, %v2746_v58  ;;  %v2720_v60 = vld [vmem:[%s5254_s3 + $0x20] sm:$0xf]  ;;  %v3001_v61 = vld [vmem:[%s5254_s3 + $0x2c] sm:$0xf0]  ;;  %v2999_v62 = vld [vmem:[%s5254_s3 + $0x24] sm:$0xf] }
  0x21   : > { %v308_v12 = vadd.f32 %v3106_v8, %v307_v11  ;;  %v2721_v63 = vor.u32 %v3001_v61, %v2720_v60  ;;  %s3211_s20 = scalar_lea.hbm %s3210_s19, 64  ;;  %s3215_s29 = scalar_lea.hbm %s5258_s7, 128 }
  0x22   : > { %298 = vadd.xlane.f32.xlu2 %v285_v3  ;;  %294 = vadd.xlane.f32.xlu1 %v283_v4  ;;  %p3212_p11 = scmp.ne.s32.totalorder %s3210_s19, %s3211_s20  ;;  %p3217_p1 = scmp.lt.s32.totalorder %s3215_s29, %s3211_s20 }
  0x23   : > { %290 = vadd.xlane.f32.xlu0 %v281_v5  ;;  %v3363_v13 = vsel %vm309_vm0, %v3106_v8, %v308_v12  ;;  %v2792_v8 = vld [vmem:[%s5254_s3 + $0xa8] sm:$0xf]  ;;  %v3016_v12 = vld [vmem:[%s5254_s3 + $0xac] sm:$0xf] }
  0x24   : > { %v2793_v11 = vor.u32 %v3018_v9, %v2792_v8  ;;  %p3213_p12 = pnand %p3212_p11, %p3340_p5  ;;  %p3218_p2 = por %p3217_p1, %p3216_p0 }
  0x26   : > { %745 = vmatpush.bf16.msra.mxu2 %v2793_v11  ;;  %v2997_v11 = vld [vmem:[%s5254_s3 + $0xc] sm:$0xf0]  ;;  %p3214_p13 = pneg %p3213_p12 }
  0x28   : > { %p3219_p3 = pnand %p3218_p2, %p3214_p13 }
  0x2a   : > { %300 = vadd.xlane.f32.xlu2 %v286_v6 }
  0x8d   : > { %v297_v14 = vpop.xlane.xlu2 %296  ;;  %v293_v15 = vpop.xlane.xlu1 %292 }
  0x8e   : > { %v289_v16 = vpop.xlane.xlu0 %288  ;;  %v315_v26 = vmul.f32 %v3363_v13, %v297_v14  ;;  %v313_v27 = vmul.f32 %v3363_v13, %v293_v15  ;;  %v2794_v14 = vld [vmem:[%s5254_s3 + $0xb8] sm:$0xf0] }
  0x8f   : > { %v311_v17 = vmul.f32 %v3363_v13, %v289_v16  ;;  %v2797_v15 = vor.u32 %v3016_v12, %v2794_v14  ;;  %v2768_v16 = vld [vmem:[%s5254_s3 + $0x80] sm:$0xf]  ;;  %v2995_v12 = vld [vmem:[%s5254_s3 + $0x4] sm:$0xf] }
  0x90   : > { %v3385_v32 = vsub.f32 %v284_v0, %v315_v26  ;;  %v3387_v33 = vsub.f32 %v282_v1, %v313_v27  ;;  %v3020_v0 = vld [vmem:[%s5254_s3 + $0xcc] sm:$0xf]  ;;  %v2810_v1 = vld [vmem:[%s5254_s3 + $0xd8] sm:$0xf0] }
  0x91   : > { %v3366_v18 = vsub.f32 %v280_v2, %v311_v17  ;;  %v2813_v2 = vor.u32 %v3020_v0, %v2810_v1  ;;  %v3013_v17 = vld [vmem:[%s5254_s3 + $0x8c] sm:$0xf0]  ;;  %v3012_v27 = vld [vmem:[%s5254_s3 + $0x8c] sm:$0xf]  ;;  %v2722_v0 = vld [vmem:[%s5254_s3 + $0x30] sm:$0xf0] }
  0x92   : > { %v331_v38 = vmul.f32 %v3385_v32, %v3385_v32  ;;  %v329_v39 = vmul.f32 %v3387_v33, %v3387_v33  ;;  %v2728_v1 = vld [vmem:[%s5254_s3 + $0x28] sm:$0xf] }
  0x93   : > { %v327_v19 = vmul.f32 %v3366_v18, %v3366_v18  ;;  %773 = vmatpush.bf16.msra.mxu3 %v2813_v2  ;;  %v3002_v2 = vld [vmem:[%s5254_s3 + $0x34] sm:$0xf0] }
  0x95   : > { %335 = vadd.xlane.f32.xlu0 %v327_v19  ;;  %v299_v20 = vpop.xlane.xlu2 %298  ;;  %v295_v21 = vpop.xlane.xlu1 %294  ;;  %v3011_v19 = vld [vmem:[%s5254_s3 + $0x84] sm:$0xf] }
  0x96   : > { %v314_v22 = vmul.f32 %v3363_v13, %v295_v21  ;;  %v291_v23 = vpop.xlane.xlu0 %290  ;;  %v316_v37 = vmul.f32 %v3363_v13, %v299_v20  ;;  %v2769_v20 = vor.u32 %v3013_v17, %v2768_v16  ;;  %v2770_v21 = vld [vmem:[%s5254_s3 + $0x90] sm:$0xf0]  ;;  %v2712_v17 = vld [vmem:[%s5254_s3 + $0x8] sm:$0xf] }
  0x97   : > { %v312_v24 = vmul.f32 %v3363_v13, %v291_v23  ;;  %774 = vmatpush.bf16.msra.mxu3 %v2797_v15  ;;  %v3014_v23 = vld [vmem:[%s5254_s3 + $0x94] sm:$0xf0]  ;;  %v2706_v16 = vld [vmem:[%s5254_s3 + $0x10] sm:$0xf0] }
  0x98   : > { %v3372_v25 = vsub.f32 %v283_v4, %v314_v22  ;;  %v3400_v41 = vsub.f32 %v285_v3, %v316_v37  ;;  %v2784_v3 = vld [vmem:[%s5254_s3 + $0xa0] sm:$0xf]  ;;  %v3017_v4 = vld [vmem:[%s5254_s3 + $0xac] sm:$0xf0]  ;;  %v2776_v22 = vld [vmem:[%s5254_s3 + $0x88] sm:$0xf] }
  0x99   : > { %v3376_v28 = vsub.f32 %v281_v5, %v312_v24  ;;  %v3015_v5 = vld [vmem:[%s5254_s3 + $0xa4] sm:$0xf]  ;;  %v2773_v24 = vor.u32 %v3011_v19, %v2770_v21  ;;  %v2777_v26 = vor.u32 %v3014_v23, %v2776_v22  ;;  %v2709_v19 = vor.u32 %v2995_v12, %v2706_v16  ;;  %v2996_v21 = vld [vmem:[%s5254_s3 + $0xc] sm:$0xf]  ;;  %v2714_v22 = vld [vmem:[%s5254_s3 + $0x18] sm:$0xf0] }
  0x9a   : > { %v330_v29 = vmul.f32 %v3372_v25, %v3372_v25  ;;  %v332_v42 = vmul.f32 %v3400_v41, %v3400_v41  ;;  %v2789_v10 = vor.u32 %v3015_v5, %v2786_v7  ;;  %v3007_v37 = vld [vmem:[%s5254_s3 + $0x64] sm:$0xf]  ;;  %v2729_v5 = vor.u32 %v3002_v2, %v2728_v1  ;;  %v2730_v7 = vld [vmem:[%s5254_s3 + $0x38] sm:$0xf0] }
  0x9b   : > { %v328_v31 = vmul.f32 %v3376_v28, %v3376_v28  ;;  %746 = vmatpush.bf16.msra.mxu2 %v2777_v26 }
  0x9c   : > { %341 = vadd.xlane.f32.xlu2 %v330_v29  ;;  %716 = vmatpush.bf16.msra.mxu1 %v2789_v10  ;;  %v2778_v29 = vld [vmem:[%s5254_s3 + $0x98] sm:$0xf0]  ;;  %v2704_v10 = vld [vmem:[%s5254_s3] sm:$0xf] }
  0x9d   : > { %302 = vadd.xlane.f32.xlu0 %v3381_v30  ;;  %337 = vadd.xlane.f32.xlu1 %v328_v31  ;;  %v301_v34 = vpop.xlane.xlu2 %300  ;;  %v2781_v31 = vor.u32 %v3012_v27, %v2778_v29  ;;  %v2705_v15 = vor.u32 %v2997_v11, %v2704_v10 }
  0x9e   : > { %v317_v35 = vmul.f32 %v3363_v13, %v301_v34  ;;  %v2752_v34 = vld [vmem:[%s5254_s3 + $0x60] sm:$0xf] }
  0x9f   : > { %775 = vmatpush.bf16.msra.mxu3 %v2781_v31 }
  0xa0   : > { %v3391_v36 = vsub.f32 %v286_v6, %v317_v35  ;;  %v2785_v6 = vor.u32 %v3017_v4, %v2784_v3  ;;  %717 = vmatpush.bf16.msra.mxu1 %v2773_v24  ;;  %v3009_v35 = vld [vmem:[%s5254_s3 + $0x6c] sm:$0xf0]  ;;  %v2725_v4 = vor.u32 %v2999_v62, %v2722_v0  ;;  %v2717_v24 = vor.u32 %v2996_v21, %v2714_v22 }
  0xa2   : > { %v333_v40 = vmul.f32 %v3391_v36, %v3391_v36  ;;  %687 = vmatpush.bf16.msra.mxu0 %v2785_v6  ;;  %v3000_v6 = vld [vmem:[%s5254_s3 + $0x2c] sm:$0xf] }
  0xa3   : > { %776 = vmatpush.bf16.msra.mxu3 %v2765_v47  ;;  %v2733_v9 = vor.u32 %v3000_v6, %v2730_v7 }
  0xa4   : > { %347 = vadd.xlane.f32.xlu2 %v333_v40  ;;  %v2760_v40 = vld [vmem:[%s5254_s3 + $0x68] sm:$0xf] }
  0xa5   : > { %343 = vadd.xlane.f32.xlu0 %v331_v38  ;;  %339 = vadd.xlane.f32.xlu1 %v329_v39  ;;  %v2753_v38 = vor.u32 %v3009_v35, %v2752_v34  ;;  %v2754_v39 = vld [vmem:[%s5254_s3 + $0x70] sm:$0xf0] }
  0xa6   : > { %688 = vmatpush.bf16.msra.mxu0 %v2769_v20  ;;  %v2757_v43 = vor.u32 %v3007_v37, %v2754_v39  ;;  %v2998_v20 = vld [vmem:[%s5254_s3 + $0x14] sm:$0xf0] }
  0xa7   : > { %777 = vmatpush.bf16.msra.mxu3 %v2749_v59  ;;  %v2713_v23 = vor.u32 %v2998_v20, %v2712_v17 }
  0xa8   : > { %718 = vmatpush.bf16.msra.mxu1 %v2757_v43 }
  0xaa   : > { %689 = vmatpush.bf16.msra.mxu0 %v2753_v38 }
  0xab   : > { %778 = vmatpush.bf16.msra.mxu3 %v2733_v9 }
  0xac   : > { %719 = vmatpush.bf16.msra.mxu1 %v2741_v55 }
  0xad   : > { %345 = vadd.xlane.f32.xlu1 %v332_v42  ;;  %v3010_v42 = vld [vmem:[%s5254_s3 + $0x74] sm:$0xf0] }
  0xae   : > { %v2761_v44 = vor.u32 %v3010_v42, %v2760_v40  ;;  %690 = vmatpush.bf16.msra.mxu0 %v2737_v51 }
  0xaf   : > { %779 = vmatpush.bf16.msra.mxu3 %v2717_v24 }
  0xb0   : > { %747 = vmatpush.bf16.msra.mxu2 %v2761_v44  ;;  %720 = vmatpush.bf16.msra.mxu1 %v2725_v4 }
  0xb2   : > { %691 = vmatpush.bf16.msra.mxu0 %v2721_v63 }
  0xb4   : > { %748 = vmatpush.bf16.msra.mxu2 %v2745_v56  ;;  %721 = vmatpush.bf16.msra.mxu1 %v2709_v19 }
  0xb6   : > { %692 = vmatpush.bf16.msra.mxu0 %v2705_v15 }
  0xb8   : > { %749 = vmatpush.bf16.msra.mxu2 %v2729_v5  ;;  %v3623_v5 = vld [vmem:[%s5252_s1] ss:$0 sm:$0xff] }
  0xbc   : > { %750 = vmatpush.bf16.msra.mxu2 %v2713_v23 }
 0x108   : > { %v336_v3 = vpop.xlane.xlu0 %335 }
 0x109   : > { %v351_v8 = vmul.f32 %v336_v3, %v3363_v13 }
 0x10b   : > { %v359_v14 = vadd.f32 1e-05, %v351_v8 }
 0x10d   : > { %3107 = vrsqrt.f32 %v359_v14  ;;  %vm373_vm2 = vweird.f32 %v359_v14 }
 0x10f   : > { %v342_v26 = vpop.xlane.xlu2 %341 }
 0x110   : > { %v354_v27 = vmul.f32 %v342_v26, %v3363_v13  ;;  %v338_v29 = vpop.xlane.xlu1 %337  ;;  %v303_v31 = vpop.xlane.xlu0 %302 }
 0x111   : > { %v352_v34 = vmul.f32 %v338_v29, %v3363_v13  ;;  %v318_v35 = vmul.f32 %v3363_v13, %v303_v31 }
 0x112   : > { %v3600_v37 = vadd.f32 1e-05, %v354_v27 }
 0x113   : > { %v3108_v38 = vpop.eup %3107  ;;  %v360_v39 = vadd.f32 1e-05, %v352_v34  ;;  %v3603_v40 = vsub.f32 %v3381_v30, %v318_v35 }
 0x114   : > { %v368_v42 = vmul.f32 %v3108_v38, %v359_v14  ;;  %3109 = vrsqrt.f32 %v3600_v37  ;;  %vm374_vm1 = vweird.f32 %v3108_v38  ;;  %vm403_vm9 = vweird.f32 %v3600_v37 }
 0x115   : > { %3111 = vrsqrt.f32 %v360_v39  ;;  %v334_v43 = vmul.f32 %v3603_v40, %v3603_v40  ;;  %vm375_vm3 = vmor %vm373_vm2, %vm374_vm1  ;;  %vm383_vm4 = vweird.f32 %v360_v39 }
 0x116   : > { %v369_v44 = vmul.f32 %v3108_v38, %v368_v42 }
 0x117   : > { %349 = vadd.xlane.f32.xlu0 %v334_v43 }
 0x118   : > { %v370_v45 = vmul.f32 0.5, %v369_v44  ;;  %v340_v46 = vpop.xlane.xlu1 %339  ;;  %v344_v48 = vpop.xlane.xlu0 %343 }
 0x119   : > { %v353_v47 = vmul.f32 %v340_v46, %v3363_v13  ;;  %v355_v53 = vmul.f32 %v344_v48, %v3363_v13 }
 0x11a   : > { %v3609_v49 = vpop.eup %3109  ;;  %v371_v50 = vsub.f32 1.5, %v370_v45 }
 0x11b   : > { %v3112_v51 = vpop.eup %3111  ;;  %v361_v30 = vadd.f32 1e-05, %v353_v47  ;;  %v398_v55 = vmul.f32 %v3609_v49, %v3600_v37  ;;  %v3614_v58 = vadd.f32 1e-05, %v355_v53  ;;  %vm404_vm10 = vweird.f32 %v3609_v49 }
 0x11c   : > { %v378_v52 = vmul.f32 %v3112_v51, %v360_v39  ;;  %v372_v54 = vmul.f32 %v3108_v38, %v371_v50  ;;  %vm384_vm5 = vweird.f32 %v3112_v51  ;;  %vm405_vm12 = vmor %vm403_vm9, %vm404_vm10 }
 0x11d   : > { %3113 = vrsqrt.f32 %v361_v30  ;;  %v399_v61 = vmul.f32 %v3609_v49, %v398_v55  ;;  %vm385_vm6 = vmor %vm383_vm4, %vm384_vm5  ;;  %vm393_vm7 = vweird.f32 %v361_v30  ;;  %vm413_vm15 = vweird.f32 %v3614_v58 }
 0x11e   : > { %v379_v56 = vmul.f32 %v3112_v51, %v378_v52  ;;  %v376_v60 = vsel %vm375_vm3, %v3108_v38, %v372_v54  ;;  %3115 = vrsqrt.f32 %v3614_v58 }
 0x11f   : > { %v447_v2 = vmul.f32 %v376_v60, %v3366_v18  ;;  %v400_v6 = vmul.f32 0.5, %v399_v61  ;;  %v3630_v18 = vld [vmem:[%s5253_s2] ss:$0 sm:$0xff] }
 0x120   : > { %v380_v57 = vmul.f32 0.5, %v379_v56  ;;  %v346_v59 = vpop.xlane.xlu1 %345  ;;  %v348_v56 = vpop.xlane.xlu2 %347 }
 0x121   : > { %v356_v62 = vmul.f32 %v346_v59, %v3363_v13  ;;  %v459_v11 = vmul.f32 %v3623_v5, %v447_v2  ;;  %v401_v12 = vsub.f32 1.5, %v400_v6 }
 0x122   : > { %v381_v63 = vsub.f32 1.5, %v380_v57  ;;  %v357_v57 = vmul.f32 %v348_v56, %v3363_v13 }
 0x123   : > { %v3114_v0 = vpop.eup %3113  ;;  %v364_v1 = vadd.f32 1e-05, %v356_v62  ;;  %v471_v20 = vadd.f32 %v3630_v18, %v459_v11  ;;  %v402_v21 = vmul.f32 %v3609_v49, %v401_v12 }
 0x124   : > { %v382_v3 = vmul.f32 %v3112_v51, %v381_v63  ;;  %v388_v4 = vmul.f32 %v3114_v0, %v361_v30  ;;  %vm394_vm8 = vweird.f32 %v3114_v0  ;;  %v3116_v15 = vpop.eup %3115 }
 0x125   : > { %3117 = vrsqrt.f32 %v364_v1  ;;  %vm395_vm11 = vmor %vm393_vm7, %vm394_vm8  ;;  %v408_v22 = vmul.f32 %v3116_v15, %v3614_v58  ;;  %v406_v29 = vsel %vm405_vm12, %v3609_v49, %v402_v21  ;;  %vm423_vm13 = vweird.f32 %v364_v1 }
 0x126   : > { %v386_v7 = vsel %vm385_vm6, %v3112_v51, %v382_v3  ;;  %v389_v8 = vmul.f32 %v3114_v0, %v388_v4  ;;  %v450_v37 = vmul.f32 %v406_v29, %v3372_v25  ;;  %vm414_vm0 = vweird.f32 %v3116_v15 }
 0x127   : > { %v448_v9 = vmul.f32 %v386_v7, %v3376_v28  ;;  %v409_v31 = vmul.f32 %v3116_v15, %v408_v22  ;;  %vm415_vm2 = vmor %vm413_vm15, %vm414_vm0  ;;  %v365_v58 = vadd.f32 1e-05, %v357_v57 }
 0x128   : > { %v390_v10 = vmul.f32 0.5, %v389_v8  ;;  %v462_v43 = vmul.f32 %v3623_v5, %v450_v37 }
 0x129   : > { %v460_v14 = vmul.f32 %v3623_v5, %v448_v9  ;;  %v410_v38 = vmul.f32 0.5, %v409_v31  ;;  %3119 = vrsqrt.f32 %v365_v58  ;;  %vm433_vm3 = vweird.f32 %v365_v58 }
 0x12a   : > { %v391_v16 = vsub.f32 1.5, %v390_v10 }
 0x12b   : > { %v472_v28 = vadd.f32 %v3630_v18, %v460_v14  ;;  %v3118_v17 = vpop.eup %3117  ;;  %v411_v44 = vsub.f32 1.5, %v410_v38 }
 0x12c   : > { %v392_v19 = vmul.f32 %v3114_v0, %v391_v16  ;;  %v418_v23 = vmul.f32 %v3118_v17, %v364_v1  ;;  %vm424_vm14 = vweird.f32 %v3118_v17 }
 0x12d   : > { %v479_v24 = vpack.c.bf16 %v472_v28, %v471_v20  ;;  %vm425_vm1 = vmor %vm423_vm13, %vm424_vm14  ;;  %v412_v47 = vmul.f32 %v3116_v15, %v411_v44 }
 0x12e   : > { %v396_v26 = vsel %vm395_vm11, %v3114_v0, %v392_v19  ;;  %v419_v27 = vmul.f32 %v3118_v17, %v418_v23 }
 0x12f   : > { %693 = vmatmul.bf16.vlgmr.msra.gmra.mxu0 %v479_v24  ;;  %722 = vmatmul.bf16.vlgmr.msra.gmra.mxu1 %v479_v24  ;;  %v449_v34 = vmul.f32 %v396_v26, %v3387_v33  ;;  %v474_v33 = vadd.f32 %v3630_v18, %v462_v43  ;;  %v416_v49 = vsel %vm415_vm2, %v3116_v15, %v412_v47 }
 0x130   : > { %751 = vmatmul.bf16.vlgmr.msra.gmra.mxu2 %v479_v24  ;;  %780 = vmatmul.bf16.vlgmr.msra.gmra.mxu3 %v479_v24  ;;  %v420_v35 = vmul.f32 0.5, %v419_v27  ;;  %v451_v51 = vmul.f32 %v416_v49, %v3385_v32 }
 0x131   : > { %v461_v39 = vmul.f32 %v3623_v5, %v449_v34 }
 0x132   : > { %v421_v42 = vsub.f32 1.5, %v420_v35  ;;  %v463_v52 = vmul.f32 %v3623_v5, %v451_v51 }
 0x133   : > { %v473_v45 = vadd.f32 %v3630_v18, %v461_v39 }
 0x134   : > { %v422_v46 = vmul.f32 %v3118_v17, %v421_v42  ;;  %v475_v54 = vadd.f32 %v3630_v18, %v463_v52 }
 0x135   : > { %v480_v25 = vpack.c.bf16 %v474_v33, %v473_v45 }
 0x136   : > { %v426_v48 = vsel %vm425_vm1, %v3118_v17, %v422_v46  ;;  %v515_v17 = vld [vmem:[%s5255_s4] sm:$0xf] }
 0x137   : > { %v452_v50 = vmul.f32 %v426_v48, %v3400_v41  ;;  %v3120_v41 = vpop.eup %3119  ;;  %v3680_v23 = vperm.slane %v515_v17, 2  ;;  %v3682_v24 = vperm.slane %v515_v17, 3 }
 0x138   : > { %v428_v32 = vmul.f32 %v3120_v41, %v365_v58  ;;  %vm434_vm4 = vweird.f32 %v3120_v41 }
 0x139   : > { %v464_v30 = vmul.f32 %v3623_v5, %v452_v50  ;;  %vm435_vm5 = vmor %vm433_vm3, %vm434_vm4  ;;  %5283 = vst [vmem:[#allocation7_spill] sm:$0xff] %v3680_v23 }
 0x13a   : > { %v429_v59 = vmul.f32 %v3120_v41, %v428_v32  ;;  %5284 = vst [vmem:[#allocation8_spill] sm:$0xff] %v3682_v24 }
 0x13b   : > { %v476_v53 = vadd.f32 %v3630_v18, %v464_v30 }
 0x13c   : > { %v430_v63 = vmul.f32 0.5, %v429_v59 }
 0x13d   : > { %v481_v55 = vpack.c.bf16 %v476_v53, %v475_v54 }
 0x13e   : > { %v431_v0 = vsub.f32 1.5, %v430_v63 }
 0x13f   : > { %698 = vmatmul.bf16.gmra.mxu0 %v480_v25  ;;  %727 = vmatmul.bf16.gmra.mxu1 %v480_v25 }
 0x140   : > { %756 = vmatmul.bf16.gmra.mxu2 %v480_v25  ;;  %785 = vmatmul.bf16.gmra.mxu3 %v480_v25  ;;  %v432_v2 = vmul.f32 %v3120_v41, %v431_v0 }
 0x142   : > { %v436_v6 = vsel %vm435_vm5, %v3120_v41, %v432_v2 }
 0x143   : > { %v453_v9 = vmul.f32 %v436_v6, %v3391_v36  ;;  %v3664_v36 = vperm.slane %v515_v17, 0 }
 0x145   : > { %v465_v12 = vmul.f32 %v3623_v5, %v453_v9  ;;  %5281 = vst [vmem:[#allocation5_spill] sm:$0xff] %v3664_v36 }
 0x147   : > { %v477_v15 = vadd.f32 %v3630_v18, %v465_v12 }
 0x14f   : > { %703 = vmatmul.bf16.gmra.mxu0 %v481_v55  ;;  %732 = vmatmul.bf16.gmra.mxu1 %v481_v55 }
 0x150   : > { %761 = vmatmul.bf16.gmra.mxu2 %v481_v55  ;;  %790 = vmatmul.bf16.gmra.mxu3 %v481_v55 }
 0x18a   : > { %v350_v60 = vpop.xlane.xlu0 %349 }
 0x18b   : > { %v358_v61 = vmul.f32 %v350_v60, %v3363_v13 }
 0x18d   : > { %v366_v62 = vadd.f32 1e-05, %v358_v61 }
 0x18f   : > { %3121 = vrsqrt.f32 %v366_v62  ;;  %vm443_vm7 = vweird.f32 %v366_v62 }
 0x195   : > { %v3122_v1 = vpop.eup %3121 }
 0x196   : > { %v438_v3 = vmul.f32 %v3122_v1, %v366_v62  ;;  %vm444_vm6 = vweird.f32 %v3122_v1 }
 0x197   : > { %vm445_vm8 = vmor %vm443_vm7, %vm444_vm6 }
 0x198   : > { %v439_v4 = vmul.f32 %v3122_v1, %v438_v3 }
 0x19a   : > { %v440_v7 = vmul.f32 0.5, %v439_v4 }
 0x19c   : > { %v441_v8 = vsub.f32 1.5, %v440_v7 }
 0x19e   : > { %v442_v10 = vmul.f32 %v3122_v1, %v441_v8 }
 0x1a0   : > { %v446_v13 = vsel %vm445_vm8, %v3122_v1, %v442_v10 }
 0x1a1   : > { %v454_v11 = vmul.f32 %v446_v13, %v3603_v40  ;;  %v3666_v40 = vperm.slane %v515_v17, 1 }
 0x1a3   : > { %v466_v14 = vmul.f32 %v3623_v5, %v454_v11  ;;  %5282 = vst [vmem:[#allocation6_spill] sm:$0xff] %v3666_v40 }
 0x1a5   : > { %v478_v16 = vadd.f32 %v3630_v18, %v466_v14 }
 0x1a7   : > { %v482_v28 = vpack.c.bf16 %v478_v16, %v477_v15 }
 0x1a9   : > { %708 = vmatmul.bf16.gmra.mxu0 %v482_v28  ;;  %737 = vmatmul.bf16.gmra.mxu1 %v482_v28 }
 0x1aa   : > { %766 = vmatmul.bf16.gmra.mxu2 %v482_v28  ;;  %795 = vmatmul.bf16.gmra.mxu3 %v482_v28 }
 0x1ac   : > { %v694_v19 = vpop.f32.mrf.mxu0  ;;  %v723_v20 = vpop.f32.mrf.mxu1 }
 0x1ad   : > { %v3669_v5 = vadd.f32 %v694_v19, %v3664_v36  ;;  %v3672_v18 = vadd.f32 %v723_v20, %v3666_v40 }
 0x1af   : > { %v3675_v21 = vmul.f32 0.70710677, %v3669_v5  ;;  %v3678_v22 = vmul.f32 0.70710677, %v3672_v18 }
 0x1b1   : > { %v865_v26 = vmul.f32 %v3675_v21, %v3675_v21  ;;  %v905_v27 = vmul.f32 %v3678_v22, %v3678_v22 }
 0x1b3   : > { %v3688_v29 = vmin.f32 %v865_v26, 16.0  ;;  %v3690_v31 = vmin.f32 %v905_v27, 16.0  ;;  %v752_v34 = vpop.f32.mrf.mxu2  ;;  %v781_v35 = vpop.f32.mrf.mxu3 }
 0x1b4   : > { %v3693_v37 = vadd.f32 %v752_v34, %v3680_v23  ;;  %v3696_v38 = vadd.f32 %v781_v35, %v3682_v24  ;;  %v696_v59 = vpop.f32.mrf.mxu0 }
 0x1b5   : > { %v867_v39 = vmul.f32 2.1237322e-06, %v3688_v29  ;;  %v878_v42 = vmul.f32 3.8918573e-05, %v3688_v29  ;;  %v907_v43 = vmul.f32 2.1237322e-06, %v3690_v31  ;;  %v3726_v3 = vadd.f32 %v696_v59, %v3664_v36 }
 0x1b6   : > { %v918_v44 = vmul.f32 3.8918573e-05, %v3690_v31  ;;  %v3703_v45 = vmul.f32 0.70710677, %v3693_v37  ;;  %v3708_v49 = vmul.f32 0.70710677, %v3696_v38 }
 0x1b7   : > { %v868_v46 = vadd.f32 0.00028619796, %v867_v39  ;;  %v879_v33 = vadd.f32 0.001143296, %v878_v42  ;;  %v908_v47 = vadd.f32 0.00028619796, %v907_v43 }
 0x1b8   : > { %v919_v25 = vadd.f32 0.001143296, %v918_v44  ;;  %v945_v48 = vmul.f32 %v3703_v45, %v3703_v45  ;;  %v985_v54 = vmul.f32 %v3708_v49, %v3708_v49  ;;  %v3736_v16 = vmul.f32 0.70710677, %v3726_v3 }
 0x1b9   : > { %v869_v50 = vmul.f32 %v868_v46, %v3688_v29  ;;  %v880_v51 = vmul.f32 %v879_v33, %v3688_v29  ;;  %v909_v30 = vmul.f32 %v908_v47, %v3690_v31 }
 0x1ba   : > { %v920_v52 = vmul.f32 %v919_v25, %v3690_v31  ;;  %v3714_v53 = vmin.f32 %v945_v48, 16.0  ;;  %v3720_v32 = vmin.f32 %v985_v54, 16.0  ;;  %v1025_v44 = vmul.f32 %v3736_v16, %v3736_v16 }
 0x1bb   : > { %v881_v55 = vadd.f32 0.014752088, %v880_v51  ;;  %v870_v58 = vadd.f32 0.0036580483, %v869_v50  ;;  %v910_v60 = vadd.f32 0.0036580483, %v909_v30  ;;  %v725_v50 = vpop.f32.mrf.mxu1 }
 0x1bc   : > { %v921_v56 = vadd.f32 0.014752088, %v920_v52  ;;  %v958_v57 = vmul.f32 3.8918573e-05, %v3714_v53  ;;  %v947_v0 = vmul.f32 2.1237322e-06, %v3714_v53 }
 0x1bd   : > { %v882_v41 = vmul.f32 %v881_v55, %v3688_v29  ;;  %v871_v4 = vmul.f32 %v870_v58, %v3688_v29  ;;  %v998_v7 = vmul.f32 3.8918573e-05, %v3720_v32  ;;  %v911_v8 = vmul.f32 %v910_v60, %v3690_v31 }
 0x1be   : > { %v922_v61 = vmul.f32 %v921_v56, %v3690_v31  ;;  %v959_v62 = vadd.f32 0.001143296, %v958_v57  ;;  %v948_v11 = vadd.f32 0.00028619796, %v947_v0  ;;  %v987_v12 = vmul.f32 2.1237322e-06, %v3720_v32 }
 0x1bf   : > { %v883_v63 = vadd.f32 0.112945676, %v882_v41  ;;  %v872_v28 = vadd.f32 0.05243302, %v871_v4  ;;  %v999_v19 = vadd.f32 0.001143296, %v998_v7  ;;  %v726_v57 = vadd.f32 %v725_v50, %v3666_v40 }
 0x1c0   : > { %v923_v1 = vadd.f32 0.112945676, %v922_v61  ;;  %v960_v2 = vmul.f32 %v959_v62, %v3714_v53  ;;  %v912_v20 = vadd.f32 0.05243302, %v911_v8  ;;  %v949_v35 = vmul.f32 %v948_v11, %v3714_v53  ;;  %v754_v11 = vpop.f32.mrf.mxu2 }
 0x1c1   : > { %v884_v6 = vmul.f32 %v883_v63, %v3688_v29  ;;  %v988_v39 = vadd.f32 0.00028619796, %v987_v12  ;;  %v873_v46 = vmul.f32 %v872_v28, %v3688_v29  ;;  %v1000_v33 = vmul.f32 %v999_v19, %v3720_v32 }
 0x1c2   : > { %v924_v9 = vmul.f32 %v923_v1, %v3690_v31  ;;  %v961_v10 = vadd.f32 0.014752088, %v960_v2  ;;  %v913_v47 = vmul.f32 %v912_v20, %v3690_v31  ;;  %v950_v25 = vadd.f32 0.0036580483, %v949_v35 }
 0x1c3   : > { %v885_v13 = vadd.f32 0.4994258, %v884_v6  ;;  %v989_v48 = vmul.f32 %v988_v39, %v3720_v32  ;;  %v3754_v30 = vmin.f32 %v1025_v44, 16.0  ;;  %v874_v52 = vadd.f32 0.18741608, %v873_v46 }
 0x1c4   : > { %v925_v14 = vadd.f32 0.4994258, %v924_v9  ;;  %v962_v15 = vmul.f32 %v961_v10, %v3714_v53  ;;  %v1001_v54 = vadd.f32 0.014752088, %v1000_v33  ;;  %v914_v55 = vadd.f32 0.18741608, %v913_v47 }
 0x1c5   : > { %v886_v17 = vmul.f32 %v885_v13, %v3688_v29  ;;  %v951_v41 = vmul.f32 %v950_v25, %v3714_v53  ;;  %v990_v59 = vadd.f32 0.0036580483, %v989_v48  ;;  %v1038_v62 = vmul.f32 3.8918573e-05, %v3754_v30 }
 0x1c6   : > { %v926_v26 = vmul.f32 %v925_v14, %v3690_v31  ;;  %v963_v27 = vadd.f32 0.112945676, %v962_v15  ;;  %v1002_v60 = vmul.f32 %v1001_v54, %v3720_v32  ;;  %v875_v0 = vmul.f32 %v874_v52, %v3688_v29 }
 0x1c7   : > { %v3740_v34 = vadd.f32 1.0, %v886_v17  ;;  %v3771_v4 = vmul.f32 0.5, %v3669_v5  ;;  %v3774_v6 = vmul.f32 0.5, %v3672_v18  ;;  %v915_v7 = vmul.f32 %v914_v55, %v3690_v31 }
 0x1c8   : > { %v3743_v42 = vadd.f32 1.0, %v926_v26  ;;  %v964_v43 = vmul.f32 %v963_v27, %v3714_v53  ;;  %v1003_v2 = vadd.f32 0.112945676, %v1002_v60  ;;  %v3777_v8 = vmul.f32 0.70710677, %v726_v57 }
 0x1c9   : > { %3123 = vrcp.f32 %v3740_v34  ;;  %v3780_v9 = vmul.f32 0.5, %v3693_v37  ;;  %v952_v10 = vadd.f32 0.05243302, %v951_v41  ;;  %v991_v29 = vmul.f32 %v990_v59, %v3720_v32 }
 0x1ca   : > { %3125 = vrcp.f32 %v3743_v42  ;;  %v965_v51 = vadd.f32 0.4994258, %v964_v43  ;;  %v1004_v13 = vmul.f32 %v1003_v2, %v3720_v32  ;;  %v3788_v18 = vmul.f32 0.5, %v3696_v38 }
 0x1cb   : > { %v1039_v31 = vadd.f32 0.001143296, %v1038_v62  ;;  %v876_v12 = vadd.f32 1.1283791, %v875_v0  ;;  %v3791_v37 = vmul.f32 0.5, %v3726_v3  ;;  %v1065_v19 = vmul.f32 %v3777_v8, %v3777_v8 }
 0x1cc   : > { %v966_v56 = vmul.f32 %v965_v51, %v3714_v53  ;;  %v1005_v15 = vadd.f32 0.4994258, %v1004_v13  ;;  %v916_v28 = vadd.f32 1.1283791, %v915_v7  ;;  %v755_v20 = vadd.f32 %v754_v11, %v3680_v23 }
 0x1cd   : > { %v1040_v17 = vmul.f32 %v1039_v31, %v3754_v30  ;;  %v897_v26 = vand.u32 2147483647, %v3740_v34  ;;  %v953_v38 = vmul.f32 %v952_v10, %v3714_v53  ;;  %v992_v27 = vadd.f32 0.05243302, %v991_v29 }
 0x1ce   : > { %v3762_v61 = vadd.f32 1.0, %v966_v56  ;;  %v1006_v35 = vmul.f32 %v1005_v15, %v3720_v32  ;;  %v1027_v43 = vmul.f32 2.1237322e-06, %v3754_v30  ;;  %v3801_v44 = vmul.f32 0.5, %v726_v57 }
 0x1cf   : > { %v3758_v58 = vpop.eup %3123  ;;  %v1041_v3 = vadd.f32 0.014752088, %v1040_v17  ;;  %v877_v46 = vmul.f32 %v876_v12, %v3675_v21  ;;  %vm893_vm9 = vweird.f32 %v3740_v34  ;;  %v3806_v47 = vmin.f32 %v1065_v19, 16.0 }
 0x1d0   : > { %v3765_v63 = vpop.eup %3125  ;;  %v889_v1 = vmul.f32 %v3758_v58, %v3740_v34  ;;  %3127 = vrcp.f32 %v3762_v61  ;;  %v899_v48 = vand.u32 2147483648, %v3740_v34  ;;  %v3812_v50 = vmul.f32 %v916_v28, %v3678_v22 }
 0x1d1   : > { %v929_v5 = vmul.f32 %v3765_v63, %v3743_v42  ;;  %v3814_v51 = vadd.f32 1.0, %v1006_v35  ;;  %v3816_v52 = vmul.f32 0.70710677, %v755_v20  ;;  %vm933_vm10 = vweird.f32 %v3743_v42 }
 0x1d2   : > { %v890_v14 = vsub.f32 1.0, %v889_v1  ;;  %v954_v21 = vadd.f32 0.18741608, %v953_v38  ;;  %v993_v54 = vmul.f32 %v992_v27, %v3720_v32  ;;  %v1042_v55 = vmul.f32 %v1041_v3, %v3754_v30 }
 0x1d3   : > { %v930_v39 = vsub.f32 1.0, %v929_v5  ;;  %vm894_vm11 = vweird.f32 %v3758_v58  ;;  %vm3822_vm12 = vcmp.eq.f32.partialorder %v897_v26, 8.507059e+37  ;;  %v1028_v57 = vadd.f32 0.00028619796, %v1027_v43 }
 0x1d4   : > { %v891_v33 = vmul.f32 %v3758_v58, %v890_v14  ;;  %3129 = vrcp.f32 %v3814_v51  ;;  %v1067_v60 = vmul.f32 2.1237322e-06, %v3806_v47  ;;  %v937_v62 = vand.u32 2147483647, %v3743_v42  ;;  %vm3843_vm13 = vmor %vm893_vm9, %vm894_vm11 }
 0x1d5   : > { %v931_v22 = vmul.f32 %v3765_v63, %v930_v39  ;;  %v939_v0 = vand.u32 2147483648, %v3743_v42  ;;  %v1043_v1 = vadd.f32 0.112945676, %v1042_v55  ;;  %v1105_v2 = vmul.f32 %v3816_v52, %v3816_v52  ;;  %v783_v42 = vpop.f32.mrf.mxu3 }
 0x1d6   : > { %v3808_v25 = vpop.eup %3127  ;;  %v892_v41 = vadd.f32 %v3758_v58, %v891_v33  ;;  %v900_v7 = vor.u32 1.1754944e-38, %v899_v48  ;;  %v955_v10 = vmul.f32 %v954_v21, %v3714_v53  ;;  %v994_v29 = vadd.f32 0.18741608, %v993_v54 }
 0x1d7   : > { %v969_v59 = vmul.f32 %v3808_v25, %v3762_v61  ;;  %v3837_v13 = vmul.f32 0.5, %v755_v20  ;;  %vm934_vm14 = vweird.f32 %v3765_v63  ;;  %v1029_v5 = vmul.f32 %v1028_v57, %v3754_v30 }
 0x1d8   : > { %v1044_v31 = vmul.f32 %v1043_v1, %v3754_v30  ;;  %v1078_v12 = vmul.f32 3.8918573e-05, %v3806_v47  ;;  %v896_v53 = vsel %vm3843_vm13, %v3758_v58, %v892_v41  ;;  %v932_v14 = vadd.f32 %v3765_v63, %v931_v22  ;;  %vm3871_vm0 = vmor %vm933_vm10, %vm934_vm14 }
 0x1d9   : > { %v970_v15 = vsub.f32 1.0, %v969_v59  ;;  %v1068_v34 = vadd.f32 0.00028619796, %v1067_v60  ;;  %vm3855_vm15 = vcmp.eq.f32.partialorder %v937_v62, 8.507059e+37  ;;  %v3859_v20 = vmin.f32 %v1105_v2, 16.0 }
 0x1da   : > { %v1045_v17 = vadd.f32 0.4994258, %v1044_v31  ;;  %v1079_v19 = vadd.f32 0.001143296, %v1078_v12  ;;  %v3861_v26 = vpop.eup %3129  ;;  %v940_v38 = vor.u32 1.1754944e-38, %v939_v0  ;;  %v995_v58 = vmul.f32 %v994_v29, %v3720_v32 }
 0x1db   : > { %v956_v27 = vadd.f32 1.1283791, %v955_v10  ;;  %v977_v35 = vand.u32 2147483647, %v3762_v61  ;;  %v901_v39 = vsel %vm3822_vm12, %v900_v7, %v896_v53  ;;  %v1030_v3 = vadd.f32 0.0036580483, %v1029_v5 }
 0x1dc   : > { %v1046_v33 = vmul.f32 %v1045_v17, %v3754_v30  ;;  %v1080_v48 = vmul.f32 %v1079_v19, %v3806_v47  ;;  %v936_v32 = vsel %vm3871_vm0, %v3765_v63, %v932_v14  ;;  %v971_v21 = vmul.f32 %v3808_v25, %v970_v15  ;;  %v699_v17 = vpop.f32.mrf.mxu0 }
 0x1dd   : > { %v979_v54 = vand.u32 2147483648, %v3762_v61  ;;  %v1069_v55 = vmul.f32 %v1068_v34, %v3806_v47  ;;  %v1009_v56 = vmul.f32 %v3861_v26, %v3814_v51  ;;  %v1118_v41 = vmul.f32 3.8918573e-05, %v3859_v20 }
 0x1de   : > { %v3885_v22 = vadd.f32 1.0, %v1046_v33  ;;  %v1081_v57 = vadd.f32 0.014752088, %v1080_v48  ;;  %v902_v59 = vmul.f32 %v901_v39, %v877_v46  ;;  %v957_v60 = vmul.f32 %v956_v27, %v3703_v45 }
 0x1df   : > { %vm973_vm1 = vweird.f32 %v3762_v61  ;;  %v996_v63 = vadd.f32 1.1283791, %v995_v58  ;;  %v941_v62 = vsel %vm3855_vm15, %v940_v38, %v936_v32  ;;  %vm3892_vm2 = vcmp.eq.f32.partialorder %v977_v35, 8.507059e+37 }
 0x1e0   : > { %v1031_v1 = vmul.f32 %v1030_v3, %v3754_v30  ;;  %3131 = vrcp.f32 %v3885_v22  ;;  %v3899_v2 = vadd.f32 %v783_v42, %v3682_v24  ;;  %v980_v46 = vor.u32 1.1754944e-38, %v979_v54 }
 0x1e1   : > { %v1070_v7 = vadd.f32 0.0036580483, %v1069_v55  ;;  %v1082_v45 = vmul.f32 %v1081_v57, %v3806_v47  ;;  %v1107_v10 = vmul.f32 2.1237322e-06, %v3859_v20  ;;  %v972_v29 = vadd.f32 %v3808_v25, %v971_v21 }
 0x1e2   : > { %vm974_vm3 = vweird.f32 %v3808_v25  ;;  %v1010_v11 = vsub.f32 1.0, %v1009_v56  ;;  %v1119_v5 = vadd.f32 0.001143296, %v1118_v41  ;;  %v2830_v31 = vclamps-f32 %v902_v59, 1.0 }
 0x1e3   : > { %v942_v12 = vmul.f32 %v941_v62, %v3812_v50  ;;  %v3907_v53 = vmul.f32 %v996_v63, %v3708_v49  ;;  %v1083_v14 = vadd.f32 0.112945676, %v1082_v45  ;;  %vm1013_vm4 = vweird.f32 %v3814_v51  ;;  %vm3916_vm5 = vmor %vm973_vm1, %vm974_vm3 }
 0x1e4   : > { %v1032_v15 = vadd.f32 0.05243302, %v1031_v1  ;;  %v1120_v34 = vmul.f32 %v1119_v5, %v3859_v20  ;;  %v3912_v28 = vmul.f32 0.70710677, %v3899_v2  ;;  %v1017_v50 = vand.u32 2147483647, %v3814_v51 }
 0x1e5   : > { %v1071_v49 = vmul.f32 %v1070_v7, %v3806_v47  ;;  %v1084_v38 = vmul.f32 %v1083_v14, %v3806_v47  ;;  %v1108_v27 = vadd.f32 0.00028619796, %v1107_v10  ;;  %v976_v58 = vsel %vm3916_vm5, %v3808_v25, %v972_v29 }
 0x1e6   : > { %v3923_v35 = vpop.eup %3131  ;;  %v1011_v39 = vmul.f32 %v3861_v26, %v1010_v11  ;;  %v1121_v61 = vadd.f32 0.014752088, %v1120_v34  ;;  %v1145_v43 = vmul.f32 %v3912_v28, %v3912_v28  ;;  %v2831_v3 = vclamps-f32 %v942_v12, 1.0 }
 0x1e7   : > { %v1019_v33 = vand.u32 2147483648, %v3814_v51  ;;  %v1049_v48 = vmul.f32 %v3923_v35, %v3885_v22  ;;  %v3935_v32 = vadd.f32 %v699_v17, %v3664_v36  ;;  %v1033_v21 = vmul.f32 %v1032_v15, %v3754_v30 }
 0x1e8   : > { %v1085_v54 = vadd.f32 0.4994258, %v1084_v38  ;;  %v1122_v25 = vmul.f32 %v1121_v61, %v3859_v20  ;;  %v3939_v55 = vmin.f32 %v1145_v43, 16.0  ;;  %v981_v42 = vsel %vm3892_vm2, %v980_v46, %v976_v58  ;;  %v728_v46 = vpop.f32.mrf.mxu1 }
 0x1e9   : > { %vm1014_vm6 = vweird.f32 %v3861_v26  ;;  %v1072_v56 = vadd.f32 0.05243302, %v1071_v49  ;;  %v1109_v57 = vmul.f32 %v1108_v27, %v3859_v20  ;;  %v1012_v41 = vadd.f32 %v3861_v26, %v1011_v39 }
 0x1ea   : > { %v1086_v59 = vmul.f32 %v1085_v54, %v3806_v47  ;;  %v1123_v63 = vadd.f32 0.112945676, %v1122_v25  ;;  %v1147_v62 = vmul.f32 2.1237322e-06, %v3939_v55  ;;  %v3948_v1 = vadd.f32 1.0, %v2830_v31  ;;  %vm3961_vm7 = vmor %vm1013_vm4, %vm1014_vm6 }
 0x1eb   : > { %v1050_v7 = vsub.f32 1.0, %v1049_v48  ;;  %v1158_v45 = vmul.f32 3.8918573e-05, %v3939_v55  ;;  %v3952_v0 = vmul.f32 0.70710677, %v3935_v32  ;;  %v982_v10 = vmul.f32 %v981_v42, %v957_v60 }
 0x1ec   : > { %v3954_v29 = vadd.f32 1.0, %v1086_v59  ;;  %v1124_v11 = vmul.f32 %v1123_v63, %v3859_v20  ;;  %v1148_v5 = vadd.f32 0.00028619796, %v1147_v62  ;;  %v1020_v12 = vor.u32 1.1754944e-38, %v1019_v33 }
 0x1ed   : > { %v1073_v14 = vmul.f32 %v1072_v56, %v3806_v47  ;;  %v1110_v15 = vadd.f32 0.0036580483, %v1109_v57  ;;  %v1159_v34 = vadd.f32 0.001143296, %v1158_v45  ;;  %v1016_v60 = vsel %vm3961_vm7, %v3861_v26, %v1012_v41  ;;  %v757_v56 = vpop.f32.mrf.mxu2 }
 0x1ee   : > { %v1034_v17 = vadd.f32 0.18741608, %v1033_v21  ;;  %3133 = vrcp.f32 %v3954_v29  ;;  %v3971_v19 = vadd.f32 %v728_v46, %v3666_v40  ;;  %v1051_v51 = vmul.f32 %v3923_v35, %v1050_v7 }
 0x1ef   : > { %v1125_v49 = vadd.f32 0.4994258, %v1124_v11  ;;  %v1149_v38 = vmul.f32 %v1148_v5, %v3939_v55  ;;  %v1185_v27 = vmul.f32 %v3952_v0, %v3952_v0  ;;  %v2146_v58 = vadd.f32 1.0, %v2831_v3 }
 0x1f0   : > { %v2832_v39 = vclamps-f32 %v982_v10, 1.0  ;;  %vm1018_vm8 = vcmp.eq.f32.partialorder %v1017_v50, 8.507059e+37  ;;  %v1160_v61 = vmul.f32 %v1159_v34, %v3939_v55  ;;  %v1074_v43 = vadd.f32 0.18741608, %v1073_v14 }
 0x1f1   : > { %v1021_v26 = vsel %vm1018_vm8, %v1020_v12, %v1016_v60  ;;  %v1111_v33 = vmul.f32 %v1110_v15, %v3859_v20  ;;  %v1126_v48 = vmul.f32 %v1125_v49, %v3859_v20  ;;  %v1035_v21 = vmul.f32 %v1034_v17, %v3754_v30  ;;  %v3034_v12 = vld [vmem:[%s5256_s5 + $0x38] sm:$0xff] }
 0x1f2   : > { %v1150_v54 = vadd.f32 0.0036580483, %v1149_v38  ;;  %v1161_v25 = vadd.f32 0.014752088, %v1160_v61  ;;  %v3982_v42 = vmul.f32 0.70710677, %v3971_v19  ;;  %v1052_v3 = vadd.f32 %v3923_v35, %v1051_v51  ;;  %2485 = vmatpush.bf16.msrb.mxu0 %v3034_v12 }
 0x1f3   : > { %vm1054_vm9 = vweird.f32 %v3923_v35  ;;  %v1059_v50 = vand.u32 2147483648, %v3885_v22  ;;  %v3987_v57 = vmin.f32 %v1185_v27, 16.0  ;;  %v1022_v59 = vmul.f32 %v1021_v26, %v3907_v53  ;;  %v3033_v26 = vld [vmem:[%s5256_s5 + $0x30] sm:$0xff] }
 0x1f4   : > { %v3989_v41 = vpop.eup %3133  ;;  %v3992_v63 = vadd.f32 1.0, %v1126_v48  ;;  %v1162_v30 = vmul.f32 %v1161_v25, %v3939_v55  ;;  %v1225_v62 = vmul.f32 %v3982_v42, %v3982_v42  ;;  %vm1053_vm10 = vweird.f32 %v3885_v22 }
 0x1f5   : > { %v1057_v7 = vand.u32 2147483647, %v3885_v22  ;;  %v1112_v45 = vadd.f32 0.05243302, %v1111_v33  ;;  %v4000_v46 = vadd.f32 %v757_v56, %v3680_v23  ;;  %v2147_v10 = vadd.f32 1.0, %v2832_v39  ;;  %vm4002_vm11 = vmor %vm1053_vm10, %vm1054_vm9 }
 0x1f6   : > { %v1036_v11 = vadd.f32 1.1283791, %v1035_v21  ;;  %v1075_v53 = vmul.f32 %v1074_v43, %v3806_v47  ;;  %v1151_v31 = vmul.f32 %v1150_v54, %v3939_v55  ;;  %v1056_v22 = vsel %vm4002_vm11, %v3923_v35, %v1052_v3  ;;  %v3042_v47 = vld [vmem:[%s5256_s5 + $0x78] sm:$0xff]  ;;  %v3041_v43 = vld [vmem:[%s5256_s5 + $0x70] sm:$0xff]  ;;  %2486 = vmatpush.bf16.msrb.mxu0 %v3033_v26 }
 0x1f7   : > { %v1089_v14 = vmul.f32 %v3989_v41, %v3954_v29  ;;  %v1163_v15 = vadd.f32 0.112945676, %v1162_v30  ;;  %v1187_v34 = vmul.f32 2.1237322e-06, %v3987_v57  ;;  %v2833_v60 = vclamps-f32 %v1022_v59, 1.0  ;;  %2514 = vmatpush.bf16.msrb.mxu1 %v3042_v47  ;;  %v786_v59 = vpop.f32.mrf.mxu3 }
 0x1f8   : > { %v1060_v17 = vor.u32 1.1754944e-38, %v1059_v50  ;;  %3135 = vrcp.f32 %v3992_v63  ;;  %v4021_v51 = vmin.f32 %v1225_v62, 16.0  ;;  %vm1058_vm12 = vcmp.eq.f32.partialorder %v1057_v7, 8.507059e+37 }
 0x1f9   : > { %v1113_v35 = vmul.f32 %v1112_v45, %v3859_v20  ;;  %v1164_v49 = vmul.f32 %v1163_v15, %v3939_v55  ;;  %v4026_v38 = vmul.f32 0.70710677, %v4000_v46  ;;  %v1076_v39 = vadd.f32 1.1283791, %v1075_v53  ;;  %v701_v15 = vpop.f32.mrf.mxu0 }
 0x1fa   : > { %v1061_v27 = vsel %vm1058_vm12, %v1060_v17, %v1056_v22  ;;  %v1152_v61 = vadd.f32 0.05243302, %v1151_v31  ;;  %v1090_v33 = vsub.f32 1.0, %v1089_v14  ;;  %v1188_v21 = vadd.f32 0.00028619796, %v1187_v34 }
 0x1fb   : > { %v1165_v48 = vadd.f32 0.4994258, %v1164_v49  ;;  %v1265_v54 = vmul.f32 %v4026_v38, %v4026_v38  ;;  %v4038_v25 = vmul.f32 %v3948_v1, %v3771_v4  ;;  %v2148_v56 = vadd.f32 1.0, %v2833_v60  ;;  %2515 = vmatpush.bf16.msrb.mxu1 %v3041_v43  ;;  %v3050_v4 = vld [vmem:[%s5256_s5 + $0xb8] sm:$0xff] }
 0x1fc   : > { %v1037_v3 = vmul.f32 %v1036_v11, %v3736_v16  ;;  %v1227_v50 = vmul.f32 2.1237322e-06, %v4021_v51  ;;  %v4043_v30 = vmul.f32 %v2146_v58, %v3774_v6  ;;  %v1114_v62 = vadd.f32 0.18741608, %v1113_v35  ;;  %v3058_v16 = vld [vmem:[%s5256_s5 + $0xf8] sm:$0xff]  ;;  %2543 = vmatpush.bf16.msrb.mxu2 %v3050_v4 }
 0x1fd   : > { %v1166_v7 = vmul.f32 %v1165_v48, %v3939_v55  ;;  %v4046_v45 = vmin.f32 %v1265_v54, 16.0  ;;  %v4057_v11 = vmul.f32 %v2147_v10, %v3780_v9  ;;  %v4060_v58 = vmul.f32 %v1076_v39, %v3777_v8  ;;  %2572 = vmatpush.bf16.msrb.mxu3 %v3058_v16 }
 0x1fe   : > { %v4054_v1 = vpop.eup %3135  ;;  %v1062_v6 = vmul.f32 %v1061_v27, %v1037_v3  ;;  %v1153_v5 = vmul.f32 %v1152_v61, %v3939_v55  ;;  %v1091_v53 = vmul.f32 %v3989_v41, %v1090_v33  ;;  %v4065_v31 = vmul.f32 0.5, %v3899_v2 }
 0x1ff   : > { %v1189_v12 = vmul.f32 %v1188_v21, %v3987_v57  ;;  %v4069_v22 = vadd.f32 %v786_v59, %v3682_v24  ;;  %v4072_v9 = vmul.f32 %v2148_v56, %v3788_v18  ;;  %v4075_v8 = vmul.f32 0.5, %v3935_v32  ;;  %v730_v21 = vpop.f32.mrf.mxu1  ;;  %v3040_v59 = vld [vmem:[%s5256_s5 + $0x68] sm:$0xff] }
 0x200   : > { %v1228_v10 = vadd.f32 0.00028619796, %v1227_v50  ;;  %v1267_v14 = vmul.f32 2.1237322e-06, %v4046_v45  ;;  %v1097_v2 = vand.u32 2147483647, %v3954_v29  ;;  %v1115_v34 = vmul.f32 %v1114_v62, %v3859_v20  ;;  %2516 = vmatpush.bf16.msrb.mxu1 %v3040_v59 }
 0x201   : > { %5301 = vst [vmem:[#allocation9_spill] sm:$0xff] %v4075_v8  ;;  %v1129_v47 = vmul.f32 %v4054_v1, %v3992_v63  ;;  %v4082_v60 = vadd.f32 1.0, %v1166_v7  ;;  %v2834_v17 = vclamps-f32 %v1062_v6, 1.0  ;;  %vm1094_vm13 = vweird.f32 %v3989_v41  ;;  %v3032_v50 = vld [vmem:[%s5256_s5 + $0x28] sm:$0xff] }
 0x202   : > { %v1099_v18 = vand.u32 2147483648, %v3954_v29  ;;  %v1154_v32 = vadd.f32 0.18741608, %v1153_v5  ;;  %v1092_v35 = vadd.f32 %v3989_v41, %v1091_v53  ;;  %v1190_v49 = vadd.f32 0.0036580483, %v1189_v12  ;;  %2487 = vmatpush.bf16.msrb.mxu0 %v3032_v50  ;;  %v3057_v12 = vld [vmem:[%s5256_s5 + $0xf0] sm:$0xff] }
 0x203   : > { %v4088_v27 = vmul.f32 0.70710677, %v4069_v22  ;;  %v4091_v39 = vadd.f32 %v701_v15, %v3664_v36  ;;  %vm1093_vm14 = vweird.f32 %v3954_v29  ;;  %v4095_v20 = vmul.f32 0.5, %v3971_v19  ;;  %2573 = vmatpush.bf16.msrb.mxu3 %v3057_v12 }
 0x204   : > { %v1229_v61 = vmul.f32 %v1228_v10, %v4021_v51  ;;  %v1268_v26 = vadd.f32 0.00028619796, %v1267_v14  ;;  %v1116_v43 = vadd.f32 1.1283791, %v1115_v34  ;;  %v1130_v33 = vsub.f32 1.0, %v1129_v47  ;;  %vm4103_vm15 = vmor %vm1093_vm14, %vm1094_vm13  ;;  %v759_v34 = vpop.f32.mrf.mxu2 }
 0x205   : > { %5302 = vst [vmem:[#allocation10_spill] sm:$0xff] %v4095_v20  ;;  %3137 = vrcp.f32 %v4082_v60  ;;  %v1305_v48 = vmul.f32 %v4088_v27, %v4088_v27  ;;  %v2149_v54 = vadd.f32 1.0, %v2834_v17  ;;  %vm4107_vm0 = vcmp.eq.f32.partialorder %v1097_v2, 8.507059e+37 }
 0x206   : > { %v1100_v19 = vor.u32 1.1754944e-38, %v1099_v18  ;;  %v1155_v3 = vmul.f32 %v1154_v32, %v3939_v55  ;;  %v1096_v62 = vsel %vm4103_vm15, %v3989_v41, %v1092_v35  ;;  %v1191_v7 = vmul.f32 %v1190_v49, %v3987_v57  ;;  %v3049_v41 = vld [vmem:[%s5256_s5 + $0xb0] sm:$0xff] }
 0x207   : > { %v4122_v4 = vmin.f32 %v1305_v48, 16.0  ;;  %v4125_v16 = vmul.f32 0.70710677, %v4091_v39  ;;  %v1137_v55 = vand.u32 2147483647, %v3992_v63  ;;  %v1269_v5 = vmul.f32 %v1268_v26, %v4046_v45  ;;  %2544 = vmatpush.bf16.msrb.mxu2 %v3049_v41 }
 0x208   : > { %v1230_v6 = vadd.f32 0.0036580483, %v1229_v61  ;;  %v4130_v53 = vadd.f32 %v730_v21, %v3666_v40  ;;  %v4139_v10 = vmul.f32 %v1116_v43, %v3816_v52  ;;  %v1131_v14 = vmul.f32 %v4054_v1, %v1130_v33  ;;  %v3031_v52 = vld [vmem:[%s5256_s5 + $0x20] sm:$0xff]  ;;  %v3029_v43 = vld [vmem:[%s5256_s5 + $0x10] sm:$0xff] }
 0x209   : > { %v4143_v15 = vmul.f32 0.5, %v4000_v46  ;;  %v1345_v2 = vmul.f32 %v4125_v16, %v4125_v16  ;;  %v1101_v47 = vsel %vm4107_vm0, %v1100_v19, %v1096_v62  ;;  %vm1133_vm1 = vweird.f32 %v3992_v63  ;;  %v3039_v46 = vld [vmem:[%s5256_s5 + $0x60] sm:$0xff]  ;;  %2488 = vmatpush.bf16.msrb.mxu0 %v3031_v52  ;;  %v788_v62 = vpop.f32.mrf.mxu3 }
 0x20a   : > { %v1139_v17 = vand.u32 2147483648, %v3992_v63  ;;  %v1307_v18 = vmul.f32 2.1237322e-06, %v4122_v4  ;;  %v4161_v35 = vmul.f32 %v2149_v54, %v3791_v37  ;;  %v1156_v49 = vadd.f32 1.1283791, %v1155_v3  ;;  %2517 = vmatpush.bf16.msrb.mxu1 %v3039_v46  ;;  %v3056_v63 = vld [vmem:[%s5256_s5 + $0xe8] sm:$0xff] }
 0x20b   : > { %5307 = vst [vmem:[#allocation11_spill] sm:$0xff] %v4143_v15  ;;  %v4158_v32 = vpop.eup %3137  ;;  %v1192_v61 = vadd.f32 0.05243302, %v1191_v7  ;;  %v4163_v26 = vmin.f32 %v1345_v2, 16.0  ;;  %vm4165_vm2 = vcmp.eq.f32.partialorder %v1137_v55, 8.507059e+37  ;;  %v1231_v33 = vmul.f32 %v1230_v6, %v4021_v51  ;;  %2574 = vmatpush.bf16.msrb.mxu3 %v3056_v63 }
 0x20c   : > { %v1270_v48 = vadd.f32 0.0036580483, %v1269_v5  ;;  %v4171_v21 = vmul.f32 0.70710677, %v4130_v53  ;;  %v4174_v56 = vadd.f32 %v759_v34, %v3680_v23  ;;  %v1102_v37 = vmul.f32 %v1101_v47, %v4060_v58  ;;  %v704_v34 = vpop.f32.mrf.mxu0  ;;  %v762_v15 = vpop.f32.mrf.mxu2 }
 0x20d   : > { %v1132_v54 = vadd.f32 %v4054_v1, %v1131_v14  ;;  %vm1134_vm3 = vweird.f32 %v4054_v1  ;;  %v1347_v29 = vmul.f32 2.1237322e-06, %v4163_v26  ;;  %v1169_v19 = vmul.f32 %v4158_v32, %v4082_v60 }
 0x20e   : > { %v1308_v3 = vadd.f32 0.00028619796, %v1307_v18  ;;  %v1385_v50 = vmul.f32 %v4171_v21, %v4171_v21  ;;  %v4185_v59 = vmul.f32 0.70710677, %v4174_v56  ;;  %v1140_v7 = vor.u32 1.1754944e-38, %v1139_v17  ;;  %vm4193_vm4 = vmor %vm1133_vm1, %vm1134_vm3 }
 0x20f   : > { %v4188_v58 = vmul.f32 %v1156_v49, %v3912_v28  ;;  %v1193_v55 = vmul.f32 %v1192_v61, %v3987_v57  ;;  %v1348_v6 = vadd.f32 0.00028619796, %v1347_v29  ;;  %v1232_v41 = vadd.f32 0.05243302, %v1231_v33  ;;  %v3048_v28 = vld [vmem:[%s5256_s5 + $0xa8] sm:$0xff] }
 0x210   : > { %v1271_v12 = vmul.f32 %v1270_v48, %v4046_v45  ;;  %v4198_v14 = vmin.f32 %v1385_v50, 16.0  ;;  %v1425_v2 = vmul.f32 %v4185_v59, %v4185_v59  ;;  %v2835_v47 = vclamps-f32 %v1102_v37, 1.0  ;;  %2545 = vmatpush.bf16.msrb.mxu2 %v3048_v28  ;;  %v3030_v48 = vld [vmem:[%s5256_s5 + $0x18] sm:$0xff] }
 0x211   : > { %v1136_v17 = vsel %vm4193_vm4, %v4054_v1, %v1132_v54  ;;  %v4212_v18 = vmul.f32 0.5, %v4069_v22  ;;  %v4215_v52 = vadd.f32 %v788_v62, %v3682_v24  ;;  %v1170_v46 = vsub.f32 1.0, %v1169_v19  ;;  %v3038_v1 = vld [vmem:[%s5256_s5 + $0x58] sm:$0xff]  ;;  %v733_v19 = vpop.f32.mrf.mxu1  ;;  %2489 = vmatpush.bf16.msrb.mxu0 %v3030_v48 }
 0x212   : > { %v1309_v49 = vmul.f32 %v1308_v3, %v4122_v4  ;;  %v1387_v61 = vmul.f32 2.1237322e-06, %v4198_v14  ;;  %v4219_v33 = vmin.f32 %v1425_v2, 16.0  ;;  %v1177_v22 = vand.u32 2147483647, %v4082_v60  ;;  %2518 = vmatpush.bf16.msrb.mxu1 %v3038_v1 }
 0x213   : > { %5312 = vst [vmem:[#allocation12_spill] sm:$0xff] %v4212_v18  ;;  %v1194_v37 = vadd.f32 0.18741608, %v1193_v55  ;;  %v1349_v54 = vmul.f32 %v1348_v6, %v4163_v26  ;;  %v4230_v29 = vadd.f32 %v704_v34, %v3664_v36  ;;  %vm1173_vm5 = vweird.f32 %v4082_v60  ;;  %v3047_v55 = vld [vmem:[%s5256_s5 + $0xa0] sm:$0xff] }
 0x214   : > { %v1179_v3 = vand.u32 2147483648, %v4082_v60  ;;  %v1233_v50 = vmul.f32 %v1232_v41, %v4021_v51  ;;  %v1272_v62 = vadd.f32 0.05243302, %v1271_v12  ;;  %v1427_v5 = vmul.f32 2.1237322e-06, %v4219_v33  ;;  %v3055_v41 = vld [vmem:[%s5256_s5 + $0xe0] sm:$0xff]  ;;  %2546 = vmatpush.bf16.msrb.mxu2 %v3047_v55 }
 0x215   : > { %v4239_v6 = vadd.f32 1.0, %v2835_v47  ;;  %v1141_v2 = vsel %vm4165_vm2, %v1140_v7, %v1136_v17  ;;  %v1388_v34 = vadd.f32 0.00028619796, %v1387_v61  ;;  %v4244_v28 = vmul.f32 0.70710677, %v4215_v52  ;;  %v3037_v7 = vld [vmem:[%s5256_s5 + $0x50] sm:$0xff]  ;;  %2575 = vmatpush.bf16.msrb.mxu3 %v3055_v41  ;;  %2490 = vmatpush.bf16.msrb.mxu0 %v3029_v43 }
 0x216   : > { %v1171_v12 = vmul.f32 %v4158_v32, %v1170_v46  ;;  %v1310_v63 = vadd.f32 0.0036580483, %v1309_v49  ;;  %v1428_v48 = vadd.f32 0.00028619796, %v1427_v5  ;;  %v4251_v1 = vadd.f32 %v733_v19, %v3666_v40  ;;  %2519 = vmatpush.bf16.msrb.mxu1 %v3037_v7  ;;  %v3027_v60 = vld [vmem:[%s5256_s5] sm:$0xff] }
 0x217   : > { %v1195_v47 = vmul.f32 %v1194_v37, %v3987_v57  ;;  %v1350_v17 = vadd.f32 0.0036580483, %v1349_v54  ;;  %v1465_v46 = vmul.f32 %v4244_v28, %v4244_v28  ;;  %v4263_v49 = vmul.f32 0.70710677, %v4230_v29  ;;  %v3046_v37 = vld [vmem:[%s5256_s5 + $0x98] sm:$0xff] }
 0x218   : > { %5313 = vst [vmem:[#allocation13_spill] sm:$0xff] %v4251_v1  ;;  %v1142_v61 = vmul.f32 %v1141_v2, %v4139_v10  ;;  %vm4266_vm6 = vcmp.eq.f32.partialorder %v1177_v22, 8.507059e+37  ;;  %v1180_v5 = vor.u32 1.1754944e-38, %v1179_v3  ;;  %v1234_v55 = vadd.f32 0.18741608, %v1233_v50  ;;  %v3054_v54 = vld [vmem:[%s5256_s5 + $0xd8] sm:$0xff]  ;;  %2547 = vmatpush.bf16.msrb.mxu2 %v3046_v37 }
 0x219   : > { %5314 = vst [vmem:[#allocation14_spill] sm:$0xff] %v4263_v49  ;;  %v1273_v18 = vmul.f32 %v1272_v62, %v4046_v45  ;;  %v1389_v10 = vmul.f32 %v1388_v34, %v4198_v14  ;;  %v1429_v22 = vmul.f32 %v1428_v48, %v4219_v33  ;;  %v4279_v2 = vmin.f32 %v1465_v46, 16.0  ;;  %v3028_v34 = vld [vmem:[%s5256_s5 + $0x8] sm:$0xff]  ;;  %2576 = vmatpush.bf16.msrb.mxu3 %v3054_v54 }
 0x21a   : > { %v1505_v3 = vmul.f32 %v4263_v49, %v4263_v49  ;;  %v1172_v50 = vadd.f32 %v4158_v32, %v1171_v12  ;;  %vm1174_vm7 = vweird.f32 %v4158_v32  ;;  %v1311_v62 = vmul.f32 %v1310_v63, %v4122_v4  ;;  %v3036_v48 = vld [vmem:[%s5256_s5 + $0x48] sm:$0xff]  ;;  %2491 = vmatpush.bf16.msrb.mxu0 %v3028_v34  ;;  %v791_v34 = vpop.f32.mrf.mxu3 }
 0x21b   : > { %v4287_v41 = vmul.f32 0.70710677, %v4251_v1  ;;  %v1196_v43 = vadd.f32 1.1283791, %v1195_v47  ;;  %v1351_v7 = vmul.f32 %v1350_v17, %v4163_v26  ;;  %v1467_v12 = vmul.f32 2.1237322e-06, %v4279_v2  ;;  %2520 = vmatpush.bf16.msrb.mxu1 %v3036_v48  ;;  %vm4314_vm8 = vmor %vm1173_vm5, %vm1174_vm7 }
 0x21c   : > { %v4298_v46 = vadd.f32 %v762_v15, %v3680_v23  ;;  %v2836_v63 = vclamps-f32 %v1142_v61, 1.0  ;;  %v1274_v1 = vadd.f32 0.18741608, %v1273_v18  ;;  %v4300_v37 = vmin.f32 %v1505_v3, 16.0  ;;  %v3045_v47 = vld [vmem:[%s5256_s5 + $0x90] sm:$0xff] }
 0x21d   : > { %5317 = vst [vmem:[#allocation15_spill] sm:$0xff] %v4287_v41  ;;  %v1545_v20 = vmul.f32 %v4287_v41, %v4287_v41  ;;  %v3053_v17 = vld [vmem:[%s5256_s5 + $0xd0] sm:$0xff]  ;;  %v1235_v18 = vmul.f32 %v1234_v55, %v4021_v51  ;;  %v1390_v61 = vadd.f32 0.0036580483, %v1389_v10  ;;  %v1430_v54 = vadd.f32 0.0036580483, %v1429_v22  ;;  %2548 = vmatpush.bf16.msrb.mxu2 %v3045_v47 }
 0x21e   : > { %5318 = vst [vmem:[#allocation16_spill] sm:$0xff] %v4298_v46  ;;  %v1468_v3 = vadd.f32 0.00028619796, %v1467_v12  ;;  %v1176_v48 = vsel %vm4314_vm8, %v4158_v32, %v1172_v50  ;;  %v1312_v8 = vadd.f32 0.05243302, %v1311_v62  ;;  %v4330_v55 = vmul.f32 %v4239_v6, %v3801_v44  ;;  %2577 = vmatpush.bf16.msrb.mxu3 %v3053_v17  ;;  %v706_v6 = vpop.f32.mrf.mxu0  ;;  %2492 = vmatpush.bf16.msrb.mxu0 %v3027_v60  ;;  %v3051_v60 = vld [vmem:[%s5256_s5 + $0xc0] sm:$0xff] }
 0x21f   : > { %v1507_v41 = vmul.f32 2.1237322e-06, %v4300_v37  ;;  %v4323_v49 = vmin.f32 %v1545_v20, 16.0  ;;  %v1352_v10 = vadd.f32 0.05243302, %v1351_v7  ;;  %v3035_v20 = vld [vmem:[%s5256_s5 + $0x40] sm:$0xff]  ;;  %v4340_v50 = vmul.f32 %v1196_v43, %v3952_v0 }
 0x220   : > { %v1469_v22 = vmul.f32 %v1468_v3, %v4279_v2  ;;  %v4334_v12 = vmul.f32 0.70710677, %v4298_v46  ;;  %v2151_v32 = vadd.f32 1.0, %v2836_v63  ;;  %v4343_v62 = vmul.f32 0.5, %v4091_v39  ;;  %2521 = vmatpush.bf16.msrb.mxu1 %v3035_v20  ;;  %v3044_v0 = vld [vmem:[%s5256_s5 + $0x88] sm:$0xff] }
 0x221   : > { %v4346_v44 = vadd.f32 %v791_v34, %v3682_v24  ;;  %v1181_v7 = vsel %vm4266_vm6, %v1180_v5, %v1176_v48  ;;  %v1391_v47 = vmul.f32 %v1390_v61, %v4198_v14  ;;  %v1431_v17 = vmul.f32 %v1430_v54, %v4219_v33  ;;  %v3052_v39 = vld [vmem:[%s5256_s5 + $0xc8] sm:$0xff]  ;;  %2549 = vmatpush.bf16.msrb.mxu2 %v3044_v0  ;;  %v3043_v48 = vld [vmem:[%s5256_s5 + $0x80] sm:$0xff] }
 0x222   : > { %5321 = vst [vmem:[#allocation17_spill] sm:$0xff] %v4334_v12  ;;  %v1508_v15 = vadd.f32 0.00028619796, %v1507_v41  ;;  %v1236_v43 = vadd.f32 1.1283791, %v1235_v18  ;;  %v1275_v63 = vmul.f32 %v1274_v1, %v4046_v45  ;;  %v1313_v19 = vmul.f32 %v1312_v8, %v4122_v4  ;;  %2578 = vmatpush.bf16.msrb.mxu3 %v3052_v39 }
 0x223   : > { %5322 = vst [vmem:[#allocation18_spill] sm:$0xff] %v4346_v44  ;;  %v1547_v5 = vmul.f32 2.1237322e-06, %v4323_v49  ;;  %v1353_v61 = vmul.f32 %v1352_v10, %v4163_v26  ;;  %v1470_v54 = vadd.f32 0.0036580483, %v1469_v22  ;;  %v1585_v41 = vmul.f32 %v4334_v12, %v4334_v12 }
 0x224   : > { %v4365_v3 = vadd.f32 %v706_v6, %v3664_v36  ;;  %v4368_v34 = vmul.f32 %v2151_v32, %v3837_v13  ;;  %v1182_v1 = vmul.f32 %v1181_v7, %v4188_v58  ;;  %v4372_v8 = vmul.f32 0.5, %v4130_v53  ;;  %v735_v53 = vpop.f32.mrf.mxu1 }
 0x225   : > { %v4375_v18 = vmul.f32 0.70710677, %v4346_v44  ;;  %v1392_v10 = vadd.f32 0.05243302, %v1391_v47  ;;  %v4384_v13 = vmul.f32 0.5, %v4174_v56  ;;  %v1509_v58 = vmul.f32 %v1508_v15, %v4300_v37  ;;  %2550 = vmatpush.bf16.msrb.mxu2 %v3043_v48 }
 0x226   : > { %v1432_v22 = vadd.f32 0.05243302, %v1431_v17  ;;  %v4388_v20 = vmul.f32 %v1236_v43, %v3982_v42  ;;  %v1276_v32 = vadd.f32 1.1283791, %v1275_v63  ;;  %v1314_v6 = vadd.f32 0.18741608, %v1313_v19  ;;  %2579 = vmatpush.bf16.msrb.mxu3 %v3051_v60 }
 0x227   : > { %5323 = vst [vmem:[#allocation19_spill] sm:$0xff] %v4375_v18  ;;  %v1548_v7 = vadd.f32 0.00028619796, %v1547_v5  ;;  %v1354_v0 = vadd.f32 0.18741608, %v1353_v61  ;;  %v1471_v39 = vmul.f32 %v1470_v54, %v4279_v2  ;;  %v4391_v44 = vmin.f32 %v1585_v41, 16.0  ;;  %v764_v61 = vpop.f32.mrf.mxu2 }
 0x228   : > { %v4394_v47 = vmul.f32 0.70710677, %v4365_v3  ;;  %v2837_v56 = vclamps-f32 %v1182_v1, 1.0  ;;  %v4397_v17 = vmul.f32 0.5, %v4215_v52  ;;  %v1625_v42 = vmul.f32 %v4375_v18, %v4375_v18 }
 0x229   : > { %v4402_v15 = vadd.f32 %v735_v53, %v3666_v40  ;;  %v1393_v43 = vmul.f32 %v1392_v10, %v4198_v14  ;;  %v1433_v63 = vmul.f32 %v1432_v22, %v4219_v33  ;;  %v1510_v19 = vadd.f32 0.0036580483, %v1509_v58 }
 0x22a   : > { %v1665_v5 = vmul.f32 %v4394_v47, %v4394_v47  ;;  %v4409_v54 = vmul.f32 %v1276_v32, %v4026_v38  ;;  %v1315_v52 = vmul.f32 %v1314_v6, %v4122_v4  ;;  %v1549_v41 = vmul.f32 %v1548_v7, %v4323_v49 }
 0x22b   : > { %5324 = vst [vmem:[#allocation20_spill] sm:$0xff] %v4402_v15  ;;  %v4414_v1 = vmul.f32 0.70710677, %v4402_v15  ;;  %v1355_v48 = vmul.f32 %v1354_v0, %v4163_v26  ;;  %v1472_v60 = vadd.f32 0.05243302, %v1471_v39  ;;  %v2152_v58 = vadd.f32 1.0, %v2837_v56 }
 0x22c   : > { %v1587_v10 = vmul.f32 2.1237322e-06, %v4391_v44  ;;  %v4418_v22 = vmin.f32 %v1665_v5, 16.0  ;;  %v4420_v53 = vmin.f32 %v1625_v42, 16.0  ;;  %v4425_v32 = vadd.f32 %v764_v61, %v3680_v23  ;;  %v793_v61 = vpop.f32.mrf.mxu3 }
 0x22d   : > { %v1705_v38 = vmul.f32 %v4414_v1, %v4414_v1  ;;  %v1394_v6 = vadd.f32 0.18741608, %v1393_v43  ;;  %v1434_v7 = vadd.f32 0.18741608, %v1433_v63  ;;  %v1511_v18 = vmul.f32 %v1510_v19, %v4300_v37 }
 0x22e   : > { %5325 = vst [vmem:[#allocation21_spill] sm:$0xff] %v4425_v32  ;;  %v1667_v0 = vmul.f32 2.1237322e-06, %v4418_v22  ;;  %v1316_v39 = vadd.f32 1.1283791, %v1315_v52  ;;  %v4430_v46 = vmul.f32 0.5, %v4230_v29  ;;  %v1473_v40 = vmul.f32 %v1472_v60, %v4279_v2 }
 0x22f   : > { %v1550_v5 = vadd.f32 0.0036580483, %v1549_v41  ;;  %v4432_v56 = vmin.f32 %v1705_v38, 16.0  ;;  %v1356_v42 = vadd.f32 1.1283791, %v1355_v48  ;;  %v2184_v43 = vmul.f32 %v2152_v58, %v4065_v31 }
 0x230   : > { %v1588_v36 = vadd.f32 0.00028619796, %v1587_v10  ;;  %v1668_v12 = vadd.f32 0.00028619796, %v1667_v0  ;;  %v1627_v63 = vmul.f32 2.1237322e-06, %v4420_v53  ;;  %v1395_v29 = vmul.f32 %v1394_v6, %v4198_v14 }
 0x231   : > { %v1707_v19 = vmul.f32 2.1237322e-06, %v4432_v56  ;;  %v4439_v52 = vmul.f32 0.70710677, %v4425_v32  ;;  %v1435_v41 = vmul.f32 %v1434_v7, %v4219_v33  ;;  %v1512_v38 = vadd.f32 0.05243302, %v1511_v18 }
 0x232   : > { %v1669_v48 = vmul.f32 %v1668_v12, %v4418_v22  ;;  %v1551_v60 = vmul.f32 %v1550_v5, %v4323_v49  ;;  %v4448_v58 = vadd.f32 %v793_v61, %v3682_v24  ;;  %v4451_v0 = vmul.f32 %v1316_v39, %v4088_v27 }
 0x233   : > { %5326 = vst [vmem:[#allocation22_spill] sm:$0xff] %v4439_v52  ;;  %v1708_v10 = vadd.f32 0.00028619796, %v1707_v19  ;;  %v1745_v31 = vmul.f32 %v4439_v52, %v4439_v52  ;;  %v1474_v32 = vadd.f32 0.18741608, %v1473_v40  ;;  %v1589_v6 = vmul.f32 %v1588_v36, %v4391_v44 }
 0x234   : > { %5327 = vst [vmem:[#allocation23_spill] sm:$0xff] %v4448_v58  ;;  %v1670_v23 = vadd.f32 0.0036580483, %v1669_v48  ;;  %v4455_v18 = vmul.f32 %v1356_v42, %v4125_v16  ;;  %v1628_v12 = vadd.f32 0.00028619796, %v1627_v63  ;;  %v1513_v61 = vmul.f32 %v1512_v38, %v4300_v37 }
 0x235   : > { %v1709_v7 = vmul.f32 %v1708_v10, %v4432_v56  ;;  %v4458_v5 = vmin.f32 %v1745_v31, 16.0  ;;  %v1396_v19 = vadd.f32 1.1283791, %v1395_v29  ;;  %v1436_v52 = vadd.f32 1.1283791, %v1435_v41 }
 0x236   : > { %v2209_v27 = vpack.c.bf16 %v4161_v35, %v4038_v25  ;;  %v1552_v39 = vadd.f32 0.05243302, %v1551_v60  ;;  %v1671_v40 = vmul.f32 %v1670_v23, %v4418_v22  ;;  %v4465_v36 = vmul.f32 0.70710677, %v4448_v58 }
 0x237   : > { %v2210_v16 = vpack.c.bf16 %v4330_v55, %v4043_v30  ;;  %v1475_v42 = vmul.f32 %v1474_v32, %v4279_v2  ;;  %v1590_v63 = vadd.f32 0.0036580483, %v1589_v6  ;;  %v4471_v29 = vmul.f32 0.5, %v4365_v3 }
 0x238   : > { %5328 = vst [vmem:[#allocation24_spill] sm:$0xff] %v4465_v36  ;;  %2493 = vmatmul.bf16.vlgmr.msrb.gmra.mxu0 %v2209_v27  ;;  %v2211_v41 = vpack.c.bf16 %v4368_v34, %v4057_v11  ;;  %v1629_v25 = vmul.f32 %v1628_v12, %v4420_v53  ;;  %v1710_v35 = vadd.f32 0.0036580483, %v1709_v7  ;;  %v1747_v23 = vmul.f32 2.1237322e-06, %v4458_v5 }
 0x239   : > { %5329 = vst [vmem:[#allocation25_spill] sm:$0xff] %v4471_v29  ;;  %2522 = vmatmul.bf16.vlgmr.msrb.gmra.mxu1 %v2210_v16  ;;  %v2212_v38 = vpack.c.bf16 %v2184_v43, %v4072_v9  ;;  %v4479_v30 = vmul.f32 %v1396_v19, %v4171_v21  ;;  %v4482_v55 = vmul.f32 %v1436_v52, %v4185_v59  ;;  %v1514_v3 = vadd.f32 0.18741608, %v1513_v61 }
 0x23a   : > { %2551 = vmatmul.bf16.vlgmr.msrb.gmra.mxu2 %v2211_v41  ;;  %v1198_v32 = vmul.f32 3.8918573e-05, %v3987_v57  ;;  %v1553_v11 = vmul.f32 %v1552_v39, %v4323_v49  ;;  %v1672_v34 = vadd.f32 0.05243302, %v1671_v40  ;;  %v1785_v48 = vmul.f32 %v4465_v36, %v4465_v36 }
 0x23b   : > { %2580 = vmatmul.bf16.vlgmr.msrb.gmra.mxu3 %v2212_v38  ;;  %v1358_v60 = vmul.f32 3.8918573e-05, %v4163_v26  ;;  %v1476_v9 = vadd.f32 1.1283791, %v1475_v42  ;;  %v1591_v21 = vmul.f32 %v1590_v63, %v4391_v44  ;;  %v1238_v59 = vmul.f32 3.8918573e-05, %v4021_v51 }
 0x23c   : > { %v1199_v43 = vadd.f32 0.001143296, %v1198_v32  ;;  %v1630_v52 = vadd.f32 0.0036580483, %v1629_v25  ;;  %v1711_v10 = vmul.f32 %v1710_v35, %v4432_v56  ;;  %v1748_v31 = vadd.f32 0.00028619796, %v1747_v23 }
 0x23d   : > { %v1359_v6 = vadd.f32 0.001143296, %v1358_v60  ;;  %v1515_v12 = vmul.f32 %v1514_v3, %v4300_v37  ;;  %v1239_v19 = vadd.f32 0.001143296, %v1238_v59  ;;  %v1398_v61 = vmul.f32 3.8918573e-05, %v4198_v14 }
 0x23e   : > { %v1200_v7 = vmul.f32 %v1199_v43, %v3987_v57  ;;  %v1554_v27 = vadd.f32 0.18741608, %v1553_v11  ;;  %v1673_v39 = vmul.f32 %v1672_v34, %v4418_v22  ;;  %v4496_v40 = vmin.f32 %v1785_v48, 16.0 }
 0x23f   : > { %v1360_v16 = vmul.f32 %v1359_v6, %v4163_v26  ;;  %v4500_v42 = vmul.f32 %v1476_v9, %v4244_v28  ;;  %v1240_v41 = vmul.f32 %v1239_v19, %v4021_v51  ;;  %v1399_v25 = vadd.f32 0.001143296, %v1398_v61 }
 0x240   : > { %v1201_v63 = vadd.f32 0.014752088, %v1200_v7  ;;  %v1592_v35 = vadd.f32 0.05243302, %v1591_v21  ;;  %v1712_v23 = vadd.f32 0.05243302, %v1711_v10  ;;  %v1749_v38 = vmul.f32 %v1748_v31, %v4458_v5 }
 0x241   : > { %v1361_v3 = vadd.f32 0.014752088, %v1360_v16  ;;  %v1631_v32 = vmul.f32 %v1630_v52, %v4420_v53  ;;  %v1241_v34 = vadd.f32 0.014752088, %v1240_v41  ;;  %v1400_v48 = vmul.f32 %v1399_v25, %v4198_v14 }
 0x242   : > { %v1202_v11 = vmul.f32 %v1201_v63, %v3987_v57  ;;  %v1516_v60 = vadd.f32 1.1283791, %v1515_v12  ;;  %v1674_v43 = vadd.f32 0.18741608, %v1673_v39  ;;  %v1787_v28 = vmul.f32 2.1237322e-06, %v4496_v40 }
 0x243   : > { %v1362_v9 = vmul.f32 %v1361_v3, %v4163_v26  ;;  %v1242_v21 = vmul.f32 %v1241_v34, %v4021_v51  ;;  %v1401_v10 = vadd.f32 0.014752088, %v1400_v48  ;;  %v1278_v31 = vmul.f32 3.8918573e-05, %v4046_v45 }
 0x244   : > { %v1203_v59 = vadd.f32 0.112945676, %v1202_v11  ;;  %v1555_v6 = vmul.f32 %v1554_v27, %v4323_v49  ;;  %v1713_v52 = vmul.f32 %v1712_v23, %v4432_v56  ;;  %v1750_v7 = vadd.f32 0.0036580483, %v1749_v38 }
 0x245   : > { %v1363_v19 = vadd.f32 0.112945676, %v1362_v9  ;;  %v1243_v12 = vadd.f32 0.112945676, %v1242_v21  ;;  %v1402_v39 = vmul.f32 %v1401_v10, %v4198_v14  ;;  %v1279_v16 = vadd.f32 0.001143296, %v1278_v31 }
 0x246   : > { %v1204_v61 = vmul.f32 %v1203_v59, %v3987_v57  ;;  %v1675_v63 = vmul.f32 %v1674_v43, %v4418_v22  ;;  %v1788_v41 = vadd.f32 0.00028619796, %v1787_v28  ;;  %v1438_v3 = vmul.f32 3.8918573e-05, %v4219_v33 }
 0x247   : > { %v1364_v25 = vmul.f32 %v1363_v19, %v4163_v26  ;;  %v1244_v27 = vmul.f32 %v1243_v12, %v4021_v51  ;;  %v1403_v34 = vadd.f32 0.112945676, %v1402_v39  ;;  %v1280_v23 = vmul.f32 %v1279_v16, %v4046_v45 }
 0x248   : > { %v1205_v11 = vadd.f32 0.4994258, %v1204_v61  ;;  %v1556_v38 = vadd.f32 1.1283791, %v1555_v6  ;;  %v1593_v48 = vmul.f32 %v1592_v35, %v4391_v44  ;;  %v1714_v9 = vadd.f32 0.18741608, %v1713_v52 }
 0x249   : > { %v1365_v59 = vadd.f32 0.4994258, %v1364_v25  ;;  %v1245_v10 = vadd.f32 0.4994258, %v1244_v27  ;;  %v1404_v43 = vmul.f32 %v1403_v34, %v4198_v14  ;;  %v1281_v28 = vadd.f32 0.014752088, %v1280_v23 }
 0x24a   : > { %v1206_v21 = vmul.f32 %v1205_v11, %v3987_v57  ;;  %v1751_v31 = vmul.f32 %v1750_v7, %v4458_v5  ;;  %v1789_v19 = vmul.f32 %v1788_v41, %v4496_v40  ;;  %v1439_v12 = vadd.f32 0.001143296, %v1438_v3  ;;  %v5331_v7 = vld [vmem:[#allocation14_spill] sm:$0xff] }
 0x24b   : > { %v1366_v61 = vmul.f32 %v1365_v59, %v4163_v26  ;;  %v4526_v39 = vadd.f32 0.05243302, %v1631_v32  ;;  %v1676_v6 = vadd.f32 1.1283791, %v1675_v63  ;;  %v1246_v35 = vmul.f32 %v1245_v10, %v4021_v51  ;;  %v5333_v32 = vld [vmem:[#allocation15_spill] sm:$0xff] }
 0x24c   : > { %v4528_v16 = vadd.f32 1.0, %v1206_v21  ;;  %v1405_v57 = vadd.f32 0.4994258, %v1404_v43  ;;  %v1282_v25 = vmul.f32 %v1281_v28, %v4046_v45  ;;  %v1440_v11 = vmul.f32 %v1439_v12, %v4219_v33 }
 0x24d   : > { %5330 = vst [vmem:[#allocation26_spill] sm:$0xff] %v4526_v39  ;;  %v4531_v52 = vadd.f32 1.0, %v1366_v61  ;;  %v4536_v27 = vmul.f32 %v1516_v60, %v5331_v7  ;;  %v4538_v41 = vadd.f32 0.18741608, %v1593_v48  ;;  %v1715_v26 = vmul.f32 %v1714_v9, %v4432_v56 }
 0x24e   : > { %3139 = vrcp.f32 %v4528_v16  ;;  %v4543_v63 = vmul.f32 %v1556_v38, %v5333_v32  ;;  %v1752_v51 = vadd.f32 0.05243302, %v1751_v31  ;;  %v4545_v3 = vadd.f32 0.0036580483, %v1789_v19 }
 0x24f   : > { %5332 = vst [vmem:[#allocation14_spill] sm:$0xff] %v4538_v41  ;;  %3141 = vrcp.f32 %v4531_v52  ;;  %v4549_v34 = vmul.f32 %v1676_v6, %v4394_v47  ;;  %v1217_v60 = vand.u32 2147483647, %v4528_v16  ;;  %v4552_v23 = vadd.f32 1.0, %v1246_v35 }
 0x250   : > { %v1318_v48 = vmul.f32 3.8918573e-05, %v4122_v4  ;;  %v1219_v9 = vand.u32 2147483648, %v4528_v16  ;;  %v1406_v59 = vmul.f32 %v1405_v57, %v4198_v14  ;;  %v1283_v38 = vadd.f32 0.112945676, %v1282_v25 }
 0x251   : > { %v1441_v21 = vadd.f32 0.014752088, %v1440_v11  ;;  %v4557_v10 = vadd.f32 1.1283791, %v1715_v26  ;;  %v1377_v43 = vand.u32 2147483647, %v4531_v52  ;;  %3143 = vrcp.f32 %v4552_v23 }
 0x252   : > { %v1379_v28 = vand.u32 2147483648, %v4531_v52  ;;  %v4563_v47 = vmul.f32 %v1752_v51, %v4458_v5  ;;  %v4565_v31 = vadd.f32 1.0, %v1406_v59  ;;  %v1284_v19 = vmul.f32 %v1283_v38, %v4046_v45 }
 0x253   : > { %v1442_v61 = vmul.f32 %v1441_v21, %v4219_v33  ;;  %vm1213_vm9 = vweird.f32 %v4528_v16  ;;  %vm1373_vm10 = vweird.f32 %v4531_v52  ;;  %v1259_v12 = vand.u32 2147483648, %v4552_v23 }
 0x254   : > { %v3140_v14 = vpop.eup %3139  ;;  %v1319_v6 = vadd.f32 0.001143296, %v1318_v48  ;;  %vm4573_vm11 = vcmp.eq.f32.partialorder %v1217_v60, 8.507059e+37  ;;  %v1220_v11 = vor.u32 1.1754944e-38, %v1219_v9  ;;  %v1257_v7 = vand.u32 2147483647, %v4552_v23 }
 0x255   : > { %v3142_v35 = vpop.eup %3141  ;;  %v1209_v57 = vmul.f32 %v3140_v14, %v4528_v16  ;;  %3145 = vrcp.f32 %v4565_v31  ;;  %vm4580_vm12 = vcmp.eq.f32.partialorder %v1377_v43, 8.507059e+37  ;;  %v1380_v51 = vor.u32 1.1754944e-38, %v1379_v28 }
 0x256   : > { %v1369_v26 = vmul.f32 %v3142_v35, %v4531_v52  ;;  %v1478_v48 = vmul.f32 3.8918573e-05, %v4279_v2  ;;  %vm1253_vm13 = vweird.f32 %v4552_v23  ;;  %v1285_v60 = vadd.f32 0.4994258, %v1284_v19 }
 0x257   : > { %v1210_v59 = vsub.f32 1.0, %v1209_v57  ;;  %v1443_v38 = vadd.f32 0.112945676, %v1442_v61  ;;  %v3144_v21 = vpop.eup %3143  ;;  %vm1214_vm14 = vweird.f32 %v3140_v14  ;;  %v1260_v58 = vor.u32 1.1754944e-38, %v1259_v12 }
 0x258   : > { %v1370_v9 = vsub.f32 1.0, %v1369_v26  ;;  %v1320_v36 = vmul.f32 %v1319_v6, %v4122_v4  ;;  %vm1374_vm15 = vweird.f32 %v3142_v35  ;;  %v1249_v43 = vmul.f32 %v3144_v21, %v4552_v23  ;;  %vm1215_vm2 = vmor %vm1213_vm9, %vm1214_vm14 }
 0x259   : > { %v1211_v24 = vmul.f32 %v3140_v14, %v1210_v59  ;;  %vm4588_vm0 = vcmp.eq.f32.partialorder %v1257_v7, 8.507059e+37  ;;  %v1417_v28 = vand.u32 2147483647, %v4565_v31  ;;  %vm1413_vm1 = vweird.f32 %v4565_v31  ;;  %vm1375_vm4 = vmor %vm1373_vm10, %vm1374_vm15 }
 0x25a   : > { %v1371_v57 = vmul.f32 %v3142_v35, %v1370_v9  ;;  %v1286_v19 = vmul.f32 %v1285_v60, %v4046_v45  ;;  %v1444_v61 = vmul.f32 %v1443_v38, %v4219_v33  ;;  %v1321_v12 = vadd.f32 0.014752088, %v1320_v36 }
 0x25b   : > { %v3146_v26 = vpop.eup %3145  ;;  %v1212_v6 = vadd.f32 %v3140_v14, %v1211_v24  ;;  %v1250_v59 = vsub.f32 1.0, %v1249_v43  ;;  %v1419_v15 = vand.u32 2147483648, %v4565_v31  ;;  %v1479_v39 = vadd.f32 0.001143296, %v1478_v48 }
 0x25c   : > { %v1372_v7 = vadd.f32 %v3142_v35, %v1371_v57  ;;  %vm1254_vm3 = vweird.f32 %v3144_v21  ;;  %v1409_v9 = vmul.f32 %v3146_v26, %v4565_v31  ;;  %v4601_v29 = vadd.f32 1.0, %v1286_v19  ;;  %v5342_v31 = vld [vmem:[#allocation9_spill] sm:$0xff] }
 0x25d   : > { %v1216_v45 = vsel %vm1215_vm2, %v3140_v14, %v1212_v6  ;;  %v1251_v24 = vmul.f32 %v3144_v21, %v1250_v59  ;;  %v1445_v36 = vadd.f32 0.4994258, %v1444_v61  ;;  %v1322_v60 = vmul.f32 %v1321_v12, %v4122_v4  ;;  %vm1255_vm6 = vmor %vm1253_vm13, %vm1254_vm3 }
 0x25e   : > { %v1221_v48 = vsel %vm4573_vm11, %v1220_v11, %v1216_v45  ;;  %v1376_v16 = vsel %vm1375_vm4, %v3142_v35, %v1372_v7  ;;  %v1410_v38 = vsub.f32 1.0, %v1409_v9  ;;  %3147 = vrcp.f32 %v4601_v29 }
 0x25f   : > { %v1222_v43 = vmul.f32 %v1221_v48, %v4340_v50  ;;  %v1381_v14 = vsel %vm4580_vm12, %v1380_v51, %v1376_v16  ;;  %v1252_v57 = vadd.f32 %v3144_v21, %v1251_v24  ;;  %vm4613_vm5 = vcmp.eq.f32.partialorder %v1417_v28, 8.507059e+37 }
 0x260   : > { %v1382_v19 = vmul.f32 %v1381_v14, %v4455_v18  ;;  %v1411_v35 = vmul.f32 %v3146_v26, %v1410_v38  ;;  %vm1414_vm7 = vweird.f32 %v3146_v26  ;;  %v1480_v25 = vmul.f32 %v1479_v39, %v4279_v2 }
 0x261   : > { %v2838_v11 = vclamps-f32 %v1222_v43, 1.0  ;;  %v1256_v50 = vsel %vm1255_vm6, %v3144_v21, %v1252_v57  ;;  %v1446_v32 = vmul.f32 %v1445_v36, %v4219_v33  ;;  %v1323_v51 = vadd.f32 0.112945676, %v1322_v60  ;;  %vm1415_vm8 = vmor %vm1413_vm1, %vm1414_vm7 }
 0x262   : > { %v2842_v61 = vclamps-f32 %v1382_v19, 1.0  ;;  %v1261_v28 = vsel %vm4588_vm0, %v1260_v58, %v1256_v50  ;;  %v1412_v12 = vadd.f32 %v3146_v26, %v1411_v35  ;;  %v1420_v6 = vor.u32 1.1754944e-38, %v1419_v15 }
 0x263   : > { %v2153_v18 = vadd.f32 1.0, %v2838_v11  ;;  %v1262_v59 = vmul.f32 %v1261_v28, %v4388_v20  ;;  %v4628_v23 = vadd.f32 1.0, %v1446_v32  ;;  %v1518_v39 = vmul.f32 3.8918573e-05, %v4300_v37 }
 0x264   : > { %v3148_v21 = vpop.eup %3147  ;;  %v2157_v7 = vadd.f32 1.0, %v2842_v61  ;;  %v1416_v33 = vsel %vm1415_vm8, %v3146_v26, %v1412_v12  ;;  %v1297_v9 = vand.u32 2147483647, %v4601_v29  ;;  %v1324_v41 = vmul.f32 %v1323_v51, %v4122_v4 }
 0x265   : > { %v2839_v58 = vclamps-f32 %v1262_v59, 1.0  ;;  %v1421_v15 = vsel %vm4613_vm5, %v1420_v6, %v1416_v33  ;;  %v1289_v20 = vmul.f32 %v3148_v21, %v4601_v29  ;;  %v1481_v45 = vadd.f32 0.014752088, %v1480_v25 }
 0x266   : > { %v2185_v24 = vmul.f32 %v2153_v18, %v5342_v31  ;;  %v2189_v36 = vmul.f32 %v2157_v7, %v4343_v62  ;;  %v1422_v60 = vmul.f32 %v1421_v15, %v4479_v30  ;;  %3149 = vrcp.f32 %v4628_v23 }
 0x267   : > { %v4642_v26 = vmul.f32 %v4545_v3, %v4496_v40  ;;  %v2154_v48 = vadd.f32 1.0, %v2839_v58  ;;  %v1290_v16 = vsub.f32 1.0, %v1289_v20  ;;  %v1299_v38 = vand.u32 2147483648, %v4601_v29 }
 0x268   : > { %v4647_v43 = vmul.f32 %v4557_v10, %v4414_v1  ;;  %v2213_v14 = vpack.c.bf16 %v2189_v36, %v2185_v24  ;;  %v2843_v57 = vclamps-f32 %v1422_v60, 1.0  ;;  %v1325_v52 = vadd.f32 0.4994258, %v1324_v41  ;;  %v5345_v1 = vld [vmem:[#allocation10_spill] sm:$0xff] }
 0x269   : > { %v1291_v62 = vmul.f32 %v3148_v21, %v1290_v16  ;;  %vm1293_vm9 = vweird.f32 %v4601_v29  ;;  %vm1294_vm10 = vweird.f32 %v3148_v21  ;;  %v1482_v30 = vmul.f32 %v1481_v45, %v4279_v2 }
 0x26a   : > { %2498 = vmatmul.bf16.gmra.mxu0 %v2213_v14  ;;  %v2158_v3 = vadd.f32 1.0, %v2843_v57  ;;  %vm4651_vm11 = vcmp.eq.f32.partialorder %v1297_v9, 8.507059e+37  ;;  %v1326_v35 = vmul.f32 %v1325_v52, %v4122_v4  ;;  %v1519_v25 = vadd.f32 0.001143296, %v1518_v39  ;;  %vm1295_vm12 = vmor %vm1293_vm9, %vm1294_vm10 }
 0x26b   : > { %v2186_v10 = vmul.f32 %v2154_v48, %v5345_v1  ;;  %v1292_v11 = vadd.f32 %v3148_v21, %v1291_v62  ;;  %v1300_v50 = vor.u32 1.1754944e-38, %v1299_v38  ;;  %v1483_v32 = vadd.f32 0.112945676, %v1482_v30 }
 0x26c   : > { %v3150_v51 = vpop.eup %3149  ;;  %v2190_v29 = vmul.f32 %v2158_v3, %v4372_v8  ;;  %v4658_v61 = vadd.f32 1.0, %v1326_v35  ;;  %v1520_v28 = vmul.f32 %v1519_v25, %v4300_v37  ;;  %v1678_v12 = vmul.f32 3.8918573e-05, %v4418_v22 }
 0x26d   : > { %v1296_v6 = vsel %vm1295_vm12, %v3148_v21, %v1292_v11  ;;  %v1449_v18 = vmul.f32 %v3150_v51, %v4628_v23  ;;  %v1459_v4 = vand.u32 2147483648, %v4628_v23  ;;  %v1484_v59 = vmul.f32 %v1483_v32, %v4279_v2 }
 0x26e   : > { %v2214_v39 = vpack.c.bf16 %v2190_v29, %v2186_v10  ;;  %v1301_v7 = vsel %vm4651_vm11, %v1300_v50, %v1296_v6  ;;  %3151 = vrcp.f32 %v4658_v61  ;;  %v1558_v8 = vmul.f32 3.8918573e-05, %v4323_v49 }
 0x26f   : > { %v1302_v33 = vmul.f32 %v1301_v7, %v4409_v54  ;;  %v1450_v9 = vsub.f32 1.0, %v1449_v18  ;;  %v1457_v41 = vand.u32 2147483647, %v4628_v23  ;;  %v1718_v21 = vmul.f32 3.8918573e-05, %v4432_v56 }
 0x270   : > { %2527 = vmatmul.bf16.gmra.mxu1 %v2214_v39  ;;  %vm1453_vm13 = vweird.f32 %v4628_v23  ;;  %v1485_v58 = vadd.f32 0.4994258, %v1484_v59  ;;  %v1521_v15 = vadd.f32 0.014752088, %v1520_v28  ;;  %v1679_v20 = vadd.f32 0.001143296, %v1678_v12 }
 0x271   : > { %v1451_v45 = vmul.f32 %v3150_v51, %v1450_v9  ;;  %vm1454_vm14 = vweird.f32 %v3150_v51  ;;  %v1460_v31 = vor.u32 1.1754944e-38, %v1459_v4  ;;  %v1337_v24 = vand.u32 2147483647, %v4658_v61 }
 0x272   : > { %v1486_v36 = vmul.f32 %v1485_v58, %v4279_v2  ;;  %v1522_v54 = vmul.f32 %v1521_v15, %v4300_v37  ;;  %v1680_v60 = vmul.f32 %v1679_v20, %v4418_v22  ;;  %v1559_v48 = vadd.f32 0.001143296, %v1558_v8  ;;  %vm1455_vm15 = vmor %vm1453_vm13, %vm1454_vm14 }
 0x273   : > { %v2840_v16 = vclamps-f32 %v1302_v33, 1.0  ;;  %v1452_v38 = vadd.f32 %v3150_v51, %v1451_v45  ;;  %v1339_v14 = vand.u32 2147483648, %v4658_v61  ;;  %v1719_v57 = vadd.f32 0.001143296, %v1718_v21  ;;  %v5348_v33 = vld [vmem:[#allocation11_spill] sm:$0xff] }
 0x274   : > { %v3152_v52 = vpop.eup %3151  ;;  %v4680_v62 = vadd.f32 1.0, %v1486_v36  ;;  %v1523_v30 = vadd.f32 0.112945676, %v1522_v54  ;;  %v1681_v3 = vadd.f32 0.014752088, %v1680_v60  ;;  %v1560_v2 = vmul.f32 %v1559_v48, %v4323_v49 }
 0x275   : > { %v1456_v19 = vsel %vm1455_vm15, %v3150_v51, %v1452_v38  ;;  %vm1458_vm0 = vcmp.eq.f32.partialorder %v1457_v41, 8.507059e+37  ;;  %v1329_v35 = vmul.f32 %v3152_v52, %v4658_v61  ;;  %vm1333_vm1 = vweird.f32 %v4658_v61 }
 0x276   : > { %v1461_v25 = vsel %vm1458_vm0, %v1460_v31, %v1456_v19  ;;  %vm4685_vm2 = vcmp.eq.f32.partialorder %v1337_v24, 8.507059e+37  ;;  %3153 = vrcp.f32 %v4680_v62  ;;  %v1598_v23 = vmul.f32 3.8918573e-05, %v4391_v44 }
 0x277   : > { %v1462_v10 = vmul.f32 %v1461_v25, %v4482_v55  ;;  %v2155_v11 = vadd.f32 1.0, %v2840_v16  ;;  %v1330_v50 = vsub.f32 1.0, %v1329_v35  ;;  %v1524_v32 = vmul.f32 %v1523_v30, %v4300_v37 }
 0x278   : > { %v1340_v51 = vor.u32 1.1754944e-38, %v1339_v14  ;;  %v1682_v29 = vmul.f32 %v1681_v3, %v4418_v22  ;;  %v1561_v28 = vadd.f32 0.014752088, %v1560_v2  ;;  %v1720_v12 = vmul.f32 %v1719_v57, %v4432_v56 }
 0x279   : > { %v2844_v6 = vclamps-f32 %v1462_v10, 1.0  ;;  %v1331_v18 = vmul.f32 %v3152_v52, %v1330_v50  ;;  %vm1334_vm3 = vweird.f32 %v3152_v52  ;;  %v1525_v4 = vadd.f32 0.4994258, %v1524_v32 }
 0x27a   : > { %v1683_v59 = vadd.f32 0.112945676, %v1682_v29  ;;  %v1562_v39 = vmul.f32 %v1561_v28, %v4323_v49  ;;  %v1721_v7 = vadd.f32 0.014752088, %v1720_v12  ;;  %v1599_v8 = vadd.f32 0.001143296, %v1598_v23  ;;  %vm1335_vm4 = vmor %vm1333_vm1, %vm1334_vm3 }
 0x27b   : > { %v2159_v55 = vadd.f32 1.0, %v2844_v6  ;;  %v2187_v9 = vmul.f32 %v2155_v11, %v5348_v33  ;;  %v1332_v41 = vadd.f32 %v3152_v52, %v1331_v18  ;;  %v1526_v21 = vmul.f32 %v1525_v4, %v4300_v37 }
 0x27c   : > { %v3154_v58 = vpop.eup %3153  ;;  %v1497_v15 = vand.u32 2147483647, %v4680_v62  ;;  %v1684_v20 = vmul.f32 %v1683_v59, %v4418_v22  ;;  %v1563_v45 = vadd.f32 0.112945676, %v1562_v39  ;;  %v1722_v31 = vmul.f32 %v1721_v7, %v4432_v56 }
 0x27d   : > { %v2191_v24 = vmul.f32 %v2159_v55, %v4384_v13  ;;  %v1336_v36 = vsel %vm1335_vm4, %v3152_v52, %v1332_v41  ;;  %v1489_v54 = vmul.f32 %v3154_v58, %v4680_v62  ;;  %v1600_v60 = vmul.f32 %v1599_v8, %v4391_v44  ;;  %v5353_v55 = vld [vmem:[#allocation12_spill] sm:$0xff] }
 0x27e   : > { %v1341_v37 = vsel %vm4685_vm2, %v1340_v51, %v1336_v36  ;;  %v4708_v48 = vadd.f32 1.0, %v1526_v21  ;;  %v1685_v61 = vadd.f32 0.4994258, %v1684_v20  ;;  %v1564_v16 = vmul.f32 %v1563_v45, %v4323_v49 }
 0x27f   : > { %v2215_v38 = vpack.c.bf16 %v2191_v24, %v2187_v9  ;;  %v1342_v14 = vmul.f32 %v1341_v37, %v4451_v0  ;;  %v1490_v57 = vsub.f32 1.0, %v1489_v54  ;;  %v1723_v30 = vadd.f32 0.112945676, %v1722_v31 }
 0x280   : > { %vm1493_vm5 = vweird.f32 %v4680_v62  ;;  %vm1494_vm6 = vweird.f32 %v3154_v58  ;;  %v1499_v13 = vand.u32 2147483648, %v4680_v62  ;;  %3155 = vrcp.f32 %v4708_v48 }
 0x281   : > { %2556 = vmatmul.bf16.gmra.mxu2 %v2215_v38  ;;  %v2841_v52 = vclamps-f32 %v1342_v14, 1.0  ;;  %v1491_v3 = vmul.f32 %v3154_v58, %v1490_v57  ;;  %v1686_v2 = vmul.f32 %v1685_v61, %v4418_v22  ;;  %v1565_v19 = vadd.f32 0.4994258, %v1564_v16  ;;  %vm1495_vm8 = vmor %vm1493_vm5, %vm1494_vm6 }
 0x282   : > { %vm4716_vm7 = vcmp.eq.f32.partialorder %v1497_v15, 8.507059e+37  ;;  %v1724_v0 = vmul.f32 %v1723_v30, %v4432_v56  ;;  %v1601_v25 = vadd.f32 0.014752088, %v1600_v60  ;;  %v1758_v1 = vmul.f32 3.8918573e-05, %v4458_v5 }
 0x283   : > { %v1492_v23 = vadd.f32 %v3154_v58, %v1491_v3  ;;  %v1537_v10 = vand.u32 2147483647, %v4708_v48  ;;  %v4723_v11 = vadd.f32 1.0, %v1686_v2  ;;  %v1566_v50 = vmul.f32 %v1565_v19, %v4323_v49 }
 0x284   : > { %v1500_v22 = vor.u32 1.1754944e-38, %v1499_v13  ;;  %v2156_v32 = vadd.f32 1.0, %v2841_v52  ;;  %v1539_v51 = vand.u32 2147483648, %v4708_v48  ;;  %v1725_v29 = vadd.f32 0.4994258, %v1724_v0 }
 0x285   : > { %v1496_v28 = vsel %vm1495_vm8, %v3154_v58, %v1492_v23  ;;  %vm1533_vm9 = vweird.f32 %v4708_v48  ;;  %3157 = vrcp.f32 %v4723_v11  ;;  %v1602_v12 = vmul.f32 %v1601_v25, %v4391_v44 }
 0x286   : > { %v3156_v6 = vpop.eup %3155  ;;  %v1501_v49 = vsel %vm4716_vm7, %v1500_v22, %v1496_v28  ;;  %v4735_v18 = vadd.f32 1.0, %v1566_v50  ;;  %v1759_v62 = vadd.f32 0.001143296, %v1758_v1  ;;  %v1638_v4 = vmul.f32 3.8918573e-05, %v4420_v53 }
 0x287   : > { %v1502_v59 = vmul.f32 %v1501_v49, %v4500_v42  ;;  %v1529_v39 = vmul.f32 %v3156_v6, %v4708_v48  ;;  %vm4740_vm10 = vcmp.eq.f32.partialorder %v1537_v10, 8.507059e+37  ;;  %v1726_v8 = vmul.f32 %v1725_v29, %v4432_v56 }
 0x288   : > { %v2188_v33 = vmul.f32 %v2156_v32, %v5353_v55  ;;  %v1540_v9 = vor.u32 1.1754944e-38, %v1539_v51  ;;  %v1697_v41 = vand.u32 2147483647, %v4723_v11  ;;  %3159 = vrcp.f32 %v4735_v18 }
 0x289   : > { %v2845_v21 = vclamps-f32 %v1502_v59, 1.0  ;;  %v1530_v58 = vsub.f32 1.0, %v1529_v39  ;;  %vm1534_vm11 = vweird.f32 %v3156_v6  ;;  %v1699_v42 = vand.u32 2147483648, %v4723_v11 }
 0x28a   : > { %v4749_v15 = vadd.f32 1.0, %v1726_v8  ;;  %v1603_v20 = vadd.f32 0.112945676, %v1602_v12  ;;  %v1760_v45 = vmul.f32 %v1759_v62, %v4458_v5  ;;  %v1639_v31 = vadd.f32 0.001143296, %v1638_v4  ;;  %vm1535_vm15 = vmor %vm1533_vm9, %vm1534_vm11 }
 0x28b   : > { %v3158_v24 = vpop.eup %3157  ;;  %v2160_v56 = vadd.f32 1.0, %v2845_v21  ;;  %v1531_v36 = vmul.f32 %v3156_v6, %v1530_v58  ;;  %v1577_v54 = vand.u32 2147483647, %v4735_v18  ;;  %v1579_v60 = vand.u32 2147483648, %v4735_v18 }
 0x28c   : > { %v1689_v37 = vmul.f32 %v3158_v24, %v4723_v11  ;;  %vm1693_vm12 = vweird.f32 %v4723_v11  ;;  %vm4756_vm13 = vcmp.eq.f32.partialorder %v1697_v41, 8.507059e+37  ;;  %3161 = vrcp.f32 %v4749_v15 }
 0x28d   : > { %v2192_v16 = vmul.f32 %v2160_v56, %v4397_v17  ;;  %v1532_v38 = vadd.f32 %v3156_v6, %v1531_v36  ;;  %v1700_v14 = vor.u32 1.1754944e-38, %v1699_v42  ;;  %vm1573_vm14 = vweird.f32 %v4735_v18 }
 0x28e   : > { %v3160_v57 = vpop.eup %3159  ;;  %v1690_v30 = vsub.f32 1.0, %v1689_v37  ;;  %v1604_v13 = vmul.f32 %v1603_v20, %v4391_v44  ;;  %v1761_v52 = vadd.f32 0.014752088, %v1760_v45  ;;  %v1640_v3 = vmul.f32 %v1639_v31, %v4420_v53 }
 0x28f   : > { %v2216_v2 = vpack.c.bf16 %v2192_v16, %v2188_v33  ;;  %v1536_v19 = vsel %vm1535_vm15, %v3156_v6, %v1532_v38  ;;  %v1569_v35 = vmul.f32 %v3160_v57, %v4735_v18  ;;  %vm4769_vm0 = vcmp.eq.f32.partialorder %v1577_v54, 8.507059e+37  ;;  %v5358_v38 = vld [vmem:[#allocation25_spill] sm:$0xff] }
 0x290   : > { %v1580_v0 = vor.u32 1.1754944e-38, %v1579_v60  ;;  %v1541_v25 = vsel %vm4740_vm10, %v1540_v9, %v1536_v19  ;;  %v1691_v48 = vmul.f32 %v3158_v24, %v1690_v30  ;;  %vm1694_vm1 = vweird.f32 %v3158_v24  ;;  %v5359_v30 = vld [vmem:[#allocation26_spill] sm:$0xff] }
 0x291   : > { %v1737_v1 = vand.u32 2147483647, %v4749_v15  ;;  %2585 = vmatmul.bf16.gmra.mxu3 %v2216_v2  ;;  %v1542_v23 = vmul.f32 %v1541_v25, %v4536_v27  ;;  %v1570_v10 = vsub.f32 1.0, %v1569_v35  ;;  %v1605_v50 = vadd.f32 0.4994258, %v1604_v13  ;;  %vm1695_vm3 = vmor %vm1693_vm12, %vm1694_vm1 }
 0x292   : > { %v1762_v22 = vmul.f32 %v1761_v52, %v4458_v5  ;;  %v3162_v32 = vpop.eup %3161  ;;  %v1692_v51 = vadd.f32 %v3158_v24, %v1691_v48  ;;  %vm1574_vm2 = vweird.f32 %v3160_v57  ;;  %v1739_v29 = vand.u32 2147483648, %v4749_v15  ;;  %v5361_v48 = vld [vmem:[#allocation20_spill] sm:$0xff] }
 0x293   : > { %v1641_v28 = vadd.f32 0.014752088, %v1640_v3  ;;  %v2846_v12 = vclamps-f32 %v1542_v23, 1.0  ;;  %v1571_v6 = vmul.f32 %v3160_v57, %v1570_v10  ;;  %v1729_v49 = vmul.f32 %v3162_v32, %v4749_v15  ;;  %vm1575_vm5 = vmor %vm1573_vm14, %vm1574_vm2 }
 0x294   : > { %v1798_v62 = vmul.f32 3.8918573e-05, %v4496_v40  ;;  %v1696_v27 = vsel %vm1695_vm3, %v3158_v24, %v1692_v51  ;;  %v1606_v4 = vmul.f32 %v1605_v50, %v4391_v44  ;;  %v1763_v59 = vadd.f32 0.112945676, %v1762_v22  ;;  %v5362_v50 = vld [vmem:[#allocation14_spill] sm:$0xff] }
 0x295   : > { %v1642_v39 = vmul.f32 %v1641_v28, %v4420_v53  ;;  %v1701_v7 = vsel %vm4756_vm13, %v1700_v14, %v1696_v27  ;;  %v1572_v8 = vadd.f32 %v3160_v57, %v1571_v6  ;;  %v1730_v55 = vsub.f32 1.0, %v1729_v49 }
 0x296   : > { %vm1734_vm4 = vweird.f32 %v3162_v32  ;;  %v1702_v11 = vmul.f32 %v1701_v7, %v4549_v34  ;;  %v4791_v33 = vadd.f32 1.0, %v1606_v4  ;;  %v1764_v9 = vmul.f32 %v1763_v59, %v4458_v5 }
 0x297   : > { %v1643_v41 = vadd.f32 0.112945676, %v1642_v39  ;;  %v2161_v21 = vadd.f32 1.0, %v2846_v12  ;;  %v1576_v58 = vsel %vm1575_vm5, %v3160_v57, %v1572_v8  ;;  %v1731_v42 = vmul.f32 %v3162_v32, %v1730_v55 }
 0x298   : > { %v1799_v20 = vadd.f32 0.001143296, %v1798_v62  ;;  %v1754_v45 = vadd.f32 0.18741608, %v4563_v47  ;;  %v2850_v31 = vclamps-f32 %v1702_v11, 1.0  ;;  %v1581_v24 = vsel %vm4769_vm0, %v1580_v0, %v1576_v58  ;;  %v5360_v0 = vld [vmem:[#allocation13_spill] sm:$0xff] }
 0x299   : > { %3163 = vrcp.f32 %v4791_v33  ;;  %v1582_v34 = vmul.f32 %v1581_v24, %v4543_v63  ;;  %v1732_v18 = vadd.f32 %v3162_v32, %v1731_v42  ;;  %vm1733_vm6 = vweird.f32 %v4749_v15  ;;  %v5363_v42 = vld [vmem:[#allocation17_spill] sm:$0xff] }
 0x29a   : > { %v1740_v56 = vor.u32 1.1754944e-38, %v1739_v29  ;;  %v2165_v36 = vadd.f32 1.0, %v2850_v31  ;;  %vm1735_vm7 = vmor %vm1733_vm6, %vm1734_vm4  ;;  %v1765_v54 = vadd.f32 0.4994258, %v1764_v9  ;;  %v1644_v60 = vmul.f32 %v1643_v41, %v4420_v53 }
 0x29b   : > { %v1800_v47 = vmul.f32 %v1799_v20, %v4496_v40  ;;  %v2193_v37 = vmul.f32 %v2161_v21, %v4430_v46  ;;  %v2847_v61 = vclamps-f32 %v1582_v34, 1.0  ;;  %v1736_v16 = vsel %vm1735_vm7, %v3162_v32, %v1732_v18 }
 0x29c   : > { %vm1738_vm8 = vcmp.eq.f32.partialorder %v1737_v1, 8.507059e+37  ;;  %v2197_v14 = vmul.f32 %v2165_v36, %v5358_v38  ;;  %v1766_v57 = vmul.f32 %v1765_v54, %v4458_v5  ;;  %v1645_v15 = vadd.f32 0.4994258, %v1644_v60  ;;  %v709_v60 = vpop.f32.mrf.mxu0 }
 0x29d   : > { %v1741_v63 = vsel %vm1738_vm8, %v1740_v56, %v1736_v16  ;;  %v1633_v13 = vmul.f32 %v5359_v30, %v4420_v53  ;;  %v1801_v3 = vadd.f32 0.014752088, %v1800_v47  ;;  %v2162_v35 = vadd.f32 1.0, %v2847_v61  ;;  %v5365_v61 = vld [vmem:[#allocation5_spill] sm:$0xff] }
 0x29e   : > { %v1742_v52 = vmul.f32 %v1741_v63, %v4647_v43  ;;  %v2217_v19 = vpack.c.bf16 %v2197_v14, %v2193_v37  ;;  %v4809_v17 = vadd.f32 1.0, %v1766_v57  ;;  %v1646_v46 = vmul.f32 %v1645_v15, %v4420_v53  ;;  %v5366_v63 = vld [vmem:[#allocation6_spill] sm:$0xff]  ;;  %v767_v15 = vpop.f32.mrf.mxu2 }
 0x29f   : > { %v3164_v2 = vpop.eup %3163  ;;  %v818_v25 = vmul.f32 0.5, %v5360_v0  ;;  %v822_v1 = vmul.f32 0.5, %v5361_v48  ;;  %v1595_v22 = vmul.f32 %v5362_v50, %v4391_v44  ;;  %v1755_v43 = vmul.f32 %v1754_v45, %v4458_v5  ;;  %v5369_v0 = vld [vmem:[#allocation7_spill] sm:$0xff] }
 0x2a0   : > { %v2851_v23 = vclamps-f32 %v1742_v52, 1.0  ;;  %v1609_v10 = vmul.f32 %v3164_v2, %v4791_v33  ;;  %v1792_v32 = vadd.f32 0.05243302, %v4642_v26  ;;  %2503 = vmatmul.bf16.gmra.mxu0 %v2217_v19  ;;  %3165 = vrcp.f32 %v4809_v17 }
 0x2a1   : > { %v4820_v28 = vadd.f32 1.0, %v1646_v46  ;;  %v1802_v12 = vmul.f32 %v1801_v3, %v4496_v40  ;;  %v1634_v6 = vadd.f32 0.18741608, %v1633_v13  ;;  %v2194_v49 = vmul.f32 %v2162_v35, %v818_v25 }
 0x2a2   : > { %v2166_v51 = vadd.f32 1.0, %v2851_v23  ;;  %v1610_v29 = vsub.f32 1.0, %v1609_v10  ;;  %v1617_v62 = vand.u32 2147483647, %v4791_v33  ;;  %v1619_v27 = vand.u32 2147483648, %v4791_v33 }
 0x2a3   : > { %vm1614_vm9 = vweird.f32 %v3164_v2  ;;  %3167 = vrcp.f32 %v4820_v28  ;;  %v1596_v5 = vadd.f32 1.1283791, %v1595_v22  ;;  %v1793_v26 = vmul.f32 %v1792_v32, %v4496_v40  ;;  %v5370_v32 = vld [vmem:[#allocation16_spill] sm:$0xff] }
 0x2a4   : > { %v2198_v44 = vmul.f32 %v2166_v51, %v822_v1  ;;  %v1611_v4 = vmul.f32 %v3164_v2, %v1610_v29  ;;  %v1803_v59 = vadd.f32 0.112945676, %v1802_v12  ;;  %v1756_v39 = vadd.f32 1.1283791, %v1755_v43 }
 0x2a5   : > { %vm1613_vm10 = vweird.f32 %v4791_v33  ;;  %v1620_v11 = vor.u32 1.1754944e-38, %v1619_v27  ;;  %v1635_v41 = vmul.f32 %v1634_v6, %v4420_v53  ;;  %vm1618_vm12 = vcmp.eq.f32.partialorder %v1617_v62, 8.507059e+37  ;;  %v5364_v33 = vld [vmem:[#allocation22_spill] sm:$0xff]  ;;  %v738_v53 = vpop.f32.mrf.mxu1 }
 0x2a6   : > { %v2218_v7 = vpack.c.bf16 %v2198_v44, %v2194_v49  ;;  %v1612_v8 = vadd.f32 %v3164_v2, %v1611_v4  ;;  %v3166_v55 = vpop.eup %3165  ;;  %vm1615_vm11 = vmor %vm1613_vm10, %vm1614_vm9  ;;  %v1804_v9 = vmul.f32 %v1803_v59, %v4496_v40  ;;  %v1597_v20 = vmul.f32 %v1596_v5, %v5363_v42  ;;  %v711_v5 = vpop.f32.mrf.mxu0 }
 0x2a7   : > { %v1769_v58 = vmul.f32 %v3166_v55, %v4809_v17  ;;  %v1777_v31 = vand.u32 2147483647, %v4809_v17  ;;  %v1757_v18 = vmul.f32 %v1756_v39, %v5364_v33  ;;  %v1794_v56 = vadd.f32 0.18741608, %v1793_v26 }
 0x2a8   : > { %2532 = vmatmul.bf16.gmra.mxu1 %v2218_v7  ;;  %v1616_v21 = vsel %vm1615_vm11, %v3164_v2, %v1612_v8  ;;  %v1805_v24 = vadd.f32 0.4994258, %v1804_v9  ;;  %v1779_v54 = vand.u32 2147483648, %v4809_v17  ;;  %vm1773_vm13 = vweird.f32 %v4809_v17  ;;  %v796_v7 = vpop.f32.mrf.mxu3 }
 0x2a9   : > { %v1621_v45 = vsel %vm1618_vm12, %v1620_v11, %v1616_v21  ;;  %v3168_v34 = vpop.eup %3167  ;;  %v1770_v36 = vsub.f32 1.0, %v1769_v58  ;;  %v4839_v16 = vadd.f32 %v709_v60, %v5365_v61  ;;  %vm1774_vm14 = vweird.f32 %v3166_v55 }
 0x2aa   : > { %v1649_v47 = vmul.f32 %v3168_v34, %v4820_v28  ;;  %v1806_v37 = vmul.f32 %v1805_v24, %v4496_v40  ;;  %v1622_v38 = vmul.f32 %v1621_v45, %v1597_v20  ;;  %v4842_v57 = vadd.f32 %v738_v53, %v5366_v63  ;;  %vm1775_vm1 = vmor %vm1773_vm13, %vm1774_vm14  ;;  %v5374_v20 = vld [vmem:[#allocation19_spill] sm:$0xff] }
 0x2ab   : > { %v1771_v14 = vmul.f32 %v3166_v55, %v1770_v36  ;;  %vm4844_vm15 = vcmp.eq.f32.partialorder %v1777_v31, 8.507059e+37  ;;  %v4851_v3 = vmul.f32 0.70710677, %v4839_v16  ;;  %v1780_v19 = vor.u32 1.1754944e-38, %v1779_v54 }
 0x2ac   : > { %v1650_v13 = vsub.f32 1.0, %v1649_v47  ;;  %v4848_v52 = vadd.f32 1.0, %v1806_v37  ;;  %vm1653_vm0 = vweird.f32 %v4820_v28  ;;  %v4855_v35 = vmul.f32 0.70710677, %v4842_v57 }
 0x2ad   : > { %v1772_v2 = vadd.f32 %v3166_v55, %v1771_v14  ;;  %vm1654_vm2 = vweird.f32 %v3168_v34  ;;  %v4861_v25 = vadd.f32 %v767_v15, %v5369_v0  ;;  %v2848_v48 = vclamps-f32 %v1622_v38, 1.0 }
 0x2ae   : > { %v1651_v46 = vmul.f32 %v3168_v34, %v1650_v13  ;;  %3169 = vrcp.f32 %v4848_v52  ;;  %v1659_v23 = vand.u32 2147483648, %v4820_v28  ;;  %v1825_v10 = vmul.f32 %v4851_v3, %v4851_v3  ;;  %vm4874_vm3 = vmor %vm1653_vm0, %vm1654_vm2 }
 0x2af   : > { %v1776_v1 = vsel %vm1775_vm1, %v3166_v55, %v1772_v2  ;;  %v1657_v17 = vand.u32 2147483647, %v4820_v28  ;;  %v1865_v43 = vmul.f32 %v4855_v35, %v4855_v35  ;;  %v819_v51 = vmul.f32 0.5, %v5370_v32  ;;  %v5373_v55 = vld [vmem:[#allocation21_spill] sm:$0xff]  ;;  %v769_v32 = vpop.f32.mrf.mxu2 }
 0x2b0   : > { %v1781_v50 = vsel %vm4844_vm15, %v1780_v19, %v1776_v1  ;;  %v1652_v22 = vadd.f32 %v3168_v34, %v1651_v46  ;;  %v1636_v29 = vadd.f32 1.1283791, %v1635_v41  ;;  %v4878_v49 = vmin.f32 %v1825_v10, 16.0  ;;  %v5376_v1 = vld [vmem:[#allocation24_spill] sm:$0xff] }
 0x2b1   : > { %v1782_v12 = vmul.f32 %v1781_v50, %v1757_v18  ;;  %v1795_v62 = vmul.f32 %v1794_v56, %v4496_v40  ;;  %v4883_v44 = vmin.f32 %v1865_v43, 16.0  ;;  %v4886_v4 = vmul.f32 0.70710677, %v4861_v25 }
 0x2b2   : > { %v1656_v27 = vsel %vm4874_vm3, %v3168_v34, %v1652_v22  ;;  %v2163_v59 = vadd.f32 1.0, %v2848_v48  ;;  %v1660_v28 = vor.u32 1.1754944e-38, %v1659_v23  ;;  %v1827_v39 = vmul.f32 2.1237322e-06, %v4878_v49  ;;  %v5375_v34 = vld [vmem:[#allocation8_spill] sm:$0xff] }
 0x2b3   : > { %v2852_v26 = vclamps-f32 %v1782_v12, 1.0  ;;  %v823_v11 = vmul.f32 0.5, %v5373_v55  ;;  %vm1658_vm4 = vcmp.eq.f32.partialorder %v1657_v17, 8.507059e+37  ;;  %v1867_v40 = vmul.f32 2.1237322e-06, %v4883_v44 }
 0x2b4   : > { %v3170_v8 = vpop.eup %3169  ;;  %v1905_v9 = vmul.f32 %v4886_v4, %v4886_v4  ;;  %v1661_v21 = vsel %vm1658_vm4, %v1660_v28, %v1656_v27  ;;  %v4895_v42 = vadd.f32 %v711_v5, %v5365_v61  ;;  %v1637_v45 = vmul.f32 %v1636_v29, %v5374_v20  ;;  %v740_v61 = vpop.f32.mrf.mxu1 }
 0x2b5   : > { %v2167_v41 = vadd.f32 1.0, %v2852_v26  ;;  %v1809_v58 = vmul.f32 %v3170_v8, %v4848_v52  ;;  %v1828_v31 = vadd.f32 0.00028619796, %v1827_v39  ;;  %v1868_v24 = vadd.f32 0.00028619796, %v1867_v40 }
 0x2b6   : > { %v4899_v33 = vadd.f32 %v796_v7, %v5375_v34  ;;  %v1796_v18 = vadd.f32 1.1283791, %v1795_v62  ;;  %v2195_v56 = vmul.f32 %v2163_v59, %v819_v51  ;;  %v1662_v60 = vmul.f32 %v1661_v21, %v1637_v45  ;;  %v5377_v7 = vld [vmem:[#allocation18_spill] sm:$0xff] }
 0x2b7   : > { %v2199_v36 = vmul.f32 %v2167_v41, %v823_v11  ;;  %v1810_v54 = vsub.f32 1.0, %v1809_v58  ;;  %v1817_v53 = vand.u32 2147483647, %v4848_v52  ;;  %v1819_v47 = vand.u32 2147483648, %v4848_v52 }
 0x2b8   : > { %v4903_v37 = vmin.f32 %v1905_v9, 16.0  ;;  %vm1814_vm5 = vweird.f32 %v3170_v8  ;;  %v4906_v15 = vmul.f32 0.70710677, %v4895_v42  ;;  %v1829_v30 = vmul.f32 %v1828_v31, %v4878_v49  ;;  %v5378_v9 = vld [vmem:[#allocation23_spill] sm:$0xff] }
 0x2b9   : > { %v2219_v38 = vpack.c.bf16 %v2199_v36, %v2195_v56  ;;  %v1811_v14 = vmul.f32 %v3170_v8, %v1810_v54  ;;  %v1869_v13 = vmul.f32 %v1868_v24, %v4883_v44  ;;  %v4911_v2 = vmul.f32 0.70710677, %v4899_v33  ;;  %v798_v56 = vpop.f32.mrf.mxu3 }
 0x2ba   : > { %vm1813_vm6 = vweird.f32 %v4848_v52  ;;  %v1985_v46 = vmul.f32 %v4906_v15, %v4906_v15  ;;  %v4917_v48 = vadd.f32 %v740_v61, %v5366_v63  ;;  %v1797_v23 = vmul.f32 %v1796_v18, %v5376_v1 }
 0x2bb   : > { %2561 = vmatmul.bf16.gmra.mxu2 %v2219_v38  ;;  %v1812_v19 = vadd.f32 %v3170_v8, %v1811_v14  ;;  %vm1815_vm7 = vmor %vm1813_vm6, %vm1814_vm5  ;;  %v1820_v10 = vor.u32 1.1754944e-38, %v1819_v47  ;;  %v1907_v50 = vmul.f32 2.1237322e-06, %v4903_v37  ;;  %v2849_v22 = vclamps-f32 %v1662_v60, 1.0 }
 0x2bc   : > { %vm1818_vm8 = vcmp.eq.f32.partialorder %v1817_v53, 8.507059e+37  ;;  %v4921_v43 = vmin.f32 %v1985_v46, 16.0  ;;  %v1830_v52 = vadd.f32 0.0036580483, %v1829_v30  ;;  %v1870_v29 = vadd.f32 0.0036580483, %v1869_v13 }
 0x2bd   : > { %v1816_v17 = vsel %vm1815_vm7, %v3170_v8, %v1812_v19  ;;  %v1945_v12 = vmul.f32 %v4911_v2, %v4911_v2  ;;  %v4927_v62 = vmul.f32 0.70710677, %v4917_v48  ;;  %v1908_v27 = vadd.f32 0.00028619796, %v1907_v50 }
 0x2be   : > { %v1821_v51 = vsel %vm1818_vm8, %v1820_v10, %v1816_v17  ;;  %v1987_v6 = vmul.f32 2.1237322e-06, %v4921_v43  ;;  %v4930_v5 = vadd.f32 %v769_v32, %v5369_v0  ;;  %v2164_v59 = vadd.f32 1.0, %v2849_v22 }
 0x2bf   : > { %v1822_v63 = vmul.f32 %v1821_v51, %v1797_v23  ;;  %v2025_v39 = vmul.f32 %v4927_v62, %v4927_v62  ;;  %v820_v8 = vmul.f32 0.5, %v5377_v7  ;;  %v1831_v55 = vmul.f32 %v1830_v52, %v4878_v49 }
 0x2c0   : > { %v1988_v28 = vadd.f32 0.00028619796, %v1987_v6  ;;  %v1871_v11 = vmul.f32 %v1870_v29, %v4883_v44  ;;  %v4937_v40 = vmin.f32 %v1945_v12, 16.0  ;;  %v824_v41 = vmul.f32 0.5, %v5378_v9 }
 0x2c1   : > { %v2853_v26 = vclamps-f32 %v1822_v63, 1.0  ;;  %v4941_v58 = vmin.f32 %v2025_v39, 16.0  ;;  %v1909_v20 = vmul.f32 %v1908_v27, %v4903_v37  ;;  %v4945_v45 = vmul.f32 0.70710677, %v4930_v5 }
 0x2c2   : > { %v1989_v0 = vmul.f32 %v1988_v28, %v4921_v43  ;;  %v2196_v31 = vmul.f32 %v2164_v59, %v820_v8  ;;  %v1832_v36 = vadd.f32 0.05243302, %v1831_v55  ;;  %v1872_v54 = vadd.f32 0.05243302, %v1871_v11 }
 0x2c3   : > { %v2168_v21 = vadd.f32 1.0, %v2853_v26  ;;  %v2027_v18 = vmul.f32 2.1237322e-06, %v4941_v58  ;;  %v1947_v60 = vmul.f32 2.1237322e-06, %v4937_v40  ;;  %v2065_v38 = vmul.f32 %v4945_v45, %v4945_v45 }
 0x2c4   : > { %v1990_v47 = vadd.f32 0.0036580483, %v1989_v0  ;;  %v1910_v14 = vadd.f32 0.0036580483, %v1909_v20  ;;  %v4952_v30 = vadd.f32 %v798_v56, %v5375_v34  ;;  %v1833_v19 = vmul.f32 %v1832_v36, %v4878_v49 }
 0x2c5   : > { %v2200_v24 = vmul.f32 %v2168_v21, %v824_v41  ;;  %v2028_v61 = vadd.f32 0.00028619796, %v2027_v18  ;;  %v1873_v46 = vmul.f32 %v1872_v54, %v4883_v44  ;;  %v1948_v1 = vadd.f32 0.00028619796, %v1947_v60 }
 0x2c6   : > { %v1991_v23 = vmul.f32 %v1990_v47, %v4921_v43  ;;  %v4958_v50 = vmin.f32 %v2065_v38, 16.0  ;;  %v1838_v22 = vmul.f32 3.8918573e-05, %v4878_v49  ;;  %v1911_v17 = vmul.f32 %v1910_v14, %v4903_v37 }
 0x2c7   : > { %v2220_v53 = vpack.c.bf16 %v2200_v24, %v2196_v31  ;;  %v2029_v13 = vmul.f32 %v2028_v61, %v4941_v58  ;;  %v4963_v34 = vmul.f32 0.70710677, %v4952_v30  ;;  %v1878_v32 = vmul.f32 3.8918573e-05, %v4883_v44 }
 0x2c8   : > { %v4967_v51 = vmul.f32 0.5, %v4839_v16  ;;  %v4970_v52 = vmul.f32 0.5, %v4842_v57  ;;  %v1839_v12 = vadd.f32 0.001143296, %v1838_v22  ;;  %v1834_v63 = vadd.f32 0.18741608, %v1833_v19 }
 0x2c9   : > { %2590 = vmatmul.bf16.gmra.mxu3 %v2220_v53  ;;  %v2030_v10 = vadd.f32 0.0036580483, %v2029_v13  ;;  %v1949_v6 = vmul.f32 %v1948_v1, %v4937_v40  ;;  %v4975_v27 = vmul.f32 0.5, %v4895_v42  ;;  %v1879_v26 = vadd.f32 0.001143296, %v1878_v32 }
 0x2ca   : > { %v1874_v59 = vadd.f32 0.18741608, %v1873_v46  ;;  %v1992_v28 = vadd.f32 0.05243302, %v1991_v23  ;;  %v2067_v39 = vmul.f32 2.1237322e-06, %v4958_v50  ;;  %v1840_v16 = vmul.f32 %v1839_v12, %v4878_v49 }
 0x2cb   : > { %v2031_v29 = vmul.f32 %v2030_v10, %v4941_v58  ;;  %v1912_v7 = vadd.f32 0.05243302, %v1911_v17  ;;  %v2105_v57 = vmul.f32 %v4963_v34, %v4963_v34  ;;  %v1998_v8 = vmul.f32 3.8918573e-05, %v4921_v43 }
 0x2cc   : > { %v1880_v55 = vmul.f32 %v1879_v26, %v4883_v44  ;;  %v1841_v9 = vadd.f32 0.014752088, %v1840_v16  ;;  %v1918_v42 = vmul.f32 3.8918573e-05, %v4903_v37  ;;  %v2038_v0 = vmul.f32 3.8918573e-05, %v4941_v58 }
 0x2cd   : > { %v2032_v11 = vadd.f32 0.05243302, %v2031_v29  ;;  %v1999_v41 = vadd.f32 0.001143296, %v1998_v8  ;;  %v1950_v20 = vadd.f32 0.0036580483, %v1949_v6  ;;  %v1993_v31 = vmul.f32 %v1992_v28, %v4921_v43 }
 0x2ce   : > { %v1881_v21 = vadd.f32 0.014752088, %v1880_v55  ;;  %v2068_v24 = vadd.f32 0.00028619796, %v2067_v39  ;;  %v1842_v18 = vmul.f32 %v1841_v9, %v4878_v49  ;;  %v4987_v56 = vmin.f32 %v2105_v57, 16.0 }
 0x2cf   : > { %v2000_v36 = vmul.f32 %v1999_v41, %v4921_v43  ;;  %v2039_v60 = vadd.f32 0.001143296, %v2038_v0  ;;  %v1835_v53 = vmul.f32 %v1834_v63, %v4878_v49  ;;  %v2033_v47 = vmul.f32 %v2032_v11, %v4941_v58 }
 0x2d0   : > { %v1882_v54 = vmul.f32 %v1881_v21, %v4883_v44  ;;  %v1843_v61 = vadd.f32 0.112945676, %v1842_v18  ;;  %v1919_v38 = vadd.f32 0.001143296, %v1918_v42  ;;  %v1875_v14 = vmul.f32 %v1874_v59, %v4883_v44 }
 0x2d1   : > { %v2001_v13 = vadd.f32 0.014752088, %v2000_v36  ;;  %v2040_v46 = vmul.f32 %v2039_v60, %v4941_v58  ;;  %v1994_v1 = vadd.f32 0.18741608, %v1993_v31  ;;  %v2069_v23 = vmul.f32 %v2068_v24, %v4958_v50 }
 0x2d2   : > { %v1883_v19 = vadd.f32 0.112945676, %v1882_v54  ;;  %v1844_v10 = vmul.f32 %v1843_v61, %v4878_v49  ;;  %v1920_v22 = vmul.f32 %v1919_v38, %v4903_v37  ;;  %v2107_v17 = vmul.f32 2.1237322e-06, %v4987_v56 }
 0x2d3   : > { %v2002_v32 = vmul.f32 %v2001_v13, %v4921_v43  ;;  %v2041_v12 = vadd.f32 0.014752088, %v2040_v46  ;;  %v1913_v63 = vmul.f32 %v1912_v7, %v4903_v37  ;;  %v2034_v6 = vadd.f32 0.18741608, %v2033_v47 }
 0x2d4   : > { %v1884_v29 = vmul.f32 %v1883_v19, %v4883_v44  ;;  %v1845_v26 = vadd.f32 0.4994258, %v1844_v10  ;;  %v1921_v59 = vadd.f32 0.014752088, %v1920_v22  ;;  %v1951_v28 = vmul.f32 %v1950_v20, %v4937_v40 }
 0x2d5   : > { %v2003_v39 = vadd.f32 0.112945676, %v2002_v32  ;;  %v2042_v57 = vmul.f32 %v2041_v12, %v4941_v58  ;;  %v1995_v8 = vmul.f32 %v1994_v1, %v4921_v43  ;;  %v2070_v55 = vadd.f32 0.0036580483, %v2069_v23 }
 0x2d6   : > { %v1885_v16 = vadd.f32 0.4994258, %v1884_v29  ;;  %v1846_v11 = vmul.f32 %v1845_v26, %v4878_v49  ;;  %v1922_v9 = vmul.f32 %v1921_v59, %v4903_v37  ;;  %v2108_v42 = vadd.f32 0.00028619796, %v2107_v17 }
 0x2d7   : > { %v2004_v41 = vmul.f32 %v2003_v39, %v4921_v43  ;;  %v2043_v21 = vadd.f32 0.112945676, %v2042_v57  ;;  %v1836_v0 = vadd.f32 1.1283791, %v1835_v53  ;;  %v1876_v31 = vadd.f32 1.1283791, %v1875_v14 }
 0x2d8   : > { %v1886_v7 = vmul.f32 %v1885_v16, %v4883_v44  ;;  %v2035_v20 = vmul.f32 %v2034_v6, %v4941_v58  ;;  %v5010_v24 = vadd.f32 1.0, %v1846_v11  ;;  %v1923_v49 = vadd.f32 0.112945676, %v1922_v9 }
 0x2d9   : > { %v2005_v18 = vadd.f32 0.4994258, %v2004_v41  ;;  %v2044_v54 = vmul.f32 %v2043_v21, %v4941_v58  ;;  %v1914_v60 = vadd.f32 0.18741608, %v1913_v63  ;;  %v1996_v47 = vadd.f32 1.1283791, %v1995_v8 }
 0x2da   : > { %v5012_v36 = vadd.f32 1.0, %v1886_v7  ;;  %3171 = vrcp.f32 %v5010_v24  ;;  %v2078_v61 = vmul.f32 3.8918573e-05, %v4958_v50  ;;  %v2071_v44 = vmul.f32 %v2070_v55, %v4958_v50 }
 0x2db   : > { %v2109_v53 = vmul.f32 %v2108_v42, %v4987_v56  ;;  %v2006_v38 = vmul.f32 %v2005_v18, %v4921_v43  ;;  %v5022_v14 = vmul.f32 %v1836_v0, %v4851_v3  ;;  %v5024_v13 = vadd.f32 0.05243302, %v1951_v28 }
 0x2dc   : > { %3173 = vrcp.f32 %v5012_v36  ;;  %v5027_v19 = vmul.f32 0.5, %v4917_v48  ;;  %v2036_v46 = vadd.f32 1.1283791, %v2035_v20  ;;  %v5030_v1 = vmul.f32 %v1876_v31, %v4855_v35 }
 0x2dd   : > { %v5032_v23 = vadd.f32 1.0, %v2006_v38  ;;  %v2045_v10 = vadd.f32 0.4994258, %v2044_v54  ;;  %v1924_v22 = vmul.f32 %v1923_v49, %v4903_v37  ;;  %v5036_v43 = vmul.f32 %v1914_v60, %v4903_v37 }
 0x2de   : > { %v5039_v3 = vmul.f32 %v1996_v47, %v4906_v15  ;;  %v1857_v17 = vand.u32 2147483647, %v5010_v24  ;;  %v2079_v32 = vadd.f32 0.001143296, %v2078_v61  ;;  %v5042_v48 = vadd.f32 0.05243302, %v2071_v44 }
 0x2df   : > { %v5044_v29 = vadd.f32 0.0036580483, %v2109_v53  ;;  %v1859_v35 = vand.u32 2147483648, %v5010_v24  ;;  %3175 = vrcp.f32 %v5032_v23  ;;  %v5049_v63 = vmul.f32 %v2036_v46, %v4927_v62 }
 0x2e0   : > { %v3172_v12 = vpop.eup %3171  ;;  %vm1853_vm9 = vweird.f32 %v5010_v24  ;;  %v2046_v15 = vmul.f32 %v2045_v10, %v4941_v58  ;;  %v1925_v6 = vadd.f32 0.4994258, %v1924_v22  ;;  %vm1893_vm10 = vweird.f32 %v5012_v36 }
 0x2e1   : > { %v1849_v59 = vmul.f32 %v3172_v12, %v5010_v24  ;;  %v2080_v28 = vmul.f32 %v2079_v32, %v4958_v50  ;;  %v1958_v39 = vmul.f32 3.8918573e-05, %v4937_v40  ;;  %vm5057_vm11 = vcmp.eq.f32.partialorder %v1857_v17, 8.507059e+37 }
 0x2e2   : > { %v3174_v26 = vpop.eup %3173  ;;  %v1897_v57 = vand.u32 2147483647, %v5012_v36  ;;  %v5063_v8 = vadd.f32 1.0, %v2046_v15  ;;  %v1860_v55 = vor.u32 1.1754944e-38, %v1859_v35  ;;  %v1899_v11 = vand.u32 2147483648, %v5012_v36 }
 0x2e3   : > { %v1889_v62 = vmul.f32 %v3174_v26, %v5012_v36  ;;  %v1850_v58 = vsub.f32 1.0, %v1849_v59  ;;  %v1926_v9 = vmul.f32 %v1925_v6, %v4903_v37  ;;  %vm1854_vm12 = vweird.f32 %v3172_v12 }
 0x2e4   : > { %v2017_v42 = vand.u32 2147483647, %v5032_v23  ;;  %3177 = vrcp.f32 %v5063_v8  ;;  %v2081_v31 = vadd.f32 0.014752088, %v2080_v28  ;;  %v1959_v20 = vadd.f32 0.001143296, %v1958_v39  ;;  %vm1855_vm15 = vmor %vm1853_vm9, %vm1854_vm12 }
 0x2e5   : > { %v1890_v41 = vsub.f32 1.0, %v1889_v62  ;;  %v3176_v7 = vpop.eup %3175  ;;  %v1851_v21 = vmul.f32 %v3172_v12, %v1850_v58  ;;  %v5069_v0 = vadd.f32 1.0, %v1926_v9  ;;  %vm1894_vm13 = vweird.f32 %v3174_v26 }
 0x2e6   : > { %v2009_v18 = vmul.f32 %v3176_v7, %v5032_v23  ;;  %vm5072_vm14 = vcmp.eq.f32.partialorder %v1897_v57, 8.507059e+37  ;;  %v2019_v60 = vand.u32 2147483648, %v5032_v23  ;;  %v1900_v47 = vor.u32 1.1754944e-38, %v1899_v11  ;;  %vm1895_vm2 = vmor %vm1893_vm10, %vm1894_vm13 }
 0x2e7   : > { %v1891_v54 = vmul.f32 %v3174_v26, %v1890_v41  ;;  %v1852_v37 = vadd.f32 %v3172_v12, %v1851_v21  ;;  %3179 = vrcp.f32 %v5069_v0  ;;  %vm2013_vm0 = vweird.f32 %v5032_v23 }
 0x2e8   : > { %v2010_v61 = vsub.f32 1.0, %v2009_v18  ;;  %vm5082_vm1 = vcmp.eq.f32.partialorder %v2017_v42, 8.507059e+37  ;;  %v2082_v46 = vmul.f32 %v2081_v31, %v4958_v50  ;;  %v1960_v10 = vmul.f32 %v1959_v20, %v4937_v40 }
 0x2e9   : > { %v1892_v53 = vadd.f32 %v3174_v26, %v1891_v54  ;;  %v1856_v38 = vsel %vm1855_vm15, %v3172_v12, %v1852_v37  ;;  %v2118_v22 = vmul.f32 3.8918573e-05, %v4987_v56  ;;  %vm2014_vm3 = vweird.f32 %v3176_v7 }
 0x2ea   : > { %v3178_v24 = vpop.eup %3177  ;;  %v1861_v17 = vsel %vm5057_vm11, %v1860_v55, %v1856_v38  ;;  %v2011_v32 = vmul.f32 %v3176_v7, %v2010_v61  ;;  %v2020_v6 = vor.u32 1.1754944e-38, %v2019_v60  ;;  %vm2053_vm4 = vweird.f32 %v5063_v8  ;;  %vm2015_vm5 = vmor %vm2013_vm0, %vm2014_vm3 }
 0x2eb   : > { %v1896_v35 = vsel %vm1895_vm2, %v3174_v26, %v1892_v53  ;;  %v1862_v15 = vmul.f32 %v1861_v17, %v5022_v14  ;;  %v2049_v12 = vmul.f32 %v3178_v24, %v5063_v8  ;;  %v2057_v28 = vand.u32 2147483647, %v5063_v8 }
 0x2ec   : > { %v1901_v36 = vsel %vm5072_vm14, %v1900_v47, %v1896_v35  ;;  %v2012_v59 = vadd.f32 %v3176_v7, %v2011_v32  ;;  %v2083_v39 = vadd.f32 0.112945676, %v2082_v46  ;;  %v2059_v14 = vand.u32 2147483648, %v5063_v8 }
 0x2ed   : > { %v5099_v62 = vpop.eup %3179  ;;  %v2050_v26 = vsub.f32 1.0, %v2049_v12  ;;  %v1961_v16 = vadd.f32 0.014752088, %v1960_v10  ;;  %v2119_v57 = vadd.f32 0.001143296, %v2118_v22  ;;  %v2854_v58 = vclamps-f32 %v1862_v15, 1.0 }
 0x2ee   : > { %v2016_v55 = vsel %vm2015_vm5, %v3176_v7, %v2012_v59  ;;  %v1902_v11 = vmul.f32 %v1901_v36, %v5030_v1  ;;  %v1929_v9 = vmul.f32 %v5099_v62, %v5069_v0  ;;  %vm2054_vm6 = vweird.f32 %v3178_v24  ;;  %v2494_v36 = vpop.f32.mrf.mxu0 }
 0x2ef   : > { %v2021_v42 = vsel %vm5082_vm1, %v2020_v6, %v2016_v55  ;;  %v2051_v41 = vmul.f32 %v3178_v24, %v2050_v26  ;;  %v2084_v23 = vmul.f32 %v2083_v39, %v4958_v50  ;;  %vm5111_vm7 = vcmp.eq.f32.partialorder %v2057_v28, 8.507059e+37  ;;  %vm2055_vm8 = vmor %vm2053_vm4, %vm2054_vm6  ;;  %v5140_v39 = vld [vmem:[%s5257_s6] ss:$0 sm:$0xff]  ;;  %v2523_v26 = vpop.f32.mrf.mxu1 }
 0x2f0   : > { %v2022_v21 = vmul.f32 %v2021_v42, %v5039_v3  ;;  %v1930_v20 = vsub.f32 1.0, %v1929_v9  ;;  %v1962_v7 = vmul.f32 %v1961_v16, %v4937_v40  ;;  %v2060_v18 = vor.u32 1.1754944e-38, %v2059_v14 }
 0x2f1   : > { %v2052_v1 = vadd.f32 %v3178_v24, %v2051_v41  ;;  %v2085_v54 = vadd.f32 0.4994258, %v2084_v23  ;;  %v2120_v49 = vmul.f32 %v2119_v57, %v4987_v56  ;;  %v2169_v60 = vadd.f32 1.0, %v2854_v58 }
 0x2f2   : > { %v2858_v37 = vclamps-f32 %v2022_v21, 1.0  ;;  %v2855_v47 = vclamps-f32 %v1902_v11, 1.0  ;;  %v1963_v61 = vadd.f32 0.112945676, %v1962_v7  ;;  %v1931_v44 = vmul.f32 %v5099_v62, %v1930_v20 }
 0x2f3   : > { %v2056_v3 = vsel %vm2055_vm8, %v3178_v24, %v2052_v1  ;;  %v2086_v53 = vmul.f32 %v2085_v54, %v4958_v50  ;;  %v2121_v38 = vadd.f32 0.014752088, %v2120_v49  ;;  %v2073_v46 = vmul.f32 %v5042_v48, %v4958_v50 }
 0x2f4   : > { %v2173_v10 = vadd.f32 1.0, %v2858_v37  ;;  %v2061_v22 = vsel %vm5111_vm7, %v2060_v18, %v2056_v3  ;;  %v1964_v17 = vmul.f32 %v1963_v61, %v4937_v40  ;;  %v2111_v8 = vmul.f32 %v5044_v29, %v4987_v56  ;;  %v2552_v3 = vpop.f32.mrf.mxu2 }
 0x2f5   : > { %v2062_v32 = vmul.f32 %v2061_v22, %v5049_v63  ;;  %v5129_v24 = vadd.f32 1.0, %v2086_v53  ;;  %v2122_v35 = vmul.f32 %v2121_v38, %v4987_v56  ;;  %v2201_v15 = vmul.f32 %v2169_v60, %v4967_v51 }
 0x2f6   : > { %v2205_v6 = vmul.f32 %v2173_v10, %v4975_v27  ;;  %v2170_v48 = vadd.f32 1.0, %v2855_v47  ;;  %v1965_v12 = vadd.f32 0.4994258, %v1964_v17  ;;  %v1932_v28 = vadd.f32 %v5099_v62, %v1931_v44  ;;  %v2496_v37 = vpop.f32.mrf.mxu0  ;;  %v2581_v44 = vpop.f32.mrf.mxu3 }
 0x2f7   : > { %v2859_v59 = vclamps-f32 %v2062_v32, 1.0  ;;  %vm1934_vm9 = vweird.f32 %v5099_v62  ;;  %3181 = vrcp.f32 %v5129_v24  ;;  %v2074_v29 = vadd.f32 0.18741608, %v2073_v46 }
 0x2f8   : > { %v2221_v63 = vpack.c.bf16 %v2205_v6, %v2201_v15  ;;  %vm1933_vm10 = vweird.f32 %v5069_v0  ;;  %v1939_v51 = vand.u32 2147483648, %v5069_v0  ;;  %v1937_v14 = vand.u32 2147483647, %v5069_v0 }
 0x2f9   : > { %v2174_v27 = vadd.f32 1.0, %v2859_v59  ;;  %v1966_v16 = vmul.f32 %v1965_v12, %v4937_v40  ;;  %v2123_v57 = vadd.f32 0.112945676, %v2122_v35  ;;  %v1916_v58 = vadd.f32 1.1283791, %v5036_v43  ;;  %vm1935_vm11 = vmor %vm1933_vm10, %vm1934_vm9  ;;  %v3187_v59 = vld [vmem:[%s3354_s17] sm:$0xff] }
 0x2fa   : > { %v1953_v55 = vmul.f32 %v5024_v13, %v4937_v40  ;;  %v2112_v11 = vadd.f32 0.05243302, %v2111_v8  ;;  %2508 = vmatmul.bf16.gmra.mxu0 %v2221_v63  ;;  %v2202_v9 = vmul.f32 %v2170_v48, %v4970_v52  ;;  %v1936_v41 = vsel %vm1935_vm11, %v5099_v62, %v1932_v28  ;;  %v2525_v8 = vpop.f32.mrf.mxu1 }
 0x2fb   : > { %v2206_v42 = vmul.f32 %v2174_v27, %v5027_v19  ;;  %v5154_v0 = vadd.f32 1.0, %v1966_v16  ;;  %v2124_v23 = vmul.f32 %v2123_v57, %v4987_v56  ;;  %v2495_v43 = vadd.f32 %v5140_v39, %v2494_v36 }
 0x2fc   : > { %v1940_v21 = vor.u32 1.1754944e-38, %v1939_v51  ;;  %v2075_v31 = vmul.f32 %v2074_v29, %v4958_v50  ;;  %vm1938_vm12 = vcmp.eq.f32.partialorder %v1937_v14, 8.507059e+37  ;;  %v1917_v62 = vmul.f32 %v1916_v58, %v4886_v4 }
 0x2fd   : > { %v3182_v13 = vpop.eup %3181  ;;  %v2222_v20 = vpack.c.bf16 %v2206_v42, %v2202_v9  ;;  %3183 = vrcp.f32 %v5154_v0  ;;  %v1954_v7 = vadd.f32 0.18741608, %v1953_v55  ;;  %v2113_v1 = vmul.f32 %v2112_v11, %v4987_v56  ;;  %v2554_v55 = vpop.f32.mrf.mxu2 }
 0x2fe   : > { %v1941_v52 = vsel %vm1938_vm12, %v1940_v21, %v1936_v41  ;;  %v2089_v19 = vmul.f32 %v3182_v13, %v5129_v24  ;;  %v2125_v18 = vadd.f32 0.4994258, %v2124_v23  ;;  %v2524_v54 = vadd.f32 %v2523_v26, %v2495_v43  ;;  %v2499_v14 = vpop.f32.mrf.mxu0  ;;  %v2583_v11 = vpop.f32.mrf.mxu3 }
 0x2ff   : > { %2537 = vmatmul.bf16.gmra.mxu1 %v2222_v20  ;;  %v2076_v50 = vadd.f32 1.1283791, %v2075_v31  ;;  %v1942_v60 = vmul.f32 %v1941_v52, %v1917_v62  ;;  %v2099_v47 = vand.u32 2147483648, %v5129_v24  ;;  %vm2094_vm13 = vweird.f32 %v3182_v13 }
 0x300   : > { %v2090_v49 = vsub.f32 1.0, %v2089_v19  ;;  %v2126_v61 = vmul.f32 %v2125_v18, %v4987_v56  ;;  %v2097_v4 = vand.u32 2147483647, %v5129_v24  ;;  %v2553_v38 = vadd.f32 %v2552_v3, %v2524_v54 }
 0x301   : > { %v1955_v10 = vmul.f32 %v1954_v7, %v4937_v40  ;;  %v2114_v22 = vadd.f32 0.18741608, %v2113_v1  ;;  %vm2093_vm14 = vweird.f32 %v5129_v24  ;;  %v2497_v15 = vadd.f32 %v5140_v39, %v2496_v37 }
 0x302   : > { %v2091_v53 = vmul.f32 %v3182_v13, %v2090_v49  ;;  %v5171_v17 = vadd.f32 1.0, %v2126_v61  ;;  %v2582_v6 = vadd.f32 %v2581_v44, %v2553_v38  ;;  %v2077_v48 = vmul.f32 %v2076_v50, %v4945_v45  ;;  %vm2095_vm15 = vmor %vm2093_vm14, %vm2094_vm13  ;;  %v2528_v62 = vpop.f32.mrf.mxu1  ;;  %v3188_v50 = vld [vmem:[%s3354_s17 + $0x8] sm:$0xff] }
 0x303   : > { %v3184_v46 = vpop.eup %3183  ;;  %v2856_v36 = vclamps-f32 %v1942_v60, 1.0  ;;  %v2100_v12 = vor.u32 1.1754944e-38, %v2099_v47  ;;  %vm2098_vm0 = vcmp.eq.f32.partialorder %v2097_v4, 8.507059e+37  ;;  %v1977_v63 = vand.u32 2147483647, %v5154_v0 }
 0x304   : > { %v2092_v32 = vadd.f32 %v3182_v13, %v2091_v53  ;;  %v1969_v35 = vmul.f32 %v3184_v46, %v5154_v0  ;;  %3185 = vrcp.f32 %v5171_v17  ;;  %v2601_v28 = vadd.f32 %v3187_v59, %v2582_v6 }
 0x305   : > { %v1979_v51 = vand.u32 2147483648, %v5154_v0  ;;  %vm1974_vm1 = vweird.f32 %v3184_v46  ;;  %v2526_v45 = vadd.f32 %v2525_v8, %v2497_v15  ;;  %v1956_v16 = vadd.f32 1.1283791, %v1955_v10  ;;  %v2557_v44 = vpop.f32.mrf.mxu2 }
 0x306   : > { %v2096_v40 = vsel %vm2095_vm15, %v3182_v13, %v2092_v32  ;;  %v1970_v24 = vsub.f32 1.0, %v1969_v35  ;;  %2609 = vst [vmem:[%s5181_s8] sm:$0xff] %v2601_v28  ;;  %v2115_v57 = vmul.f32 %v2114_v22, %v4987_v56  ;;  %v2171_v58 = vadd.f32 1.0, %v2856_v36 }
 0x307   : > { %v2101_v29 = vsel %vm2098_vm0, %v2100_v12, %v2096_v40  ;;  %vm1973_vm2 = vweird.f32 %v5154_v0  ;;  %v2555_v41 = vadd.f32 %v2554_v55, %v2526_v45  ;;  %v827_v43 = vmul.f32 0.5, %v4861_v25 }
 0x308   : > { %v2102_v27 = vmul.f32 %v2101_v29, %v2077_v48  ;;  %v1971_v26 = vmul.f32 %v3184_v46, %v1970_v24  ;;  %v831_v21 = vmul.f32 0.5, %v4930_v5  ;;  %vm1975_vm3 = vmor %vm1973_vm2, %vm1974_vm1  ;;  %v1980_v13 = vor.u32 1.1754944e-38, %v1979_v51  ;;  %v3189_v48 = vld [vmem:[%s3354_s17 + $0x10] sm:$0xff] }
 0x309   : > { %v2500_v31 = vadd.f32 %v5140_v39, %v2499_v14  ;;  %vm1978_vm4 = vcmp.eq.f32.partialorder %v1977_v63, 8.507059e+37  ;;  %v1957_v19 = vmul.f32 %v1956_v16, %v4911_v2  ;;  %v2584_v7 = vadd.f32 %v2583_v11, %v2555_v41  ;;  %v2501_v2 = vpop.f32.mrf.mxu0  ;;  %v3190_v16 = vld [vmem:[%s3354_s17 + $0x18] sm:$0xff] }
 0x30a   : > { %v2860_v9 = vclamps-f32 %v2102_v27, 1.0  ;;  %v1972_v42 = vadd.f32 %v3184_v46, %v1971_v26  ;;  %v3186_v23 = vpop.eup %3185  ;;  %v2116_v25 = vadd.f32 1.1283791, %v2115_v57  ;;  %v2203_v1 = vmul.f32 %v2171_v58, %v827_v43  ;;  %v2530_v12 = vpop.f32.mrf.mxu1 }
 0x30b   : > { %v2129_v52 = vmul.f32 %v3186_v23, %v5171_v17  ;;  %v2137_v54 = vand.u32 2147483647, %v5171_v17  ;;  %v2139_v49 = vand.u32 2147483648, %v5171_v17  ;;  %v2529_v37 = vadd.f32 %v2528_v62, %v2500_v31  ;;  %v3192_v62 = vld [vmem:[%s3354_s17 + $0x28] sm:$0xff] }
 0x30c   : > { %v2175_v56 = vadd.f32 1.0, %v2860_v9  ;;  %v1976_v20 = vsel %vm1975_vm3, %v3184_v46, %v1972_v42  ;;  %v2602_v60 = vadd.f32 %v3188_v50, %v2584_v7  ;;  %vm2134_vm5 = vweird.f32 %v3186_v23 }
 0x30d   : > { %v1981_v0 = vsel %vm1978_vm4, %v1980_v13, %v1976_v20  ;;  %v2130_v18 = vsub.f32 1.0, %v2129_v52  ;;  %vm2133_vm6 = vweird.f32 %v5171_v17  ;;  %v2558_v38 = vadd.f32 %v2557_v44, %v2529_v37  ;;  %v3193_v44 = vld [vmem:[%s3354_s17 + $0x30] sm:$0xff] }
 0x30e   : > { %v2207_v5 = vmul.f32 %v2175_v56, %v831_v21  ;;  %v1982_v61 = vmul.f32 %v1981_v0, %v1957_v19  ;;  %2610 = vst [vmem:[%s5181_s8 + $0x8] sm:$0xff] %v2602_v60  ;;  %v2117_v46 = vmul.f32 %v2116_v25, %v4963_v34  ;;  %vm2135_vm7 = vmor %vm2133_vm6, %vm2134_vm5  ;;  %vm2138_vm8 = vcmp.eq.f32.partialorder %v2137_v54, 8.507059e+37  ;;  %v2559_v34 = vpop.f32.mrf.mxu2  ;;  %v3191_v56 = vld [vmem:[%s3354_s17 + $0x20] sm:$0xff] }
 0x30f   : > { %v2131_v3 = vmul.f32 %v3186_v23, %v2130_v18  ;;  %v2140_v10 = vor.u32 1.1754944e-38, %v2139_v49  ;;  %v2502_v32 = vadd.f32 %v5140_v39, %v2501_v2  ;;  %v828_v59 = vmul.f32 0.5, %v4899_v33 }
 0x310   : > { %v2223_v47 = vpack.c.bf16 %v2207_v5, %v2203_v1  ;;  %v2857_v22 = vclamps-f32 %v1982_v61, 1.0  ;;  %v832_v28 = vmul.f32 0.5, %v4952_v30 }
 0x311   : > { %v2132_v4 = vadd.f32 %v3186_v23, %v2131_v3  ;;  %v2531_v24 = vadd.f32 %v2530_v12, %v2502_v32 }
 0x312   : > { %2566 = vmatmul.bf16.gmra.mxu2 %v2223_v47  ;;  %v2172_v17 = vadd.f32 1.0, %v2857_v22 }
 0x313   : > { %v2136_v8 = vsel %vm2135_vm7, %v3186_v23, %v2132_v4  ;;  %v2560_v63 = vadd.f32 %v2559_v34, %v2531_v24 }
 0x314   : > { %v2586_v53 = vpop.f32.mrf.mxu3  ;;  %v2141_v15 = vsel %vm2138_vm8, %v2140_v10, %v2136_v8  ;;  %v2204_v27 = vmul.f32 %v2172_v17, %v828_v59 }
 0x315   : > { %v2587_v35 = vadd.f32 %v2586_v53, %v2558_v38  ;;  %v2142_v6 = vmul.f32 %v2141_v15, %v2117_v46  ;;  %v3194_v46 = vld [vmem:[%s3354_s17 + $0x38] sm:$0xff] }
 0x317   : > { %v2603_v36 = vadd.f32 %v3189_v48, %v2587_v35  ;;  %v2861_v40 = vclamps-f32 %v2142_v6, 1.0 }
 0x319   : > { %2611 = vst [vmem:[%s5181_s8 + $0x10] sm:$0xff] %v2603_v36  ;;  %v2176_v29 = vadd.f32 1.0, %v2861_v40 }
 0x31b   : > { %v2208_v26 = vmul.f32 %v2176_v29, %v832_v28 }
 0x31c   : > { %v2588_v51 = vpop.f32.mrf.mxu3 }
 0x31d   : > { %v2589_v45 = vadd.f32 %v2588_v51, %v2560_v63  ;;  %v2224_v14 = vpack.c.bf16 %v2208_v26, %v2204_v27  ;;  %v2504_v58 = vpop.f32.mrf.mxu0 }
 0x31e   : > { %v2505_v55 = vadd.f32 %v5140_v39, %v2504_v58 }
 0x31f   : > { %v2604_v57 = vadd.f32 %v3190_v16, %v2589_v45  ;;  %2595 = vmatmul.bf16.gmra.mxu3 %v2224_v14 }
 0x321   : > { %2612 = vst [vmem:[%s5181_s8 + $0x18] sm:$0xff] %v2604_v57 }
 0x325   : > { %v2533_v11 = vpop.f32.mrf.mxu1  ;;  %v2506_v9 = vpop.f32.mrf.mxu0 }
 0x326   : > { %v2534_v30 = vadd.f32 %v2533_v11, %v2505_v55  ;;  %v2507_v41 = vadd.f32 %v5140_v39, %v2506_v9 }
 0x32d   : > { %v2535_v21 = vpop.f32.mrf.mxu1 }
 0x32e   : > { %v2536_v31 = vadd.f32 %v2535_v21, %v2507_v41 }
 0x33e   : > { %v2562_v33 = vpop.f32.mrf.mxu2 }
 0x33f   : > { %v2563_v42 = vadd.f32 %v2562_v33, %v2534_v30 }
 0x346   : > { %v2564_v13 = vpop.f32.mrf.mxu2 }
 0x347   : > { %v2565_v52 = vadd.f32 %v2564_v13, %v2536_v31 }
 0x34c   : > { %v2591_v23 = vpop.f32.mrf.mxu3 }
 0x34d   : > { %v2592_v43 = vadd.f32 %v2591_v23, %v2563_v42 }
 0x34f   : > { %v2605_v20 = vadd.f32 %v3191_v56, %v2592_v43 }
 0x351   : > { %2613 = vst [vmem:[%s5181_s8 + $0x20] sm:$0xff] %v2605_v20 }
 0x354   : > { %v2593_v19 = vpop.f32.mrf.mxu3 }
 0x355   : > { %v2594_v0 = vadd.f32 %v2593_v19, %v2565_v52 }
 0x357   : > { %v2606_v7 = vadd.f32 %v3192_v62, %v2594_v0 }
 0x359   : > { %2614 = vst [vmem:[%s5181_s8 + $0x28] sm:$0xff] %v2606_v7 }
 0x377   : > { %v2509_v25 = vpop.f32.mrf.mxu0 }
 0x378   : > { %v2510_v1 = vadd.f32 %v5140_v39, %v2509_v25 }
 0x37c   : > { %v2538_v5 = vpop.f32.mrf.mxu1 }
 0x37d   : > { %v2539_v54 = vadd.f32 %v2538_v5, %v2510_v1 }
 0x37f   : > { %v2511_v49 = vpop.f32.mrf.mxu0 }
 0x380   : > { %v2512_v50 = vadd.f32 %v5140_v39, %v2511_v49 }
 0x384   : > { %v2540_v61 = vpop.f32.mrf.mxu1 }
 0x385   : > { %v2541_v2 = vadd.f32 %v2540_v61, %v2512_v50 }
 0x395   : > { %v2567_v18 = vpop.f32.mrf.mxu2 }
 0x396   : > { %v2568_v37 = vadd.f32 %v2567_v18, %v2539_v54 }
 0x39d   : > { %v2569_v3 = vpop.f32.mrf.mxu2 }
 0x39e   : > { %v2570_v4 = vadd.f32 %v2569_v3, %v2541_v2 }
 0x3a2   : > { %v2596_v60 = vpop.f32.mrf.mxu3 }
 0x3a3   : > { %v2597_v47 = vadd.f32 %v2596_v60, %v2568_v37 }
 0x3a5   : > { %v2607_v53 = vadd.f32 %v3193_v44, %v2597_v47 }
 0x3a7   : > { %2615 = vst [vmem:[%s5181_s8 + $0x30] sm:$0xff] %v2607_v53 }
 0x3aa   : > { %v2598_v39 = vpop.f32.mrf.mxu3 }
 0x3ab   : > { %v2599_v38 = vadd.f32 %v2598_v39, %v2570_v4 }
 0x3ad   : > { %v2608_v10 = vadd.f32 %v3194_v46, %v2599_v38 }
 0x3af   : > { %2616 = vst [vmem:[%s5181_s8 + $0x38] sm:$0xff] %v2608_v10 }
 0x3b0   : > { %3222 = shalt.err (!%p3219_p3)
}
 0x3b1   : > { %s3260_s17 = smov 128   ;;  %s3261_s23 = smov 8  }
 0x3b2   : > { %3060 = dma.vmem_to_hbm [thread:$0]  (%p3340_p5), %s2631_s16, 1024, %s2633_s18, %s2618_s28, %s3260_s17, %s3260_s17, %s3261_s23  }
 0x3b3 PF: > { %p3066_p4 = scmp.ge.s32.totalorder %s3257_s27, 2  ;;  %s2647_s8 = sand.u32 1, %s3245_s24  }
 0x3b4   : > { %s2648_s14 = scalar_lea.sflag [#allocation3], %s2647_s8 }
 0x3b5   : > { %p3063_p7 = pnand %p3066_p4, %p3344_p6 }
 0x3b7   : > { %p3064_p8 = pneg %p3063_p7 }
 0x3b9   : > { %3240 = dma.done.wait (%p3064_p8), %s2648_s14, 1024  }
 0x3ba   : > { %3242 = vsyncadd (%p3064_p8), %s2648_s14, 4294966272  ;;  %p17_p9 = scmp.ge.s32.totalorder %s3327_s30, 4   ;;  %s5387_s24 = smov %s3249_s25 }
 0x3bb   : > { %s5388_s25 = smov %s3253_s26  ;;  %s5389_s26 = smov %s3338_s10 }
 0x3bc   : > { %s5390_s27 = smov %s3327_s30  ;;  %19 = sbr.rel (!%p17_p9) target bundleno = 3 (0x3), region = 83 }
 0x3c1   :  { %2654 = vsyncpa [#allocation3], 1 }
 0x3c2   :  { %2656 = vsyncpa [#allocation3 + $0x1], 1 }

// kernel: channel_mixer.1
= control target key start
LH: loop header
LB: loop body
LE: loop exit
PB: predicated region body
PF: predicated region fallthrough
CT: control target
= control target key end

     0   :  { %12 = vsyncpa [#allocation3], 0  ;;  %s5251_s0 = inlined_call_operand.vmem [shape: f32[128,128], index: 0, kind: input, shape index: {}]   ;;  %s5252_s1 = inlined_call_operand.vmem [shape: f32[1,128], index: 1, kind: input, shape index: {}]   ;;  %s5253_s2 = inlined_call_operand.vmem [shape: f32[1,128], index: 2, kind: input, shape index: {}]   ;;  %s5254_s3 = inlined_call_operand.vmem [shape: bf16[128,512], index: 3, kind: input, shape index: {}]   ;;  %s5255_s4 = inlined_call_operand.vmem [shape: f32[1,512], index: 4, kind: input, shape index: {}]   ;;  %s5256_s5 = inlined_call_operand.vmem [shape: bf16[512,128], index: 5, kind: input, shape index: {}]   ;;  %s5257_s6 = inlined_call_operand.vmem [shape: f32[1,128], index: 6, kind: input, shape index: {}]   ;;  %s5258_s7 = inlined_call_operand.hbm [shape: f32[128,128], index: 7, kind: output, shape index: {}]  }
   0x1   :  { %14 = vsyncpa [#allocation3 + $0x1], 0  ;;  %s3302_s24 = smov 0   ;;  %s3304_s25 = smov 0  }
   0x2   :  { %s3306_s26 = smov 0   ;;  %s3308_s27 = smov 0  }
   0x3 LB: > { %s3323_s28 = sadd.s32 4294967295, %s3257_s27   ;;  %s2695_s29 = sadd.s32 4294967294, %s3257_s27   ;;  %s3257_s27 = sphi %s3308_s27, %s5390_s27   ;;  %s3253_s26 = sphi %s3306_s26, %s5389_s26   ;;  %s3249_s25 = sphi %s3304_s25, %s5388_s25   ;;  %s3245_s24 = sphi %s3302_s24, %s5387_s24  }
   0x4   : > { %s3327_s30 = sadd.s32 1, %s3257_s27   ;;  %s179_s8 = sadd.s32 1, %s3253_s26 }
   0x5   : > { %s176_s9 = ssub.s32 %s3257_s27, %s3327_s30  ;;  %p189_p0 = scmp.ne.s32.totalorder %s3253_s26, %s3249_s25 }
   0x6   : > { %p177_p1 = scmp.eq.s32.totalorder %s176_s9, 0  ;;  %p190_p2 = scmp.eq.s32.totalorder %s3323_s28, 1 }
   0x7   : > { %p195_p3 = scmp.ne.s32.totalorder %s3249_s25, %s3245_s24  ;;  %p196_p4 = scmp.eq.s32.totalorder %s2695_s29, 1 }
   0x8   : > { %s3338_s10 = scalar_select %p177_p1, %s3253_s26, %s179_s8  }
   0x9   : > { %p3340_p5 = por %p190_p2, %p189_p0  ;;  %p3344_p6 = por %p196_p4, %p195_p3 }
   0xa   : > { %p2698_p7 = scmp.ge.s32.totalorder %s3257_s27, 1  ;;  %p241_p8 = scmp.lt.s32.totalorder %s3257_s27, 3 }
   0xc   : > { %p242_p9 = pnand %p2698_p7, %p241_p8 }
   0xe   : > { %245 = sbr.rel (%p242_p9) target bundleno = 947 (0x3b3), region = 48 }
  0x13   : > { %s2700_s13 = sshll.u32 %s3323_s28, 3  ;;  %v3259_v7 = vmov 128.0   ;;  %v2816_v43 = vld [vmem:[%s5254_s3 + $0xe0] sm:$0xf]  ;;  %v3025_v44 = vld [vmem:[%s5254_s3 + $0xec] sm:$0xf0] }
  0x14   : > { %p274_p10 = scmp.lt.s32.totalorder %s2700_s13, 15  ;;  %3105 = vrcp.f32 %v3259_v7  ;;  %v3023_v45 = vld [vmem:[%s5254_s3 + $0xe4] sm:$0xf]  ;;  %v2817_v46 = vor.u32 %v3025_v44, %v2816_v43  ;;  %v2818_v47 = vld [vmem:[%s5254_s3 + $0xf0] sm:$0xf0]  ;;  %s270_s23 = sand.u32 1, %s3249_s25  }
  0x15   : > { %v2824_v48 = vld [vmem:[%s5254_s3 + $0xe8] sm:$0xf]  ;;  %v3026_v49 = vld [vmem:[%s5254_s3 + $0xf4] sm:$0xf0]  ;;  %v2821_v50 = vor.u32 %v3023_v45, %v2818_v47  ;;  %v3024_v52 = vld [vmem:[%s5254_s3 + $0xec] sm:$0xf] }
  0x16   : > { %s5392_s13 = smov (!%p274_p10, %s2700_s13), 15  ;;  %v2825_v51 = vor.u32 %v3026_v49, %v2824_v48  ;;  %v2826_v53 = vld [vmem:[%s5254_s3 + $0xf8] sm:$0xf0]  ;;  %685 = vmatpush.bf16.msra.mxu0 %v2817_v46  ;;  %v2800_v55 = vld [vmem:[%s5254_s3 + $0xc0] sm:$0xf]  ;;  %s2699_s29 = sshll.u32 %s270_s23, 6 }
  0x17   : > { %s2701_s14 = sshll.u32 %s5392_s13, 3  ;;  %v2829_v54 = vor.u32 %v3024_v52, %v2826_v53  ;;  %714 = vmatpush.bf16.msra.mxu1 %v2821_v50  ;;  %v3021_v56 = vld [vmem:[%s5254_s3 + $0xcc] sm:$0xf0]  ;;  %v3019_v57 = vld [vmem:[%s5254_s3 + $0xc4] sm:$0xf]  ;;  %s5181_s8 = scalar_lea.vmem [#allocation2], %s2699_s29 }
  0x18   : > { %s3354_s17 = scalar_lea.vmem %s5251_s0, %s2701_s14  ;;  %743 = vmatpush.bf16.msra.mxu2 %v2825_v51  ;;  %v2801_v58 = vor.u32 %v3021_v56, %v2800_v55  ;;  %v2802_v59 = vld [vmem:[%s5254_s3 + $0xd0] sm:$0xf0]  ;;  %v2808_v60 = vld [vmem:[%s5254_s3 + $0xc8] sm:$0xf]  ;;  %v3022_v61 = vld [vmem:[%s5254_s3 + $0xd4] sm:$0xf0] }
  0x19   : > { %v284_v0 = vld [vmem:[%s3354_s17 + $0x20] sm:$0xff]  ;;  %v282_v1 = vld [vmem:[%s3354_s17 + $0x10] sm:$0xff]  ;;  %v285_v3 = vld [vmem:[%s3354_s17 + $0x28] sm:$0xff]  ;;  %772 = vmatpush.bf16.msra.mxu3 %v2829_v54  ;;  %v2805_v62 = vor.u32 %v3019_v57, %v2802_v59  ;;  %v2809_v63 = vor.u32 %v3022_v61, %v2808_v60  ;;  %s3059_s9 = sshll.u32 %s3323_s28, 6  ;;  %s2630_s16 = sshll.u32 %s5181_s8, 4  ;;  %s2631_s16 = int_to_ptr.vmem [resolvable:$true] %s2630_s16 }
  0x1a   : > { %v280_v2 = vld [vmem:[%s3354_s17] sm:$0xff]  ;;  %296 = vadd.xlane.f32.xlu2 %v284_v0  ;;  %292 = vadd.xlane.f32.xlu1 %v282_v1  ;;  %v283_v4 = vld [vmem:[%s3354_s17 + $0x18] sm:$0xff]  ;;  %v281_v5 = vld [vmem:[%s3354_s17 + $0x8] sm:$0xff]  ;;  %v3106_v8 = vpop.eup %3105  ;;  %s2629_s15 = scalar_lea.hbm %s5258_s7, %s3059_s9  ;;  %s2618_s28 = scalar_lea.sflag [#allocation3], %s270_s23 }
  0x1b   : > { %288 = vadd.xlane.f32.xlu0 %v280_v2  ;;  %v286_v6 = vld [vmem:[%s3354_s17 + $0x30] sm:$0xff]  ;;  %v305_v9 = vmul.f32 128.0, %v3106_v8  ;;  %vm309_vm0 = vweird.f32 %v3106_v8  ;;  %v3381_v30 = vld [vmem:[%s3354_s17 + $0x38] sm:$0xff]  ;;  %686 = vmatpush.bf16.msra.mxu0 %v2801_v58  ;;  %v3008_v45 = vld [vmem:[%s5254_s3 + $0x6c] sm:$0xf]  ;;  %s2632_s18 = sshll.u32 %s2629_s15, 4  ;;  %s2633_s18 = int_to_ptr.hbm [resolvable:$true] %s2632_s18 }
  0x1c   : > { %715 = vmatpush.bf16.msra.mxu1 %v2805_v62  ;;  %744 = vmatpush.bf16.msra.mxu2 %v2809_v63  ;;  %v2786_v7 = vld [vmem:[%s5254_s3 + $0xb0] sm:$0xf0]  ;;  %v2762_v46 = vld [vmem:[%s5254_s3 + $0x78] sm:$0xf0]  ;;  %v2736_v48 = vld [vmem:[%s5254_s3 + $0x40] sm:$0xf] }
  0x1d   : > { %v306_v10 = vsub.f32 1.0, %v305_v9  ;;  %v3018_v9 = vld [vmem:[%s5254_s3 + $0xb4] sm:$0xf0]  ;;  %v2765_v47 = vor.u32 %v3008_v45, %v2762_v46  ;;  %v3005_v49 = vld [vmem:[%s5254_s3 + $0x4c] sm:$0xf0]  ;;  %s3209_s19 = sshra.s32 %s2633_s18, 4  ;;  %s3210_s19 = int_to_ptr.hbm [resolvable:$true] %s3209_s19 }
  0x1e   : > { %v3003_v50 = vld [vmem:[%s5254_s3 + $0x44] sm:$0xf]  ;;  %v2737_v51 = vor.u32 %v3005_v49, %v2736_v48  ;;  %v2738_v52 = vld [vmem:[%s5254_s3 + $0x50] sm:$0xf0]  ;;  %v2744_v53 = vld [vmem:[%s5254_s3 + $0x48] sm:$0xf]  ;;  %p3216_p0 = scmp.lt.s32.totalorder %s3210_s19, %s5258_s7 }
  0x1f   : > { %v307_v11 = vmul.f32 %v3106_v8, %v306_v10  ;;  %v3006_v54 = vld [vmem:[%s5254_s3 + $0x54] sm:$0xf0]  ;;  %v2741_v55 = vor.u32 %v3003_v50, %v2738_v52  ;;  %v3004_v57 = vld [vmem:[%s5254_s3 + $0x4c] sm:$0xf]  ;;  %v2746_v58 = vld [vmem:[%s5254_s3 + $0x58] sm:$0xf0] }
  0x20   : > { %v2745_v56 = vor.u32 %v3006_v54, %v2744_v53  ;;  %v2749_v59 = vor.u32 %v3004_v57, %v2746_v58  ;;  %v2720_v60 = vld [vmem:[%s5254_s3 + $0x20] sm:$0xf]  ;;  %v3001_v61 = vld [vmem:[%s5254_s3 + $0x2c] sm:$0xf0]  ;;  %v2999_v62 = vld [vmem:[%s5254_s3 + $0x24] sm:$0xf] }
  0x21   : > { %v308_v12 = vadd.f32 %v3106_v8, %v307_v11  ;;  %v2721_v63 = vor.u32 %v3001_v61, %v2720_v60  ;;  %s3211_s20 = scalar_lea.hbm %s3210_s19, 64  ;;  %s3215_s29 = scalar_lea.hbm %s5258_s7, 128 }
  0x22   : > { %298 = vadd.xlane.f32.xlu2 %v285_v3  ;;  %294 = vadd.xlane.f32.xlu1 %v283_v4  ;;  %p3212_p11 = scmp.ne.s32.totalorder %s3210_s19, %s3211_s20  ;;  %p3217_p1 = scmp.lt.s32.totalorder %s3215_s29, %s3211_s20 }
  0x23   : > { %290 = vadd.xlane.f32.xlu0 %v281_v5  ;;  %v3363_v13 = vsel %vm309_vm0, %v3106_v8, %v308_v12  ;;  %v2792_v8 = vld [vmem:[%s5254_s3 + $0xa8] sm:$0xf]  ;;  %v3016_v12 = vld [vmem:[%s5254_s3 + $0xac] sm:$0xf] }
  0x24   : > { %v2793_v11 = vor.u32 %v3018_v9, %v2792_v8  ;;  %p3213_p12 = pnand %p3212_p11, %p3340_p5  ;;  %p3218_p2 = por %p3217_p1, %p3216_p0 }
  0x26   : > { %745 = vmatpush.bf16.msra.mxu2 %v2793_v11  ;;  %v2997_v11 = vld [vmem:[%s5254_s3 + $0xc] sm:$0xf0]  ;;  %p3214_p13 = pneg %p3213_p12 }
  0x28   : > { %p3219_p3 = pnand %p3218_p2, %p3214_p13 }
  0x2a   : > { %300 = vadd.xlane.f32.xlu2 %v286_v6 }
  0x8d   : > { %v297_v14 = vpop.xlane.xlu2 %296  ;;  %v293_v15 = vpop.xlane.xlu1 %292 }
  0x8e   : > { %v289_v16 = vpop.xlane.xlu0 %288  ;;  %v315_v26 = vmul.f32 %v3363_v13, %v297_v14  ;;  %v313_v27 = vmul.f32 %v3363_v13, %v293_v15  ;;  %v2794_v14 = vld [vmem:[%s5254_s3 + $0xb8] sm:$0xf0] }
  0x8f   : > { %v311_v17 = vmul.f32 %v3363_v13, %v289_v16  ;;  %v2797_v15 = vor.u32 %v3016_v12, %v2794_v14  ;;  %v2768_v16 = vld [vmem:[%s5254_s3 + $0x80] sm:$0xf]  ;;  %v2995_v12 = vld [vmem:[%s5254_s3 + $0x4] sm:$0xf] }
  0x90   : > { %v3385_v32 = vsub.f32 %v284_v0, %v315_v26  ;;  %v3387_v33 = vsub.f32 %v282_v1, %v313_v27  ;;  %v3020_v0 = vld [vmem:[%s5254_s3 + $0xcc] sm:$0xf]  ;;  %v2810_v1 = vld [vmem:[%s5254_s3 + $0xd8] sm:$0xf0] }
  0x91   : > { %v3366_v18 = vsub.f32 %v280_v2, %v311_v17  ;;  %v2813_v2 = vor.u32 %v3020_v0, %v2810_v1  ;;  %v3013_v17 = vld [vmem:[%s5254_s3 + $0x8c] sm:$0xf0]  ;;  %v3012_v27 = vld [vmem:[%s5254_s3 + $0x8c] sm:$0xf]  ;;  %v2722_v0 = vld [vmem:[%s5254_s3 + $0x30] sm:$0xf0] }
  0x92   : > { %v331_v38 = vmul.f32 %v3385_v32, %v3385_v32  ;;  %v329_v39 = vmul.f32 %v3387_v33, %v3387_v33  ;;  %v2728_v1 = vld [vmem:[%s5254_s3 + $0x28] sm:$0xf] }
  0x93   : > { %v327_v19 = vmul.f32 %v3366_v18, %v3366_v18  ;;  %773 = vmatpush.bf16.msra.mxu3 %v2813_v2  ;;  %v3002_v2 = vld [vmem:[%s5254_s3 + $0x34] sm:$0xf0] }
  0x95   : > { %335 = vadd.xlane.f32.xlu0 %v327_v19  ;;  %v299_v20 = vpop.xlane.xlu2 %298  ;;  %v295_v21 = vpop.xlane.xlu1 %294  ;;  %v3011_v19 = vld [vmem:[%s5254_s3 + $0x84] sm:$0xf] }
  0x96   : > { %v314_v22 = vmul.f32 %v3363_v13, %v295_v21  ;;  %v291_v23 = vpop.xlane.xlu0 %290  ;;  %v316_v37 = vmul.f32 %v3363_v13, %v299_v20  ;;  %v2769_v20 = vor.u32 %v3013_v17, %v2768_v16  ;;  %v2770_v21 = vld [vmem:[%s5254_s3 + $0x90] sm:$0xf0]  ;;  %v2712_v17 = vld [vmem:[%s5254_s3 + $0x8] sm:$0xf] }
  0x97   : > { %v312_v24 = vmul.f32 %v3363_v13, %v291_v23  ;;  %774 = vmatpush.bf16.msra.mxu3 %v2797_v15  ;;  %v3014_v23 = vld [vmem:[%s5254_s3 + $0x94] sm:$0xf0]  ;;  %v2706_v16 = vld [vmem:[%s5254_s3 + $0x10] sm:$0xf0] }
  0x98   : > { %v3372_v25 = vsub.f32 %v283_v4, %v314_v22  ;;  %v3400_v41 = vsub.f32 %v285_v3, %v316_v37  ;;  %v2784_v3 = vld [vmem:[%s5254_s3 + $0xa0] sm:$0xf]  ;;  %v3017_v4 = vld [vmem:[%s5254_s3 + $0xac] sm:$0xf0]  ;;  %v2776_v22 = vld [vmem:[%s5254_s3 + $0x88] sm:$0xf] }
  0x99   : > { %v3376_v28 = vsub.f32 %v281_v5, %v312_v24  ;;  %v3015_v5 = vld [vmem:[%s5254_s3 + $0xa4] sm:$0xf]  ;;  %v2773_v24 = vor.u32 %v3011_v19, %v2770_v21  ;;  %v2777_v26 = vor.u32 %v3014_v23, %v2776_v22  ;;  %v2709_v19 = vor.u32 %v2995_v12, %v2706_v16  ;;  %v2996_v21 = vld [vmem:[%s5254_s3 + $0xc] sm:$0xf]  ;;  %v2714_v22 = vld [vmem:[%s5254_s3 + $0x18] sm:$0xf0] }
  0x9a   : > { %v330_v29 = vmul.f32 %v3372_v25, %v3372_v25  ;;  %v332_v42 = vmul.f32 %v3400_v41, %v3400_v41  ;;  %v2789_v10 = vor.u32 %v3015_v5, %v2786_v7  ;;  %v3007_v37 = vld [vmem:[%s5254_s3 + $0x64] sm:$0xf]  ;;  %v2729_v5 = vor.u32 %v3002_v2, %v2728_v1  ;;  %v2730_v7 = vld [vmem:[%s5254_s3 + $0x38] sm:$0xf0] }
  0x9b   : > { %v328_v31 = vmul.f32 %v3376_v28, %v3376_v28  ;;  %746 = vmatpush.bf16.msra.mxu2 %v2777_v26 }
  0x9c   : > { %341 = vadd.xlane.f32.xlu2 %v330_v29  ;;  %716 = vmatpush.bf16.msra.mxu1 %v2789_v10  ;;  %v2778_v29 = vld [vmem:[%s5254_s3 + $0x98] sm:$0xf0]  ;;  %v2704_v10 = vld [vmem:[%s5254_s3] sm:$0xf] }
  0x9d   : > { %302 = vadd.xlane.f32.xlu0 %v3381_v30  ;;  %337 = vadd.xlane.f32.xlu1 %v328_v31  ;;  %v301_v34 = vpop.xlane.xlu2 %300  ;;  %v2781_v31 = vor.u32 %v3012_v27, %v2778_v29  ;;  %v2705_v15 = vor.u32 %v2997_v11, %v2704_v10 }
  0x9e   : > { %v317_v35 = vmul.f32 %v3363_v13, %v301_v34  ;;  %v2752_v34 = vld [vmem:[%s5254_s3 + $0x60] sm:$0xf] }
  0x9f   : > { %775 = vmatpush.bf16.msra.mxu3 %v2781_v31 }
  0xa0   : > { %v3391_v36 = vsub.f32 %v286_v6, %v317_v35  ;;  %v2785_v6 = vor.u32 %v3017_v4, %v2784_v3  ;;  %717 = vmatpush.bf16.msra.mxu1 %v2773_v24  ;;  %v3009_v35 = vld [vmem:[%s5254_s3 + $0x6c] sm:$0xf0]  ;;  %v2725_v4 = vor.u32 %v2999_v62, %v2722_v0  ;;  %v2717_v24 = vor.u32 %v2996_v21, %v2714_v22 }
  0xa2   : > { %v333_v40 = vmul.f32 %v3391_v36, %v3391_v36  ;;  %687 = vmatpush.bf16.msra.mxu0 %v2785_v6  ;;  %v3000_v6 = vld [vmem:[%s5254_s3 + $0x2c] sm:$0xf] }
  0xa3   : > { %776 = vmatpush.bf16.msra.mxu3 %v2765_v47  ;;  %v2733_v9 = vor.u32 %v3000_v6, %v2730_v7 }
  0xa4   : > { %347 = vadd.xlane.f32.xlu2 %v333_v40  ;;  %v2760_v40 = vld [vmem:[%s5254_s3 + $0x68] sm:$0xf] }
  0xa5   : > { %343 = vadd.xlane.f32.xlu0 %v331_v38  ;;  %339 = vadd.xlane.f32.xlu1 %v329_v39  ;;  %v2753_v38 = vor.u32 %v3009_v35, %v2752_v34  ;;  %v2754_v39 = vld [vmem:[%s5254_s3 + $0x70] sm:$0xf0] }
  0xa6   : > { %688 = vmatpush.bf16.msra.mxu0 %v2769_v20  ;;  %v2757_v43 = vor.u32 %v3007_v37, %v2754_v39  ;;  %v2998_v20 = vld [vmem:[%s5254_s3 + $0x14] sm:$0xf0] }
  0xa7   : > { %777 = vmatpush.bf16.msra.mxu3 %v2749_v59  ;;  %v2713_v23 = vor.u32 %v2998_v20, %v2712_v17 }
  0xa8   : > { %718 = vmatpush.bf16.msra.mxu1 %v2757_v43 }
  0xaa   : > { %689 = vmatpush.bf16.msra.mxu0 %v2753_v38 }
  0xab   : > { %778 = vmatpush.bf16.msra.mxu3 %v2733_v9 }
  0xac   : > { %719 = vmatpush.bf16.msra.mxu1 %v2741_v55 }
  0xad   : > { %345 = vadd.xlane.f32.xlu1 %v332_v42  ;;  %v3010_v42 = vld [vmem:[%s5254_s3 + $0x74] sm:$0xf0] }
  0xae   : > { %v2761_v44 = vor.u32 %v3010_v42, %v2760_v40  ;;  %690 = vmatpush.bf16.msra.mxu0 %v2737_v51 }
  0xaf   : > { %779 = vmatpush.bf16.msra.mxu3 %v2717_v24 }
  0xb0   : > { %747 = vmatpush.bf16.msra.mxu2 %v2761_v44  ;;  %720 = vmatpush.bf16.msra.mxu1 %v2725_v4 }
  0xb2   : > { %691 = vmatpush.bf16.msra.mxu0 %v2721_v63 }
  0xb4   : > { %748 = vmatpush.bf16.msra.mxu2 %v2745_v56  ;;  %721 = vmatpush.bf16.msra.mxu1 %v2709_v19 }
  0xb6   : > { %692 = vmatpush.bf16.msra.mxu0 %v2705_v15 }
  0xb8   : > { %749 = vmatpush.bf16.msra.mxu2 %v2729_v5  ;;  %v3623_v5 = vld [vmem:[%s5252_s1] ss:$0 sm:$0xff] }
  0xbc   : > { %750 = vmatpush.bf16.msra.mxu2 %v2713_v23 }
 0x108   : > { %v336_v3 = vpop.xlane.xlu0 %335 }
 0x109   : > { %v351_v8 = vmul.f32 %v336_v3, %v3363_v13 }
 0x10b   : > { %v359_v14 = vadd.f32 1e-05, %v351_v8 }
 0x10d   : > { %3107 = vrsqrt.f32 %v359_v14  ;;  %vm373_vm2 = vweird.f32 %v359_v14 }
 0x10f   : > { %v342_v26 = vpop.xlane.xlu2 %341 }
 0x110   : > { %v354_v27 = vmul.f32 %v342_v26, %v3363_v13  ;;  %v338_v29 = vpop.xlane.xlu1 %337  ;;  %v303_v31 = vpop.xlane.xlu0 %302 }
 0x111   : > { %v352_v34 = vmul.f32 %v338_v29, %v3363_v13  ;;  %v318_v35 = vmul.f32 %v3363_v13, %v303_v31 }
 0x112   : > { %v3600_v37 = vadd.f32 1e-05, %v354_v27 }
 0x113   : > { %v3108_v38 = vpop.eup %3107  ;;  %v360_v39 = vadd.f32 1e-05, %v352_v34  ;;  %v3603_v40 = vsub.f32 %v3381_v30, %v318_v35 }
 0x114   : > { %v368_v42 = vmul.f32 %v3108_v38, %v359_v14  ;;  %3109 = vrsqrt.f32 %v3600_v37  ;;  %vm374_vm1 = vweird.f32 %v3108_v38  ;;  %vm403_vm9 = vweird.f32 %v3600_v37 }
 0x115   : > { %3111 = vrsqrt.f32 %v360_v39  ;;  %v334_v43 = vmul.f32 %v3603_v40, %v3603_v40  ;;  %vm375_vm3 = vmor %vm373_vm2, %vm374_vm1  ;;  %vm383_vm4 = vweird.f32 %v360_v39 }
 0x116   : > { %v369_v44 = vmul.f32 %v3108_v38, %v368_v42 }
 0x117   : > { %349 = vadd.xlane.f32.xlu0 %v334_v43 }
 0x118   : > { %v370_v45 = vmul.f32 0.5, %v369_v44  ;;  %v340_v46 = vpop.xlane.xlu1 %339  ;;  %v344_v48 = vpop.xlane.xlu0 %343 }
 0x119   : > { %v353_v47 = vmul.f32 %v340_v46, %v3363_v13  ;;  %v355_v53 = vmul.f32 %v344_v48, %v3363_v13 }
 0x11a   : > { %v3609_v49 = vpop.eup %3109  ;;  %v371_v50 = vsub.f32 1.5, %v370_v45 }
 0x11b   : > { %v3112_v51 = vpop.eup %3111  ;;  %v361_v30 = vadd.f32 1e-05, %v353_v47  ;;  %v398_v55 = vmul.f32 %v3609_v49, %v3600_v37  ;;  %v3614_v58 = vadd.f32 1e-05, %v355_v53  ;;  %vm404_vm10 = vweird.f32 %v3609_v49 }
 0x11c   : > { %v378_v52 = vmul.f32 %v3112_v51, %v360_v39  ;;  %v372_v54 = vmul.f32 %v3108_v38, %v371_v50  ;;  %vm384_vm5 = vweird.f32 %v3112_v51  ;;  %vm405_vm12 = vmor %vm403_vm9, %vm404_vm10 }
 0x11d   : > { %3113 = vrsqrt.f32 %v361_v30  ;;  %v399_v61 = vmul.f32 %v3609_v49, %v398_v55  ;;  %vm385_vm6 = vmor %vm383_vm4, %vm384_vm5  ;;  %vm393_vm7 = vweird.f32 %v361_v30  ;;  %vm413_vm15 = vweird.f32 %v3614_v58 }
 0x11e   : > { %v379_v56 = vmul.f32 %v3112_v51, %v378_v52  ;;  %v376_v60 = vsel %vm375_vm3, %v3108_v38, %v372_v54  ;;  %3115 = vrsqrt.f32 %v3614_v58 }
 0x11f   : > { %v447_v2 = vmul.f32 %v376_v60, %v3366_v18  ;;  %v400_v6 = vmul.f32 0.5, %v399_v61  ;;  %v3630_v18 = vld [vmem:[%s5253_s2] ss:$0 sm:$0xff] }
 0x120   : > { %v380_v57 = vmul.f32 0.5, %v379_v56  ;;  %v346_v59 = vpop.xlane.xlu1 %345  ;;  %v348_v56 = vpop.xlane.xlu2 %347 }
 0x121   : > { %v356_v62 = vmul.f32 %v346_v59, %v3363_v13  ;;  %v459_v11 = vmul.f32 %v3623_v5, %v447_v2  ;;  %v401_v12 = vsub.f32 1.5, %v400_v6 }
 0x122   : > { %v381_v63 = vsub.f32 1.5, %v380_v57  ;;  %v357_v57 = vmul.f32 %v348_v56, %v3363_v13 }
 0x123   : > { %v3114_v0 = vpop.eup %3113  ;;  %v364_v1 = vadd.f32 1e-05, %v356_v62  ;;  %v471_v20 = vadd.f32 %v3630_v18, %v459_v11  ;;  %v402_v21 = vmul.f32 %v3609_v49, %v401_v12 }
 0x124   : > { %v382_v3 = vmul.f32 %v3112_v51, %v381_v63  ;;  %v388_v4 = vmul.f32 %v3114_v0, %v361_v30  ;;  %vm394_vm8 = vweird.f32 %v3114_v0  ;;  %v3116_v15 = vpop.eup %3115 }
 0x125   : > { %3117 = vrsqrt.f32 %v364_v1  ;;  %vm395_vm11 = vmor %vm393_vm7, %vm394_vm8  ;;  %v408_v22 = vmul.f32 %v3116_v15, %v3614_v58  ;;  %v406_v29 = vsel %vm405_vm12, %v3609_v49, %v402_v21  ;;  %vm423_vm13 = vweird.f32 %v364_v1 }
 0x126   : > { %v386_v7 = vsel %vm385_vm6, %v3112_v51, %v382_v3  ;;  %v389_v8 = vmul.f32 %v3114_v0, %v388_v4  ;;  %v450_v37 = vmul.f32 %v406_v29, %v3372_v25  ;;  %vm414_vm0 = vweird.f32 %v3116_v15 }
 0x127   : > { %v448_v9 = vmul.f32 %v386_v7, %v3376_v28  ;;  %v409_v31 = vmul.f32 %v3116_v15, %v408_v22  ;;  %vm415_vm2 = vmor %vm413_vm15, %vm414_vm0  ;;  %v365_v58 = vadd.f32 1e-05, %v357_v57 }
 0x128   : > { %v390_v10 = vmul.f32 0.5, %v389_v8  ;;  %v462_v43 = vmul.f32 %v3623_v5, %v450_v37 }
 0x129   : > { %v460_v14 = vmul.f32 %v3623_v5, %v448_v9  ;;  %v410_v38 = vmul.f32 0.5, %v409_v31  ;;  %3119 = vrsqrt.f32 %v365_v58  ;;  %vm433_vm3 = vweird.f32 %v365_v58 }
 0x12a   : > { %v391_v16 = vsub.f32 1.5, %v390_v10 }
 0x12b   : > { %v472_v28 = vadd.f32 %v3630_v18, %v460_v14  ;;  %v3118_v17 = vpop.eup %3117  ;;  %v411_v44 = vsub.f32 1.5, %v410_v38 }
 0x12c   : > { %v392_v19 = vmul.f32 %v3114_v0, %v391_v16  ;;  %v418_v23 = vmul.f32 %v3118_v17, %v364_v1  ;;  %vm424_vm14 = vweird.f32 %v3118_v17 }
 0x12d   : > { %v479_v24 = vpack.c.bf16 %v472_v28, %v471_v20  ;;  %vm425_vm1 = vmor %vm423_vm13, %vm424_vm14  ;;  %v412_v47 = vmul.f32 %v3116_v15, %v411_v44 }
 0x12e   : > { %v396_v26 = vsel %vm395_vm11, %v3114_v0, %v392_v19  ;;  %v419_v27 = vmul.f32 %v3118_v17, %v418_v23 }
 0x12f   : > { %693 = vmatmul.bf16.vlgmr.msra.gmra.mxu0 %v479_v24  ;;  %722 = vmatmul.bf16.vlgmr.msra.gmra.mxu1 %v479_v24  ;;  %v449_v34 = vmul.f32 %v396_v26, %v3387_v33  ;;  %v474_v33 = vadd.f32 %v3630_v18, %v462_v43  ;;  %v416_v49 = vsel %vm415_vm2, %v3116_v15, %v412_v47 }
 0x130   : > { %751 = vmatmul.bf16.vlgmr.msra.gmra.mxu2 %v479_v24  ;;  %780 = vmatmul.bf16.vlgmr.msra.gmra.mxu3 %v479_v24  ;;  %v420_v35 = vmul.f32 0.5, %v419_v27  ;;  %v451_v51 = vmul.f32 %v416_v49, %v3385_v32 }
 0x131   : > { %v461_v39 = vmul.f32 %v3623_v5, %v449_v34 }
 0x132   : > { %v421_v42 = vsub.f32 1.5, %v420_v35  ;;  %v463_v52 = vmul.f32 %v3623_v5, %v451_v51 }
 0x133   : > { %v473_v45 = vadd.f32 %v3630_v18, %v461_v39 }
 0x134   : > { %v422_v46 = vmul.f32 %v3118_v17, %v421_v42  ;;  %v475_v54 = vadd.f32 %v3630_v18, %v463_v52 }
 0x135   : > { %v480_v25 = vpack.c.bf16 %v474_v33, %v473_v45 }
 0x136   : > { %v426_v48 = vsel %vm425_vm1, %v3118_v17, %v422_v46  ;;  %v515_v17 = vld [vmem:[%s5255_s4] sm:$0xf] }
 0x137   : > { %v452_v50 = vmul.f32 %v426_v48, %v3400_v41  ;;  %v3120_v41 = vpop.eup %3119  ;;  %v3680_v23 = vperm.slane %v515_v17, 2  ;;  %v3682_v24 = vperm.slane %v515_v17, 3 }
 0x138   : > { %v428_v32 = vmul.f32 %v3120_v41, %v365_v58  ;;  %vm434_vm4 = vweird.f32 %v3120_v41 }
 0x139   : > { %v464_v30 = vmul.f32 %v3623_v5, %v452_v50  ;;  %vm435_vm5 = vmor %vm433_vm3, %vm434_vm4  ;;  %5283 = vst [vmem:[#allocation7_spill] sm:$0xff] %v3680_v23 }
 0x13a   : > { %v429_v59 = vmul.f32 %v3120_v41, %v428_v32  ;;  %5284 = vst [vmem:[#allocation8_spill] sm:$0xff] %v3682_v24 }
 0x13b   : > { %v476_v53 = vadd.f32 %v3630_v18, %v464_v30 }
 0x13c   : > { %v430_v63 = vmul.f32 0.5, %v429_v59 }
 0x13d   : > { %v481_v55 = vpack.c.bf16 %v476_v53, %v475_v54 }
 0x13e   : > { %v431_v0 = vsub.f32 1.5, %v430_v63 }
 0x13f   : > { %698 = vmatmul.bf16.gmra.mxu0 %v480_v25  ;;  %727 = vmatmul.bf16.gmra.mxu1 %v480_v25 }
 0x140   : > { %756 = vmatmul.bf16.gmra.mxu2 %v480_v25  ;;  %785 = vmatmul.bf16.gmra.mxu3 %v480_v25  ;;  %v432_v2 = vmul.f32 %v3120_v41, %v431_v0 }
 0x142   : > { %v436_v6 = vsel %vm435_vm5, %v3120_v41, %v432_v2 }
 0x143   : > { %v453_v9 = vmul.f32 %v436_v6, %v3391_v36  ;;  %v3664_v36 = vperm.slane %v515_v17, 0 }
 0x145   : > { %v465_v12 = vmul.f32 %v3623_v5, %v453_v9  ;;  %5281 = vst [vmem:[#allocation5_spill] sm:$0xff] %v3664_v36 }
 0x147   : > { %v477_v15 = vadd.f32 %v3630_v18, %v465_v12 }
 0x14f   : > { %703 = vmatmul.bf16.gmra.mxu0 %v481_v55  ;;  %732 = vmatmul.bf16.gmra.mxu1 %v481_v55 }
 0x150   : > { %761 = vmatmul.bf16.gmra.mxu2 %v481_v55  ;;  %790 = vmatmul.bf16.gmra.mxu3 %v481_v55 }
 0x18a   : > { %v350_v60 = vpop.xlane.xlu0 %349 }
 0x18b   : > { %v358_v61 = vmul.f32 %v350_v60, %v3363_v13 }
 0x18d   : > { %v366_v62 = vadd.f32 1e-05, %v358_v61 }
 0x18f   : > { %3121 = vrsqrt.f32 %v366_v62  ;;  %vm443_vm7 = vweird.f32 %v366_v62 }
 0x195   : > { %v3122_v1 = vpop.eup %3121 }
 0x196   : > { %v438_v3 = vmul.f32 %v3122_v1, %v366_v62  ;;  %vm444_vm6 = vweird.f32 %v3122_v1 }
 0x197   : > { %vm445_vm8 = vmor %vm443_vm7, %vm444_vm6 }
 0x198   : > { %v439_v4 = vmul.f32 %v3122_v1, %v438_v3 }
 0x19a   : > { %v440_v7 = vmul.f32 0.5, %v439_v4 }
 0x19c   : > { %v441_v8 = vsub.f32 1.5, %v440_v7 }
 0x19e   : > { %v442_v10 = vmul.f32 %v3122_v1, %v441_v8 }
 0x1a0   : > { %v446_v13 = vsel %vm445_vm8, %v3122_v1, %v442_v10 }
 0x1a1   : > { %v454_v11 = vmul.f32 %v446_v13, %v3603_v40  ;;  %v3666_v40 = vperm.slane %v515_v17, 1 }
 0x1a3   : > { %v466_v14 = vmul.f32 %v3623_v5, %v454_v11  ;;  %5282 = vst [vmem:[#allocation6_spill] sm:$0xff] %v3666_v40 }
 0x1a5   : > { %v478_v16 = vadd.f32 %v3630_v18, %v466_v14 }
 0x1a7   : > { %v482_v28 = vpack.c.bf16 %v478_v16, %v477_v15 }
 0x1a9   : > { %708 = vmatmul.bf16.gmra.mxu0 %v482_v28  ;;  %737 = vmatmul.bf16.gmra.mxu1 %v482_v28 }
 0x1aa   : > { %766 = vmatmul.bf16.gmra.mxu2 %v482_v28  ;;  %795 = vmatmul.bf16.gmra.mxu3 %v482_v28 }
 0x1ac   : > { %v694_v19 = vpop.f32.mrf.mxu0  ;;  %v723_v20 = vpop.f32.mrf.mxu1 }
 0x1ad   : > { %v3669_v5 = vadd.f32 %v694_v19, %v3664_v36  ;;  %v3672_v18 = vadd.f32 %v723_v20, %v3666_v40 }
 0x1af   : > { %v3675_v21 = vmul.f32 0.70710677, %v3669_v5  ;;  %v3678_v22 = vmul.f32 0.70710677, %v3672_v18 }
 0x1b1   : > { %v865_v26 = vmul.f32 %v3675_v21, %v3675_v21  ;;  %v905_v27 = vmul.f32 %v3678_v22, %v3678_v22 }
 0x1b3   : > { %v3688_v29 = vmin.f32 %v865_v26, 16.0  ;;  %v3690_v31 = vmin.f32 %v905_v27, 16.0  ;;  %v752_v34 = vpop.f32.mrf.mxu2  ;;  %v781_v35 = vpop.f32.mrf.mxu3 }
 0x1b4   : > { %v3693_v37 = vadd.f32 %v752_v34, %v3680_v23  ;;  %v3696_v38 = vadd.f32 %v781_v35, %v3682_v24  ;;  %v696_v59 = vpop.f32.mrf.mxu0 }
 0x1b5   : > { %v867_v39 = vmul.f32 2.1237322e-06, %v3688_v29  ;;  %v878_v42 = vmul.f32 3.8918573e-05, %v3688_v29  ;;  %v907_v43 = vmul.f32 2.1237322e-06, %v3690_v31  ;;  %v3726_v3 = vadd.f32 %v696_v59, %v3664_v36 }
 0x1b6   : > { %v918_v44 = vmul.f32 3.8918573e-05, %v3690_v31  ;;  %v3703_v45 = vmul.f32 0.70710677, %v3693_v37  ;;  %v3708_v49 = vmul.f32 0.70710677, %v3696_v38 }
 0x1b7   : > { %v868_v46 = vadd.f32 0.00028619796, %v867_v39  ;;  %v879_v33 = vadd.f32 0.001143296, %v878_v42  ;;  %v908_v47 = vadd.f32 0.00028619796, %v907_v43 }
 0x1b8   : > { %v919_v25 = vadd.f32 0.001143296, %v918_v44  ;;  %v945_v48 = vmul.f32 %v3703_v45, %v3703_v45  ;;  %v985_v54 = vmul.f32 %v3708_v49, %v3708_v49  ;;  %v3736_v16 = vmul.f32 0.70710677, %v3726_v3 }
 0x1b9   : > { %v869_v50 = vmul.f32 %v868_v46, %v3688_v29  ;;  %v880_v51 = vmul.f32 %v879_v33, %v3688_v29  ;;  %v909_v30 = vmul.f32 %v908_v47, %v3690_v31 }
 0x1ba   : > { %v920_v52 = vmul.f32 %v919_v25, %v3690_v31  ;;  %v3714_v53 = vmin.f32 %v945_v48, 16.0  ;;  %v3720_v32 = vmin.f32 %v985_v54, 16.0  ;;  %v1025_v44 = vmul.f32 %v3736_v16, %v3736_v16 }
 0x1bb   : > { %v881_v55 = vadd.f32 0.014752088, %v880_v51  ;;  %v870_v58 = vadd.f32 0.0036580483, %v869_v50  ;;  %v910_v60 = vadd.f32 0.0036580483, %v909_v30  ;;  %v725_v50 = vpop.f32.mrf.mxu1 }
 0x1bc   : > { %v921_v56 = vadd.f32 0.014752088, %v920_v52  ;;  %v958_v57 = vmul.f32 3.8918573e-05, %v3714_v53  ;;  %v947_v0 = vmul.f32 2.1237322e-06, %v3714_v53 }
 0x1bd   : > { %v882_v41 = vmul.f32 %v881_v55, %v3688_v29  ;;  %v871_v4 = vmul.f32 %v870_v58, %v3688_v29  ;;  %v998_v7 = vmul.f32 3.8918573e-05, %v3720_v32  ;;  %v911_v8 = vmul.f32 %v910_v60, %v3690_v31 }
 0x1be   : > { %v922_v61 = vmul.f32 %v921_v56, %v3690_v31  ;;  %v959_v62 = vadd.f32 0.001143296, %v958_v57  ;;  %v948_v11 = vadd.f32 0.00028619796, %v947_v0  ;;  %v987_v12 = vmul.f32 2.1237322e-06, %v3720_v32 }
 0x1bf   : > { %v883_v63 = vadd.f32 0.112945676, %v882_v41  ;;  %v872_v28 = vadd.f32 0.05243302, %v871_v4  ;;  %v999_v19 = vadd.f32 0.001143296, %v998_v7  ;;  %v726_v57 = vadd.f32 %v725_v50, %v3666_v40 }
 0x1c0   : > { %v923_v1 = vadd.f32 0.112945676, %v922_v61  ;;  %v960_v2 = vmul.f32 %v959_v62, %v3714_v53  ;;  %v912_v20 = vadd.f32 0.05243302, %v911_v8  ;;  %v949_v35 = vmul.f32 %v948_v11, %v3714_v53  ;;  %v754_v11 = vpop.f32.mrf.mxu2 }
 0x1c1   : > { %v884_v6 = vmul.f32 %v883_v63, %v3688_v29  ;;  %v988_v39 = vadd.f32 0.00028619796, %v987_v12  ;;  %v873_v46 = vmul.f32 %v872_v28, %v3688_v29  ;;  %v1000_v33 = vmul.f32 %v999_v19, %v3720_v32 }
 0x1c2   : > { %v924_v9 = vmul.f32 %v923_v1, %v3690_v31  ;;  %v961_v10 = vadd.f32 0.014752088, %v960_v2  ;;  %v913_v47 = vmul.f32 %v912_v20, %v3690_v31  ;;  %v950_v25 = vadd.f32 0.0036580483, %v949_v35 }
 0x1c3   : > { %v885_v13 = vadd.f32 0.4994258, %v884_v6  ;;  %v989_v48 = vmul.f32 %v988_v39, %v3720_v32  ;;  %v3754_v30 = vmin.f32 %v1025_v44, 16.0  ;;  %v874_v52 = vadd.f32 0.18741608, %v873_v46 }
 0x1c4   : > { %v925_v14 = vadd.f32 0.4994258, %v924_v9  ;;  %v962_v15 = vmul.f32 %v961_v10, %v3714_v53  ;;  %v1001_v54 = vadd.f32 0.014752088, %v1000_v33  ;;  %v914_v55 = vadd.f32 0.18741608, %v913_v47 }
 0x1c5   : > { %v886_v17 = vmul.f32 %v885_v13, %v3688_v29  ;;  %v951_v41 = vmul.f32 %v950_v25, %v3714_v53  ;;  %v990_v59 = vadd.f32 0.0036580483, %v989_v48  ;;  %v1038_v62 = vmul.f32 3.8918573e-05, %v3754_v30 }
 0x1c6   : > { %v926_v26 = vmul.f32 %v925_v14, %v3690_v31  ;;  %v963_v27 = vadd.f32 0.112945676, %v962_v15  ;;  %v1002_v60 = vmul.f32 %v1001_v54, %v3720_v32  ;;  %v875_v0 = vmul.f32 %v874_v52, %v3688_v29 }
 0x1c7   : > { %v3740_v34 = vadd.f32 1.0, %v886_v17  ;;  %v3771_v4 = vmul.f32 0.5, %v3669_v5  ;;  %v3774_v6 = vmul.f32 0.5, %v3672_v18  ;;  %v915_v7 = vmul.f32 %v914_v55, %v3690_v31 }
 0x1c8   : > { %v3743_v42 = vadd.f32 1.0, %v926_v26  ;;  %v964_v43 = vmul.f32 %v963_v27, %v3714_v53  ;;  %v1003_v2 = vadd.f32 0.112945676, %v1002_v60  ;;  %v3777_v8 = vmul.f32 0.70710677, %v726_v57 }
 0x1c9   : > { %3123 = vrcp.f32 %v3740_v34  ;;  %v3780_v9 = vmul.f32 0.5, %v3693_v37  ;;  %v952_v10 = vadd.f32 0.05243302, %v951_v41  ;;  %v991_v29 = vmul.f32 %v990_v59, %v3720_v32 }
 0x1ca   : > { %3125 = vrcp.f32 %v3743_v42  ;;  %v965_v51 = vadd.f32 0.4994258, %v964_v43  ;;  %v1004_v13 = vmul.f32 %v1003_v2, %v3720_v32  ;;  %v3788_v18 = vmul.f32 0.5, %v3696_v38 }
 0x1cb   : > { %v1039_v31 = vadd.f32 0.001143296, %v1038_v62  ;;  %v876_v12 = vadd.f32 1.1283791, %v875_v0  ;;  %v3791_v37 = vmul.f32 0.5, %v3726_v3  ;;  %v1065_v19 = vmul.f32 %v3777_v8, %v3777_v8 }
 0x1cc   : > { %v966_v56 = vmul.f32 %v965_v51, %v3714_v53  ;;  %v1005_v15 = vadd.f32 0.4994258, %v1004_v13  ;;  %v916_v28 = vadd.f32 1.1283791, %v915_v7  ;;  %v755_v20 = vadd.f32 %v754_v11, %v3680_v23 }
 0x1cd   : > { %v1040_v17 = vmul.f32 %v1039_v31, %v3754_v30  ;;  %v897_v26 = vand.u32 2147483647, %v3740_v34  ;;  %v953_v38 = vmul.f32 %v952_v10, %v3714_v53  ;;  %v992_v27 = vadd.f32 0.05243302, %v991_v29 }
 0x1ce   : > { %v3762_v61 = vadd.f32 1.0, %v966_v56  ;;  %v1006_v35 = vmul.f32 %v1005_v15, %v3720_v32  ;;  %v1027_v43 = vmul.f32 2.1237322e-06, %v3754_v30  ;;  %v3801_v44 = vmul.f32 0.5, %v726_v57 }
 0x1cf   : > { %v3758_v58 = vpop.eup %3123  ;;  %v1041_v3 = vadd.f32 0.014752088, %v1040_v17  ;;  %v877_v46 = vmul.f32 %v876_v12, %v3675_v21  ;;  %vm893_vm9 = vweird.f32 %v3740_v34  ;;  %v3806_v47 = vmin.f32 %v1065_v19, 16.0 }
 0x1d0   : > { %v3765_v63 = vpop.eup %3125  ;;  %v889_v1 = vmul.f32 %v3758_v58, %v3740_v34  ;;  %3127 = vrcp.f32 %v3762_v61  ;;  %v899_v48 = vand.u32 2147483648, %v3740_v34  ;;  %v3812_v50 = vmul.f32 %v916_v28, %v3678_v22 }
 0x1d1   : > { %v929_v5 = vmul.f32 %v3765_v63, %v3743_v42  ;;  %v3814_v51 = vadd.f32 1.0, %v1006_v35  ;;  %v3816_v52 = vmul.f32 0.70710677, %v755_v20  ;;  %vm933_vm10 = vweird.f32 %v3743_v42 }
 0x1d2   : > { %v890_v14 = vsub.f32 1.0, %v889_v1  ;;  %v954_v21 = vadd.f32 0.18741608, %v953_v38  ;;  %v993_v54 = vmul.f32 %v992_v27, %v3720_v32  ;;  %v1042_v55 = vmul.f32 %v1041_v3, %v3754_v30 }
 0x1d3   : > { %v930_v39 = vsub.f32 1.0, %v929_v5  ;;  %vm894_vm11 = vweird.f32 %v3758_v58  ;;  %vm3822_vm12 = vcmp.eq.f32.partialorder %v897_v26, 8.507059e+37  ;;  %v1028_v57 = vadd.f32 0.00028619796, %v1027_v43 }
 0x1d4   : > { %v891_v33 = vmul.f32 %v3758_v58, %v890_v14  ;;  %3129 = vrcp.f32 %v3814_v51  ;;  %v1067_v60 = vmul.f32 2.1237322e-06, %v3806_v47  ;;  %v937_v62 = vand.u32 2147483647, %v3743_v42  ;;  %vm3843_vm13 = vmor %vm893_vm9, %vm894_vm11 }
 0x1d5   : > { %v931_v22 = vmul.f32 %v3765_v63, %v930_v39  ;;  %v939_v0 = vand.u32 2147483648, %v3743_v42  ;;  %v1043_v1 = vadd.f32 0.112945676, %v1042_v55  ;;  %v1105_v2 = vmul.f32 %v3816_v52, %v3816_v52  ;;  %v783_v42 = vpop.f32.mrf.mxu3 }
 0x1d6   : > { %v3808_v25 = vpop.eup %3127  ;;  %v892_v41 = vadd.f32 %v3758_v58, %v891_v33  ;;  %v900_v7 = vor.u32 1.1754944e-38, %v899_v48  ;;  %v955_v10 = vmul.f32 %v954_v21, %v3714_v53  ;;  %v994_v29 = vadd.f32 0.18741608, %v993_v54 }
 0x1d7   : > { %v969_v59 = vmul.f32 %v3808_v25, %v3762_v61  ;;  %v3837_v13 = vmul.f32 0.5, %v755_v20  ;;  %vm934_vm14 = vweird.f32 %v3765_v63  ;;  %v1029_v5 = vmul.f32 %v1028_v57, %v3754_v30 }
 0x1d8   : > { %v1044_v31 = vmul.f32 %v1043_v1, %v3754_v30  ;;  %v1078_v12 = vmul.f32 3.8918573e-05, %v3806_v47  ;;  %v896_v53 = vsel %vm3843_vm13, %v3758_v58, %v892_v41  ;;  %v932_v14 = vadd.f32 %v3765_v63, %v931_v22  ;;  %vm3871_vm0 = vmor %vm933_vm10, %vm934_vm14 }
 0x1d9   : > { %v970_v15 = vsub.f32 1.0, %v969_v59  ;;  %v1068_v34 = vadd.f32 0.00028619796, %v1067_v60  ;;  %vm3855_vm15 = vcmp.eq.f32.partialorder %v937_v62, 8.507059e+37  ;;  %v3859_v20 = vmin.f32 %v1105_v2, 16.0 }
 0x1da   : > { %v1045_v17 = vadd.f32 0.4994258, %v1044_v31  ;;  %v1079_v19 = vadd.f32 0.001143296, %v1078_v12  ;;  %v3861_v26 = vpop.eup %3129  ;;  %v940_v38 = vor.u32 1.1754944e-38, %v939_v0  ;;  %v995_v58 = vmul.f32 %v994_v29, %v3720_v32 }
 0x1db   : > { %v956_v27 = vadd.f32 1.1283791, %v955_v10  ;;  %v977_v35 = vand.u32 2147483647, %v3762_v61  ;;  %v901_v39 = vsel %vm3822_vm12, %v900_v7, %v896_v53  ;;  %v1030_v3 = vadd.f32 0.0036580483, %v1029_v5 }
 0x1dc   : > { %v1046_v33 = vmul.f32 %v1045_v17, %v3754_v30  ;;  %v1080_v48 = vmul.f32 %v1079_v19, %v3806_v47  ;;  %v936_v32 = vsel %vm3871_vm0, %v3765_v63, %v932_v14  ;;  %v971_v21 = vmul.f32 %v3808_v25, %v970_v15  ;;  %v699_v17 = vpop.f32.mrf.mxu0 }
 0x1dd   : > { %v979_v54 = vand.u32 2147483648, %v3762_v61  ;;  %v1069_v55 = vmul.f32 %v1068_v34, %v3806_v47  ;;  %v1009_v56 = vmul.f32 %v3861_v26, %v3814_v51  ;;  %v1118_v41 = vmul.f32 3.8918573e-05, %v3859_v20 }
 0x1de   : > { %v3885_v22 = vadd.f32 1.0, %v1046_v33  ;;  %v1081_v57 = vadd.f32 0.014752088, %v1080_v48  ;;  %v902_v59 = vmul.f32 %v901_v39, %v877_v46  ;;  %v957_v60 = vmul.f32 %v956_v27, %v3703_v45 }
 0x1df   : > { %vm973_vm1 = vweird.f32 %v3762_v61  ;;  %v996_v63 = vadd.f32 1.1283791, %v995_v58  ;;  %v941_v62 = vsel %vm3855_vm15, %v940_v38, %v936_v32  ;;  %vm3892_vm2 = vcmp.eq.f32.partialorder %v977_v35, 8.507059e+37 }
 0x1e0   : > { %v1031_v1 = vmul.f32 %v1030_v3, %v3754_v30  ;;  %3131 = vrcp.f32 %v3885_v22  ;;  %v3899_v2 = vadd.f32 %v783_v42, %v3682_v24  ;;  %v980_v46 = vor.u32 1.1754944e-38, %v979_v54 }
 0x1e1   : > { %v1070_v7 = vadd.f32 0.0036580483, %v1069_v55  ;;  %v1082_v45 = vmul.f32 %v1081_v57, %v3806_v47  ;;  %v1107_v10 = vmul.f32 2.1237322e-06, %v3859_v20  ;;  %v972_v29 = vadd.f32 %v3808_v25, %v971_v21 }
 0x1e2   : > { %vm974_vm3 = vweird.f32 %v3808_v25  ;;  %v1010_v11 = vsub.f32 1.0, %v1009_v56  ;;  %v1119_v5 = vadd.f32 0.001143296, %v1118_v41  ;;  %v2830_v31 = vclamps-f32 %v902_v59, 1.0 }
 0x1e3   : > { %v942_v12 = vmul.f32 %v941_v62, %v3812_v50  ;;  %v3907_v53 = vmul.f32 %v996_v63, %v3708_v49  ;;  %v1083_v14 = vadd.f32 0.112945676, %v1082_v45  ;;  %vm1013_vm4 = vweird.f32 %v3814_v51  ;;  %vm3916_vm5 = vmor %vm973_vm1, %vm974_vm3 }
 0x1e4   : > { %v1032_v15 = vadd.f32 0.05243302, %v1031_v1  ;;  %v1120_v34 = vmul.f32 %v1119_v5, %v3859_v20  ;;  %v3912_v28 = vmul.f32 0.70710677, %v3899_v2  ;;  %v1017_v50 = vand.u32 2147483647, %v3814_v51 }
 0x1e5   : > { %v1071_v49 = vmul.f32 %v1070_v7, %v3806_v47  ;;  %v1084_v38 = vmul.f32 %v1083_v14, %v3806_v47  ;;  %v1108_v27 = vadd.f32 0.00028619796, %v1107_v10  ;;  %v976_v58 = vsel %vm3916_vm5, %v3808_v25, %v972_v29 }
 0x1e6   : > { %v3923_v35 = vpop.eup %3131  ;;  %v1011_v39 = vmul.f32 %v3861_v26, %v1010_v11  ;;  %v1121_v61 = vadd.f32 0.014752088, %v1120_v34  ;;  %v1145_v43 = vmul.f32 %v3912_v28, %v3912_v28  ;;  %v2831_v3 = vclamps-f32 %v942_v12, 1.0 }
 0x1e7   : > { %v1019_v33 = vand.u32 2147483648, %v3814_v51  ;;  %v1049_v48 = vmul.f32 %v3923_v35, %v3885_v22  ;;  %v3935_v32 = vadd.f32 %v699_v17, %v3664_v36  ;;  %v1033_v21 = vmul.f32 %v1032_v15, %v3754_v30 }
 0x1e8   : > { %v1085_v54 = vadd.f32 0.4994258, %v1084_v38  ;;  %v1122_v25 = vmul.f32 %v1121_v61, %v3859_v20  ;;  %v3939_v55 = vmin.f32 %v1145_v43, 16.0  ;;  %v981_v42 = vsel %vm3892_vm2, %v980_v46, %v976_v58  ;;  %v728_v46 = vpop.f32.mrf.mxu1 }
 0x1e9   : > { %vm1014_vm6 = vweird.f32 %v3861_v26  ;;  %v1072_v56 = vadd.f32 0.05243302, %v1071_v49  ;;  %v1109_v57 = vmul.f32 %v1108_v27, %v3859_v20  ;;  %v1012_v41 = vadd.f32 %v3861_v26, %v1011_v39 }
 0x1ea   : > { %v1086_v59 = vmul.f32 %v1085_v54, %v3806_v47  ;;  %v1123_v63 = vadd.f32 0.112945676, %v1122_v25  ;;  %v1147_v62 = vmul.f32 2.1237322e-06, %v3939_v55  ;;  %v3948_v1 = vadd.f32 1.0, %v2830_v31  ;;  %vm3961_vm7 = vmor %vm1013_vm4, %vm1014_vm6 }
 0x1eb   : > { %v1050_v7 = vsub.f32 1.0, %v1049_v48  ;;  %v1158_v45 = vmul.f32 3.8918573e-05, %v3939_v55  ;;  %v3952_v0 = vmul.f32 0.70710677, %v3935_v32  ;;  %v982_v10 = vmul.f32 %v981_v42, %v957_v60 }
 0x1ec   : > { %v3954_v29 = vadd.f32 1.0, %v1086_v59  ;;  %v1124_v11 = vmul.f32 %v1123_v63, %v3859_v20  ;;  %v1148_v5 = vadd.f32 0.00028619796, %v1147_v62  ;;  %v1020_v12 = vor.u32 1.1754944e-38, %v1019_v33 }
 0x1ed   : > { %v1073_v14 = vmul.f32 %v1072_v56, %v3806_v47  ;;  %v1110_v15 = vadd.f32 0.0036580483, %v1109_v57  ;;  %v1159_v34 = vadd.f32 0.001143296, %v1158_v45  ;;  %v1016_v60 = vsel %vm3961_vm7, %v3861_v26, %v1012_v41  ;;  %v757_v56 = vpop.f32.mrf.mxu2 }
 0x1ee   : > { %v1034_v17 = vadd.f32 0.18741608, %v1033_v21  ;;  %3133 = vrcp.f32 %v3954_v29  ;;  %v3971_v19 = vadd.f32 %v728_v46, %v3666_v40  ;;  %v1051_v51 = vmul.f32 %v3923_v35, %v1050_v7 }
 0x1ef   : > { %v1125_v49 = vadd.f32 0.4994258, %v1124_v11  ;;  %v1149_v38 = vmul.f32 %v1148_v5, %v3939_v55  ;;  %v1185_v27 = vmul.f32 %v3952_v0, %v3952_v0  ;;  %v2146_v58 = vadd.f32 1.0, %v2831_v3 }
 0x1f0   : > { %v2832_v39 = vclamps-f32 %v982_v10, 1.0  ;;  %vm1018_vm8 = vcmp.eq.f32.partialorder %v1017_v50, 8.507059e+37  ;;  %v1160_v61 = vmul.f32 %v1159_v34, %v3939_v55  ;;  %v1074_v43 = vadd.f32 0.18741608, %v1073_v14 }
 0x1f1   : > { %v1021_v26 = vsel %vm1018_vm8, %v1020_v12, %v1016_v60  ;;  %v1111_v33 = vmul.f32 %v1110_v15, %v3859_v20  ;;  %v1126_v48 = vmul.f32 %v1125_v49, %v3859_v20  ;;  %v1035_v21 = vmul.f32 %v1034_v17, %v3754_v30  ;;  %v3034_v12 = vld [vmem:[%s5256_s5 + $0x38] sm:$0xff] }
 0x1f2   : > { %v1150_v54 = vadd.f32 0.0036580483, %v1149_v38  ;;  %v1161_v25 = vadd.f32 0.014752088, %v1160_v61  ;;  %v3982_v42 = vmul.f32 0.70710677, %v3971_v19  ;;  %v1052_v3 = vadd.f32 %v3923_v35, %v1051_v51  ;;  %2485 = vmatpush.bf16.msrb.mxu0 %v3034_v12 }
 0x1f3   : > { %vm1054_vm9 = vweird.f32 %v3923_v35  ;;  %v1059_v50 = vand.u32 2147483648, %v3885_v22  ;;  %v3987_v57 = vmin.f32 %v1185_v27, 16.0  ;;  %v1022_v59 = vmul.f32 %v1021_v26, %v3907_v53  ;;  %v3033_v26 = vld [vmem:[%s5256_s5 + $0x30] sm:$0xff] }
 0x1f4   : > { %v3989_v41 = vpop.eup %3133  ;;  %v3992_v63 = vadd.f32 1.0, %v1126_v48  ;;  %v1162_v30 = vmul.f32 %v1161_v25, %v3939_v55  ;;  %v1225_v62 = vmul.f32 %v3982_v42, %v3982_v42  ;;  %vm1053_vm10 = vweird.f32 %v3885_v22 }
 0x1f5   : > { %v1057_v7 = vand.u32 2147483647, %v3885_v22  ;;  %v1112_v45 = vadd.f32 0.05243302, %v1111_v33  ;;  %v4000_v46 = vadd.f32 %v757_v56, %v3680_v23  ;;  %v2147_v10 = vadd.f32 1.0, %v2832_v39  ;;  %vm4002_vm11 = vmor %vm1053_vm10, %vm1054_vm9 }
 0x1f6   : > { %v1036_v11 = vadd.f32 1.1283791, %v1035_v21  ;;  %v1075_v53 = vmul.f32 %v1074_v43, %v3806_v47  ;;  %v1151_v31 = vmul.f32 %v1150_v54, %v3939_v55  ;;  %v1056_v22 = vsel %vm4002_vm11, %v3923_v35, %v1052_v3  ;;  %v3042_v47 = vld [vmem:[%s5256_s5 + $0x78] sm:$0xff]  ;;  %v3041_v43 = vld [vmem:[%s5256_s5 + $0x70] sm:$0xff]  ;;  %2486 = vmatpush.bf16.msrb.mxu0 %v3033_v26 }
 0x1f7   : > { %v1089_v14 = vmul.f32 %v3989_v41, %v3954_v29  ;;  %v1163_v15 = vadd.f32 0.112945676, %v1162_v30  ;;  %v1187_v34 = vmul.f32 2.1237322e-06, %v3987_v57  ;;  %v2833_v60 = vclamps-f32 %v1022_v59, 1.0  ;;  %2514 = vmatpush.bf16.msrb.mxu1 %v3042_v47  ;;  %v786_v59 = vpop.f32.mrf.mxu3 }
 0x1f8   : > { %v1060_v17 = vor.u32 1.1754944e-38, %v1059_v50  ;;  %3135 = vrcp.f32 %v3992_v63  ;;  %v4021_v51 = vmin.f32 %v1225_v62, 16.0  ;;  %vm1058_vm12 = vcmp.eq.f32.partialorder %v1057_v7, 8.507059e+37 }
 0x1f9   : > { %v1113_v35 = vmul.f32 %v1112_v45, %v3859_v20  ;;  %v1164_v49 = vmul.f32 %v1163_v15, %v3939_v55  ;;  %v4026_v38 = vmul.f32 0.70710677, %v4000_v46  ;;  %v1076_v39 = vadd.f32 1.1283791, %v1075_v53  ;;  %v701_v15 = vpop.f32.mrf.mxu0 }
 0x1fa   : > { %v1061_v27 = vsel %vm1058_vm12, %v1060_v17, %v1056_v22  ;;  %v1152_v61 = vadd.f32 0.05243302, %v1151_v31  ;;  %v1090_v33 = vsub.f32 1.0, %v1089_v14  ;;  %v1188_v21 = vadd.f32 0.00028619796, %v1187_v34 }
 0x1fb   : > { %v1165_v48 = vadd.f32 0.4994258, %v1164_v49  ;;  %v1265_v54 = vmul.f32 %v4026_v38, %v4026_v38  ;;  %v4038_v25 = vmul.f32 %v3948_v1, %v3771_v4  ;;  %v2148_v56 = vadd.f32 1.0, %v2833_v60  ;;  %2515 = vmatpush.bf16.msrb.mxu1 %v3041_v43  ;;  %v3050_v4 = vld [vmem:[%s5256_s5 + $0xb8] sm:$0xff] }
 0x1fc   : > { %v1037_v3 = vmul.f32 %v1036_v11, %v3736_v16  ;;  %v1227_v50 = vmul.f32 2.1237322e-06, %v4021_v51  ;;  %v4043_v30 = vmul.f32 %v2146_v58, %v3774_v6  ;;  %v1114_v62 = vadd.f32 0.18741608, %v1113_v35  ;;  %v3058_v16 = vld [vmem:[%s5256_s5 + $0xf8] sm:$0xff]  ;;  %2543 = vmatpush.bf16.msrb.mxu2 %v3050_v4 }
 0x1fd   : > { %v1166_v7 = vmul.f32 %v1165_v48, %v3939_v55  ;;  %v4046_v45 = vmin.f32 %v1265_v54, 16.0  ;;  %v4057_v11 = vmul.f32 %v2147_v10, %v3780_v9  ;;  %v4060_v58 = vmul.f32 %v1076_v39, %v3777_v8  ;;  %2572 = vmatpush.bf16.msrb.mxu3 %v3058_v16 }
 0x1fe   : > { %v4054_v1 = vpop.eup %3135  ;;  %v1062_v6 = vmul.f32 %v1061_v27, %v1037_v3  ;;  %v1153_v5 = vmul.f32 %v1152_v61, %v3939_v55  ;;  %v1091_v53 = vmul.f32 %v3989_v41, %v1090_v33  ;;  %v4065_v31 = vmul.f32 0.5, %v3899_v2 }
 0x1ff   : > { %v1189_v12 = vmul.f32 %v1188_v21, %v3987_v57  ;;  %v4069_v22 = vadd.f32 %v786_v59, %v3682_v24  ;;  %v4072_v9 = vmul.f32 %v2148_v56, %v3788_v18  ;;  %v4075_v8 = vmul.f32 0.5, %v3935_v32  ;;  %v730_v21 = vpop.f32.mrf.mxu1  ;;  %v3040_v59 = vld [vmem:[%s5256_s5 + $0x68] sm:$0xff] }
 0x200   : > { %v1228_v10 = vadd.f32 0.00028619796, %v1227_v50  ;;  %v1267_v14 = vmul.f32 2.1237322e-06, %v4046_v45  ;;  %v1097_v2 = vand.u32 2147483647, %v3954_v29  ;;  %v1115_v34 = vmul.f32 %v1114_v62, %v3859_v20  ;;  %2516 = vmatpush.bf16.msrb.mxu1 %v3040_v59 }
 0x201   : > { %5301 = vst [vmem:[#allocation9_spill] sm:$0xff] %v4075_v8  ;;  %v1129_v47 = vmul.f32 %v4054_v1, %v3992_v63  ;;  %v4082_v60 = vadd.f32 1.0, %v1166_v7  ;;  %v2834_v17 = vclamps-f32 %v1062_v6, 1.0  ;;  %vm1094_vm13 = vweird.f32 %v3989_v41  ;;  %v3032_v50 = vld [vmem:[%s5256_s5 + $0x28] sm:$0xff] }
 0x202   : > { %v1099_v18 = vand.u32 2147483648, %v3954_v29  ;;  %v1154_v32 = vadd.f32 0.18741608, %v1153_v5  ;;  %v1092_v35 = vadd.f32 %v3989_v41, %v1091_v53  ;;  %v1190_v49 = vadd.f32 0.0036580483, %v1189_v12  ;;  %2487 = vmatpush.bf16.msrb.mxu0 %v3032_v50  ;;  %v3057_v12 = vld [vmem:[%s5256_s5 + $0xf0] sm:$0xff] }
 0x203   : > { %v4088_v27 = vmul.f32 0.70710677, %v4069_v22  ;;  %v4091_v39 = vadd.f32 %v701_v15, %v3664_v36  ;;  %vm1093_vm14 = vweird.f32 %v3954_v29  ;;  %v4095_v20 = vmul.f32 0.5, %v3971_v19  ;;  %2573 = vmatpush.bf16.msrb.mxu3 %v3057_v12 }
 0x204   : > { %v1229_v61 = vmul.f32 %v1228_v10, %v4021_v51  ;;  %v1268_v26 = vadd.f32 0.00028619796, %v1267_v14  ;;  %v1116_v43 = vadd.f32 1.1283791, %v1115_v34  ;;  %v1130_v33 = vsub.f32 1.0, %v1129_v47  ;;  %vm4103_vm15 = vmor %vm1093_vm14, %vm1094_vm13  ;;  %v759_v34 = vpop.f32.mrf.mxu2 }
 0x205   : > { %5302 = vst [vmem:[#allocation10_spill] sm:$0xff] %v4095_v20  ;;  %3137 = vrcp.f32 %v4082_v60  ;;  %v1305_v48 = vmul.f32 %v4088_v27, %v4088_v27  ;;  %v2149_v54 = vadd.f32 1.0, %v2834_v17  ;;  %vm4107_vm0 = vcmp.eq.f32.partialorder %v1097_v2, 8.507059e+37 }
 0x206   : > { %v1100_v19 = vor.u32 1.1754944e-38, %v1099_v18  ;;  %v1155_v3 = vmul.f32 %v1154_v32, %v3939_v55  ;;  %v1096_v62 = vsel %vm4103_vm15, %v3989_v41, %v1092_v35  ;;  %v1191_v7 = vmul.f32 %v1190_v49, %v3987_v57  ;;  %v3049_v41 = vld [vmem:[%s5256_s5 + $0xb0] sm:$0xff] }
 0x207   : > { %v4122_v4 = vmin.f32 %v1305_v48, 16.0  ;;  %v4125_v16 = vmul.f32 0.70710677, %v4091_v39  ;;  %v1137_v55 = vand.u32 2147483647, %v3992_v63  ;;  %v1269_v5 = vmul.f32 %v1268_v26, %v4046_v45  ;;  %2544 = vmatpush.bf16.msrb.mxu2 %v3049_v41 }
 0x208   : > { %v1230_v6 = vadd.f32 0.0036580483, %v1229_v61  ;;  %v4130_v53 = vadd.f32 %v730_v21, %v3666_v40  ;;  %v4139_v10 = vmul.f32 %v1116_v43, %v3816_v52  ;;  %v1131_v14 = vmul.f32 %v4054_v1, %v1130_v33  ;;  %v3031_v52 = vld [vmem:[%s5256_s5 + $0x20] sm:$0xff]  ;;  %v3029_v43 = vld [vmem:[%s5256_s5 + $0x10] sm:$0xff] }
 0x209   : > { %v4143_v15 = vmul.f32 0.5, %v4000_v46  ;;  %v1345_v2 = vmul.f32 %v4125_v16, %v4125_v16  ;;  %v1101_v47 = vsel %vm4107_vm0, %v1100_v19, %v1096_v62  ;;  %vm1133_vm1 = vweird.f32 %v3992_v63  ;;  %v3039_v46 = vld [vmem:[%s5256_s5 + $0x60] sm:$0xff]  ;;  %2488 = vmatpush.bf16.msrb.mxu0 %v3031_v52  ;;  %v788_v62 = vpop.f32.mrf.mxu3 }
 0x20a   : > { %v1139_v17 = vand.u32 2147483648, %v3992_v63  ;;  %v1307_v18 = vmul.f32 2.1237322e-06, %v4122_v4  ;;  %v4161_v35 = vmul.f32 %v2149_v54, %v3791_v37  ;;  %v1156_v49 = vadd.f32 1.1283791, %v1155_v3  ;;  %2517 = vmatpush.bf16.msrb.mxu1 %v3039_v46  ;;  %v3056_v63 = vld [vmem:[%s5256_s5 + $0xe8] sm:$0xff] }
 0x20b   : > { %5307 = vst [vmem:[#allocation11_spill] sm:$0xff] %v4143_v15  ;;  %v4158_v32 = vpop.eup %3137  ;;  %v1192_v61 = vadd.f32 0.05243302, %v1191_v7  ;;  %v4163_v26 = vmin.f32 %v1345_v2, 16.0  ;;  %vm4165_vm2 = vcmp.eq.f32.partialorder %v1137_v55, 8.507059e+37  ;;  %v1231_v33 = vmul.f32 %v1230_v6, %v4021_v51  ;;  %2574 = vmatpush.bf16.msrb.mxu3 %v3056_v63 }
 0x20c   : > { %v1270_v48 = vadd.f32 0.0036580483, %v1269_v5  ;;  %v4171_v21 = vmul.f32 0.70710677, %v4130_v53  ;;  %v4174_v56 = vadd.f32 %v759_v34, %v3680_v23  ;;  %v1102_v37 = vmul.f32 %v1101_v47, %v4060_v58  ;;  %v704_v34 = vpop.f32.mrf.mxu0  ;;  %v762_v15 = vpop.f32.mrf.mxu2 }
 0x20d   : > { %v1132_v54 = vadd.f32 %v4054_v1, %v1131_v14  ;;  %vm1134_vm3 = vweird.f32 %v4054_v1  ;;  %v1347_v29 = vmul.f32 2.1237322e-06, %v4163_v26  ;;  %v1169_v19 = vmul.f32 %v4158_v32, %v4082_v60 }
 0x20e   : > { %v1308_v3 = vadd.f32 0.00028619796, %v1307_v18  ;;  %v1385_v50 = vmul.f32 %v4171_v21, %v4171_v21  ;;  %v4185_v59 = vmul.f32 0.70710677, %v4174_v56  ;;  %v1140_v7 = vor.u32 1.1754944e-38, %v1139_v17  ;;  %vm4193_vm4 = vmor %vm1133_vm1, %vm1134_vm3 }
 0x20f   : > { %v4188_v58 = vmul.f32 %v1156_v49, %v3912_v28  ;;  %v1193_v55 = vmul.f32 %v1192_v61, %v3987_v57  ;;  %v1348_v6 = vadd.f32 0.00028619796, %v1347_v29  ;;  %v1232_v41 = vadd.f32 0.05243302, %v1231_v33  ;;  %v3048_v28 = vld [vmem:[%s5256_s5 + $0xa8] sm:$0xff] }
 0x210   : > { %v1271_v12 = vmul.f32 %v1270_v48, %v4046_v45  ;;  %v4198_v14 = vmin.f32 %v1385_v50, 16.0  ;;  %v1425_v2 = vmul.f32 %v4185_v59, %v4185_v59  ;;  %v2835_v47 = vclamps-f32 %v1102_v37, 1.0  ;;  %2545 = vmatpush.bf16.msrb.mxu2 %v3048_v28  ;;  %v3030_v48 = vld [vmem:[%s5256_s5 + $0x18] sm:$0xff] }
 0x211   : > { %v1136_v17 = vsel %vm4193_vm4, %v4054_v1, %v1132_v54  ;;  %v4212_v18 = vmul.f32 0.5, %v4069_v22  ;;  %v4215_v52 = vadd.f32 %v788_v62, %v3682_v24  ;;  %v1170_v46 = vsub.f32 1.0, %v1169_v19  ;;  %v3038_v1 = vld [vmem:[%s5256_s5 + $0x58] sm:$0xff]  ;;  %v733_v19 = vpop.f32.mrf.mxu1  ;;  %2489 = vmatpush.bf16.msrb.mxu0 %v3030_v48 }
 0x212   : > { %v1309_v49 = vmul.f32 %v1308_v3, %v4122_v4  ;;  %v1387_v61 = vmul.f32 2.1237322e-06, %v4198_v14  ;;  %v4219_v33 = vmin.f32 %v1425_v2, 16.0  ;;  %v1177_v22 = vand.u32 2147483647, %v4082_v60  ;;  %2518 = vmatpush.bf16.msrb.mxu1 %v3038_v1 }
 0x213   : > { %5312 = vst [vmem:[#allocation12_spill] sm:$0xff] %v4212_v18  ;;  %v1194_v37 = vadd.f32 0.18741608, %v1193_v55  ;;  %v1349_v54 = vmul.f32 %v1348_v6, %v4163_v26  ;;  %v4230_v29 = vadd.f32 %v704_v34, %v3664_v36  ;;  %vm1173_vm5 = vweird.f32 %v4082_v60  ;;  %v3047_v55 = vld [vmem:[%s5256_s5 + $0xa0] sm:$0xff] }
 0x214   : > { %v1179_v3 = vand.u32 2147483648, %v4082_v60  ;;  %v1233_v50 = vmul.f32 %v1232_v41, %v4021_v51  ;;  %v1272_v62 = vadd.f32 0.05243302, %v1271_v12  ;;  %v1427_v5 = vmul.f32 2.1237322e-06, %v4219_v33  ;;  %v3055_v41 = vld [vmem:[%s5256_s5 + $0xe0] sm:$0xff]  ;;  %2546 = vmatpush.bf16.msrb.mxu2 %v3047_v55 }
 0x215   : > { %v4239_v6 = vadd.f32 1.0, %v2835_v47  ;;  %v1141_v2 = vsel %vm4165_vm2, %v1140_v7, %v1136_v17  ;;  %v1388_v34 = vadd.f32 0.00028619796, %v1387_v61  ;;  %v4244_v28 = vmul.f32 0.70710677, %v4215_v52  ;;  %v3037_v7 = vld [vmem:[%s5256_s5 + $0x50] sm:$0xff]  ;;  %2575 = vmatpush.bf16.msrb.mxu3 %v3055_v41  ;;  %2490 = vmatpush.bf16.msrb.mxu0 %v3029_v43 }
 0x216   : > { %v1171_v12 = vmul.f32 %v4158_v32, %v1170_v46  ;;  %v1310_v63 = vadd.f32 0.0036580483, %v1309_v49  ;;  %v1428_v48 = vadd.f32 0.00028619796, %v1427_v5  ;;  %v4251_v1 = vadd.f32 %v733_v19, %v3666_v40  ;;  %2519 = vmatpush.bf16.msrb.mxu1 %v3037_v7  ;;  %v3027_v60 = vld [vmem:[%s5256_s5] sm:$0xff] }
 0x217   : > { %v1195_v47 = vmul.f32 %v1194_v37, %v3987_v57  ;;  %v1350_v17 = vadd.f32 0.0036580483, %v1349_v54  ;;  %v1465_v46 = vmul.f32 %v4244_v28, %v4244_v28  ;;  %v4263_v49 = vmul.f32 0.70710677, %v4230_v29  ;;  %v3046_v37 = vld [vmem:[%s5256_s5 + $0x98] sm:$0xff] }
 0x218   : > { %5313 = vst [vmem:[#allocation13_spill] sm:$0xff] %v4251_v1  ;;  %v1142_v61 = vmul.f32 %v1141_v2, %v4139_v10  ;;  %vm4266_vm6 = vcmp.eq.f32.partialorder %v1177_v22, 8.507059e+37  ;;  %v1180_v5 = vor.u32 1.1754944e-38, %v1179_v3  ;;  %v1234_v55 = vadd.f32 0.18741608, %v1233_v50  ;;  %v3054_v54 = vld [vmem:[%s5256_s5 + $0xd8] sm:$0xff]  ;;  %2547 = vmatpush.bf16.msrb.mxu2 %v3046_v37 }
 0x219   : > { %5314 = vst [vmem:[#allocation14_spill] sm:$0xff] %v4263_v49  ;;  %v1273_v18 = vmul.f32 %v1272_v62, %v4046_v45  ;;  %v1389_v10 = vmul.f32 %v1388_v34, %v4198_v14  ;;  %v1429_v22 = vmul.f32 %v1428_v48, %v4219_v33  ;;  %v4279_v2 = vmin.f32 %v1465_v46, 16.0  ;;  %v3028_v34 = vld [vmem:[%s5256_s5 + $0x8] sm:$0xff]  ;;  %2576 = vmatpush.bf16.msrb.mxu3 %v3054_v54 }
 0x21a   : > { %v1505_v3 = vmul.f32 %v4263_v49, %v4263_v49  ;;  %v1172_v50 = vadd.f32 %v4158_v32, %v1171_v12  ;;  %vm1174_vm7 = vweird.f32 %v4158_v32  ;;  %v1311_v62 = vmul.f32 %v1310_v63, %v4122_v4  ;;  %v3036_v48 = vld [vmem:[%s5256_s5 + $0x48] sm:$0xff]  ;;  %2491 = vmatpush.bf16.msrb.mxu0 %v3028_v34  ;;  %v791_v34 = vpop.f32.mrf.mxu3 }
 0x21b   : > { %v4287_v41 = vmul.f32 0.70710677, %v4251_v1  ;;  %v1196_v43 = vadd.f32 1.1283791, %v1195_v47  ;;  %v1351_v7 = vmul.f32 %v1350_v17, %v4163_v26  ;;  %v1467_v12 = vmul.f32 2.1237322e-06, %v4279_v2  ;;  %2520 = vmatpush.bf16.msrb.mxu1 %v3036_v48  ;;  %vm4314_vm8 = vmor %vm1173_vm5, %vm1174_vm7 }
 0x21c   : > { %v4298_v46 = vadd.f32 %v762_v15, %v3680_v23  ;;  %v2836_v63 = vclamps-f32 %v1142_v61, 1.0  ;;  %v1274_v1 = vadd.f32 0.18741608, %v1273_v18  ;;  %v4300_v37 = vmin.f32 %v1505_v3, 16.0  ;;  %v3045_v47 = vld [vmem:[%s5256_s5 + $0x90] sm:$0xff] }
 0x21d   : > { %5317 = vst [vmem:[#allocation15_spill] sm:$0xff] %v4287_v41  ;;  %v1545_v20 = vmul.f32 %v4287_v41, %v4287_v41  ;;  %v3053_v17 = vld [vmem:[%s5256_s5 + $0xd0] sm:$0xff]  ;;  %v1235_v18 = vmul.f32 %v1234_v55, %v4021_v51  ;;  %v1390_v61 = vadd.f32 0.0036580483, %v1389_v10  ;;  %v1430_v54 = vadd.f32 0.0036580483, %v1429_v22  ;;  %2548 = vmatpush.bf16.msrb.mxu2 %v3045_v47 }
 0x21e   : > { %5318 = vst [vmem:[#allocation16_spill] sm:$0xff] %v4298_v46  ;;  %v1468_v3 = vadd.f32 0.00028619796, %v1467_v12  ;;  %v1176_v48 = vsel %vm4314_vm8, %v4158_v32, %v1172_v50  ;;  %v1312_v8 = vadd.f32 0.05243302, %v1311_v62  ;;  %v4330_v55 = vmul.f32 %v4239_v6, %v3801_v44  ;;  %2577 = vmatpush.bf16.msrb.mxu3 %v3053_v17  ;;  %v706_v6 = vpop.f32.mrf.mxu0  ;;  %2492 = vmatpush.bf16.msrb.mxu0 %v3027_v60  ;;  %v3051_v60 = vld [vmem:[%s5256_s5 + $0xc0] sm:$0xff] }
 0x21f   : > { %v1507_v41 = vmul.f32 2.1237322e-06, %v4300_v37  ;;  %v4323_v49 = vmin.f32 %v1545_v20, 16.0  ;;  %v1352_v10 = vadd.f32 0.05243302, %v1351_v7  ;;  %v3035_v20 = vld [vmem:[%s5256_s5 + $0x40] sm:$0xff]  ;;  %v4340_v50 = vmul.f32 %v1196_v43, %v3952_v0 }
 0x220   : > { %v1469_v22 = vmul.f32 %v1468_v3, %v4279_v2  ;;  %v4334_v12 = vmul.f32 0.70710677, %v4298_v46  ;;  %v2151_v32 = vadd.f32 1.0, %v2836_v63  ;;  %v4343_v62 = vmul.f32 0.5, %v4091_v39  ;;  %2521 = vmatpush.bf16.msrb.mxu1 %v3035_v20  ;;  %v3044_v0 = vld [vmem:[%s5256_s5 + $0x88] sm:$0xff] }
 0x221   : > { %v4346_v44 = vadd.f32 %v791_v34, %v3682_v24  ;;  %v1181_v7 = vsel %vm4266_vm6, %v1180_v5, %v1176_v48  ;;  %v1391_v47 = vmul.f32 %v1390_v61, %v4198_v14  ;;  %v1431_v17 = vmul.f32 %v1430_v54, %v4219_v33  ;;  %v3052_v39 = vld [vmem:[%s5256_s5 + $0xc8] sm:$0xff]  ;;  %2549 = vmatpush.bf16.msrb.mxu2 %v3044_v0  ;;  %v3043_v48 = vld [vmem:[%s5256_s5 + $0x80] sm:$0xff] }
 0x222   : > { %5321 = vst [vmem:[#allocation17_spill] sm:$0xff] %v4334_v12  ;;  %v1508_v15 = vadd.f32 0.00028619796, %v1507_v41  ;;  %v1236_v43 = vadd.f32 1.1283791, %v1235_v18  ;;  %v1275_v63 = vmul.f32 %v1274_v1, %v4046_v45  ;;  %v1313_v19 = vmul.f32 %v1312_v8, %v4122_v4  ;;  %2578 = vmatpush.bf16.msrb.mxu3 %v3052_v39 }
 0x223   : > { %5322 = vst [vmem:[#allocation18_spill] sm:$0xff] %v4346_v44  ;;  %v1547_v5 = vmul.f32 2.1237322e-06, %v4323_v49  ;;  %v1353_v61 = vmul.f32 %v1352_v10, %v4163_v26  ;;  %v1470_v54 = vadd.f32 0.0036580483, %v1469_v22  ;;  %v1585_v41 = vmul.f32 %v4334_v12, %v4334_v12 }
 0x224   : > { %v4365_v3 = vadd.f32 %v706_v6, %v3664_v36  ;;  %v4368_v34 = vmul.f32 %v2151_v32, %v3837_v13  ;;  %v1182_v1 = vmul.f32 %v1181_v7, %v4188_v58  ;;  %v4372_v8 = vmul.f32 0.5, %v4130_v53  ;;  %v735_v53 = vpop.f32.mrf.mxu1 }
 0x225   : > { %v4375_v18 = vmul.f32 0.70710677, %v4346_v44  ;;  %v1392_v10 = vadd.f32 0.05243302, %v1391_v47  ;;  %v4384_v13 = vmul.f32 0.5, %v4174_v56  ;;  %v1509_v58 = vmul.f32 %v1508_v15, %v4300_v37  ;;  %2550 = vmatpush.bf16.msrb.mxu2 %v3043_v48 }
 0x226   : > { %v1432_v22 = vadd.f32 0.05243302, %v1431_v17  ;;  %v4388_v20 = vmul.f32 %v1236_v43, %v3982_v42  ;;  %v1276_v32 = vadd.f32 1.1283791, %v1275_v63  ;;  %v1314_v6 = vadd.f32 0.18741608, %v1313_v19  ;;  %2579 = vmatpush.bf16.msrb.mxu3 %v3051_v60 }
 0x227   : > { %5323 = vst [vmem:[#allocation19_spill] sm:$0xff] %v4375_v18  ;;  %v1548_v7 = vadd.f32 0.00028619796, %v1547_v5  ;;  %v1354_v0 = vadd.f32 0.18741608, %v1353_v61  ;;  %v1471_v39 = vmul.f32 %v1470_v54, %v4279_v2  ;;  %v4391_v44 = vmin.f32 %v1585_v41, 16.0  ;;  %v764_v61 = vpop.f32.mrf.mxu2 }
 0x228   : > { %v4394_v47 = vmul.f32 0.70710677, %v4365_v3  ;;  %v2837_v56 = vclamps-f32 %v1182_v1, 1.0  ;;  %v4397_v17 = vmul.f32 0.5, %v4215_v52  ;;  %v1625_v42 = vmul.f32 %v4375_v18, %v4375_v18 }
 0x229   : > { %v4402_v15 = vadd.f32 %v735_v53, %v3666_v40  ;;  %v1393_v43 = vmul.f32 %v1392_v10, %v4198_v14  ;;  %v1433_v63 = vmul.f32 %v1432_v22, %v4219_v33  ;;  %v1510_v19 = vadd.f32 0.0036580483, %v1509_v58 }
 0x22a   : > { %v1665_v5 = vmul.f32 %v4394_v47, %v4394_v47  ;;  %v4409_v54 = vmul.f32 %v1276_v32, %v4026_v38  ;;  %v1315_v52 = vmul.f32 %v1314_v6, %v4122_v4  ;;  %v1549_v41 = vmul.f32 %v1548_v7, %v4323_v49 }
 0x22b   : > { %5324 = vst [vmem:[#allocation20_spill] sm:$0xff] %v4402_v15  ;;  %v4414_v1 = vmul.f32 0.70710677, %v4402_v15  ;;  %v1355_v48 = vmul.f32 %v1354_v0, %v4163_v26  ;;  %v1472_v60 = vadd.f32 0.05243302, %v1471_v39  ;;  %v2152_v58 = vadd.f32 1.0, %v2837_v56 }
 0x22c   : > { %v1587_v10 = vmul.f32 2.1237322e-06, %v4391_v44  ;;  %v4418_v22 = vmin.f32 %v1665_v5, 16.0  ;;  %v4420_v53 = vmin.f32 %v1625_v42, 16.0  ;;  %v4425_v32 = vadd.f32 %v764_v61, %v3680_v23  ;;  %v793_v61 = vpop.f32.mrf.mxu3 }
 0x22d   : > { %v1705_v38 = vmul.f32 %v4414_v1, %v4414_v1  ;;  %v1394_v6 = vadd.f32 0.18741608, %v1393_v43  ;;  %v1434_v7 = vadd.f32 0.18741608, %v1433_v63  ;;  %v1511_v18 = vmul.f32 %v1510_v19, %v4300_v37 }
 0x22e   : > { %5325 = vst [vmem:[#allocation21_spill] sm:$0xff] %v4425_v32  ;;  %v1667_v0 = vmul.f32 2.1237322e-06, %v4418_v22  ;;  %v1316_v39 = vadd.f32 1.1283791, %v1315_v52  ;;  %v4430_v46 = vmul.f32 0.5, %v4230_v29  ;;  %v1473_v40 = vmul.f32 %v1472_v60, %v4279_v2 }
 0x22f   : > { %v1550_v5 = vadd.f32 0.0036580483, %v1549_v41  ;;  %v4432_v56 = vmin.f32 %v1705_v38, 16.0  ;;  %v1356_v42 = vadd.f32 1.1283791, %v1355_v48  ;;  %v2184_v43 = vmul.f32 %v2152_v58, %v4065_v31 }
 0x230   : > { %v1588_v36 = vadd.f32 0.00028619796, %v1587_v10  ;;  %v1668_v12 = vadd.f32 0.00028619796, %v1667_v0  ;;  %v1627_v63 = vmul.f32 2.1237322e-06, %v4420_v53  ;;  %v1395_v29 = vmul.f32 %v1394_v6, %v4198_v14 }
 0x231   : > { %v1707_v19 = vmul.f32 2.1237322e-06, %v4432_v56  ;;  %v4439_v52 = vmul.f32 0.70710677, %v4425_v32  ;;  %v1435_v41 = vmul.f32 %v1434_v7, %v4219_v33  ;;  %v1512_v38 = vadd.f32 0.05243302, %v1511_v18 }
 0x232   : > { %v1669_v48 = vmul.f32 %v1668_v12, %v4418_v22  ;;  %v1551_v60 = vmul.f32 %v1550_v5, %v4323_v49  ;;  %v4448_v58 = vadd.f32 %v793_v61, %v3682_v24  ;;  %v4451_v0 = vmul.f32 %v1316_v39, %v4088_v27 }
 0x233   : > { %5326 = vst [vmem:[#allocation22_spill] sm:$0xff] %v4439_v52  ;;  %v1708_v10 = vadd.f32 0.00028619796, %v1707_v19  ;;  %v1745_v31 = vmul.f32 %v4439_v52, %v4439_v52  ;;  %v1474_v32 = vadd.f32 0.18741608, %v1473_v40  ;;  %v1589_v6 = vmul.f32 %v1588_v36, %v4391_v44 }
 0x234   : > { %5327 = vst [vmem:[#allocation23_spill] sm:$0xff] %v4448_v58  ;;  %v1670_v23 = vadd.f32 0.0036580483, %v1669_v48  ;;  %v4455_v18 = vmul.f32 %v1356_v42, %v4125_v16  ;;  %v1628_v12 = vadd.f32 0.00028619796, %v1627_v63  ;;  %v1513_v61 = vmul.f32 %v1512_v38, %v4300_v37 }
 0x235   : > { %v1709_v7 = vmul.f32 %v1708_v10, %v4432_v56  ;;  %v4458_v5 = vmin.f32 %v1745_v31, 16.0  ;;  %v1396_v19 = vadd.f32 1.1283791, %v1395_v29  ;;  %v1436_v52 = vadd.f32 1.1283791, %v1435_v41 }
 0x236   : > { %v2209_v27 = vpack.c.bf16 %v4161_v35, %v4038_v25  ;;  %v1552_v39 = vadd.f32 0.05243302, %v1551_v60  ;;  %v1671_v40 = vmul.f32 %v1670_v23, %v4418_v22  ;;  %v4465_v36 = vmul.f32 0.70710677, %v4448_v58 }
 0x237   : > { %v2210_v16 = vpack.c.bf16 %v4330_v55, %v4043_v30  ;;  %v1475_v42 = vmul.f32 %v1474_v32, %v4279_v2  ;;  %v1590_v63 = vadd.f32 0.0036580483, %v1589_v6  ;;  %v4471_v29 = vmul.f32 0.5, %v4365_v3 }
 0x238   : > { %5328 = vst [vmem:[#allocation24_spill] sm:$0xff] %v4465_v36  ;;  %2493 = vmatmul.bf16.vlgmr.msrb.gmra.mxu0 %v2209_v27  ;;  %v2211_v41 = vpack.c.bf16 %v4368_v34, %v4057_v11  ;;  %v1629_v25 = vmul.f32 %v1628_v12, %v4420_v53  ;;  %v1710_v35 = vadd.f32 0.0036580483, %v1709_v7  ;;  %v1747_v23 = vmul.f32 2.1237322e-06, %v4458_v5 }
 0x239   : > { %5329 = vst [vmem:[#allocation25_spill] sm:$0xff] %v4471_v29  ;;  %2522 = vmatmul.bf16.vlgmr.msrb.gmra.mxu1 %v2210_v16  ;;  %v2212_v38 = vpack.c.bf16 %v2184_v43, %v4072_v9  ;;  %v4479_v30 = vmul.f32 %v1396_v19, %v4171_v21  ;;  %v4482_v55 = vmul.f32 %v1436_v52, %v4185_v59  ;;  %v1514_v3 = vadd.f32 0.18741608, %v1513_v61 }
 0x23a   : > { %2551 = vmatmul.bf16.vlgmr.msrb.gmra.mxu2 %v2211_v41  ;;  %v1198_v32 = vmul.f32 3.8918573e-05, %v3987_v57  ;;  %v1553_v11 = vmul.f32 %v1552_v39, %v4323_v49  ;;  %v1672_v34 = vadd.f32 0.05243302, %v1671_v40  ;;  %v1785_v48 = vmul.f32 %v4465_v36, %v4465_v36 }
 0x23b   : > { %2580 = vmatmul.bf16.vlgmr.msrb.gmra.mxu3 %v2212_v38  ;;  %v1358_v60 = vmul.f32 3.8918573e-05, %v4163_v26  ;;  %v1476_v9 = vadd.f32 1.1283791, %v1475_v42  ;;  %v1591_v21 = vmul.f32 %v1590_v63, %v4391_v44  ;;  %v1238_v59 = vmul.f32 3.8918573e-05, %v4021_v51 }
 0x23c   : > { %v1199_v43 = vadd.f32 0.001143296, %v1198_v32  ;;  %v1630_v52 = vadd.f32 0.0036580483, %v1629_v25  ;;  %v1711_v10 = vmul.f32 %v1710_v35, %v4432_v56  ;;  %v1748_v31 = vadd.f32 0.00028619796, %v1747_v23 }
 0x23d   : > { %v1359_v6 = vadd.f32 0.001143296, %v1358_v60  ;;  %v1515_v12 = vmul.f32 %v1514_v3, %v4300_v37  ;;  %v1239_v19 = vadd.f32 0.001143296, %v1238_v59  ;;  %v1398_v61 = vmul.f32 3.8918573e-05, %v4198_v14 }
 0x23e   : > { %v1200_v7 = vmul.f32 %v1199_v43, %v3987_v57  ;;  %v1554_v27 = vadd.f32 0.18741608, %v1553_v11  ;;  %v1673_v39 = vmul.f32 %v1672_v34, %v4418_v22  ;;  %v4496_v40 = vmin.f32 %v1785_v48, 16.0 }
 0x23f   : > { %v1360_v16 = vmul.f32 %v1359_v6, %v4163_v26  ;;  %v4500_v42 = vmul.f32 %v1476_v9, %v4244_v28  ;;  %v1240_v41 = vmul.f32 %v1239_v19, %v4021_v51  ;;  %v1399_v25 = vadd.f32 0.001143296, %v1398_v61 }
 0x240   : > { %v1201_v63 = vadd.f32 0.014752088, %v1200_v7  ;;  %v1592_v35 = vadd.f32 0.05243302, %v1591_v21  ;;  %v1712_v23 = vadd.f32 0.05243302, %v1711_v10  ;;  %v1749_v38 = vmul.f32 %v1748_v31, %v4458_v5 }
 0x241   : > { %v1361_v3 = vadd.f32 0.014752088, %v1360_v16  ;;  %v1631_v32 = vmul.f32 %v1630_v52, %v4420_v53  ;;  %v1241_v34 = vadd.f32 0.014752088, %v1240_v41  ;;  %v1400_v48 = vmul.f32 %v1399_v25, %v4198_v14 }
 0x242   : > { %v1202_v11 = vmul.f32 %v1201_v63, %v3987_v57  ;;  %v1516_v60 = vadd.f32 1.1283791, %v1515_v12  ;;  %v1674_v43 = vadd.f32 0.18741608, %v1673_v39  ;;  %v1787_v28 = vmul.f32 2.1237322e-06, %v4496_v40 }
 0x243   : > { %v1362_v9 = vmul.f32 %v1361_v3, %v4163_v26  ;;  %v1242_v21 = vmul.f32 %v1241_v34, %v4021_v51  ;;  %v1401_v10 = vadd.f32 0.014752088, %v1400_v48  ;;  %v1278_v31 = vmul.f32 3.8918573e-05, %v4046_v45 }
 0x244   : > { %v1203_v59 = vadd.f32 0.112945676, %v1202_v11  ;;  %v1555_v6 = vmul.f32 %v1554_v27, %v4323_v49  ;;  %v1713_v52 = vmul.f32 %v1712_v23, %v4432_v56  ;;  %v1750_v7 = vadd.f32 0.0036580483, %v1749_v38 }
 0x245   : > { %v1363_v19 = vadd.f32 0.112945676, %v1362_v9  ;;  %v1243_v12 = vadd.f32 0.112945676, %v1242_v21  ;;  %v1402_v39 = vmul.f32 %v1401_v10, %v4198_v14  ;;  %v1279_v16 = vadd.f32 0.001143296, %v1278_v31 }
 0x246   : > { %v1204_v61 = vmul.f32 %v1203_v59, %v3987_v57  ;;  %v1675_v63 = vmul.f32 %v1674_v43, %v4418_v22  ;;  %v1788_v41 = vadd.f32 0.00028619796, %v1787_v28  ;;  %v1438_v3 = vmul.f32 3.8918573e-05, %v4219_v33 }
 0x247   : > { %v1364_v25 = vmul.f32 %v1363_v19, %v4163_v26  ;;  %v1244_v27 = vmul.f32 %v1243_v12, %v4021_v51  ;;  %v1403_v34 = vadd.f32 0.112945676, %v1402_v39  ;;  %v1280_v23 = vmul.f32 %v1279_v16, %v4046_v45 }
 0x248   : > { %v1205_v11 = vadd.f32 0.4994258, %v1204_v61  ;;  %v1556_v38 = vadd.f32 1.1283791, %v1555_v6  ;;  %v1593_v48 = vmul.f32 %v1592_v35, %v4391_v44  ;;  %v1714_v9 = vadd.f32 0.18741608, %v1713_v52 }
 0x249   : > { %v1365_v59 = vadd.f32 0.4994258, %v1364_v25  ;;  %v1245_v10 = vadd.f32 0.4994258, %v1244_v27  ;;  %v1404_v43 = vmul.f32 %v1403_v34, %v4198_v14  ;;  %v1281_v28 = vadd.f32 0.014752088, %v1280_v23 }
 0x24a   : > { %v1206_v21 = vmul.f32 %v1205_v11, %v3987_v57  ;;  %v1751_v31 = vmul.f32 %v1750_v7, %v4458_v5  ;;  %v1789_v19 = vmul.f32 %v1788_v41, %v4496_v40  ;;  %v1439_v12 = vadd.f32 0.001143296, %v1438_v3  ;;  %v5331_v7 = vld [vmem:[#allocation14_spill] sm:$0xff] }
 0x24b   : > { %v1366_v61 = vmul.f32 %v1365_v59, %v4163_v26  ;;  %v4526_v39 = vadd.f32 0.05243302, %v1631_v32  ;;  %v1676_v6 = vadd.f32 1.1283791, %v1675_v63  ;;  %v1246_v35 = vmul.f32 %v1245_v10, %v4021_v51  ;;  %v5333_v32 = vld [vmem:[#allocation15_spill] sm:$0xff] }
 0x24c   : > { %v4528_v16 = vadd.f32 1.0, %v1206_v21  ;;  %v1405_v57 = vadd.f32 0.4994258, %v1404_v43  ;;  %v1282_v25 = vmul.f32 %v1281_v28, %v4046_v45  ;;  %v1440_v11 = vmul.f32 %v1439_v12, %v4219_v33 }
 0x24d   : > { %5330 = vst [vmem:[#allocation26_spill] sm:$0xff] %v4526_v39  ;;  %v4531_v52 = vadd.f32 1.0, %v1366_v61  ;;  %v4536_v27 = vmul.f32 %v1516_v60, %v5331_v7  ;;  %v4538_v41 = vadd.f32 0.18741608, %v1593_v48  ;;  %v1715_v26 = vmul.f32 %v1714_v9, %v4432_v56 }
 0x24e   : > { %3139 = vrcp.f32 %v4528_v16  ;;  %v4543_v63 = vmul.f32 %v1556_v38, %v5333_v32  ;;  %v1752_v51 = vadd.f32 0.05243302, %v1751_v31  ;;  %v4545_v3 = vadd.f32 0.0036580483, %v1789_v19 }
 0x24f   : > { %5332 = vst [vmem:[#allocation14_spill] sm:$0xff] %v4538_v41  ;;  %3141 = vrcp.f32 %v4531_v52  ;;  %v4549_v34 = vmul.f32 %v1676_v6, %v4394_v47  ;;  %v1217_v60 = vand.u32 2147483647, %v4528_v16  ;;  %v4552_v23 = vadd.f32 1.0, %v1246_v35 }
 0x250   : > { %v1318_v48 = vmul.f32 3.8918573e-05, %v4122_v4  ;;  %v1219_v9 = vand.u32 2147483648, %v4528_v16  ;;  %v1406_v59 = vmul.f32 %v1405_v57, %v4198_v14  ;;  %v1283_v38 = vadd.f32 0.112945676, %v1282_v25 }
 0x251   : > { %v1441_v21 = vadd.f32 0.014752088, %v1440_v11  ;;  %v4557_v10 = vadd.f32 1.1283791, %v1715_v26  ;;  %v1377_v43 = vand.u32 2147483647, %v4531_v52  ;;  %3143 = vrcp.f32 %v4552_v23 }
 0x252   : > { %v1379_v28 = vand.u32 2147483648, %v4531_v52  ;;  %v4563_v47 = vmul.f32 %v1752_v51, %v4458_v5  ;;  %v4565_v31 = vadd.f32 1.0, %v1406_v59  ;;  %v1284_v19 = vmul.f32 %v1283_v38, %v4046_v45 }
 0x253   : > { %v1442_v61 = vmul.f32 %v1441_v21, %v4219_v33  ;;  %vm1213_vm9 = vweird.f32 %v4528_v16  ;;  %vm1373_vm10 = vweird.f32 %v4531_v52  ;;  %v1259_v12 = vand.u32 2147483648, %v4552_v23 }
 0x254   : > { %v3140_v14 = vpop.eup %3139  ;;  %v1319_v6 = vadd.f32 0.001143296, %v1318_v48  ;;  %vm4573_vm11 = vcmp.eq.f32.partialorder %v1217_v60, 8.507059e+37  ;;  %v1220_v11 = vor.u32 1.1754944e-38, %v1219_v9  ;;  %v1257_v7 = vand.u32 2147483647, %v4552_v23 }
 0x255   : > { %v3142_v35 = vpop.eup %3141  ;;  %v1209_v57 = vmul.f32 %v3140_v14, %v4528_v16  ;;  %3145 = vrcp.f32 %v4565_v31  ;;  %vm4580_vm12 = vcmp.eq.f32.partialorder %v1377_v43, 8.507059e+37  ;;  %v1380_v51 = vor.u32 1.1754944e-38, %v1379_v28 }
 0x256   : > { %v1369_v26 = vmul.f32 %v3142_v35, %v4531_v52  ;;  %v1478_v48 = vmul.f32 3.8918573e-05, %v4279_v2  ;;  %vm1253_vm13 = vweird.f32 %v4552_v23  ;;  %v1285_v60 = vadd.f32 0.4994258, %v1284_v19 }
 0x257   : > { %v1210_v59 = vsub.f32 1.0, %v1209_v57  ;;  %v1443_v38 = vadd.f32 0.112945676, %v1442_v61  ;;  %v3144_v21 = vpop.eup %3143  ;;  %vm1214_vm14 = vweird.f32 %v3140_v14  ;;  %v1260_v58 = vor.u32 1.1754944e-38, %v1259_v12 }
 0x258   : > { %v1370_v9 = vsub.f32 1.0, %v1369_v26  ;;  %v1320_v36 = vmul.f32 %v1319_v6, %v4122_v4  ;;  %vm1374_vm15 = vweird.f32 %v3142_v35  ;;  %v1249_v43 = vmul.f32 %v3144_v21, %v4552_v23  ;;  %vm1215_vm2 = vmor %vm1213_vm9, %vm1214_vm14 }
 0x259   : > { %v1211_v24 = vmul.f32 %v3140_v14, %v1210_v59  ;;  %vm4588_vm0 = vcmp.eq.f32.partialorder %v1257_v7, 8.507059e+37  ;;  %v1417_v28 = vand.u32 2147483647, %v4565_v31  ;;  %vm1413_vm1 = vweird.f32 %v4565_v31  ;;  %vm1375_vm4 = vmor %vm1373_vm10, %vm1374_vm15 }
 0x25a   : > { %v1371_v57 = vmul.f32 %v3142_v35, %v1370_v9  ;;  %v1286_v19 = vmul.f32 %v1285_v60, %v4046_v45  ;;  %v1444_v61 = vmul.f32 %v1443_v38, %v4219_v33  ;;  %v1321_v12 = vadd.f32 0.014752088, %v1320_v36 }
 0x25b   : > { %v3146_v26 = vpop.eup %3145  ;;  %v1212_v6 = vadd.f32 %v3140_v14, %v1211_v24  ;;  %v1250_v59 = vsub.f32 1.0, %v1249_v43  ;;  %v1419_v15 = vand.u32 2147483648, %v4565_v31  ;;  %v1479_v39 = vadd.f32 0.001143296, %v1478_v48 }
 0x25c   : > { %v1372_v7 = vadd.f32 %v3142_v35, %v1371_v57  ;;  %vm1254_vm3 = vweird.f32 %v3144_v21  ;;  %v1409_v9 = vmul.f32 %v3146_v26, %v4565_v31  ;;  %v4601_v29 = vadd.f32 1.0, %v1286_v19  ;;  %v5342_v31 = vld [vmem:[#allocation9_spill] sm:$0xff] }
 0x25d   : > { %v1216_v45 = vsel %vm1215_vm2, %v3140_v14, %v1212_v6  ;;  %v1251_v24 = vmul.f32 %v3144_v21, %v1250_v59  ;;  %v1445_v36 = vadd.f32 0.4994258, %v1444_v61  ;;  %v1322_v60 = vmul.f32 %v1321_v12, %v4122_v4  ;;  %vm1255_vm6 = vmor %vm1253_vm13, %vm1254_vm3 }
 0x25e   : > { %v1221_v48 = vsel %vm4573_vm11, %v1220_v11, %v1216_v45  ;;  %v1376_v16 = vsel %vm1375_vm4, %v3142_v35, %v1372_v7  ;;  %v1410_v38 = vsub.f32 1.0, %v1409_v9  ;;  %3147 = vrcp.f32 %v4601_v29 }
 0x25f   : > { %v1222_v43 = vmul.f32 %v1221_v48, %v4340_v50  ;;  %v1381_v14 = vsel %vm4580_vm12, %v1380_v51, %v1376_v16  ;;  %v1252_v57 = vadd.f32 %v3144_v21, %v1251_v24  ;;  %vm4613_vm5 = vcmp.eq.f32.partialorder %v1417_v28, 8.507059e+37 }
 0x260   : > { %v1382_v19 = vmul.f32 %v1381_v14, %v4455_v18  ;;  %v1411_v35 = vmul.f32 %v3146_v26, %v1410_v38  ;;  %vm1414_vm7 = vweird.f32 %v3146_v26  ;;  %v1480_v25 = vmul.f32 %v1479_v39, %v4279_v2 }
 0x261   : > { %v2838_v11 = vclamps-f32 %v1222_v43, 1.0  ;;  %v1256_v50 = vsel %vm1255_vm6, %v3144_v21, %v1252_v57  ;;  %v1446_v32 = vmul.f32 %v1445_v36, %v4219_v33  ;;  %v1323_v51 = vadd.f32 0.112945676, %v1322_v60  ;;  %vm1415_vm8 = vmor %vm1413_vm1, %vm1414_vm7 }
 0x262   : > { %v2842_v61 = vclamps-f32 %v1382_v19, 1.0  ;;  %v1261_v28 = vsel %vm4588_vm0, %v1260_v58, %v1256_v50  ;;  %v1412_v12 = vadd.f32 %v3146_v26, %v1411_v35  ;;  %v1420_v6 = vor.u32 1.1754944e-38, %v1419_v15 }
 0x263   : > { %v2153_v18 = vadd.f32 1.0, %v2838_v11  ;;  %v1262_v59 = vmul.f32 %v1261_v28, %v4388_v20  ;;  %v4628_v23 = vadd.f32 1.0, %v1446_v32  ;;  %v1518_v39 = vmul.f32 3.8918573e-05, %v4300_v37 }
 0x264   : > { %v3148_v21 = vpop.eup %3147  ;;  %v2157_v7 = vadd.f32 1.0, %v2842_v61  ;;  %v1416_v33 = vsel %vm1415_vm8, %v3146_v26, %v1412_v12  ;;  %v1297_v9 = vand.u32 2147483647, %v4601_v29  ;;  %v1324_v41 = vmul.f32 %v1323_v51, %v4122_v4 }
 0x265   : > { %v2839_v58 = vclamps-f32 %v1262_v59, 1.0  ;;  %v1421_v15 = vsel %vm4613_vm5, %v1420_v6, %v1416_v33  ;;  %v1289_v20 = vmul.f32 %v3148_v21, %v4601_v29  ;;  %v1481_v45 = vadd.f32 0.014752088, %v1480_v25 }
 0x266   : > { %v2185_v24 = vmul.f32 %v2153_v18, %v5342_v31  ;;  %v2189_v36 = vmul.f32 %v2157_v7, %v4343_v62  ;;  %v1422_v60 = vmul.f32 %v1421_v15, %v4479_v30  ;;  %3149 = vrcp.f32 %v4628_v23 }
 0x267   : > { %v4642_v26 = vmul.f32 %v4545_v3, %v4496_v40  ;;  %v2154_v48 = vadd.f32 1.0, %v2839_v58  ;;  %v1290_v16 = vsub.f32 1.0, %v1289_v20  ;;  %v1299_v38 = vand.u32 2147483648, %v4601_v29 }
 0x268   : > { %v4647_v43 = vmul.f32 %v4557_v10, %v4414_v1  ;;  %v2213_v14 = vpack.c.bf16 %v2189_v36, %v2185_v24  ;;  %v2843_v57 = vclamps-f32 %v1422_v60, 1.0  ;;  %v1325_v52 = vadd.f32 0.4994258, %v1324_v41  ;;  %v5345_v1 = vld [vmem:[#allocation10_spill] sm:$0xff] }
 0x269   : > { %v1291_v62 = vmul.f32 %v3148_v21, %v1290_v16  ;;  %vm1293_vm9 = vweird.f32 %v4601_v29  ;;  %vm1294_vm10 = vweird.f32 %v3148_v21  ;;  %v1482_v30 = vmul.f32 %v1481_v45, %v4279_v2 }
 0x26a   : > { %2498 = vmatmul.bf16.gmra.mxu0 %v2213_v14  ;;  %v2158_v3 = vadd.f32 1.0, %v2843_v57  ;;  %vm4651_vm11 = vcmp.eq.f32.partialorder %v1297_v9, 8.507059e+37  ;;  %v1326_v35 = vmul.f32 %v1325_v52, %v4122_v4  ;;  %v1519_v25 = vadd.f32 0.001143296, %v1518_v39  ;;  %vm1295_vm12 = vmor %vm1293_vm9, %vm1294_vm10 }
 0x26b   : > { %v2186_v10 = vmul.f32 %v2154_v48, %v5345_v1  ;;  %v1292_v11 = vadd.f32 %v3148_v21, %v1291_v62  ;;  %v1300_v50 = vor.u32 1.1754944e-38, %v1299_v38  ;;  %v1483_v32 = vadd.f32 0.112945676, %v1482_v30 }
 0x26c   : > { %v3150_v51 = vpop.eup %3149  ;;  %v2190_v29 = vmul.f32 %v2158_v3, %v4372_v8  ;;  %v4658_v61 = vadd.f32 1.0, %v1326_v35  ;;  %v1520_v28 = vmul.f32 %v1519_v25, %v4300_v37  ;;  %v1678_v12 = vmul.f32 3.8918573e-05, %v4418_v22 }
 0x26d   : > { %v1296_v6 = vsel %vm1295_vm12, %v3148_v21, %v1292_v11  ;;  %v1449_v18 = vmul.f32 %v3150_v51, %v4628_v23  ;;  %v1459_v4 = vand.u32 2147483648, %v4628_v23  ;;  %v1484_v59 = vmul.f32 %v1483_v32, %v4279_v2 }
 0x26e   : > { %v2214_v39 = vpack.c.bf16 %v2190_v29, %v2186_v10  ;;  %v1301_v7 = vsel %vm4651_vm11, %v1300_v50, %v1296_v6  ;;  %3151 = vrcp.f32 %v4658_v61  ;;  %v1558_v8 = vmul.f32 3.8918573e-05, %v4323_v49 }
 0x26f   : > { %v1302_v33 = vmul.f32 %v1301_v7, %v4409_v54  ;;  %v1450_v9 = vsub.f32 1.0, %v1449_v18  ;;  %v1457_v41 = vand.u32 2147483647, %v4628_v23  ;;  %v1718_v21 = vmul.f32 3.8918573e-05, %v4432_v56 }
 0x270   : > { %2527 = vmatmul.bf16.gmra.mxu1 %v2214_v39  ;;  %vm1453_vm13 = vweird.f32 %v4628_v23  ;;  %v1485_v58 = vadd.f32 0.4994258, %v1484_v59  ;;  %v1521_v15 = vadd.f32 0.014752088, %v1520_v28  ;;  %v1679_v20 = vadd.f32 0.001143296, %v1678_v12 }
 0x271   : > { %v1451_v45 = vmul.f32 %v3150_v51, %v1450_v9  ;;  %vm1454_vm14 = vweird.f32 %v3150_v51  ;;  %v1460_v31 = vor.u32 1.1754944e-38, %v1459_v4  ;;  %v1337_v24 = vand.u32 2147483647, %v4658_v61 }
 0x272   : > { %v1486_v36 = vmul.f32 %v1485_v58, %v4279_v2  ;;  %v1522_v54 = vmul.f32 %v1521_v15, %v4300_v37  ;;  %v1680_v60 = vmul.f32 %v1679_v20, %v4418_v22  ;;  %v1559_v48 = vadd.f32 0.001143296, %v1558_v8  ;;  %vm1455_vm15 = vmor %vm1453_vm13, %vm1454_vm14 }
 0x273   : > { %v2840_v16 = vclamps-f32 %v1302_v33, 1.0  ;;  %v1452_v38 = vadd.f32 %v3150_v51, %v1451_v45  ;;  %v1339_v14 = vand.u32 2147483648, %v4658_v61  ;;  %v1719_v57 = vadd.f32 0.001143296, %v1718_v21  ;;  %v5348_v33 = vld [vmem:[#allocation11_spill] sm:$0xff] }
 0x274   : > { %v3152_v52 = vpop.eup %3151  ;;  %v4680_v62 = vadd.f32 1.0, %v1486_v36  ;;  %v1523_v30 = vadd.f32 0.112945676, %v1522_v54  ;;  %v1681_v3 = vadd.f32 0.014752088, %v1680_v60  ;;  %v1560_v2 = vmul.f32 %v1559_v48, %v4323_v49 }
 0x275   : > { %v1456_v19 = vsel %vm1455_vm15, %v3150_v51, %v1452_v38  ;;  %vm1458_vm0 = vcmp.eq.f32.partialorder %v1457_v41, 8.507059e+37  ;;  %v1329_v35 = vmul.f32 %v3152_v52, %v4658_v61  ;;  %vm1333_vm1 = vweird.f32 %v4658_v61 }
 0x276   : > { %v1461_v25 = vsel %vm1458_vm0, %v1460_v31, %v1456_v19  ;;  %vm4685_vm2 = vcmp.eq.f32.partialorder %v1337_v24, 8.507059e+37  ;;  %3153 = vrcp.f32 %v4680_v62  ;;  %v1598_v23 = vmul.f32 3.8918573e-05, %v4391_v44 }
 0x277   : > { %v1462_v10 = vmul.f32 %v1461_v25, %v4482_v55  ;;  %v2155_v11 = vadd.f32 1.0, %v2840_v16  ;;  %v1330_v50 = vsub.f32 1.0, %v1329_v35  ;;  %v1524_v32 = vmul.f32 %v1523_v30, %v4300_v37 }
 0x278   : > { %v1340_v51 = vor.u32 1.1754944e-38, %v1339_v14  ;;  %v1682_v29 = vmul.f32 %v1681_v3, %v4418_v22  ;;  %v1561_v28 = vadd.f32 0.014752088, %v1560_v2  ;;  %v1720_v12 = vmul.f32 %v1719_v57, %v4432_v56 }
 0x279   : > { %v2844_v6 = vclamps-f32 %v1462_v10, 1.0  ;;  %v1331_v18 = vmul.f32 %v3152_v52, %v1330_v50  ;;  %vm1334_vm3 = vweird.f32 %v3152_v52  ;;  %v1525_v4 = vadd.f32 0.4994258, %v1524_v32 }
 0x27a   : > { %v1683_v59 = vadd.f32 0.112945676, %v1682_v29  ;;  %v1562_v39 = vmul.f32 %v1561_v28, %v4323_v49  ;;  %v1721_v7 = vadd.f32 0.014752088, %v1720_v12  ;;  %v1599_v8 = vadd.f32 0.001143296, %v1598_v23  ;;  %vm1335_vm4 = vmor %vm1333_vm1, %vm1334_vm3 }
 0x27b   : > { %v2159_v55 = vadd.f32 1.0, %v2844_v6  ;;  %v2187_v9 = vmul.f32 %v2155_v11, %v5348_v33  ;;  %v1332_v41 = vadd.f32 %v3152_v52, %v1331_v18  ;;  %v1526_v21 = vmul.f32 %v1525_v4, %v4300_v37 }
 0x27c   : > { %v3154_v58 = vpop.eup %3153  ;;  %v1497_v15 = vand.u32 2147483647, %v4680_v62  ;;  %v1684_v20 = vmul.f32 %v1683_v59, %v4418_v22  ;;  %v1563_v45 = vadd.f32 0.112945676, %v1562_v39  ;;  %v1722_v31 = vmul.f32 %v1721_v7, %v4432_v56 }
 0x27d   : > { %v2191_v24 = vmul.f32 %v2159_v55, %v4384_v13  ;;  %v1336_v36 = vsel %vm1335_vm4, %v3152_v52, %v1332_v41  ;;  %v1489_v54 = vmul.f32 %v3154_v58, %v4680_v62  ;;  %v1600_v60 = vmul.f32 %v1599_v8, %v4391_v44  ;;  %v5353_v55 = vld [vmem:[#allocation12_spill] sm:$0xff] }
 0x27e   : > { %v1341_v37 = vsel %vm4685_vm2, %v1340_v51, %v1336_v36  ;;  %v4708_v48 = vadd.f32 1.0, %v1526_v21  ;;  %v1685_v61 = vadd.f32 0.4994258, %v1684_v20  ;;  %v1564_v16 = vmul.f32 %v1563_v45, %v4323_v49 }
 0x27f   : > { %v2215_v38 = vpack.c.bf16 %v2191_v24, %v2187_v9  ;;  %v1342_v14 = vmul.f32 %v1341_v37, %v4451_v0  ;;  %v1490_v57 = vsub.f32 1.0, %v1489_v54  ;;  %v1723_v30 = vadd.f32 0.112945676, %v1722_v31 }
 0x280   : > { %vm1493_vm5 = vweird.f32 %v4680_v62  ;;  %vm1494_vm6 = vweird.f32 %v3154_v58  ;;  %v1499_v13 = vand.u32 2147483648, %v4680_v62  ;;  %3155 = vrcp.f32 %v4708_v48 }
 0x281   : > { %2556 = vmatmul.bf16.gmra.mxu2 %v2215_v38  ;;  %v2841_v52 = vclamps-f32 %v1342_v14, 1.0  ;;  %v1491_v3 = vmul.f32 %v3154_v58, %v1490_v57  ;;  %v1686_v2 = vmul.f32 %v1685_v61, %v4418_v22  ;;  %v1565_v19 = vadd.f32 0.4994258, %v1564_v16  ;;  %vm1495_vm8 = vmor %vm1493_vm5, %vm1494_vm6 }
 0x282   : > { %vm4716_vm7 = vcmp.eq.f32.partialorder %v1497_v15, 8.507059e+37  ;;  %v1724_v0 = vmul.f32 %v1723_v30, %v4432_v56  ;;  %v1601_v25 = vadd.f32 0.014752088, %v1600_v60  ;;  %v1758_v1 = vmul.f32 3.8918573e-05, %v4458_v5 }
 0x283   : > { %v1492_v23 = vadd.f32 %v3154_v58, %v1491_v3  ;;  %v1537_v10 = vand.u32 2147483647, %v4708_v48  ;;  %v4723_v11 = vadd.f32 1.0, %v1686_v2  ;;  %v1566_v50 = vmul.f32 %v1565_v19, %v4323_v49 }
 0x284   : > { %v1500_v22 = vor.u32 1.1754944e-38, %v1499_v13  ;;  %v2156_v32 = vadd.f32 1.0, %v2841_v52  ;;  %v1539_v51 = vand.u32 2147483648, %v4708_v48  ;;  %v1725_v29 = vadd.f32 0.4994258, %v1724_v0 }
 0x285   : > { %v1496_v28 = vsel %vm1495_vm8, %v3154_v58, %v1492_v23  ;;  %vm1533_vm9 = vweird.f32 %v4708_v48  ;;  %3157 = vrcp.f32 %v4723_v11  ;;  %v1602_v12 = vmul.f32 %v1601_v25, %v4391_v44 }
 0x286   : > { %v3156_v6 = vpop.eup %3155  ;;  %v1501_v49 = vsel %vm4716_vm7, %v1500_v22, %v1496_v28  ;;  %v4735_v18 = vadd.f32 1.0, %v1566_v50  ;;  %v1759_v62 = vadd.f32 0.001143296, %v1758_v1  ;;  %v1638_v4 = vmul.f32 3.8918573e-05, %v4420_v53 }
 0x287   : > { %v1502_v59 = vmul.f32 %v1501_v49, %v4500_v42  ;;  %v1529_v39 = vmul.f32 %v3156_v6, %v4708_v48  ;;  %vm4740_vm10 = vcmp.eq.f32.partialorder %v1537_v10, 8.507059e+37  ;;  %v1726_v8 = vmul.f32 %v1725_v29, %v4432_v56 }
 0x288   : > { %v2188_v33 = vmul.f32 %v2156_v32, %v5353_v55  ;;  %v1540_v9 = vor.u32 1.1754944e-38, %v1539_v51  ;;  %v1697_v41 = vand.u32 2147483647, %v4723_v11  ;;  %3159 = vrcp.f32 %v4735_v18 }
 0x289   : > { %v2845_v21 = vclamps-f32 %v1502_v59, 1.0  ;;  %v1530_v58 = vsub.f32 1.0, %v1529_v39  ;;  %vm1534_vm11 = vweird.f32 %v3156_v6  ;;  %v1699_v42 = vand.u32 2147483648, %v4723_v11 }
 0x28a   : > { %v4749_v15 = vadd.f32 1.0, %v1726_v8  ;;  %v1603_v20 = vadd.f32 0.112945676, %v1602_v12  ;;  %v1760_v45 = vmul.f32 %v1759_v62, %v4458_v5  ;;  %v1639_v31 = vadd.f32 0.001143296, %v1638_v4  ;;  %vm1535_vm15 = vmor %vm1533_vm9, %vm1534_vm11 }
 0x28b   : > { %v3158_v24 = vpop.eup %3157  ;;  %v2160_v56 = vadd.f32 1.0, %v2845_v21  ;;  %v1531_v36 = vmul.f32 %v3156_v6, %v1530_v58  ;;  %v1577_v54 = vand.u32 2147483647, %v4735_v18  ;;  %v1579_v60 = vand.u32 2147483648, %v4735_v18 }
 0x28c   : > { %v1689_v37 = vmul.f32 %v3158_v24, %v4723_v11  ;;  %vm1693_vm12 = vweird.f32 %v4723_v11  ;;  %vm4756_vm13 = vcmp.eq.f32.partialorder %v1697_v41, 8.507059e+37  ;;  %3161 = vrcp.f32 %v4749_v15 }
 0x28d   : > { %v2192_v16 = vmul.f32 %v2160_v56, %v4397_v17  ;;  %v1532_v38 = vadd.f32 %v3156_v6, %v1531_v36  ;;  %v1700_v14 = vor.u32 1.1754944e-38, %v1699_v42  ;;  %vm1573_vm14 = vweird.f32 %v4735_v18 }
 0x28e   : > { %v3160_v57 = vpop.eup %3159  ;;  %v1690_v30 = vsub.f32 1.0, %v1689_v37  ;;  %v1604_v13 = vmul.f32 %v1603_v20, %v4391_v44  ;;  %v1761_v52 = vadd.f32 0.014752088, %v1760_v45  ;;  %v1640_v3 = vmul.f32 %v1639_v31, %v4420_v53 }
 0x28f   : > { %v2216_v2 = vpack.c.bf16 %v2192_v16, %v2188_v33  ;;  %v1536_v19 = vsel %vm1535_vm15, %v3156_v6, %v1532_v38  ;;  %v1569_v35 = vmul.f32 %v3160_v57, %v4735_v18  ;;  %vm4769_vm0 = vcmp.eq.f32.partialorder %v1577_v54, 8.507059e+37  ;;  %v5358_v38 = vld [vmem:[#allocation25_spill] sm:$0xff] }
 0x290   : > { %v1580_v0 = vor.u32 1.1754944e-38, %v1579_v60  ;;  %v1541_v25 = vsel %vm4740_vm10, %v1540_v9, %v1536_v19  ;;  %v1691_v48 = vmul.f32 %v3158_v24, %v1690_v30  ;;  %vm1694_vm1 = vweird.f32 %v3158_v24  ;;  %v5359_v30 = vld [vmem:[#allocation26_spill] sm:$0xff] }
 0x291   : > { %v1737_v1 = vand.u32 2147483647, %v4749_v15  ;;  %2585 = vmatmul.bf16.gmra.mxu3 %v2216_v2  ;;  %v1542_v23 = vmul.f32 %v1541_v25, %v4536_v27  ;;  %v1570_v10 = vsub.f32 1.0, %v1569_v35  ;;  %v1605_v50 = vadd.f32 0.4994258, %v1604_v13  ;;  %vm1695_vm3 = vmor %vm1693_vm12, %vm1694_vm1 }
 0x292   : > { %v1762_v22 = vmul.f32 %v1761_v52, %v4458_v5  ;;  %v3162_v32 = vpop.eup %3161  ;;  %v1692_v51 = vadd.f32 %v3158_v24, %v1691_v48  ;;  %vm1574_vm2 = vweird.f32 %v3160_v57  ;;  %v1739_v29 = vand.u32 2147483648, %v4749_v15  ;;  %v5361_v48 = vld [vmem:[#allocation20_spill] sm:$0xff] }
 0x293   : > { %v1641_v28 = vadd.f32 0.014752088, %v1640_v3  ;;  %v2846_v12 = vclamps-f32 %v1542_v23, 1.0  ;;  %v1571_v6 = vmul.f32 %v3160_v57, %v1570_v10  ;;  %v1729_v49 = vmul.f32 %v3162_v32, %v4749_v15  ;;  %vm1575_vm5 = vmor %vm1573_vm14, %vm1574_vm2 }
 0x294   : > { %v1798_v62 = vmul.f32 3.8918573e-05, %v4496_v40  ;;  %v1696_v27 = vsel %vm1695_vm3, %v3158_v24, %v1692_v51  ;;  %v1606_v4 = vmul.f32 %v1605_v50, %v4391_v44  ;;  %v1763_v59 = vadd.f32 0.112945676, %v1762_v22  ;;  %v5362_v50 = vld [vmem:[#allocation14_spill] sm:$0xff] }
 0x295   : > { %v1642_v39 = vmul.f32 %v1641_v28, %v4420_v53  ;;  %v1701_v7 = vsel %vm4756_vm13, %v1700_v14, %v1696_v27  ;;  %v1572_v8 = vadd.f32 %v3160_v57, %v1571_v6  ;;  %v1730_v55 = vsub.f32 1.0, %v1729_v49 }
 0x296   : > { %vm1734_vm4 = vweird.f32 %v3162_v32  ;;  %v1702_v11 = vmul.f32 %v1701_v7, %v4549_v34  ;;  %v4791_v33 = vadd.f32 1.0, %v1606_v4  ;;  %v1764_v9 = vmul.f32 %v1763_v59, %v4458_v5 }
 0x297   : > { %v1643_v41 = vadd.f32 0.112945676, %v1642_v39  ;;  %v2161_v21 = vadd.f32 1.0, %v2846_v12  ;;  %v1576_v58 = vsel %vm1575_vm5, %v3160_v57, %v1572_v8  ;;  %v1731_v42 = vmul.f32 %v3162_v32, %v1730_v55 }
 0x298   : > { %v1799_v20 = vadd.f32 0.001143296, %v1798_v62  ;;  %v1754_v45 = vadd.f32 0.18741608, %v4563_v47  ;;  %v2850_v31 = vclamps-f32 %v1702_v11, 1.0  ;;  %v1581_v24 = vsel %vm4769_vm0, %v1580_v0, %v1576_v58  ;;  %v5360_v0 = vld [vmem:[#allocation13_spill] sm:$0xff] }
 0x299   : > { %3163 = vrcp.f32 %v4791_v33  ;;  %v1582_v34 = vmul.f32 %v1581_v24, %v4543_v63  ;;  %v1732_v18 = vadd.f32 %v3162_v32, %v1731_v42  ;;  %vm1733_vm6 = vweird.f32 %v4749_v15  ;;  %v5363_v42 = vld [vmem:[#allocation17_spill] sm:$0xff] }
 0x29a   : > { %v1740_v56 = vor.u32 1.1754944e-38, %v1739_v29  ;;  %v2165_v36 = vadd.f32 1.0, %v2850_v31  ;;  %vm1735_vm7 = vmor %vm1733_vm6, %vm1734_vm4  ;;  %v1765_v54 = vadd.f32 0.4994258, %v1764_v9  ;;  %v1644_v60 = vmul.f32 %v1643_v41, %v4420_v53 }
 0x29b   : > { %v1800_v47 = vmul.f32 %v1799_v20, %v4496_v40  ;;  %v2193_v37 = vmul.f32 %v2161_v21, %v4430_v46  ;;  %v2847_v61 = vclamps-f32 %v1582_v34, 1.0  ;;  %v1736_v16 = vsel %vm1735_vm7, %v3162_v32, %v1732_v18 }
 0x29c   : > { %vm1738_vm8 = vcmp.eq.f32.partialorder %v1737_v1, 8.507059e+37  ;;  %v2197_v14 = vmul.f32 %v2165_v36, %v5358_v38  ;;  %v1766_v57 = vmul.f32 %v1765_v54, %v4458_v5  ;;  %v1645_v15 = vadd.f32 0.4994258, %v1644_v60  ;;  %v709_v60 = vpop.f32.mrf.mxu0 }
 0x29d   : > { %v1741_v63 = vsel %vm1738_vm8, %v1740_v56, %v1736_v16  ;;  %v1633_v13 = vmul.f32 %v5359_v30, %v4420_v53  ;;  %v1801_v3 = vadd.f32 0.014752088, %v1800_v47  ;;  %v2162_v35 = vadd.f32 1.0, %v2847_v61  ;;  %v5365_v61 = vld [vmem:[#allocation5_spill] sm:$0xff] }
 0x29e   : > { %v1742_v52 = vmul.f32 %v1741_v63, %v4647_v43  ;;  %v2217_v19 = vpack.c.bf16 %v2197_v14, %v2193_v37  ;;  %v4809_v17 = vadd.f32 1.0, %v1766_v57  ;;  %v1646_v46 = vmul.f32 %v1645_v15, %v4420_v53  ;;  %v5366_v63 = vld [vmem:[#allocation6_spill] sm:$0xff]  ;;  %v767_v15 = vpop.f32.mrf.mxu2 }
 0x29f   : > { %v3164_v2 = vpop.eup %3163  ;;  %v818_v25 = vmul.f32 0.5, %v5360_v0  ;;  %v822_v1 = vmul.f32 0.5, %v5361_v48  ;;  %v1595_v22 = vmul.f32 %v5362_v50, %v4391_v44  ;;  %v1755_v43 = vmul.f32 %v1754_v45, %v4458_v5  ;;  %v5369_v0 = vld [vmem:[#allocation7_spill] sm:$0xff] }
 0x2a0   : > { %v2851_v23 = vclamps-f32 %v1742_v52, 1.0  ;;  %v1609_v10 = vmul.f32 %v3164_v2, %v4791_v33  ;;  %v1792_v32 = vadd.f32 0.05243302, %v4642_v26  ;;  %2503 = vmatmul.bf16.gmra.mxu0 %v2217_v19  ;;  %3165 = vrcp.f32 %v4809_v17 }
 0x2a1   : > { %v4820_v28 = vadd.f32 1.0, %v1646_v46  ;;  %v1802_v12 = vmul.f32 %v1801_v3, %v4496_v40  ;;  %v1634_v6 = vadd.f32 0.18741608, %v1633_v13  ;;  %v2194_v49 = vmul.f32 %v2162_v35, %v818_v25 }
 0x2a2   : > { %v2166_v51 = vadd.f32 1.0, %v2851_v23  ;;  %v1610_v29 = vsub.f32 1.0, %v1609_v10  ;;  %v1617_v62 = vand.u32 2147483647, %v4791_v33  ;;  %v1619_v27 = vand.u32 2147483648, %v4791_v33 }
 0x2a3   : > { %vm1614_vm9 = vweird.f32 %v3164_v2  ;;  %3167 = vrcp.f32 %v4820_v28  ;;  %v1596_v5 = vadd.f32 1.1283791, %v1595_v22  ;;  %v1793_v26 = vmul.f32 %v1792_v32, %v4496_v40  ;;  %v5370_v32 = vld [vmem:[#allocation16_spill] sm:$0xff] }
 0x2a4   : > { %v2198_v44 = vmul.f32 %v2166_v51, %v822_v1  ;;  %v1611_v4 = vmul.f32 %v3164_v2, %v1610_v29  ;;  %v1803_v59 = vadd.f32 0.112945676, %v1802_v12  ;;  %v1756_v39 = vadd.f32 1.1283791, %v1755_v43 }
 0x2a5   : > { %vm1613_vm10 = vweird.f32 %v4791_v33  ;;  %v1620_v11 = vor.u32 1.1754944e-38, %v1619_v27  ;;  %v1635_v41 = vmul.f32 %v1634_v6, %v4420_v53  ;;  %vm1618_vm12 = vcmp.eq.f32.partialorder %v1617_v62, 8.507059e+37  ;;  %v5364_v33 = vld [vmem:[#allocation22_spill] sm:$0xff]  ;;  %v738_v53 = vpop.f32.mrf.mxu1 }
 0x2a6   : > { %v2218_v7 = vpack.c.bf16 %v2198_v44, %v2194_v49  ;;  %v1612_v8 = vadd.f32 %v3164_v2, %v1611_v4  ;;  %v3166_v55 = vpop.eup %3165  ;;  %vm1615_vm11 = vmor %vm1613_vm10, %vm1614_vm9  ;;  %v1804_v9 = vmul.f32 %v1803_v59, %v4496_v40  ;;  %v1597_v20 = vmul.f32 %v1596_v5, %v5363_v42  ;;  %v711_v5 = vpop.f32.mrf.mxu0 }
 0x2a7   : > { %v1769_v58 = vmul.f32 %v3166_v55, %v4809_v17  ;;  %v1777_v31 = vand.u32 2147483647, %v4809_v17  ;;  %v1757_v18 = vmul.f32 %v1756_v39, %v5364_v33  ;;  %v1794_v56 = vadd.f32 0.18741608, %v1793_v26 }
 0x2a8   : > { %2532 = vmatmul.bf16.gmra.mxu1 %v2218_v7  ;;  %v1616_v21 = vsel %vm1615_vm11, %v3164_v2, %v1612_v8  ;;  %v1805_v24 = vadd.f32 0.4994258, %v1804_v9  ;;  %v1779_v54 = vand.u32 2147483648, %v4809_v17  ;;  %vm1773_vm13 = vweird.f32 %v4809_v17  ;;  %v796_v7 = vpop.f32.mrf.mxu3 }
 0x2a9   : > { %v1621_v45 = vsel %vm1618_vm12, %v1620_v11, %v1616_v21  ;;  %v3168_v34 = vpop.eup %3167  ;;  %v1770_v36 = vsub.f32 1.0, %v1769_v58  ;;  %v4839_v16 = vadd.f32 %v709_v60, %v5365_v61  ;;  %vm1774_vm14 = vweird.f32 %v3166_v55 }
 0x2aa   : > { %v1649_v47 = vmul.f32 %v3168_v34, %v4820_v28  ;;  %v1806_v37 = vmul.f32 %v1805_v24, %v4496_v40  ;;  %v1622_v38 = vmul.f32 %v1621_v45, %v1597_v20  ;;  %v4842_v57 = vadd.f32 %v738_v53, %v5366_v63  ;;  %vm1775_vm1 = vmor %vm1773_vm13, %vm1774_vm14  ;;  %v5374_v20 = vld [vmem:[#allocation19_spill] sm:$0xff] }
 0x2ab   : > { %v1771_v14 = vmul.f32 %v3166_v55, %v1770_v36  ;;  %vm4844_vm15 = vcmp.eq.f32.partialorder %v1777_v31, 8.507059e+37  ;;  %v4851_v3 = vmul.f32 0.70710677, %v4839_v16  ;;  %v1780_v19 = vor.u32 1.1754944e-38, %v1779_v54 }
 0x2ac   : > { %v1650_v13 = vsub.f32 1.0, %v1649_v47  ;;  %v4848_v52 = vadd.f32 1.0, %v1806_v37  ;;  %vm1653_vm0 = vweird.f32 %v4820_v28  ;;  %v4855_v35 = vmul.f32 0.70710677, %v4842_v57 }
 0x2ad   : > { %v1772_v2 = vadd.f32 %v3166_v55, %v1771_v14  ;;  %vm1654_vm2 = vweird.f32 %v3168_v34  ;;  %v4861_v25 = vadd.f32 %v767_v15, %v5369_v0  ;;  %v2848_v48 = vclamps-f32 %v1622_v38, 1.0 }
 0x2ae   : > { %v1651_v46 = vmul.f32 %v3168_v34, %v1650_v13  ;;  %3169 = vrcp.f32 %v4848_v52  ;;  %v1659_v23 = vand.u32 2147483648, %v4820_v28  ;;  %v1825_v10 = vmul.f32 %v4851_v3, %v4851_v3  ;;  %vm4874_vm3 = vmor %vm1653_vm0, %vm1654_vm2 }
 0x2af   : > { %v1776_v1 = vsel %vm1775_vm1, %v3166_v55, %v1772_v2  ;;  %v1657_v17 = vand.u32 2147483647, %v4820_v28  ;;  %v1865_v43 = vmul.f32 %v4855_v35, %v4855_v35  ;;  %v819_v51 = vmul.f32 0.5, %v5370_v32  ;;  %v5373_v55 = vld [vmem:[#allocation21_spill] sm:$0xff]  ;;  %v769_v32 = vpop.f32.mrf.mxu2 }
 0x2b0   : > { %v1781_v50 = vsel %vm4844_vm15, %v1780_v19, %v1776_v1  ;;  %v1652_v22 = vadd.f32 %v3168_v34, %v1651_v46  ;;  %v1636_v29 = vadd.f32 1.1283791, %v1635_v41  ;;  %v4878_v49 = vmin.f32 %v1825_v10, 16.0  ;;  %v5376_v1 = vld [vmem:[#allocation24_spill] sm:$0xff] }
 0x2b1   : > { %v1782_v12 = vmul.f32 %v1781_v50, %v1757_v18  ;;  %v1795_v62 = vmul.f32 %v1794_v56, %v4496_v40  ;;  %v4883_v44 = vmin.f32 %v1865_v43, 16.0  ;;  %v4886_v4 = vmul.f32 0.70710677, %v4861_v25 }
 0x2b2   : > { %v1656_v27 = vsel %vm4874_vm3, %v3168_v34, %v1652_v22  ;;  %v2163_v59 = vadd.f32 1.0, %v2848_v48  ;;  %v1660_v28 = vor.u32 1.1754944e-38, %v1659_v23  ;;  %v1827_v39 = vmul.f32 2.1237322e-06, %v4878_v49  ;;  %v5375_v34 = vld [vmem:[#allocation8_spill] sm:$0xff] }
 0x2b3   : > { %v2852_v26 = vclamps-f32 %v1782_v12, 1.0  ;;  %v823_v11 = vmul.f32 0.5, %v5373_v55  ;;  %vm1658_vm4 = vcmp.eq.f32.partialorder %v1657_v17, 8.507059e+37  ;;  %v1867_v40 = vmul.f32 2.1237322e-06, %v4883_v44 }
 0x2b4   : > { %v3170_v8 = vpop.eup %3169  ;;  %v1905_v9 = vmul.f32 %v4886_v4, %v4886_v4  ;;  %v1661_v21 = vsel %vm1658_vm4, %v1660_v28, %v1656_v27  ;;  %v4895_v42 = vadd.f32 %v711_v5, %v5365_v61  ;;  %v1637_v45 = vmul.f32 %v1636_v29, %v5374_v20  ;;  %v740_v61 = vpop.f32.mrf.mxu1 }
 0x2b5   : > { %v2167_v41 = vadd.f32 1.0, %v2852_v26  ;;  %v1809_v58 = vmul.f32 %v3170_v8, %v4848_v52  ;;  %v1828_v31 = vadd.f32 0.00028619796, %v1827_v39  ;;  %v1868_v24 = vadd.f32 0.00028619796, %v1867_v40 }
 0x2b6   : > { %v4899_v33 = vadd.f32 %v796_v7, %v5375_v34  ;;  %v1796_v18 = vadd.f32 1.1283791, %v1795_v62  ;;  %v2195_v56 = vmul.f32 %v2163_v59, %v819_v51  ;;  %v1662_v60 = vmul.f32 %v1661_v21, %v1637_v45  ;;  %v5377_v7 = vld [vmem:[#allocation18_spill] sm:$0xff] }
 0x2b7   : > { %v2199_v36 = vmul.f32 %v2167_v41, %v823_v11  ;;  %v1810_v54 = vsub.f32 1.0, %v1809_v58  ;;  %v1817_v53 = vand.u32 2147483647, %v4848_v52  ;;  %v1819_v47 = vand.u32 2147483648, %v4848_v52 }
 0x2b8   : > { %v4903_v37 = vmin.f32 %v1905_v9, 16.0  ;;  %vm1814_vm5 = vweird.f32 %v3170_v8  ;;  %v4906_v15 = vmul.f32 0.70710677, %v4895_v42  ;;  %v1829_v30 = vmul.f32 %v1828_v31, %v4878_v49  ;;  %v5378_v9 = vld [vmem:[#allocation23_spill] sm:$0xff] }
 0x2b9   : > { %v2219_v38 = vpack.c.bf16 %v2199_v36, %v2195_v56  ;;  %v1811_v14 = vmul.f32 %v3170_v8, %v1810_v54  ;;  %v1869_v13 = vmul.f32 %v1868_v24, %v4883_v44  ;;  %v4911_v2 = vmul.f32 0.70710677, %v4899_v33  ;;  %v798_v56 = vpop.f32.mrf.mxu3 }
 0x2ba   : > { %vm1813_vm6 = vweird.f32 %v4848_v52  ;;  %v1985_v46 = vmul.f32 %v4906_v15, %v4906_v15  ;;  %v4917_v48 = vadd.f32 %v740_v61, %v5366_v63  ;;  %v1797_v23 = vmul.f32 %v1796_v18, %v5376_v1 }
 0x2bb   : > { %2561 = vmatmul.bf16.gmra.mxu2 %v2219_v38  ;;  %v1812_v19 = vadd.f32 %v3170_v8, %v1811_v14  ;;  %vm1815_vm7 = vmor %vm1813_vm6, %vm1814_vm5  ;;  %v1820_v10 = vor.u32 1.1754944e-38, %v1819_v47  ;;  %v1907_v50 = vmul.f32 2.1237322e-06, %v4903_v37  ;;  %v2849_v22 = vclamps-f32 %v1662_v60, 1.0 }
 0x2bc   : > { %vm1818_vm8 = vcmp.eq.f32.partialorder %v1817_v53, 8.507059e+37  ;;  %v4921_v43 = vmin.f32 %v1985_v46, 16.0  ;;  %v1830_v52 = vadd.f32 0.0036580483, %v1829_v30  ;;  %v1870_v29 = vadd.f32 0.0036580483, %v1869_v13 }
 0x2bd   : > { %v1816_v17 = vsel %vm1815_vm7, %v3170_v8, %v1812_v19  ;;  %v1945_v12 = vmul.f32 %v4911_v2, %v4911_v2  ;;  %v4927_v62 = vmul.f32 0.70710677, %v4917_v48  ;;  %v1908_v27 = vadd.f32 0.00028619796, %v1907_v50 }
 0x2be   : > { %v1821_v51 = vsel %vm1818_vm8, %v1820_v10, %v1816_v17  ;;  %v1987_v6 = vmul.f32 2.1237322e-06, %v4921_v43  ;;  %v4930_v5 = vadd.f32 %v769_v32, %v5369_v0  ;;  %v2164_v59 = vadd.f32 1.0, %v2849_v22 }
 0x2bf   : > { %v1822_v63 = vmul.f32 %v1821_v51, %v1797_v23  ;;  %v2025_v39 = vmul.f32 %v4927_v62, %v4927_v62  ;;  %v820_v8 = vmul.f32 0.5, %v5377_v7  ;;  %v1831_v55 = vmul.f32 %v1830_v52, %v4878_v49 }
 0x2c0   : > { %v1988_v28 = vadd.f32 0.00028619796, %v1987_v6  ;;  %v1871_v11 = vmul.f32 %v1870_v29, %v4883_v44  ;;  %v4937_v40 = vmin.f32 %v1945_v12, 16.0  ;;  %v824_v41 = vmul.f32 0.5, %v5378_v9 }
 0x2c1   : > { %v2853_v26 = vclamps-f32 %v1822_v63, 1.0  ;;  %v4941_v58 = vmin.f32 %v2025_v39, 16.0  ;;  %v1909_v20 = vmul.f32 %v1908_v27, %v4903_v37  ;;  %v4945_v45 = vmul.f32 0.70710677, %v4930_v5 }
 0x2c2   : > { %v1989_v0 = vmul.f32 %v1988_v28, %v4921_v43  ;;  %v2196_v31 = vmul.f32 %v2164_v59, %v820_v8  ;;  %v1832_v36 = vadd.f32 0.05243302, %v1831_v55  ;;  %v1872_v54 = vadd.f32 0.05243302, %v1871_v11 }
 0x2c3   : > { %v2168_v21 = vadd.f32 1.0, %v2853_v26  ;;  %v2027_v18 = vmul.f32 2.1237322e-06, %v4941_v58  ;;  %v1947_v60 = vmul.f32 2.1237322e-06, %v4937_v40  ;;  %v2065_v38 = vmul.f32 %v4945_v45, %v4945_v45 }
 0x2c4   : > { %v1990_v47 = vadd.f32 0.0036580483, %v1989_v0  ;;  %v1910_v14 = vadd.f32 0.0036580483, %v1909_v20  ;;  %v4952_v30 = vadd.f32 %v798_v56, %v5375_v34  ;;  %v1833_v19 = vmul.f32 %v1832_v36, %v4878_v49 }
 0x2c5   : > { %v2200_v24 = vmul.f32 %v2168_v21, %v824_v41  ;;  %v2028_v61 = vadd.f32 0.00028619796, %v2027_v18  ;;  %v1873_v46 = vmul.f32 %v1872_v54, %v4883_v44  ;;  %v1948_v1 = vadd.f32 0.00028619796, %v1947_v60 }
 0x2c6   : > { %v1991_v23 = vmul.f32 %v1990_v47, %v4921_v43  ;;  %v4958_v50 = vmin.f32 %v2065_v38, 16.0  ;;  %v1838_v22 = vmul.f32 3.8918573e-05, %v4878_v49  ;;  %v1911_v17 = vmul.f32 %v1910_v14, %v4903_v37 }
 0x2c7   : > { %v2220_v53 = vpack.c.bf16 %v2200_v24, %v2196_v31  ;;  %v2029_v13 = vmul.f32 %v2028_v61, %v4941_v58  ;;  %v4963_v34 = vmul.f32 0.70710677, %v4952_v30  ;;  %v1878_v32 = vmul.f32 3.8918573e-05, %v4883_v44 }
 0x2c8   : > { %v4967_v51 = vmul.f32 0.5, %v4839_v16  ;;  %v4970_v52 = vmul.f32 0.5, %v4842_v57  ;;  %v1839_v12 = vadd.f32 0.001143296, %v1838_v22  ;;  %v1834_v63 = vadd.f32 0.18741608, %v1833_v19 }
 0x2c9   : > { %2590 = vmatmul.bf16.gmra.mxu3 %v2220_v53  ;;  %v2030_v10 = vadd.f32 0.0036580483, %v2029_v13  ;;  %v1949_v6 = vmul.f32 %v1948_v1, %v4937_v40  ;;  %v4975_v27 = vmul.f32 0.5, %v4895_v42  ;;  %v1879_v26 = vadd.f32 0.001143296, %v1878_v32 }
 0x2ca   : > { %v1874_v59 = vadd.f32 0.18741608, %v1873_v46  ;;  %v1992_v28 = vadd.f32 0.05243302, %v1991_v23  ;;  %v2067_v39 = vmul.f32 2.1237322e-06, %v4958_v50  ;;  %v1840_v16 = vmul.f32 %v1839_v12, %v4878_v49 }
 0x2cb   : > { %v2031_v29 = vmul.f32 %v2030_v10, %v4941_v58  ;;  %v1912_v7 = vadd.f32 0.05243302, %v1911_v17  ;;  %v2105_v57 = vmul.f32 %v4963_v34, %v4963_v34  ;;  %v1998_v8 = vmul.f32 3.8918573e-05, %v4921_v43 }
 0x2cc   : > { %v1880_v55 = vmul.f32 %v1879_v26, %v4883_v44  ;;  %v1841_v9 = vadd.f32 0.014752088, %v1840_v16  ;;  %v1918_v42 = vmul.f32 3.8918573e-05, %v4903_v37  ;;  %v2038_v0 = vmul.f32 3.8918573e-05, %v4941_v58 }
 0x2cd   : > { %v2032_v11 = vadd.f32 0.05243302, %v2031_v29  ;;  %v1999_v41 = vadd.f32 0.001143296, %v1998_v8  ;;  %v1950_v20 = vadd.f32 0.0036580483, %v1949_v6  ;;  %v1993_v31 = vmul.f32 %v1992_v28, %v4921_v43 }
 0x2ce   : > { %v1881_v21 = vadd.f32 0.014752088, %v1880_v55  ;;  %v2068_v24 = vadd.f32 0.00028619796, %v2067_v39  ;;  %v1842_v18 = vmul.f32 %v1841_v9, %v4878_v49  ;;  %v4987_v56 = vmin.f32 %v2105_v57, 16.0 }
 0x2cf   : > { %v2000_v36 = vmul.f32 %v1999_v41, %v4921_v43  ;;  %v2039_v60 = vadd.f32 0.001143296, %v2038_v0  ;;  %v1835_v53 = vmul.f32 %v1834_v63, %v4878_v49  ;;  %v2033_v47 = vmul.f32 %v2032_v11, %v4941_v58 }
 0x2d0   : > { %v1882_v54 = vmul.f32 %v1881_v21, %v4883_v44  ;;  %v1843_v61 = vadd.f32 0.112945676, %v1842_v18  ;;  %v1919_v38 = vadd.f32 0.001143296, %v1918_v42  ;;  %v1875_v14 = vmul.f32 %v1874_v59, %v4883_v44 }
 0x2d1   : > { %v2001_v13 = vadd.f32 0.014752088, %v2000_v36  ;;  %v2040_v46 = vmul.f32 %v2039_v60, %v4941_v58  ;;  %v1994_v1 = vadd.f32 0.18741608, %v1993_v31  ;;  %v2069_v23 = vmul.f32 %v2068_v24, %v4958_v50 }
 0x2d2   : > { %v1883_v19 = vadd.f32 0.112945676, %v1882_v54  ;;  %v1844_v10 = vmul.f32 %v1843_v61, %v4878_v49  ;;  %v1920_v22 = vmul.f32 %v1919_v38, %v4903_v37  ;;  %v2107_v17 = vmul.f32 2.1237322e-06, %v4987_v56 }
 0x2d3   : > { %v2002_v32 = vmul.f32 %v2001_v13, %v4921_v43  ;;  %v2041_v12 = vadd.f32 0.014752088, %v2040_v46  ;;  %v1913_v63 = vmul.f32 %v1912_v7, %v4903_v37  ;;  %v2034_v6 = vadd.f32 0.18741608, %v2033_v47 }
 0x2d4   : > { %v1884_v29 = vmul.f32 %v1883_v19, %v4883_v44  ;;  %v1845_v26 = vadd.f32 0.4994258, %v1844_v10  ;;  %v1921_v59 = vadd.f32 0.014752088, %v1920_v22  ;;  %v1951_v28 = vmul.f32 %v1950_v20, %v4937_v40 }
 0x2d5   : > { %v2003_v39 = vadd.f32 0.112945676, %v2002_v32  ;;  %v2042_v57 = vmul.f32 %v2041_v12, %v4941_v58  ;;  %v1995_v8 = vmul.f32 %v1994_v1, %v4921_v43  ;;  %v2070_v55 = vadd.f32 0.0036580483, %v2069_v23 }
 0x2d6   : > { %v1885_v16 = vadd.f32 0.4994258, %v1884_v29  ;;  %v1846_v11 = vmul.f32 %v1845_v26, %v4878_v49  ;;  %v1922_v9 = vmul.f32 %v1921_v59, %v4903_v37  ;;  %v2108_v42 = vadd.f32 0.00028619796, %v2107_v17 }
 0x2d7   : > { %v2004_v41 = vmul.f32 %v2003_v39, %v4921_v43  ;;  %v2043_v21 = vadd.f32 0.112945676, %v2042_v57  ;;  %v1836_v0 = vadd.f32 1.1283791, %v1835_v53  ;;  %v1876_v31 = vadd.f32 1.1283791, %v1875_v14 }
 0x2d8   : > { %v1886_v7 = vmul.f32 %v1885_v16, %v4883_v44  ;;  %v2035_v20 = vmul.f32 %v2034_v6, %v4941_v58  ;;  %v5010_v24 = vadd.f32 1.0, %v1846_v11  ;;  %v1923_v49 = vadd.f32 0.112945676, %v1922_v9 }
 0x2d9   : > { %v2005_v18 = vadd.f32 0.4994258, %v2004_v41  ;;  %v2044_v54 = vmul.f32 %v2043_v21, %v4941_v58  ;;  %v1914_v60 = vadd.f32 0.18741608, %v1913_v63  ;;  %v1996_v47 = vadd.f32 1.1283791, %v1995_v8 }
 0x2da   : > { %v5012_v36 = vadd.f32 1.0, %v1886_v7  ;;  %3171 = vrcp.f32 %v5010_v24  ;;  %v2078_v61 = vmul.f32 3.8918573e-05, %v4958_v50  ;;  %v2071_v44 = vmul.f32 %v2070_v55, %v4958_v50 }
 0x2db   : > { %v2109_v53 = vmul.f32 %v2108_v42, %v4987_v56  ;;  %v2006_v38 = vmul.f32 %v2005_v18, %v4921_v43  ;;  %v5022_v14 = vmul.f32 %v1836_v0, %v4851_v3  ;;  %v5024_v13 = vadd.f32 0.05243302, %v1951_v28 }
 0x2dc   : > { %3173 = vrcp.f32 %v5012_v36  ;;  %v5027_v19 = vmul.f32 0.5, %v4917_v48  ;;  %v2036_v46 = vadd.f32 1.1283791, %v2035_v20  ;;  %v5030_v1 = vmul.f32 %v1876_v31, %v4855_v35 }
 0x2dd   : > { %v5032_v23 = vadd.f32 1.0, %v2006_v38  ;;  %v2045_v10 = vadd.f32 0.4994258, %v2044_v54  ;;  %v1924_v22 = vmul.f32 %v1923_v49, %v4903_v37  ;;  %v5036_v43 = vmul.f32 %v1914_v60, %v4903_v37 }
 0x2de   : > { %v5039_v3 = vmul.f32 %v1996_v47, %v4906_v15  ;;  %v1857_v17 = vand.u32 2147483647, %v5010_v24  ;;  %v2079_v32 = vadd.f32 0.001143296, %v2078_v61  ;;  %v5042_v48 = vadd.f32 0.05243302, %v2071_v44 }
 0x2df   : > { %v5044_v29 = vadd.f32 0.0036580483, %v2109_v53  ;;  %v1859_v35 = vand.u32 2147483648, %v5010_v24  ;;  %3175 = vrcp.f32 %v5032_v23  ;;  %v5049_v63 = vmul.f32 %v2036_v46, %v4927_v62 }
 0x2e0   : > { %v3172_v12 = vpop.eup %3171  ;;  %vm1853_vm9 = vweird.f32 %v5010_v24  ;;  %v2046_v15 = vmul.f32 %v2045_v10, %v4941_v58  ;;  %v1925_v6 = vadd.f32 0.4994258, %v1924_v22  ;;  %vm1893_vm10 = vweird.f32 %v5012_v36 }
 0x2e1   : > { %v1849_v59 = vmul.f32 %v3172_v12, %v5010_v24  ;;  %v2080_v28 = vmul.f32 %v2079_v32, %v4958_v50  ;;  %v1958_v39 = vmul.f32 3.8918573e-05, %v4937_v40  ;;  %vm5057_vm11 = vcmp.eq.f32.partialorder %v1857_v17, 8.507059e+37 }
 0x2e2   : > { %v3174_v26 = vpop.eup %3173  ;;  %v1897_v57 = vand.u32 2147483647, %v5012_v36  ;;  %v5063_v8 = vadd.f32 1.0, %v2046_v15  ;;  %v1860_v55 = vor.u32 1.1754944e-38, %v1859_v35  ;;  %v1899_v11 = vand.u32 2147483648, %v5012_v36 }
 0x2e3   : > { %v1889_v62 = vmul.f32 %v3174_v26, %v5012_v36  ;;  %v1850_v58 = vsub.f32 1.0, %v1849_v59  ;;  %v1926_v9 = vmul.f32 %v1925_v6, %v4903_v37  ;;  %vm1854_vm12 = vweird.f32 %v3172_v12 }
 0x2e4   : > { %v2017_v42 = vand.u32 2147483647, %v5032_v23  ;;  %3177 = vrcp.f32 %v5063_v8  ;;  %v2081_v31 = vadd.f32 0.014752088, %v2080_v28  ;;  %v1959_v20 = vadd.f32 0.001143296, %v1958_v39  ;;  %vm1855_vm15 = vmor %vm1853_vm9, %vm1854_vm12 }
 0x2e5   : > { %v1890_v41 = vsub.f32 1.0, %v1889_v62  ;;  %v3176_v7 = vpop.eup %3175  ;;  %v1851_v21 = vmul.f32 %v3172_v12, %v1850_v58  ;;  %v5069_v0 = vadd.f32 1.0, %v1926_v9  ;;  %vm1894_vm13 = vweird.f32 %v3174_v26 }
 0x2e6   : > { %v2009_v18 = vmul.f32 %v3176_v7, %v5032_v23  ;;  %vm5072_vm14 = vcmp.eq.f32.partialorder %v1897_v57, 8.507059e+37  ;;  %v2019_v60 = vand.u32 2147483648, %v5032_v23  ;;  %v1900_v47 = vor.u32 1.1754944e-38, %v1899_v11  ;;  %vm1895_vm2 = vmor %vm1893_vm10, %vm1894_vm13 }
 0x2e7   : > { %v1891_v54 = vmul.f32 %v3174_v26, %v1890_v41  ;;  %v1852_v37 = vadd.f32 %v3172_v12, %v1851_v21  ;;  %3179 = vrcp.f32 %v5069_v0  ;;  %vm2013_vm0 = vweird.f32 %v5032_v23 }
 0x2e8   : > { %v2010_v61 = vsub.f32 1.0, %v2009_v18  ;;  %vm5082_vm1 = vcmp.eq.f32.partialorder %v2017_v42, 8.507059e+37  ;;  %v2082_v46 = vmul.f32 %v2081_v31, %v4958_v50  ;;  %v1960_v10 = vmul.f32 %v1959_v20, %v4937_v40 }
 0x2e9   : > { %v1892_v53 = vadd.f32 %v3174_v26, %v1891_v54  ;;  %v1856_v38 = vsel %vm1855_vm15, %v3172_v12, %v1852_v37  ;;  %v2118_v22 = vmul.f32 3.8918573e-05, %v4987_v56  ;;  %vm2014_vm3 = vweird.f32 %v3176_v7 }
 0x2ea   : > { %v3178_v24 = vpop.eup %3177  ;;  %v1861_v17 = vsel %vm5057_vm11, %v1860_v55, %v1856_v38  ;;  %v2011_v32 = vmul.f32 %v3176_v7, %v2010_v61  ;;  %v2020_v6 = vor.u32 1.1754944e-38, %v2019_v60  ;;  %vm2053_vm4 = vweird.f32 %v5063_v8  ;;  %vm2015_vm5 = vmor %vm2013_vm0, %vm2014_vm3 }
 0x2eb   : > { %v1896_v35 = vsel %vm1895_vm2, %v3174_v26, %v1892_v53  ;;  %v1862_v15 = vmul.f32 %v1861_v17, %v5022_v14  ;;  %v2049_v12 = vmul.f32 %v3178_v24, %v5063_v8  ;;  %v2057_v28 = vand.u32 2147483647, %v5063_v8 }
 0x2ec   : > { %v1901_v36 = vsel %vm5072_vm14, %v1900_v47, %v1896_v35  ;;  %v2012_v59 = vadd.f32 %v3176_v7, %v2011_v32  ;;  %v2083_v39 = vadd.f32 0.112945676, %v2082_v46  ;;  %v2059_v14 = vand.u32 2147483648, %v5063_v8 }
 0x2ed   : > { %v5099_v62 = vpop.eup %3179  ;;  %v2050_v26 = vsub.f32 1.0, %v2049_v12  ;;  %v1961_v16 = vadd.f32 0.014752088, %v1960_v10  ;;  %v2119_v57 = vadd.f32 0.001143296, %v2118_v22  ;;  %v2854_v58 = vclamps-f32 %v1862_v15, 1.0 }
 0x2ee   : > { %v2016_v55 = vsel %vm2015_vm5, %v3176_v7, %v2012_v59  ;;  %v1902_v11 = vmul.f32 %v1901_v36, %v5030_v1  ;;  %v1929_v9 = vmul.f32 %v5099_v62, %v5069_v0  ;;  %vm2054_vm6 = vweird.f32 %v3178_v24  ;;  %v2494_v36 = vpop.f32.mrf.mxu0 }
 0x2ef   : > { %v2021_v42 = vsel %vm5082_vm1, %v2020_v6, %v2016_v55  ;;  %v2051_v41 = vmul.f32 %v3178_v24, %v2050_v26  ;;  %v2084_v23 = vmul.f32 %v2083_v39, %v4958_v50  ;;  %vm5111_vm7 = vcmp.eq.f32.partialorder %v2057_v28, 8.507059e+37  ;;  %vm2055_vm8 = vmor %vm2053_vm4, %vm2054_vm6  ;;  %v5140_v39 = vld [vmem:[%s5257_s6] ss:$0 sm:$0xff]  ;;  %v2523_v26 = vpop.f32.mrf.mxu1 }
 0x2f0   : > { %v2022_v21 = vmul.f32 %v2021_v42, %v5039_v3  ;;  %v1930_v20 = vsub.f32 1.0, %v1929_v9  ;;  %v1962_v7 = vmul.f32 %v1961_v16, %v4937_v40  ;;  %v2060_v18 = vor.u32 1.1754944e-38, %v2059_v14 }
 0x2f1   : > { %v2052_v1 = vadd.f32 %v3178_v24, %v2051_v41  ;;  %v2085_v54 = vadd.f32 0.4994258, %v2084_v23  ;;  %v2120_v49 = vmul.f32 %v2119_v57, %v4987_v56  ;;  %v2169_v60 = vadd.f32 1.0, %v2854_v58 }
 0x2f2   : > { %v2858_v37 = vclamps-f32 %v2022_v21, 1.0  ;;  %v2855_v47 = vclamps-f32 %v1902_v11, 1.0  ;;  %v1963_v61 = vadd.f32 0.112945676, %v1962_v7  ;;  %v1931_v44 = vmul.f32 %v5099_v62, %v1930_v20 }
 0x2f3   : > { %v2056_v3 = vsel %vm2055_vm8, %v3178_v24, %v2052_v1  ;;  %v2086_v53 = vmul.f32 %v2085_v54, %v4958_v50  ;;  %v2121_v38 = vadd.f32 0.014752088, %v2120_v49  ;;  %v2073_v46 = vmul.f32 %v5042_v48, %v4958_v50 }
 0x2f4   : > { %v2173_v10 = vadd.f32 1.0, %v2858_v37  ;;  %v2061_v22 = vsel %vm5111_vm7, %v2060_v18, %v2056_v3  ;;  %v1964_v17 = vmul.f32 %v1963_v61, %v4937_v40  ;;  %v2111_v8 = vmul.f32 %v5044_v29, %v4987_v56  ;;  %v2552_v3 = vpop.f32.mrf.mxu2 }
 0x2f5   : > { %v2062_v32 = vmul.f32 %v2061_v22, %v5049_v63  ;;  %v5129_v24 = vadd.f32 1.0, %v2086_v53  ;;  %v2122_v35 = vmul.f32 %v2121_v38, %v4987_v56  ;;  %v2201_v15 = vmul.f32 %v2169_v60, %v4967_v51 }
 0x2f6   : > { %v2205_v6 = vmul.f32 %v2173_v10, %v4975_v27  ;;  %v2170_v48 = vadd.f32 1.0, %v2855_v47  ;;  %v1965_v12 = vadd.f32 0.4994258, %v1964_v17  ;;  %v1932_v28 = vadd.f32 %v5099_v62, %v1931_v44  ;;  %v2496_v37 = vpop.f32.mrf.mxu0  ;;  %v2581_v44 = vpop.f32.mrf.mxu3 }
 0x2f7   : > { %v2859_v59 = vclamps-f32 %v2062_v32, 1.0  ;;  %vm1934_vm9 = vweird.f32 %v5099_v62  ;;  %3181 = vrcp.f32 %v5129_v24  ;;  %v2074_v29 = vadd.f32 0.18741608, %v2073_v46 }
 0x2f8   : > { %v2221_v63 = vpack.c.bf16 %v2205_v6, %v2201_v15  ;;  %vm1933_vm10 = vweird.f32 %v5069_v0  ;;  %v1939_v51 = vand.u32 2147483648, %v5069_v0  ;;  %v1937_v14 = vand.u32 2147483647, %v5069_v0 }
 0x2f9   : > { %v2174_v27 = vadd.f32 1.0, %v2859_v59  ;;  %v1966_v16 = vmul.f32 %v1965_v12, %v4937_v40  ;;  %v2123_v57 = vadd.f32 0.112945676, %v2122_v35  ;;  %v1916_v58 = vadd.f32 1.1283791, %v5036_v43  ;;  %vm1935_vm11 = vmor %vm1933_vm10, %vm1934_vm9  ;;  %v3187_v59 = vld [vmem:[%s3354_s17] sm:$0xff] }
 0x2fa   : > { %v1953_v55 = vmul.f32 %v5024_v13, %v4937_v40  ;;  %v2112_v11 = vadd.f32 0.05243302, %v2111_v8  ;;  %2508 = vmatmul.bf16.gmra.mxu0 %v2221_v63  ;;  %v2202_v9 = vmul.f32 %v2170_v48, %v4970_v52  ;;  %v1936_v41 = vsel %vm1935_vm11, %v5099_v62, %v1932_v28  ;;  %v2525_v8 = vpop.f32.mrf.mxu1 }
 0x2fb   : > { %v2206_v42 = vmul.f32 %v2174_v27, %v5027_v19  ;;  %v5154_v0 = vadd.f32 1.0, %v1966_v16  ;;  %v2124_v23 = vmul.f32 %v2123_v57, %v4987_v56  ;;  %v2495_v43 = vadd.f32 %v5140_v39, %v2494_v36 }
 0x2fc   : > { %v1940_v21 = vor.u32 1.1754944e-38, %v1939_v51  ;;  %v2075_v31 = vmul.f32 %v2074_v29, %v4958_v50  ;;  %vm1938_vm12 = vcmp.eq.f32.partialorder %v1937_v14, 8.507059e+37  ;;  %v1917_v62 = vmul.f32 %v1916_v58, %v4886_v4 }
 0x2fd   : > { %v3182_v13 = vpop.eup %3181  ;;  %v2222_v20 = vpack.c.bf16 %v2206_v42, %v2202_v9  ;;  %3183 = vrcp.f32 %v5154_v0  ;;  %v1954_v7 = vadd.f32 0.18741608, %v1953_v55  ;;  %v2113_v1 = vmul.f32 %v2112_v11, %v4987_v56  ;;  %v2554_v55 = vpop.f32.mrf.mxu2 }
 0x2fe   : > { %v1941_v52 = vsel %vm1938_vm12, %v1940_v21, %v1936_v41  ;;  %v2089_v19 = vmul.f32 %v3182_v13, %v5129_v24  ;;  %v2125_v18 = vadd.f32 0.4994258, %v2124_v23  ;;  %v2524_v54 = vadd.f32 %v2523_v26, %v2495_v43  ;;  %v2499_v14 = vpop.f32.mrf.mxu0  ;;  %v2583_v11 = vpop.f32.mrf.mxu3 }
 0x2ff   : > { %2537 = vmatmul.bf16.gmra.mxu1 %v2222_v20  ;;  %v2076_v50 = vadd.f32 1.1283791, %v2075_v31  ;;  %v1942_v60 = vmul.f32 %v1941_v52, %v1917_v62  ;;  %v2099_v47 = vand.u32 2147483648, %v5129_v24  ;;  %vm2094_vm13 = vweird.f32 %v3182_v13 }
 0x300   : > { %v2090_v49 = vsub.f32 1.0, %v2089_v19  ;;  %v2126_v61 = vmul.f32 %v2125_v18, %v4987_v56  ;;  %v2097_v4 = vand.u32 2147483647, %v5129_v24  ;;  %v2553_v38 = vadd.f32 %v2552_v3, %v2524_v54 }
 0x301   : > { %v1955_v10 = vmul.f32 %v1954_v7, %v4937_v40  ;;  %v2114_v22 = vadd.f32 0.18741608, %v2113_v1  ;;  %vm2093_vm14 = vweird.f32 %v5129_v24  ;;  %v2497_v15 = vadd.f32 %v5140_v39, %v2496_v37 }
 0x302   : > { %v2091_v53 = vmul.f32 %v3182_v13, %v2090_v49  ;;  %v5171_v17 = vadd.f32 1.0, %v2126_v61  ;;  %v2582_v6 = vadd.f32 %v2581_v44, %v2553_v38  ;;  %v2077_v48 = vmul.f32 %v2076_v50, %v4945_v45  ;;  %vm2095_vm15 = vmor %vm2093_vm14, %vm2094_vm13  ;;  %v2528_v62 = vpop.f32.mrf.mxu1  ;;  %v3188_v50 = vld [vmem:[%s3354_s17 + $0x8] sm:$0xff] }
 0x303   : > { %v3184_v46 = vpop.eup %3183  ;;  %v2856_v36 = vclamps-f32 %v1942_v60, 1.0  ;;  %v2100_v12 = vor.u32 1.1754944e-38, %v2099_v47  ;;  %vm2098_vm0 = vcmp.eq.f32.partialorder %v2097_v4, 8.507059e+37  ;;  %v1977_v63 = vand.u32 2147483647, %v5154_v0 }
 0x304   : > { %v2092_v32 = vadd.f32 %v3182_v13, %v2091_v53  ;;  %v1969_v35 = vmul.f32 %v3184_v46, %v5154_v0  ;;  %3185 = vrcp.f32 %v5171_v17  ;;  %v2601_v28 = vadd.f32 %v3187_v59, %v2582_v6 }
 0x305   : > { %v1979_v51 = vand.u32 2147483648, %v5154_v0  ;;  %vm1974_vm1 = vweird.f32 %v3184_v46  ;;  %v2526_v45 = vadd.f32 %v2525_v8, %v2497_v15  ;;  %v1956_v16 = vadd.f32 1.1283791, %v1955_v10  ;;  %v2557_v44 = vpop.f32.mrf.mxu2 }
 0x306   : > { %v2096_v40 = vsel %vm2095_vm15, %v3182_v13, %v2092_v32  ;;  %v1970_v24 = vsub.f32 1.0, %v1969_v35  ;;  %2609 = vst [vmem:[%s5181_s8] sm:$0xff] %v2601_v28  ;;  %v2115_v57 = vmul.f32 %v2114_v22, %v4987_v56  ;;  %v2171_v58 = vadd.f32 1.0, %v2856_v36 }
 0x307   : > { %v2101_v29 = vsel %vm2098_vm0, %v2100_v12, %v2096_v40  ;;  %vm1973_vm2 = vweird.f32 %v5154_v0  ;;  %v2555_v41 = vadd.f32 %v2554_v55, %v2526_v45  ;;  %v827_v43 = vmul.f32 0.5, %v4861_v25 }
 0x308   : > { %v2102_v27 = vmul.f32 %v2101_v29, %v2077_v48  ;;  %v1971_v26 = vmul.f32 %v3184_v46, %v1970_v24  ;;  %v831_v21 = vmul.f32 0.5, %v4930_v5  ;;  %vm1975_vm3 = vmor %vm1973_vm2, %vm1974_vm1  ;;  %v1980_v13 = vor.u32 1.1754944e-38, %v1979_v51  ;;  %v3189_v48 = vld [vmem:[%s3354_s17 + $0x10] sm:$0xff] }
 0x309   : > { %v2500_v31 = vadd.f32 %v5140_v39, %v2499_v14  ;;  %vm1978_vm4 = vcmp.eq.f32.partialorder %v1977_v63, 8.507059e+37  ;;  %v1957_v19 = vmul.f32 %v1956_v16, %v4911_v2  ;;  %v2584_v7 = vadd.f32 %v2583_v11, %v2555_v41  ;;  %v2501_v2 = vpop.f32.mrf.mxu0  ;;  %v3190_v16 = vld [vmem:[%s3354_s17 + $0x18] sm:$0xff] }
 0x30a   : > { %v2860_v9 = vclamps-f32 %v2102_v27, 1.0  ;;  %v1972_v42 = vadd.f32 %v3184_v46, %v1971_v26  ;;  %v3186_v23 = vpop.eup %3185  ;;  %v2116_v25 = vadd.f32 1.1283791, %v2115_v57  ;;  %v2203_v1 = vmul.f32 %v2171_v58, %v827_v43  ;;  %v2530_v12 = vpop.f32.mrf.mxu1 }
 0x30b   : > { %v2129_v52 = vmul.f32 %v3186_v23, %v5171_v17  ;;  %v2137_v54 = vand.u32 2147483647, %v5171_v17  ;;  %v2139_v49 = vand.u32 2147483648, %v5171_v17  ;;  %v2529_v37 = vadd.f32 %v2528_v62, %v2500_v31  ;;  %v3192_v62 = vld [vmem:[%s3354_s17 + $0x28] sm:$0xff] }
 0x30c   : > { %v2175_v56 = vadd.f32 1.0, %v2860_v9  ;;  %v1976_v20 = vsel %vm1975_vm3, %v3184_v46, %v1972_v42  ;;  %v2602_v60 = vadd.f32 %v3188_v50, %v2584_v7  ;;  %vm2134_vm5 = vweird.f32 %v3186_v23 }
 0x30d   : > { %v1981_v0 = vsel %vm1978_vm4, %v1980_v13, %v1976_v20  ;;  %v2130_v18 = vsub.f32 1.0, %v2129_v52  ;;  %vm2133_vm6 = vweird.f32 %v5171_v17  ;;  %v2558_v38 = vadd.f32 %v2557_v44, %v2529_v37  ;;  %v3193_v44 = vld [vmem:[%s3354_s17 + $0x30] sm:$0xff] }
 0x30e   : > { %v2207_v5 = vmul.f32 %v2175_v56, %v831_v21  ;;  %v1982_v61 = vmul.f32 %v1981_v0, %v1957_v19  ;;  %2610 = vst [vmem:[%s5181_s8 + $0x8] sm:$0xff] %v2602_v60  ;;  %v2117_v46 = vmul.f32 %v2116_v25, %v4963_v34  ;;  %vm2135_vm7 = vmor %vm2133_vm6, %vm2134_vm5  ;;  %vm2138_vm8 = vcmp.eq.f32.partialorder %v2137_v54, 8.507059e+37  ;;  %v2559_v34 = vpop.f32.mrf.mxu2  ;;  %v3191_v56 = vld [vmem:[%s3354_s17 + $0x20] sm:$0xff] }
 0x30f   : > { %v2131_v3 = vmul.f32 %v3186_v23, %v2130_v18  ;;  %v2140_v10 = vor.u32 1.1754944e-38, %v2139_v49  ;;  %v2502_v32 = vadd.f32 %v5140_v39, %v2501_v2  ;;  %v828_v59 = vmul.f32 0.5, %v4899_v33 }
 0x310   : > { %v2223_v47 = vpack.c.bf16 %v2207_v5, %v2203_v1  ;;  %v2857_v22 = vclamps-f32 %v1982_v61, 1.0  ;;  %v832_v28 = vmul.f32 0.5, %v4952_v30 }
 0x311   : > { %v2132_v4 = vadd.f32 %v3186_v23, %v2131_v3  ;;  %v2531_v24 = vadd.f32 %v2530_v12, %v2502_v32 }
 0x312   : > { %2566 = vmatmul.bf16.gmra.mxu2 %v2223_v47  ;;  %v2172_v17 = vadd.f32 1.0, %v2857_v22 }
 0x313   : > { %v2136_v8 = vsel %vm2135_vm7, %v3186_v23, %v2132_v4  ;;  %v2560_v63 = vadd.f32 %v2559_v34, %v2531_v24 }
 0x314   : > { %v2586_v53 = vpop.f32.mrf.mxu3  ;;  %v2141_v15 = vsel %vm2138_vm8, %v2140_v10, %v2136_v8  ;;  %v2204_v27 = vmul.f32 %v2172_v17, %v828_v59 }
 0x315   : > { %v2587_v35 = vadd.f32 %v2586_v53, %v2558_v38  ;;  %v2142_v6 = vmul.f32 %v2141_v15, %v2117_v46  ;;  %v3194_v46 = vld [vmem:[%s3354_s17 + $0x38] sm:$0xff] }
 0x317   : > { %v2603_v36 = vadd.f32 %v3189_v48, %v2587_v35  ;;  %v2861_v40 = vclamps-f32 %v2142_v6, 1.0 }
 0x319   : > { %2611 = vst [vmem:[%s5181_s8 + $0x10] sm:$0xff] %v2603_v36  ;;  %v2176_v29 = vadd.f32 1.0, %v2861_v40 }
 0x31b   : > { %v2208_v26 = vmul.f32 %v2176_v29, %v832_v28 }
 0x31c   : > { %v2588_v51 = vpop.f32.mrf.mxu3 }
 0x31d   : > { %v2589_v45 = vadd.f32 %v2588_v51, %v2560_v63  ;;  %v2224_v14 = vpack.c.bf16 %v2208_v26, %v2204_v27  ;;  %v2504_v58 = vpop.f32.mrf.mxu0 }
 0x31e   : > { %v2505_v55 = vadd.f32 %v5140_v39, %v2504_v58 }
 0x31f   : > { %v2604_v57 = vadd.f32 %v3190_v16, %v2589_v45  ;;  %2595 = vmatmul.bf16.gmra.mxu3 %v2224_v14 }
 0x321   : > { %2612 = vst [vmem:[%s5181_s8 + $0x18] sm:$0xff] %v2604_v57 }
 0x325   : > { %v2533_v11 = vpop.f32.mrf.mxu1  ;;  %v2506_v9 = vpop.f32.mrf.mxu0 }
 0x326   : > { %v2534_v30 = vadd.f32 %v2533_v11, %v2505_v55  ;;  %v2507_v41 = vadd.f32 %v5140_v39, %v2506_v9 }
 0x32d   : > { %v2535_v21 = vpop.f32.mrf.mxu1 }
 0x32e   : > { %v2536_v31 = vadd.f32 %v2535_v21, %v2507_v41 }
 0x33e   : > { %v2562_v33 = vpop.f32.mrf.mxu2 }
 0x33f   : > { %v2563_v42 = vadd.f32 %v2562_v33, %v2534_v30 }
 0x346   : > { %v2564_v13 = vpop.f32.mrf.mxu2 }
 0x347   : > { %v2565_v52 = vadd.f32 %v2564_v13, %v2536_v31 }
 0x34c   : > { %v2591_v23 = vpop.f32.mrf.mxu3 }
 0x34d   : > { %v2592_v43 = vadd.f32 %v2591_v23, %v2563_v42 }
 0x34f   : > { %v2605_v20 = vadd.f32 %v3191_v56, %v2592_v43 }
 0x351   : > { %2613 = vst [vmem:[%s5181_s8 + $0x20] sm:$0xff] %v2605_v20 }
 0x354   : > { %v2593_v19 = vpop.f32.mrf.mxu3 }
 0x355   : > { %v2594_v0 = vadd.f32 %v2593_v19, %v2565_v52 }
 0x357   : > { %v2606_v7 = vadd.f32 %v3192_v62, %v2594_v0 }
 0x359   : > { %2614 = vst [vmem:[%s5181_s8 + $0x28] sm:$0xff] %v2606_v7 }
 0x377   : > { %v2509_v25 = vpop.f32.mrf.mxu0 }
 0x378   : > { %v2510_v1 = vadd.f32 %v5140_v39, %v2509_v25 }
 0x37c   : > { %v2538_v5 = vpop.f32.mrf.mxu1 }
 0x37d   : > { %v2539_v54 = vadd.f32 %v2538_v5, %v2510_v1 }
 0x37f   : > { %v2511_v49 = vpop.f32.mrf.mxu0 }
 0x380   : > { %v2512_v50 = vadd.f32 %v5140_v39, %v2511_v49 }
 0x384   : > { %v2540_v61 = vpop.f32.mrf.mxu1 }
 0x385   : > { %v2541_v2 = vadd.f32 %v2540_v61, %v2512_v50 }
 0x395   : > { %v2567_v18 = vpop.f32.mrf.mxu2 }
 0x396   : > { %v2568_v37 = vadd.f32 %v2567_v18, %v2539_v54 }
 0x39d   : > { %v2569_v3 = vpop.f32.mrf.mxu2 }
 0x39e   : > { %v2570_v4 = vadd.f32 %v2569_v3, %v2541_v2 }
 0x3a2   : > { %v2596_v60 = vpop.f32.mrf.mxu3 }
 0x3a3   : > { %v2597_v47 = vadd.f32 %v2596_v60, %v2568_v37 }
 0x3a5   : > { %v2607_v53 = vadd.f32 %v3193_v44, %v2597_v47 }
 0x3a7   : > { %2615 = vst [vmem:[%s5181_s8 + $0x30] sm:$0xff] %v2607_v53 }
 0x3aa   : > { %v2598_v39 = vpop.f32.mrf.mxu3 }
 0x3ab   : > { %v2599_v38 = vadd.f32 %v2598_v39, %v2570_v4 }
 0x3ad   : > { %v2608_v10 = vadd.f32 %v3194_v46, %v2599_v38 }
 0x3af   : > { %2616 = vst [vmem:[%s5181_s8 + $0x38] sm:$0xff] %v2608_v10 }
 0x3b0   : > { %3222 = shalt.err (!%p3219_p3)
}
 0x3b1   : > { %s3260_s17 = smov 128   ;;  %s3261_s23 = smov 8  }
 0x3b2   : > { %3060 = dma.vmem_to_hbm [thread:$0]  (%p3340_p5), %s2631_s16, 1024, %s2633_s18, %s2618_s28, %s3260_s17, %s3260_s17, %s3261_s23  }
 0x3b3 PF: > { %p3066_p4 = scmp.ge.s32.totalorder %s3257_s27, 2  ;;  %s2647_s8 = sand.u32 1, %s3245_s24  }
 0x3b4   : > { %s2648_s14 = scalar_lea.sflag [#allocation3], %s2647_s8 }
 0x3b5   : > { %p3063_p7 = pnand %p3066_p4, %p3344_p6 }
 0x3b7   : > { %p3064_p8 = pneg %p3063_p7 }
 0x3b9   : > { %3240 = dma.done.wait (%p3064_p8), %s2648_s14, 1024  }
 0x3ba   : > { %3242 = vsyncadd (%p3064_p8), %s2648_s14, 4294966272  ;;  %p17_p9 = scmp.ge.s32.totalorder %s3327_s30, 4   ;;  %s5387_s24 = smov %s3249_s25 }
 0x3bb   : > { %s5388_s25 = smov %s3253_s26  ;;  %s5389_s26 = smov %s3338_s10 }
 0x3bc   : > { %s5390_s27 = smov %s3327_s30  ;;  %19 = sbr.rel (!%p17_p9) target bundleno = 3 (0x3), region = 83 }
 0x3c1   :  { %2654 = vsyncpa [#allocation3], 1 }
 0x3c2   :  { %2656 = vsyncpa [#allocation3 + $0x1], 1 }

</bundles_post_ra>
